<compile_context>
chip_gen: v7x
topology: tpu7x:2x2x1
jax: 0.10.0
libtpu: 0.0.40
codegen_flags: <defaults>
</compile_context>

<pallas_src>
import functools

import jax
import jax.numpy as jnp
from jax.experimental import pallas as pl
from jax.experimental.pallas import tpu as pltpu


def cbam_kernel(x_ref, w1t_ref, w2t_ref, wconv_ref, o_ref,
                pooled_ref, pad_ref, saf_ref, *, H, W, K):
    TB, C, HW = x_ref.shape
    p = K // 2
    cdt = x_ref.dtype          # elementwise compute dtype (bf16 stays bf16)

    # NOTE: for large C this single live (TB, C, HW) value should become a
    # channel-chunked lax.fori_loop (running max/sum, then a second chunked
    # pass for the scaling) to bound vreg live ranges; unnecessary at small C.
    x = x_ref[...]                                         # (TB, C, HW)

    # ---------------- channel attention ----------------
    # Global max / avg pool over the lane-dense spatial axis, packed into a
    # single (2*TB, C) matrix so the MLP is two matmuls total (not two
    # matvec passes per pooled vector).
    pooled_ref[0:TB, :] = jnp.max(x, axis=2).astype(jnp.float32)
    pooled_ref[TB:2 * TB, :] = (
        jnp.sum(x.astype(jnp.float32), axis=2) * (1.0 / HW))
    pooled = pooled_ref[...]                               # (2*TB, C) f32

    h = jnp.maximum(
        jnp.dot(pooled, w1t_ref[...], preferred_element_type=jnp.float32),
        0.0)                                               # (2*TB, hid)
    mlp_out = jnp.dot(h, w2t_ref[...],
                      preferred_element_type=jnp.float32)  # (2*TB, C)
    ca = jax.nn.sigmoid(mlp_out[:TB] + mlp_out[TB:])       # (TB, C) f32
    x_ca = ca.astype(cdt)[:, :, None] * x                  # (TB, C, HW)

    # ---------------- spatial attention ----------------
    max_sp = jnp.max(x_ca, axis=1).astype(jnp.float32)             # (TB, HW)
    avg_sp = jnp.sum(x_ca.astype(jnp.float32), axis=1) * (1.0 / C)

    # Relayout the two pooled maps (TB, HW) -> zero-padded (TB, H+2p, W+2p)
    # 2-D form through a small VMEM scratch (row-wise stores; the maps are
    # tiny, only 2 channels per image).
    pad_ref[...] = jnp.zeros_like(pad_ref)
    for c, mp in enumerate((max_sp, avg_sp)):
        for y in range(H):
            pad_ref[c, :, p + y, p:p + W] = mp[:, y * W:(y + 1) * W]

    # KxK conv: hoist the lane (dx) shift out of the dy loop -> 2*K
    # lane-offset VMEM reads total; the K dy taps per read are cheap
    # sublane-offset value slices, accumulated in f32 on the VPU.
    acc = jnp.zeros((TB, H, W), jnp.float32)
    for c in range(2):
        for dx in range(K):
            col = pad_ref[c, :, :, dx:dx + W]              # (TB, H+2p, W)
            for dy in range(K):
                wt = wconv_ref[c * K * K + dy * K + dx]    # scalar from SMEM
                acc = acc + wt * col[:, dy:dy + H, :]
    sa2d = jax.nn.sigmoid(acc).astype(cdt)                 # (TB, H, W)

    # Flatten sa back to the lane-dense layout (row stores into scratch).
    for y in range(H):
        saf_ref[:, y * W:(y + 1) * W] = sa2d[:, y, :]
    sa = saf_ref[...]                                      # (TB, HW)

    o_ref[...] = (sa[:, None, :] * x_ca).astype(o_ref.dtype)


def cbam_pallas(x, w1, w2, w_conv, *, batch_block=None):
    B, C, H, W = x.shape
    hid = w1.shape[0]
    K = w_conv.shape[-1]          # assumed odd (padding = K // 2), as in the module
    HW = H * W
    p = K // 2

    # Lane-dense view of x: (B, C, H*W) — free reshape over contiguous dims.
    x_flat = x.reshape(B, C, HW)
    w1t = jnp.transpose(w1).astype(jnp.float32)            # (C, hid)
    w2t = jnp.transpose(w2).astype(jnp.float32)            # (hid, C)
    wconv_flat = w_conv.reshape(-1).astype(jnp.float32)    # (2*K*K,) -> SMEM

    itemsize = jnp.dtype(x.dtype).itemsize
    if batch_block is None:
        # Largest divisor of B whose double-buffered in+out blocks fit a
        # conservative per-step VMEM budget; amortizes per-grid-step overhead
        # while leaving room for scratch and for both v7x TensorCores once B
        # is large enough that the budget forces multiple grid steps.
        budget = 8 * 1024 * 1024
        batch_block = 1
        for d in range(1, B + 1):
            if B % d == 0 and 4 * d * C * HW * itemsize <= budget:
                batch_block = d
    tb = batch_block
    assert B % tb == 0, (B, tb)

    block_bytes = tb * C * HW * itemsize
    # Explicit VMEM budget (v7x only has 64 MiB physical / 32 MiB default).
    vmem_limit = int(min(64 * 1024 * 1024,
                         max(32 * 1024 * 1024, 6 * block_bytes)))

    kernel = functools.partial(cbam_kernel, H=H, W=W, K=K)
    out_flat = pl.pallas_call(
        kernel,
        out_shape=jax.ShapeDtypeStruct((B, C, HW), x.dtype),
        grid=(B // tb,),
        in_specs=[
            pl.BlockSpec((tb, C, HW), lambda b: (b, 0, 0)),
            pl.BlockSpec((C, hid), lambda b: (0, 0)),
            pl.BlockSpec((hid, C), lambda b: (0, 0)),
            pl.BlockSpec(memory_space=pltpu.MemorySpace.SMEM),
        ],
        out_specs=pl.BlockSpec((tb, C, HW), lambda b: (b, 0, 0)),
        scratch_shapes=[
            pltpu.VMEM((2 * tb, C), jnp.float32),                    # pooled MLP LHS
            pltpu.VMEM((2, tb, H + 2 * p, W + 2 * p), jnp.float32),  # padded maps
            pltpu.VMEM((tb, HW), x.dtype),                           # flattened sa
        ],
        compiler_params=pltpu.CompilerParams(
            dimension_semantics=("parallel",),
            vmem_limit_bytes=vmem_limit),
    )(x_flat, w1t, w2t, wconv_flat)
    return out_flat.reshape(B, C, H, W)


def cbam_reference(x, w1, w2, w_conv):
    """Pure-JAX reference matching the PyTorch forward semantics."""
    m = jnp.max(x, axis=(2, 3))          # (B, C)
    a = jnp.mean(x, axis=(2, 3))         # (B, C)

    def mlp(v):
        h = jnp.maximum(v @ w1.T, 0.0)
        return h @ w2.T

    ca = jax.nn.sigmoid(mlp(m) + mlp(a))[:, :, None, None]
    x_ca = ca * x
    mx = jnp.max(x_ca, axis=1, keepdims=True)
    av = jnp.mean(x_ca, axis=1, keepdims=True)
    inp = jnp.concatenate([mx, av], axis=1)              # (B, 2, H, W)
    p = w_conv.shape[-1] // 2
    conv = jax.lax.conv_general_dilated(
        inp, w_conv, window_strides=(1, 1), padding=[(p, p), (p, p)],
        dimension_numbers=("NCHW", "OIHW", "NCHW"))
    sa = jax.nn.sigmoid(conv)
    return sa * x_ca


if __name__ == "__main__":
    B, C, H, W = 2, 8, 16, 16
    reduction, spatial_kernel = 4, 7
    hid = C // reduction

    key = jax.random.PRNGKey(0)
    kx, k1, k2, k3 = jax.random.split(key, 4)
    x = jax.random.normal(kx, (B, C, H, W), dtype=jnp.float32)
    # Deterministic synthetic weights (shapes from the module __init__):
    #   mlp[0]: Conv2d(C, C//r, 1, bias=False)  -> (C//r, C)
    #   mlp[2]: Conv2d(C//r, C, 1, bias=False)  -> (C, C//r)
    #   conv:   Conv2d(2, 1, 7, pad=3, bias=False) -> (1, 2, 7, 7)
    w1 = 0.2 * jax.random.normal(k1, (hid, C), dtype=jnp.float32)
    w2 = 0.2 * jax.random.normal(k2, (C, hid), dtype=jnp.float32)
    w_conv = 0.1 * jax.random.normal(
        k3, (1, 2, spatial_kernel, spatial_kernel), dtype=jnp.float32)

    out = cbam_pallas(x, w1, w2, w_conv)
    out = jax.block_until_ready(out)

    ref = cbam_reference(x, w1, w2, w_conv)
    assert out.shape == (B, C, H, W)
    assert jnp.allclose(out, ref, atol=1e-5, rtol=1e-4), (
        float(jnp.max(jnp.abs(out - ref))))
    print("KERNEL_OK")
</pallas_src>

<mosaic_0001>
module attributes {stable_mosaic.version = 11 : i64} {
  func.func @cbam_kernel(%arg0: i32, %arg1: memref<2x8x256xf32, #tpu.memory_space<vmem>>, %arg2: memref<8x2xf32, #tpu.memory_space<vmem>>, %arg3: memref<2x8xf32, #tpu.memory_space<vmem>>, %arg4: memref<98xf32, #tpu.memory_space<smem>>, %arg5: memref<2x8x256xf32, #tpu.memory_space<vmem>>, %arg6: memref<4x8xf32, #tpu.memory_space<vmem>>, %arg7: memref<2x2x22x22xf32, #tpu.memory_space<vmem>>, %arg8: memref<2x256xf32, #tpu.memory_space<vmem>>) attributes {dimension_semantics = [#tpu.dimension_semantics<parallel>], iteration_bounds = array<i64: 1>, scalar_prefetch = 0 : i64, scratch_operands = 3 : i64, tpu.core_type = #tpu.core_type<tc>, window_params = [{transform_indices = @transform_0, window_bounds = array<i64: 2, 8, 256>}, {pipeline_mode = #tpu.pipeline_mode<synchronous>, transform_indices = @transform_1, window_bounds = array<i64: 8, 2>}, {pipeline_mode = #tpu.pipeline_mode<synchronous>, transform_indices = @transform_2, window_bounds = array<i64: 2, 8>}, {transform_indices = @transform_3, window_bounds = array<i64: 98>}, {transform_indices = @transform_4, window_bounds = array<i64: 2, 8, 256>}]} {
    %c0 = arith.constant 0 : index
    %c0_0 = arith.constant 0 : index
    %c0_1 = arith.constant 0 : index
    %0 = vector.load %arg1[%c0, %c0_0, %c0_1] : memref<2x8x256xf32, #tpu.memory_space<vmem>>, vector<2x8x256xf32>
    %cst = arith.constant dense<0xFF800000> : vector<2x8xf32>
    %1 = vector.multi_reduction <maximumf>, %0, %cst [2] : vector<2x8x256xf32> to vector<2x8xf32>
    %c0_2 = arith.constant 0 : index
    %c0_3 = arith.constant 0 : index
    %2 = vector.load %arg6[%c0_2, %c0_3] : memref<4x8xf32, #tpu.memory_space<vmem>>, vector<2x8xf32>
    tpu.vector_store %arg6[%c0_2, %c0_3], %1 {strides = array<i32>} : memref<4x8xf32, #tpu.memory_space<vmem>>, vector<2x8xf32>,
    %cst_4 = arith.constant dense<0.000000e+00> : vector<2x8xf32>
    %3 = vector.multi_reduction <add>, %0, %cst_4 [2] : vector<2x8x256xf32> to vector<2x8xf32>
    %cst_5 = arith.constant 3.906250e-03 : f32
    %4 = vector.broadcast %cst_5 : f32 to vector<2x8xf32>
    %5 = arith.mulf %3, %4 : vector<2x8xf32>
    %c2 = arith.constant 2 : index
    %c0_6 = arith.constant 0 : index
    %6 = vector.load %arg6[%c2, %c0_6] : memref<4x8xf32, #tpu.memory_space<vmem>>, vector<2x8xf32>
    tpu.vector_store %arg6[%c2, %c0_6], %5 {strides = array<i32>} : memref<4x8xf32, #tpu.memory_space<vmem>>, vector<2x8xf32>,
    %c0_7 = arith.constant 0 : index
    %c0_8 = arith.constant 0 : index
    %7 = vector.load %arg6[%c0_7, %c0_8] : memref<4x8xf32, #tpu.memory_space<vmem>>, vector<4x8xf32>
    %c0_9 = arith.constant 0 : index
    %c0_10 = arith.constant 0 : index
    %8 = vector.load %arg2[%c0_9, %c0_10] : memref<8x2xf32, #tpu.memory_space<vmem>>, vector<8x2xf32>
    %cst_11 = arith.constant dense<0.000000e+00> : vector<4x2xf32>
    %9 = tpu.matmul %7, %8, %cst_11 {dimension_numbers = #tpu.dot_dimension_numbers<[1], [0], [0], [1], [0, 0, 1, 1], [], []>} : vector<4x8xf32>, vector<8x2xf32>, vector<4x2xf32> -> vector<4x2xf32>
    %cst_12 = arith.constant 0.000000e+00 : f32
    %10 = vector.broadcast %cst_12 : f32 to vector<4x2xf32>
    %11 = arith.maximumf %9, %10 : vector<4x2xf32>
    %c0_13 = arith.constant 0 : index
    %c0_14 = arith.constant 0 : index
    %12 = vector.load %arg3[%c0_13, %c0_14] : memref<2x8xf32, #tpu.memory_space<vmem>>, vector<2x8xf32>
    %cst_15 = arith.constant dense<0.000000e+00> : vector<4x8xf32>
    %13 = tpu.matmul %11, %12, %cst_15 {dimension_numbers = #tpu.dot_dimension_numbers<[1], [0], [0], [1], [0, 0, 1, 1], [], []>} : vector<4x2xf32>, vector<2x8xf32>, vector<4x8xf32> -> vector<4x8xf32>
    %14 = vector.extract_strided_slice %13 {offsets = [0, 0], sizes = [2, 8], strides = [1, 1]} : vector<4x8xf32> to vector<2x8xf32>
    %15 = vector.extract_strided_slice %13 {offsets = [2, 0], sizes = [2, 8], strides = [1, 1]} : vector<4x8xf32> to vector<2x8xf32>
    %16 = arith.addf %14, %15 : vector<2x8xf32>
    %17 = arith.negf %16 : vector<2x8xf32>
    %18 = math.exp %17 : vector<2x8xf32>
    %cst_16 = arith.constant 1.000000e+00 : f32
    %19 = vector.broadcast %cst_16 : f32 to vector<2x8xf32>
    %20 = arith.addf %19, %18 : vector<2x8xf32>
    %21 = arith.divf %19, %20 : vector<2x8xf32>
    %22 = vector.shape_cast %21 : vector<2x8xf32> to vector<2x8x1xf32>
    %23 = vector.broadcast %22 : vector<2x8x1xf32> to vector<2x8x256xf32>
    %24 = arith.mulf %23, %0 : vector<2x8x256xf32>
    %cst_17 = arith.constant dense<0xFF800000> : vector<2x256xf32>
    %25 = vector.multi_reduction <maximumf>, %24, %cst_17 [1] : vector<2x8x256xf32> to vector<2x256xf32>
    %cst_18 = arith.constant dense<0.000000e+00> : vector<2x256xf32>
    %26 = vector.multi_reduction <add>, %24, %cst_18 [1] : vector<2x8x256xf32> to vector<2x256xf32>
    %cst_19 = arith.constant 1.250000e-01 : f32
    %27 = vector.broadcast %cst_19 : f32 to vector<2x256xf32>
    %28 = arith.mulf %26, %27 : vector<2x256xf32>
    %cst_20 = arith.constant 0.000000e+00 : f32
    %29 = vector.broadcast %cst_20 : f32 to vector<2x2x22x22xf32>
    %c0_21 = arith.constant 0 : index
    %c0_22 = arith.constant 0 : index
    %c0_23 = arith.constant 0 : index
    %c0_24 = arith.constant 0 : index
    %30 = vector.load %arg7[%c0_21, %c0_22, %c0_23, %c0_24] : memref<2x2x22x22xf32, #tpu.memory_space<vmem>>, vector<2x2x22x22xf32>
    tpu.vector_store %arg7[%c0_21, %c0_22, %c0_23, %c0_24], %29 {strides = array<i32>} : memref<2x2x22x22xf32, #tpu.memory_space<vmem>>, vector<2x2x22x22xf32>,
    %31 = vector.extract_strided_slice %25 {offsets = [0, 0], sizes = [2, 16], strides = [1, 1]} : vector<2x256xf32> to vector<2x16xf32>
    %c0_25 = arith.constant 0 : index
    %c0_26 = arith.constant 0 : index
    %c3 = arith.constant 3 : index
    %c3_27 = arith.constant 3 : index
    %32 = vector.load %arg7[%c0_25, %c0_26, %c3, %c3_27] : memref<2x2x22x22xf32, #tpu.memory_space<vmem>>, vector<1x2x1x16xf32>
    %33 = vector.shape_cast %32 : vector<1x2x1x16xf32> to vector<2x16xf32>
    %34 = vector.shape_cast %31 : vector<2x16xf32> to vector<1x2x1x16xf32>
    tpu.vector_store %arg7[%c0_25, %c0_26, %c3, %c3_27], %34 {strides = array<i32>} : memref<2x2x22x22xf32, #tpu.memory_space<vmem>>, vector<1x2x1x16xf32>,
    %35 = vector.extract_strided_slice %25 {offsets = [0, 16], sizes = [2, 16], strides = [1, 1]} : vector<2x256xf32> to vector<2x16xf32>
    %c0_28 = arith.constant 0 : index
    %c0_29 = arith.constant 0 : index
    %c4 = arith.constant 4 : index
    %c3_30 = arith.constant 3 : index
    %36 = vector.load %arg7[%c0_28, %c0_29, %c4, %c3_30] : memref<2x2x22x22xf32, #tpu.memory_space<vmem>>, vector<1x2x1x16xf32>
    %37 = vector.shape_cast %36 : vector<1x2x1x16xf32> to vector<2x16xf32>
    %38 = vector.shape_cast %35 : vector<2x16xf32> to vector<1x2x1x16xf32>
    tpu.vector_store %arg7[%c0_28, %c0_29, %c4, %c3_30], %38 {strides = array<i32>} : memref<2x2x22x22xf32, #tpu.memory_space<vmem>>, vector<1x2x1x16xf32>,
    %39 = vector.extract_strided_slice %25 {offsets = [0, 32], sizes = [2, 16], strides = [1, 1]} : vector<2x256xf32> to vector<2x16xf32>
    %c0_31 = arith.constant 0 : index
    %c0_32 = arith.constant 0 : index
    %c5 = arith.constant 5 : index
    %c3_33 = arith.constant 3 : index
    %40 = vector.load %arg7[%c0_31, %c0_32, %c5, %c3_33] : memref<2x2x22x22xf32, #tpu.memory_space<vmem>>, vector<1x2x1x16xf32>
    %41 = vector.shape_cast %40 : vector<1x2x1x16xf32> to vector<2x16xf32>
    %42 = vector.shape_cast %39 : vector<2x16xf32> to vector<1x2x1x16xf32>
    tpu.vector_store %arg7[%c0_31, %c0_32, %c5, %c3_33], %42 {strides = array<i32>} : memref<2x2x22x22xf32, #tpu.memory_space<vmem>>, vector<1x2x1x16xf32>,
    %43 = vector.extract_strided_slice %25 {offsets = [0, 48], sizes = [2, 16], strides = [1, 1]} : vector<2x256xf32> to vector<2x16xf32>
    %c0_34 = arith.constant 0 : index
    %c0_35 = arith.constant 0 : index
    %c6 = arith.constant 6 : index
    %c3_36 = arith.constant 3 : index
    %44 = vector.load %arg7[%c0_34, %c0_35, %c6, %c3_36] : memref<2x2x22x22xf32, #tpu.memory_space<vmem>>, vector<1x2x1x16xf32>
    %45 = vector.shape_cast %44 : vector<1x2x1x16xf32> to vector<2x16xf32>
    %46 = vector.shape_cast %43 : vector<2x16xf32> to vector<1x2x1x16xf32>
    tpu.vector_store %arg7[%c0_34, %c0_35, %c6, %c3_36], %46 {strides = array<i32>} : memref<2x2x22x22xf32, #tpu.memory_space<vmem>>, vector<1x2x1x16xf32>,
    %47 = vector.extract_strided_slice %25 {offsets = [0, 64], sizes = [2, 16], strides = [1, 1]} : vector<2x256xf32> to vector<2x16xf32>
    %c0_37 = arith.constant 0 : index
    %c0_38 = arith.constant 0 : index
    %c7 = arith.constant 7 : index
    %c3_39 = arith.constant 3 : index
    %48 = vector.load %arg7[%c0_37, %c0_38, %c7, %c3_39] : memref<2x2x22x22xf32, #tpu.memory_space<vmem>>, vector<1x2x1x16xf32>
    %49 = vector.shape_cast %48 : vector<1x2x1x16xf32> to vector<2x16xf32>
    %50 = vector.shape_cast %47 : vector<2x16xf32> to vector<1x2x1x16xf32>
    tpu.vector_store %arg7[%c0_37, %c0_38, %c7, %c3_39], %50 {strides = array<i32>} : memref<2x2x22x22xf32, #tpu.memory_space<vmem>>, vector<1x2x1x16xf32>,
    %51 = vector.extract_strided_slice %25 {offsets = [0, 80], sizes = [2, 16], strides = [1, 1]} : vector<2x256xf32> to vector<2x16xf32>
    %c0_40 = arith.constant 0 : index
    %c0_41 = arith.constant 0 : index
    %c8 = arith.constant 8 : index
    %c3_42 = arith.constant 3 : index
    %52 = vector.load %arg7[%c0_40, %c0_41, %c8, %c3_42] : memref<2x2x22x22xf32, #tpu.memory_space<vmem>>, vector<1x2x1x16xf32>
    %53 = vector.shape_cast %52 : vector<1x2x1x16xf32> to vector<2x16xf32>
    %54 = vector.shape_cast %51 : vector<2x16xf32> to vector<1x2x1x16xf32>
    tpu.vector_store %arg7[%c0_40, %c0_41, %c8, %c3_42], %54 {strides = array<i32>} : memref<2x2x22x22xf32, #tpu.memory_space<vmem>>, vector<1x2x1x16xf32>,
    %55 = vector.extract_strided_slice %25 {offsets = [0, 96], sizes = [2, 16], strides = [1, 1]} : vector<2x256xf32> to vector<2x16xf32>
    %c0_43 = arith.constant 0 : index
    %c0_44 = arith.constant 0 : index
    %c9 = arith.constant 9 : index
    %c3_45 = arith.constant 3 : index
    %56 = vector.load %arg7[%c0_43, %c0_44, %c9, %c3_45] : memref<2x2x22x22xf32, #tpu.memory_space<vmem>>, vector<1x2x1x16xf32>
    %57 = vector.shape_cast %56 : vector<1x2x1x16xf32> to vector<2x16xf32>
    %58 = vector.shape_cast %55 : vector<2x16xf32> to vector<1x2x1x16xf32>
    tpu.vector_store %arg7[%c0_43, %c0_44, %c9, %c3_45], %58 {strides = array<i32>} : memref<2x2x22x22xf32, #tpu.memory_space<vmem>>, vector<1x2x1x16xf32>,
    %59 = vector.extract_strided_slice %25 {offsets = [0, 112], sizes = [2, 16], strides = [1, 1]} : vector<2x256xf32> to vector<2x16xf32>
    %c0_46 = arith.constant 0 : index
    %c0_47 = arith.constant 0 : index
    %c10 = arith.constant 10 : index
    %c3_48 = arith.constant 3 : index
    %60 = vector.load %arg7[%c0_46, %c0_47, %c10, %c3_48] : memref<2x2x22x22xf32, #tpu.memory_space<vmem>>, vector<1x2x1x16xf32>
    %61 = vector.shape_cast %60 : vector<1x2x1x16xf32> to vector<2x16xf32>
    %62 = vector.shape_cast %59 : vector<2x16xf32> to vector<1x2x1x16xf32>
    tpu.vector_store %arg7[%c0_46, %c0_47, %c10, %c3_48], %62 {strides = array<i32>} : memref<2x2x22x22xf32, #tpu.memory_space<vmem>>, vector<1x2x1x16xf32>,
    %63 = vector.extract_strided_slice %25 {offsets = [0, 128], sizes = [2, 16], strides = [1, 1]} : vector<2x256xf32> to vector<2x16xf32>
    %c0_49 = arith.constant 0 : index
    %c0_50 = arith.constant 0 : index
    %c11 = arith.constant 11 : index
    %c3_51 = arith.constant 3 : index
    %64 = vector.load %arg7[%c0_49, %c0_50, %c11, %c3_51] : memref<2x2x22x22xf32, #tpu.memory_space<vmem>>, vector<1x2x1x16xf32>
    %65 = vector.shape_cast %64 : vector<1x2x1x16xf32> to vector<2x16xf32>
    %66 = vector.shape_cast %63 : vector<2x16xf32> to vector<1x2x1x16xf32>
    tpu.vector_store %arg7[%c0_49, %c0_50, %c11, %c3_51], %66 {strides = array<i32>} : memref<2x2x22x22xf32, #tpu.memory_space<vmem>>, vector<1x2x1x16xf32>,
    %67 = vector.extract_strided_slice %25 {offsets = [0, 144], sizes = [2, 16], strides = [1, 1]} : vector<2x256xf32> to vector<2x16xf32>
    %c0_52 = arith.constant 0 : index
    %c0_53 = arith.constant 0 : index
    %c12 = arith.constant 12 : index
    %c3_54 = arith.constant 3 : index
    %68 = vector.load %arg7[%c0_52, %c0_53, %c12, %c3_54] : memref<2x2x22x22xf32, #tpu.memory_space<vmem>>, vector<1x2x1x16xf32>
    %69 = vector.shape_cast %68 : vector<1x2x1x16xf32> to vector<2x16xf32>
    %70 = vector.shape_cast %67 : vector<2x16xf32> to vector<1x2x1x16xf32>
    tpu.vector_store %arg7[%c0_52, %c0_53, %c12, %c3_54], %70 {strides = array<i32>} : memref<2x2x22x22xf32, #tpu.memory_space<vmem>>, vector<1x2x1x16xf32>,
    %71 = vector.extract_strided_slice %25 {offsets = [0, 160], sizes = [2, 16], strides = [1, 1]} : vector<2x256xf32> to vector<2x16xf32>
    %c0_55 = arith.constant 0 : index
    %c0_56 = arith.constant 0 : index
    %c13 = arith.constant 13 : index
    %c3_57 = arith.constant 3 : index
    %72 = vector.load %arg7[%c0_55, %c0_56, %c13, %c3_57] : memref<2x2x22x22xf32, #tpu.memory_space<vmem>>, vector<1x2x1x16xf32>
    %73 = vector.shape_cast %72 : vector<1x2x1x16xf32> to vector<2x16xf32>
    %74 = vector.shape_cast %71 : vector<2x16xf32> to vector<1x2x1x16xf32>
    tpu.vector_store %arg7[%c0_55, %c0_56, %c13, %c3_57], %74 {strides = array<i32>} : memref<2x2x22x22xf32, #tpu.memory_space<vmem>>, vector<1x2x1x16xf32>,
    %75 = vector.extract_strided_slice %25 {offsets = [0, 176], sizes = [2, 16], strides = [1, 1]} : vector<2x256xf32> to vector<2x16xf32>
    %c0_58 = arith.constant 0 : index
    %c0_59 = arith.constant 0 : index
    %c14 = arith.constant 14 : index
    %c3_60 = arith.constant 3 : index
    %76 = vector.load %arg7[%c0_58, %c0_59, %c14, %c3_60] : memref<2x2x22x22xf32, #tpu.memory_space<vmem>>, vector<1x2x1x16xf32>
    %77 = vector.shape_cast %76 : vector<1x2x1x16xf32> to vector<2x16xf32>
    %78 = vector.shape_cast %75 : vector<2x16xf32> to vector<1x2x1x16xf32>
    tpu.vector_store %arg7[%c0_58, %c0_59, %c14, %c3_60], %78 {strides = array<i32>} : memref<2x2x22x22xf32, #tpu.memory_space<vmem>>, vector<1x2x1x16xf32>,
    %79 = vector.extract_strided_slice %25 {offsets = [0, 192], sizes = [2, 16], strides = [1, 1]} : vector<2x256xf32> to vector<2x16xf32>
    %c0_61 = arith.constant 0 : index
    %c0_62 = arith.constant 0 : index
    %c15 = arith.constant 15 : index
    %c3_63 = arith.constant 3 : index
    %80 = vector.load %arg7[%c0_61, %c0_62, %c15, %c3_63] : memref<2x2x22x22xf32, #tpu.memory_space<vmem>>, vector<1x2x1x16xf32>
    %81 = vector.shape_cast %80 : vector<1x2x1x16xf32> to vector<2x16xf32>
    %82 = vector.shape_cast %79 : vector<2x16xf32> to vector<1x2x1x16xf32>
    tpu.vector_store %arg7[%c0_61, %c0_62, %c15, %c3_63], %82 {strides = array<i32>} : memref<2x2x22x22xf32, #tpu.memory_space<vmem>>, vector<1x2x1x16xf32>,
    %83 = vector.extract_strided_slice %25 {offsets = [0, 208], sizes = [2, 16], strides = [1, 1]} : vector<2x256xf32> to vector<2x16xf32>
    %c0_64 = arith.constant 0 : index
    %c0_65 = arith.constant 0 : index
    %c16 = arith.constant 16 : index
    %c3_66 = arith.constant 3 : index
    %84 = vector.load %arg7[%c0_64, %c0_65, %c16, %c3_66] : memref<2x2x22x22xf32, #tpu.memory_space<vmem>>, vector<1x2x1x16xf32>
    %85 = vector.shape_cast %84 : vector<1x2x1x16xf32> to vector<2x16xf32>
    %86 = vector.shape_cast %83 : vector<2x16xf32> to vector<1x2x1x16xf32>
    tpu.vector_store %arg7[%c0_64, %c0_65, %c16, %c3_66], %86 {strides = array<i32>} : memref<2x2x22x22xf32, #tpu.memory_space<vmem>>, vector<1x2x1x16xf32>,
    %87 = vector.extract_strided_slice %25 {offsets = [0, 224], sizes = [2, 16], strides = [1, 1]} : vector<2x256xf32> to vector<2x16xf32>
    %c0_67 = arith.constant 0 : index
    %c0_68 = arith.constant 0 : index
    %c17 = arith.constant 17 : index
    %c3_69 = arith.constant 3 : index
    %88 = vector.load %arg7[%c0_67, %c0_68, %c17, %c3_69] : memref<2x2x22x22xf32, #tpu.memory_space<vmem>>, vector<1x2x1x16xf32>
    %89 = vector.shape_cast %88 : vector<1x2x1x16xf32> to vector<2x16xf32>
    %90 = vector.shape_cast %87 : vector<2x16xf32> to vector<1x2x1x16xf32>
    tpu.vector_store %arg7[%c0_67, %c0_68, %c17, %c3_69], %90 {strides = array<i32>} : memref<2x2x22x22xf32, #tpu.memory_space<vmem>>, vector<1x2x1x16xf32>,
    %91 = vector.extract_strided_slice %25 {offsets = [0, 240], sizes = [2, 16], strides = [1, 1]} : vector<2x256xf32> to vector<2x16xf32>
    %c0_70 = arith.constant 0 : index
    %c0_71 = arith.constant 0 : index
    %c18 = arith.constant 18 : index
    %c3_72 = arith.constant 3 : index
    %92 = vector.load %arg7[%c0_70, %c0_71, %c18, %c3_72] : memref<2x2x22x22xf32, #tpu.memory_space<vmem>>, vector<1x2x1x16xf32>
    %93 = vector.shape_cast %92 : vector<1x2x1x16xf32> to vector<2x16xf32>
    %94 = vector.shape_cast %91 : vector<2x16xf32> to vector<1x2x1x16xf32>
    tpu.vector_store %arg7[%c0_70, %c0_71, %c18, %c3_72], %94 {strides = array<i32>} : memref<2x2x22x22xf32, #tpu.memory_space<vmem>>, vector<1x2x1x16xf32>,
    %95 = vector.extract_strided_slice %28 {offsets = [0, 0], sizes = [2, 16], strides = [1, 1]} : vector<2x256xf32> to vector<2x16xf32>
    %c1 = arith.constant 1 : index
    %c0_73 = arith.constant 0 : index
    %c3_74 = arith.constant 3 : index
    %c3_75 = arith.constant 3 : index
    %96 = vector.load %arg7[%c1, %c0_73, %c3_74, %c3_75] : memref<2x2x22x22xf32, #tpu.memory_space<vmem>>, vector<1x2x1x16xf32>
    %97 = vector.shape_cast %96 : vector<1x2x1x16xf32> to vector<2x16xf32>
    %98 = vector.shape_cast %95 : vector<2x16xf32> to vector<1x2x1x16xf32>
    tpu.vector_store %arg7[%c1, %c0_73, %c3_74, %c3_75], %98 {strides = array<i32>} : memref<2x2x22x22xf32, #tpu.memory_space<vmem>>, vector<1x2x1x16xf32>,
    %99 = vector.extract_strided_slice %28 {offsets = [0, 16], sizes = [2, 16], strides = [1, 1]} : vector<2x256xf32> to vector<2x16xf32>
    %c1_76 = arith.constant 1 : index
    %c0_77 = arith.constant 0 : index
    %c4_78 = arith.constant 4 : index
    %c3_79 = arith.constant 3 : index
    %100 = vector.load %arg7[%c1_76, %c0_77, %c4_78, %c3_79] : memref<2x2x22x22xf32, #tpu.memory_space<vmem>>, vector<1x2x1x16xf32>
    %101 = vector.shape_cast %100 : vector<1x2x1x16xf32> to vector<2x16xf32>
    %102 = vector.shape_cast %99 : vector<2x16xf32> to vector<1x2x1x16xf32>
    tpu.vector_store %arg7[%c1_76, %c0_77, %c4_78, %c3_79], %102 {strides = array<i32>} : memref<2x2x22x22xf32, #tpu.memory_space<vmem>>, vector<1x2x1x16xf32>,
    %103 = vector.extract_strided_slice %28 {offsets = [0, 32], sizes = [2, 16], strides = [1, 1]} : vector<2x256xf32> to vector<2x16xf32>
    %c1_80 = arith.constant 1 : index
    %c0_81 = arith.constant 0 : index
    %c5_82 = arith.constant 5 : index
    %c3_83 = arith.constant 3 : index
    %104 = vector.load %arg7[%c1_80, %c0_81, %c5_82, %c3_83] : memref<2x2x22x22xf32, #tpu.memory_space<vmem>>, vector<1x2x1x16xf32>
    %105 = vector.shape_cast %104 : vector<1x2x1x16xf32> to vector<2x16xf32>
    %106 = vector.shape_cast %103 : vector<2x16xf32> to vector<1x2x1x16xf32>
    tpu.vector_store %arg7[%c1_80, %c0_81, %c5_82, %c3_83], %106 {strides = array<i32>} : memref<2x2x22x22xf32, #tpu.memory_space<vmem>>, vector<1x2x1x16xf32>,
    %107 = vector.extract_strided_slice %28 {offsets = [0, 48], sizes = [2, 16], strides = [1, 1]} : vector<2x256xf32> to vector<2x16xf32>
    %c1_84 = arith.constant 1 : index
    %c0_85 = arith.constant 0 : index
    %c6_86 = arith.constant 6 : index
    %c3_87 = arith.constant 3 : index
    %108 = vector.load %arg7[%c1_84, %c0_85, %c6_86, %c3_87] : memref<2x2x22x22xf32, #tpu.memory_space<vmem>>, vector<1x2x1x16xf32>
    %109 = vector.shape_cast %108 : vector<1x2x1x16xf32> to vector<2x16xf32>
    %110 = vector.shape_cast %107 : vector<2x16xf32> to vector<1x2x1x16xf32>
    tpu.vector_store %arg7[%c1_84, %c0_85, %c6_86, %c3_87], %110 {strides = array<i32>} : memref<2x2x22x22xf32, #tpu.memory_space<vmem>>, vector<1x2x1x16xf32>,
    %111 = vector.extract_strided_slice %28 {offsets = [0, 64], sizes = [2, 16], strides = [1, 1]} : vector<2x256xf32> to vector<2x16xf32>
    %c1_88 = arith.constant 1 : index
    %c0_89 = arith.constant 0 : index
    %c7_90 = arith.constant 7 : index
    %c3_91 = arith.constant 3 : index
    %112 = vector.load %arg7[%c1_88, %c0_89, %c7_90, %c3_91] : memref<2x2x22x22xf32, #tpu.memory_space<vmem>>, vector<1x2x1x16xf32>
    %113 = vector.shape_cast %112 : vector<1x2x1x16xf32> to vector<2x16xf32>
    %114 = vector.shape_cast %111 : vector<2x16xf32> to vector<1x2x1x16xf32>
    tpu.vector_store %arg7[%c1_88, %c0_89, %c7_90, %c3_91], %114 {strides = array<i32>} : memref<2x2x22x22xf32, #tpu.memory_space<vmem>>, vector<1x2x1x16xf32>,
    %115 = vector.extract_strided_slice %28 {offsets = [0, 80], sizes = [2, 16], strides = [1, 1]} : vector<2x256xf32> to vector<2x16xf32>
    %c1_92 = arith.constant 1 : index
    %c0_93 = arith.constant 0 : index
    %c8_94 = arith.constant 8 : index
    %c3_95 = arith.constant 3 : index
    %116 = vector.load %arg7[%c1_92, %c0_93, %c8_94, %c3_95] : memref<2x2x22x22xf32, #tpu.memory_space<vmem>>, vector<1x2x1x16xf32>
    %117 = vector.shape_cast %116 : vector<1x2x1x16xf32> to vector<2x16xf32>
    %118 = vector.shape_cast %115 : vector<2x16xf32> to vector<1x2x1x16xf32>
    tpu.vector_store %arg7[%c1_92, %c0_93, %c8_94, %c3_95], %118 {strides = array<i32>} : memref<2x2x22x22xf32, #tpu.memory_space<vmem>>, vector<1x2x1x16xf32>,
    %119 = vector.extract_strided_slice %28 {offsets = [0, 96], sizes = [2, 16], strides = [1, 1]} : vector<2x256xf32> to vector<2x16xf32>
    %c1_96 = arith.constant 1 : index
    %c0_97 = arith.constant 0 : index
    %c9_98 = arith.constant 9 : index
    %c3_99 = arith.constant 3 : index
    %120 = vector.load %arg7[%c1_96, %c0_97, %c9_98, %c3_99] : memref<2x2x22x22xf32, #tpu.memory_space<vmem>>, vector<1x2x1x16xf32>
    %121 = vector.shape_cast %120 : vector<1x2x1x16xf32> to vector<2x16xf32>
    %122 = vector.shape_cast %119 : vector<2x16xf32> to vector<1x2x1x16xf32>
    tpu.vector_store %arg7[%c1_96, %c0_97, %c9_98, %c3_99], %122 {strides = array<i32>} : memref<2x2x22x22xf32, #tpu.memory_space<vmem>>, vector<1x2x1x16xf32>,
    %123 = vector.extract_strided_slice %28 {offsets = [0, 112], sizes = [2, 16], strides = [1, 1]} : vector<2x256xf32> to vector<2x16xf32>
    %c1_100 = arith.constant 1 : index
    %c0_101 = arith.constant 0 : index
    %c10_102 = arith.constant 10 : index
    %c3_103 = arith.constant 3 : index
    %124 = vector.load %arg7[%c1_100, %c0_101, %c10_102, %c3_103] : memref<2x2x22x22xf32, #tpu.memory_space<vmem>>, vector<1x2x1x16xf32>
    %125 = vector.shape_cast %124 : vector<1x2x1x16xf32> to vector<2x16xf32>
    %126 = vector.shape_cast %123 : vector<2x16xf32> to vector<1x2x1x16xf32>
    tpu.vector_store %arg7[%c1_100, %c0_101, %c10_102, %c3_103], %126 {strides = array<i32>} : memref<2x2x22x22xf32, #tpu.memory_space<vmem>>, vector<1x2x1x16xf32>,
    %127 = vector.extract_strided_slice %28 {offsets = [0, 128], sizes = [2, 16], strides = [1, 1]} : vector<2x256xf32> to vector<2x16xf32>
    %c1_104 = arith.constant 1 : index
    %c0_105 = arith.constant 0 : index
    %c11_106 = arith.constant 11 : index
    %c3_107 = arith.constant 3 : index
    %128 = vector.load %arg7[%c1_104, %c0_105, %c11_106, %c3_107] : memref<2x2x22x22xf32, #tpu.memory_space<vmem>>, vector<1x2x1x16xf32>
    %129 = vector.shape_cast %128 : vector<1x2x1x16xf32> to vector<2x16xf32>
    %130 = vector.shape_cast %127 : vector<2x16xf32> to vector<1x2x1x16xf32>
    tpu.vector_store %arg7[%c1_104, %c0_105, %c11_106, %c3_107], %130 {strides = array<i32>} : memref<2x2x22x22xf32, #tpu.memory_space<vmem>>, vector<1x2x1x16xf32>,
    %131 = vector.extract_strided_slice %28 {offsets = [0, 144], sizes = [2, 16], strides = [1, 1]} : vector<2x256xf32> to vector<2x16xf32>
    %c1_108 = arith.constant 1 : index
    %c0_109 = arith.constant 0 : index
    %c12_110 = arith.constant 12 : index
    %c3_111 = arith.constant 3 : index
    %132 = vector.load %arg7[%c1_108, %c0_109, %c12_110, %c3_111] : memref<2x2x22x22xf32, #tpu.memory_space<vmem>>, vector<1x2x1x16xf32>
    %133 = vector.shape_cast %132 : vector<1x2x1x16xf32> to vector<2x16xf32>
    %134 = vector.shape_cast %131 : vector<2x16xf32> to vector<1x2x1x16xf32>
    tpu.vector_store %arg7[%c1_108, %c0_109, %c12_110, %c3_111], %134 {strides = array<i32>} : memref<2x2x22x22xf32, #tpu.memory_space<vmem>>, vector<1x2x1x16xf32>,
    %135 = vector.extract_strided_slice %28 {offsets = [0, 160], sizes = [2, 16], strides = [1, 1]} : vector<2x256xf32> to vector<2x16xf32>
    %c1_112 = arith.constant 1 : index
    %c0_113 = arith.constant 0 : index
    %c13_114 = arith.constant 13 : index
    %c3_115 = arith.constant 3 : index
    %136 = vector.load %arg7[%c1_112, %c0_113, %c13_114, %c3_115] : memref<2x2x22x22xf32, #tpu.memory_space<vmem>>, vector<1x2x1x16xf32>
    %137 = vector.shape_cast %136 : vector<1x2x1x16xf32> to vector<2x16xf32>
    %138 = vector.shape_cast %135 : vector<2x16xf32> to vector<1x2x1x16xf32>
    tpu.vector_store %arg7[%c1_112, %c0_113, %c13_114, %c3_115], %138 {strides = array<i32>} : memref<2x2x22x22xf32, #tpu.memory_space<vmem>>, vector<1x2x1x16xf32>,
    %139 = vector.extract_strided_slice %28 {offsets = [0, 176], sizes = [2, 16], strides = [1, 1]} : vector<2x256xf32> to vector<2x16xf32>
    %c1_116 = arith.constant 1 : index
    %c0_117 = arith.constant 0 : index
    %c14_118 = arith.constant 14 : index
    %c3_119 = arith.constant 3 : index
    %140 = vector.load %arg7[%c1_116, %c0_117, %c14_118, %c3_119] : memref<2x2x22x22xf32, #tpu.memory_space<vmem>>, vector<1x2x1x16xf32>
    %141 = vector.shape_cast %140 : vector<1x2x1x16xf32> to vector<2x16xf32>
    %142 = vector.shape_cast %139 : vector<2x16xf32> to vector<1x2x1x16xf32>
    tpu.vector_store %arg7[%c1_116, %c0_117, %c14_118, %c3_119], %142 {strides = array<i32>} : memref<2x2x22x22xf32, #tpu.memory_space<vmem>>, vector<1x2x1x16xf32>,
    %143 = vector.extract_strided_slice %28 {offsets = [0, 192], sizes = [2, 16], strides = [1, 1]} : vector<2x256xf32> to vector<2x16xf32>
    %c1_120 = arith.constant 1 : index
    %c0_121 = arith.constant 0 : index
    %c15_122 = arith.constant 15 : index
    %c3_123 = arith.constant 3 : index
    %144 = vector.load %arg7[%c1_120, %c0_121, %c15_122, %c3_123] : memref<2x2x22x22xf32, #tpu.memory_space<vmem>>, vector<1x2x1x16xf32>
    %145 = vector.shape_cast %144 : vector<1x2x1x16xf32> to vector<2x16xf32>
    %146 = vector.shape_cast %143 : vector<2x16xf32> to vector<1x2x1x16xf32>
    tpu.vector_store %arg7[%c1_120, %c0_121, %c15_122, %c3_123], %146 {strides = array<i32>} : memref<2x2x22x22xf32, #tpu.memory_space<vmem>>, vector<1x2x1x16xf32>,
    %147 = vector.extract_strided_slice %28 {offsets = [0, 208], sizes = [2, 16], strides = [1, 1]} : vector<2x256xf32> to vector<2x16xf32>
    %c1_124 = arith.constant 1 : index
    %c0_125 = arith.constant 0 : index
    %c16_126 = arith.constant 16 : index
    %c3_127 = arith.constant 3 : index
    %148 = vector.load %arg7[%c1_124, %c0_125, %c16_126, %c3_127] : memref<2x2x22x22xf32, #tpu.memory_space<vmem>>, vector<1x2x1x16xf32>
    %149 = vector.shape_cast %148 : vector<1x2x1x16xf32> to vector<2x16xf32>
    %150 = vector.shape_cast %147 : vector<2x16xf32> to vector<1x2x1x16xf32>
    tpu.vector_store %arg7[%c1_124, %c0_125, %c16_126, %c3_127], %150 {strides = array<i32>} : memref<2x2x22x22xf32, #tpu.memory_space<vmem>>, vector<1x2x1x16xf32>,
    %151 = vector.extract_strided_slice %28 {offsets = [0, 224], sizes = [2, 16], strides = [1, 1]} : vector<2x256xf32> to vector<2x16xf32>
    %c1_128 = arith.constant 1 : index
    %c0_129 = arith.constant 0 : index
    %c17_130 = arith.constant 17 : index
    %c3_131 = arith.constant 3 : index
    %152 = vector.load %arg7[%c1_128, %c0_129, %c17_130, %c3_131] : memref<2x2x22x22xf32, #tpu.memory_space<vmem>>, vector<1x2x1x16xf32>
    %153 = vector.shape_cast %152 : vector<1x2x1x16xf32> to vector<2x16xf32>
    %154 = vector.shape_cast %151 : vector<2x16xf32> to vector<1x2x1x16xf32>
    tpu.vector_store %arg7[%c1_128, %c0_129, %c17_130, %c3_131], %154 {strides = array<i32>} : memref<2x2x22x22xf32, #tpu.memory_space<vmem>>, vector<1x2x1x16xf32>,
    %155 = vector.extract_strided_slice %28 {offsets = [0, 240], sizes = [2, 16], strides = [1, 1]} : vector<2x256xf32> to vector<2x16xf32>
    %c1_132 = arith.constant 1 : index
    %c0_133 = arith.constant 0 : index
    %c18_134 = arith.constant 18 : index
    %c3_135 = arith.constant 3 : index
    %156 = vector.load %arg7[%c1_132, %c0_133, %c18_134, %c3_135] : memref<2x2x22x22xf32, #tpu.memory_space<vmem>>, vector<1x2x1x16xf32>
    %157 = vector.shape_cast %156 : vector<1x2x1x16xf32> to vector<2x16xf32>
    %158 = vector.shape_cast %155 : vector<2x16xf32> to vector<1x2x1x16xf32>
    tpu.vector_store %arg7[%c1_132, %c0_133, %c18_134, %c3_135], %158 {strides = array<i32>} : memref<2x2x22x22xf32, #tpu.memory_space<vmem>>, vector<1x2x1x16xf32>,
    %cst_136 = arith.constant 0.000000e+00 : f32
    %159 = vector.broadcast %cst_136 : f32 to vector<2x16x16xf32>
    %c0_137 = arith.constant 0 : index
    %c0_138 = arith.constant 0 : index
    %c0_139 = arith.constant 0 : index
    %c0_140 = arith.constant 0 : index
    %160 = vector.load %arg7[%c0_137, %c0_138, %c0_139, %c0_140] : memref<2x2x22x22xf32, #tpu.memory_space<vmem>>, vector<1x2x22x16xf32>
    %161 = vector.shape_cast %160 : vector<1x2x22x16xf32> to vector<2x22x16xf32>
    %c0_141 = arith.constant 0 : index
    %162 = memref.load %arg4[%c0_141] : memref<98xf32, #tpu.memory_space<smem>>
    %163 = vector.extract_strided_slice %161 {offsets = [0, 0, 0], sizes = [2, 16, 16], strides = [1, 1, 1]} : vector<2x22x16xf32> to vector<2x16x16xf32>
    %164 = vector.broadcast %162 : f32 to vector<2x16x16xf32>
    %165 = arith.mulf %164, %163 : vector<2x16x16xf32>
    %166 = arith.addf %159, %165 : vector<2x16x16xf32>
    %c7_142 = arith.constant 7 : index
    %167 = memref.load %arg4[%c7_142] : memref<98xf32, #tpu.memory_space<smem>>
    %168 = vector.extract_strided_slice %161 {offsets = [0, 1, 0], sizes = [2, 16, 16], strides = [1, 1, 1]} : vector<2x22x16xf32> to vector<2x16x16xf32>
    %169 = vector.broadcast %167 : f32 to vector<2x16x16xf32>
    %170 = arith.mulf %169, %168 : vector<2x16x16xf32>
    %171 = arith.addf %166, %170 : vector<2x16x16xf32>
    %c14_143 = arith.constant 14 : index
    %172 = memref.load %arg4[%c14_143] : memref<98xf32, #tpu.memory_space<smem>>
    %173 = vector.extract_strided_slice %161 {offsets = [0, 2, 0], sizes = [2, 16, 16], strides = [1, 1, 1]} : vector<2x22x16xf32> to vector<2x16x16xf32>
    %174 = vector.broadcast %172 : f32 to vector<2x16x16xf32>
    %175 = arith.mulf %174, %173 : vector<2x16x16xf32>
    %176 = arith.addf %171, %175 : vector<2x16x16xf32>
    %c21 = arith.constant 21 : index
    %177 = memref.load %arg4[%c21] : memref<98xf32, #tpu.memory_space<smem>>
    %178 = vector.extract_strided_slice %161 {offsets = [0, 3, 0], sizes = [2, 16, 16], strides = [1, 1, 1]} : vector<2x22x16xf32> to vector<2x16x16xf32>
    %179 = vector.broadcast %177 : f32 to vector<2x16x16xf32>
    %180 = arith.mulf %179, %178 : vector<2x16x16xf32>
    %181 = arith.addf %176, %180 : vector<2x16x16xf32>
    %c28 = arith.constant 28 : index
    %182 = memref.load %arg4[%c28] : memref<98xf32, #tpu.memory_space<smem>>
    %183 = vector.extract_strided_slice %161 {offsets = [0, 4, 0], sizes = [2, 16, 16], strides = [1, 1, 1]} : vector<2x22x16xf32> to vector<2x16x16xf32>
    %184 = vector.broadcast %182 : f32 to vector<2x16x16xf32>
    %185 = arith.mulf %184, %183 : vector<2x16x16xf32>
    %186 = arith.addf %181, %185 : vector<2x16x16xf32>
    %c35 = arith.constant 35 : index
    %187 = memref.load %arg4[%c35] : memref<98xf32, #tpu.memory_space<smem>>
    %188 = vector.extract_strided_slice %161 {offsets = [0, 5, 0], sizes = [2, 16, 16], strides = [1, 1, 1]} : vector<2x22x16xf32> to vector<2x16x16xf32>
    %189 = vector.broadcast %187 : f32 to vector<2x16x16xf32>
    %190 = arith.mulf %189, %188 : vector<2x16x16xf32>
    %191 = arith.addf %186, %190 : vector<2x16x16xf32>
    %c42 = arith.constant 42 : index
    %192 = memref.load %arg4[%c42] : memref<98xf32, #tpu.memory_space<smem>>
    %193 = vector.extract_strided_slice %161 {offsets = [0, 6, 0], sizes = [2, 16, 16], strides = [1, 1, 1]} : vector<2x22x16xf32> to vector<2x16x16xf32>
    %194 = vector.broadcast %192 : f32 to vector<2x16x16xf32>
    %195 = arith.mulf %194, %193 : vector<2x16x16xf32>
    %196 = arith.addf %191, %195 : vector<2x16x16xf32>
    %c0_144 = arith.constant 0 : index
    %c0_145 = arith.constant 0 : index
    %c0_146 = arith.constant 0 : index
    %c1_147 = arith.constant 1 : index
    %197 = vector.load %arg7[%c0_144, %c0_145, %c0_146, %c1_147] : memref<2x2x22x22xf32, #tpu.memory_space<vmem>>, vector<1x2x22x16xf32>
    %198 = vector.shape_cast %197 : vector<1x2x22x16xf32> to vector<2x22x16xf32>
    %c1_148 = arith.constant 1 : index
    %199 = memref.load %arg4[%c1_148] : memref<98xf32, #tpu.memory_space<smem>>
    %200 = vector.extract_strided_slice %198 {offsets = [0, 0, 0], sizes = [2, 16, 16], strides = [1, 1, 1]} : vector<2x22x16xf32> to vector<2x16x16xf32>
    %201 = vector.broadcast %199 : f32 to vector<2x16x16xf32>
    %202 = arith.mulf %201, %200 : vector<2x16x16xf32>
    %203 = arith.addf %196, %202 : vector<2x16x16xf32>
    %c8_149 = arith.constant 8 : index
    %204 = memref.load %arg4[%c8_149] : memref<98xf32, #tpu.memory_space<smem>>
    %205 = vector.extract_strided_slice %198 {offsets = [0, 1, 0], sizes = [2, 16, 16], strides = [1, 1, 1]} : vector<2x22x16xf32> to vector<2x16x16xf32>
    %206 = vector.broadcast %204 : f32 to vector<2x16x16xf32>
    %207 = arith.mulf %206, %205 : vector<2x16x16xf32>
    %208 = arith.addf %203, %207 : vector<2x16x16xf32>
    %c15_150 = arith.constant 15 : index
    %209 = memref.load %arg4[%c15_150] : memref<98xf32, #tpu.memory_space<smem>>
    %210 = vector.extract_strided_slice %198 {offsets = [0, 2, 0], sizes = [2, 16, 16], strides = [1, 1, 1]} : vector<2x22x16xf32> to vector<2x16x16xf32>
    %211 = vector.broadcast %209 : f32 to vector<2x16x16xf32>
    %212 = arith.mulf %211, %210 : vector<2x16x16xf32>
    %213 = arith.addf %208, %212 : vector<2x16x16xf32>
    %c22 = arith.constant 22 : index
    %214 = memref.load %arg4[%c22] : memref<98xf32, #tpu.memory_space<smem>>
    %215 = vector.extract_strided_slice %198 {offsets = [0, 3, 0], sizes = [2, 16, 16], strides = [1, 1, 1]} : vector<2x22x16xf32> to vector<2x16x16xf32>
    %216 = vector.broadcast %214 : f32 to vector<2x16x16xf32>
    %217 = arith.mulf %216, %215 : vector<2x16x16xf32>
    %218 = arith.addf %213, %217 : vector<2x16x16xf32>
    %c29 = arith.constant 29 : index
    %219 = memref.load %arg4[%c29] : memref<98xf32, #tpu.memory_space<smem>>
    %220 = vector.extract_strided_slice %198 {offsets = [0, 4, 0], sizes = [2, 16, 16], strides = [1, 1, 1]} : vector<2x22x16xf32> to vector<2x16x16xf32>
    %221 = vector.broadcast %219 : f32 to vector<2x16x16xf32>
    %222 = arith.mulf %221, %220 : vector<2x16x16xf32>
    %223 = arith.addf %218, %222 : vector<2x16x16xf32>
    %c36 = arith.constant 36 : index
    %224 = memref.load %arg4[%c36] : memref<98xf32, #tpu.memory_space<smem>>
    %225 = vector.extract_strided_slice %198 {offsets = [0, 5, 0], sizes = [2, 16, 16], strides = [1, 1, 1]} : vector<2x22x16xf32> to vector<2x16x16xf32>
    %226 = vector.broadcast %224 : f32 to vector<2x16x16xf32>
    %227 = arith.mulf %226, %225 : vector<2x16x16xf32>
    %228 = arith.addf %223, %227 : vector<2x16x16xf32>
    %c43 = arith.constant 43 : index
    %229 = memref.load %arg4[%c43] : memref<98xf32, #tpu.memory_space<smem>>
    %230 = vector.extract_strided_slice %198 {offsets = [0, 6, 0], sizes = [2, 16, 16], strides = [1, 1, 1]} : vector<2x22x16xf32> to vector<2x16x16xf32>
    %231 = vector.broadcast %229 : f32 to vector<2x16x16xf32>
    %232 = arith.mulf %231, %230 : vector<2x16x16xf32>
    %233 = arith.addf %228, %232 : vector<2x16x16xf32>
    %c0_151 = arith.constant 0 : index
    %c0_152 = arith.constant 0 : index
    %c0_153 = arith.constant 0 : index
    %c2_154 = arith.constant 2 : index
    %234 = vector.load %arg7[%c0_151, %c0_152, %c0_153, %c2_154] : memref<2x2x22x22xf32, #tpu.memory_space<vmem>>, vector<1x2x22x16xf32>
    %235 = vector.shape_cast %234 : vector<1x2x22x16xf32> to vector<2x22x16xf32>
    %c2_155 = arith.constant 2 : index
    %236 = memref.load %arg4[%c2_155] : memref<98xf32, #tpu.memory_space<smem>>
    %237 = vector.extract_strided_slice %235 {offsets = [0, 0, 0], sizes = [2, 16, 16], strides = [1, 1, 1]} : vector<2x22x16xf32> to vector<2x16x16xf32>
    %238 = vector.broadcast %236 : f32 to vector<2x16x16xf32>
    %239 = arith.mulf %238, %237 : vector<2x16x16xf32>
    %240 = arith.addf %233, %239 : vector<2x16x16xf32>
    %c9_156 = arith.constant 9 : index
    %241 = memref.load %arg4[%c9_156] : memref<98xf32, #tpu.memory_space<smem>>
    %242 = vector.extract_strided_slice %235 {offsets = [0, 1, 0], sizes = [2, 16, 16], strides = [1, 1, 1]} : vector<2x22x16xf32> to vector<2x16x16xf32>
    %243 = vector.broadcast %241 : f32 to vector<2x16x16xf32>
    %244 = arith.mulf %243, %242 : vector<2x16x16xf32>
    %245 = arith.addf %240, %244 : vector<2x16x16xf32>
    %c16_157 = arith.constant 16 : index
    %246 = memref.load %arg4[%c16_157] : memref<98xf32, #tpu.memory_space<smem>>
    %247 = vector.extract_strided_slice %235 {offsets = [0, 2, 0], sizes = [2, 16, 16], strides = [1, 1, 1]} : vector<2x22x16xf32> to vector<2x16x16xf32>
    %248 = vector.broadcast %246 : f32 to vector<2x16x16xf32>
    %249 = arith.mulf %248, %247 : vector<2x16x16xf32>
    %250 = arith.addf %245, %249 : vector<2x16x16xf32>
    %c23 = arith.constant 23 : index
    %251 = memref.load %arg4[%c23] : memref<98xf32, #tpu.memory_space<smem>>
    %252 = vector.extract_strided_slice %235 {offsets = [0, 3, 0], sizes = [2, 16, 16], strides = [1, 1, 1]} : vector<2x22x16xf32> to vector<2x16x16xf32>
    %253 = vector.broadcast %251 : f32 to vector<2x16x16xf32>
    %254 = arith.mulf %253, %252 : vector<2x16x16xf32>
    %255 = arith.addf %250, %254 : vector<2x16x16xf32>
    %c30 = arith.constant 30 : index
    %256 = memref.load %arg4[%c30] : memref<98xf32, #tpu.memory_space<smem>>
    %257 = vector.extract_strided_slice %235 {offsets = [0, 4, 0], sizes = [2, 16, 16], strides = [1, 1, 1]} : vector<2x22x16xf32> to vector<2x16x16xf32>
    %258 = vector.broadcast %256 : f32 to vector<2x16x16xf32>
    %259 = arith.mulf %258, %257 : vector<2x16x16xf32>
    %260 = arith.addf %255, %259 : vector<2x16x16xf32>
    %c37 = arith.constant 37 : index
    %261 = memref.load %arg4[%c37] : memref<98xf32, #tpu.memory_space<smem>>
    %262 = vector.extract_strided_slice %235 {offsets = [0, 5, 0], sizes = [2, 16, 16], strides = [1, 1, 1]} : vector<2x22x16xf32> to vector<2x16x16xf32>
    %263 = vector.broadcast %261 : f32 to vector<2x16x16xf32>
    %264 = arith.mulf %263, %262 : vector<2x16x16xf32>
    %265 = arith.addf %260, %264 : vector<2x16x16xf32>
    %c44 = arith.constant 44 : index
    %266 = memref.load %arg4[%c44] : memref<98xf32, #tpu.memory_space<smem>>
    %267 = vector.extract_strided_slice %235 {offsets = [0, 6, 0], sizes = [2, 16, 16], strides = [1, 1, 1]} : vector<2x22x16xf32> to vector<2x16x16xf32>
    %268 = vector.broadcast %266 : f32 to vector<2x16x16xf32>
    %269 = arith.mulf %268, %267 : vector<2x16x16xf32>
    %270 = arith.addf %265, %269 : vector<2x16x16xf32>
    %c0_158 = arith.constant 0 : index
    %c0_159 = arith.constant 0 : index
    %c0_160 = arith.constant 0 : index
    %c3_161 = arith.constant 3 : index
    %271 = vector.load %arg7[%c0_158, %c0_159, %c0_160, %c3_161] : memref<2x2x22x22xf32, #tpu.memory_space<vmem>>, vector<1x2x22x16xf32>
    %272 = vector.shape_cast %271 : vector<1x2x22x16xf32> to vector<2x22x16xf32>
    %c3_162 = arith.constant 3 : index
    %273 = memref.load %arg4[%c3_162] : memref<98xf32, #tpu.memory_space<smem>>
    %274 = vector.extract_strided_slice %272 {offsets = [0, 0, 0], sizes = [2, 16, 16], strides = [1, 1, 1]} : vector<2x22x16xf32> to vector<2x16x16xf32>
    %275 = vector.broadcast %273 : f32 to vector<2x16x16xf32>
    %276 = arith.mulf %275, %274 : vector<2x16x16xf32>
    %277 = arith.addf %270, %276 : vector<2x16x16xf32>
    %c10_163 = arith.constant 10 : index
    %278 = memref.load %arg4[%c10_163] : memref<98xf32, #tpu.memory_space<smem>>
    %279 = vector.extract_strided_slice %272 {offsets = [0, 1, 0], sizes = [2, 16, 16], strides = [1, 1, 1]} : vector<2x22x16xf32> to vector<2x16x16xf32>
    %280 = vector.broadcast %278 : f32 to vector<2x16x16xf32>
    %281 = arith.mulf %280, %279 : vector<2x16x16xf32>
    %282 = arith.addf %277, %281 : vector<2x16x16xf32>
    %c17_164 = arith.constant 17 : index
    %283 = memref.load %arg4[%c17_164] : memref<98xf32, #tpu.memory_space<smem>>
    %284 = vector.extract_strided_slice %272 {offsets = [0, 2, 0], sizes = [2, 16, 16], strides = [1, 1, 1]} : vector<2x22x16xf32> to vector<2x16x16xf32>
    %285 = vector.broadcast %283 : f32 to vector<2x16x16xf32>
    %286 = arith.mulf %285, %284 : vector<2x16x16xf32>
    %287 = arith.addf %282, %286 : vector<2x16x16xf32>
    %c24 = arith.constant 24 : index
    %288 = memref.load %arg4[%c24] : memref<98xf32, #tpu.memory_space<smem>>
    %289 = vector.extract_strided_slice %272 {offsets = [0, 3, 0], sizes = [2, 16, 16], strides = [1, 1, 1]} : vector<2x22x16xf32> to vector<2x16x16xf32>
    %290 = vector.broadcast %288 : f32 to vector<2x16x16xf32>
    %291 = arith.mulf %290, %289 : vector<2x16x16xf32>
    %292 = arith.addf %287, %291 : vector<2x16x16xf32>
    %c31 = arith.constant 31 : index
    %293 = memref.load %arg4[%c31] : memref<98xf32, #tpu.memory_space<smem>>
    %294 = vector.extract_strided_slice %272 {offsets = [0, 4, 0], sizes = [2, 16, 16], strides = [1, 1, 1]} : vector<2x22x16xf32> to vector<2x16x16xf32>
    %295 = vector.broadcast %293 : f32 to vector<2x16x16xf32>
    %296 = arith.mulf %295, %294 : vector<2x16x16xf32>
    %297 = arith.addf %292, %296 : vector<2x16x16xf32>
    %c38 = arith.constant 38 : index
    %298 = memref.load %arg4[%c38] : memref<98xf32, #tpu.memory_space<smem>>
    %299 = vector.extract_strided_slice %272 {offsets = [0, 5, 0], sizes = [2, 16, 16], strides = [1, 1, 1]} : vector<2x22x16xf32> to vector<2x16x16xf32>
    %300 = vector.broadcast %298 : f32 to vector<2x16x16xf32>
    %301 = arith.mulf %300, %299 : vector<2x16x16xf32>
    %302 = arith.addf %297, %301 : vector<2x16x16xf32>
    %c45 = arith.constant 45 : index
    %303 = memref.load %arg4[%c45] : memref<98xf32, #tpu.memory_space<smem>>
    %304 = vector.extract_strided_slice %272 {offsets = [0, 6, 0], sizes = [2, 16, 16], strides = [1, 1, 1]} : vector<2x22x16xf32> to vector<2x16x16xf32>
    %305 = vector.broadcast %303 : f32 to vector<2x16x16xf32>
    %306 = arith.mulf %305, %304 : vector<2x16x16xf32>
    %307 = arith.addf %302, %306 : vector<2x16x16xf32>
    %c0_165 = arith.constant 0 : index
    %c0_166 = arith.constant 0 : index
    %c0_167 = arith.constant 0 : index
    %c4_168 = arith.constant 4 : index
    %308 = vector.load %arg7[%c0_165, %c0_166, %c0_167, %c4_168] : memref<2x2x22x22xf32, #tpu.memory_space<vmem>>, vector<1x2x22x16xf32>
    %309 = vector.shape_cast %308 : vector<1x2x22x16xf32> to vector<2x22x16xf32>
    %c4_169 = arith.constant 4 : index
    %310 = memref.load %arg4[%c4_169] : memref<98xf32, #tpu.memory_space<smem>>
    %311 = vector.extract_strided_slice %309 {offsets = [0, 0, 0], sizes = [2, 16, 16], strides = [1, 1, 1]} : vector<2x22x16xf32> to vector<2x16x16xf32>
    %312 = vector.broadcast %310 : f32 to vector<2x16x16xf32>
    %313 = arith.mulf %312, %311 : vector<2x16x16xf32>
    %314 = arith.addf %307, %313 : vector<2x16x16xf32>
    %c11_170 = arith.constant 11 : index
    %315 = memref.load %arg4[%c11_170] : memref<98xf32, #tpu.memory_space<smem>>
    %316 = vector.extract_strided_slice %309 {offsets = [0, 1, 0], sizes = [2, 16, 16], strides = [1, 1, 1]} : vector<2x22x16xf32> to vector<2x16x16xf32>
    %317 = vector.broadcast %315 : f32 to vector<2x16x16xf32>
    %318 = arith.mulf %317, %316 : vector<2x16x16xf32>
    %319 = arith.addf %314, %318 : vector<2x16x16xf32>
    %c18_171 = arith.constant 18 : index
    %320 = memref.load %arg4[%c18_171] : memref<98xf32, #tpu.memory_space<smem>>
    %321 = vector.extract_strided_slice %309 {offsets = [0, 2, 0], sizes = [2, 16, 16], strides = [1, 1, 1]} : vector<2x22x16xf32> to vector<2x16x16xf32>
    %322 = vector.broadcast %320 : f32 to vector<2x16x16xf32>
    %323 = arith.mulf %322, %321 : vector<2x16x16xf32>
    %324 = arith.addf %319, %323 : vector<2x16x16xf32>
    %c25 = arith.constant 25 : index
    %325 = memref.load %arg4[%c25] : memref<98xf32, #tpu.memory_space<smem>>
    %326 = vector.extract_strided_slice %309 {offsets = [0, 3, 0], sizes = [2, 16, 16], strides = [1, 1, 1]} : vector<2x22x16xf32> to vector<2x16x16xf32>
    %327 = vector.broadcast %325 : f32 to vector<2x16x16xf32>
    %328 = arith.mulf %327, %326 : vector<2x16x16xf32>
    %329 = arith.addf %324, %328 : vector<2x16x16xf32>
    %c32 = arith.constant 32 : index
    %330 = memref.load %arg4[%c32] : memref<98xf32, #tpu.memory_space<smem>>
    %331 = vector.extract_strided_slice %309 {offsets = [0, 4, 0], sizes = [2, 16, 16], strides = [1, 1, 1]} : vector<2x22x16xf32> to vector<2x16x16xf32>
    %332 = vector.broadcast %330 : f32 to vector<2x16x16xf32>
    %333 = arith.mulf %332, %331 : vector<2x16x16xf32>
    %334 = arith.addf %329, %333 : vector<2x16x16xf32>
    %c39 = arith.constant 39 : index
    %335 = memref.load %arg4[%c39] : memref<98xf32, #tpu.memory_space<smem>>
    %336 = vector.extract_strided_slice %309 {offsets = [0, 5, 0], sizes = [2, 16, 16], strides = [1, 1, 1]} : vector<2x22x16xf32> to vector<2x16x16xf32>
    %337 = vector.broadcast %335 : f32 to vector<2x16x16xf32>
    %338 = arith.mulf %337, %336 : vector<2x16x16xf32>
    %339 = arith.addf %334, %338 : vector<2x16x16xf32>
    %c46 = arith.constant 46 : index
    %340 = memref.load %arg4[%c46] : memref<98xf32, #tpu.memory_space<smem>>
    %341 = vector.extract_strided_slice %309 {offsets = [0, 6, 0], sizes = [2, 16, 16], strides = [1, 1, 1]} : vector<2x22x16xf32> to vector<2x16x16xf32>
    %342 = vector.broadcast %340 : f32 to vector<2x16x16xf32>
    %343 = arith.mulf %342, %341 : vector<2x16x16xf32>
    %344 = arith.addf %339, %343 : vector<2x16x16xf32>
    %c0_172 = arith.constant 0 : index
    %c0_173 = arith.constant 0 : index
    %c0_174 = arith.constant 0 : index
    %c5_175 = arith.constant 5 : index
    %345 = vector.load %arg7[%c0_172, %c0_173, %c0_174, %c5_175] : memref<2x2x22x22xf32, #tpu.memory_space<vmem>>, vector<1x2x22x16xf32>
    %346 = vector.shape_cast %345 : vector<1x2x22x16xf32> to vector<2x22x16xf32>
    %c5_176 = arith.constant 5 : index
    %347 = memref.load %arg4[%c5_176] : memref<98xf32, #tpu.memory_space<smem>>
    %348 = vector.extract_strided_slice %346 {offsets = [0, 0, 0], sizes = [2, 16, 16], strides = [1, 1, 1]} : vector<2x22x16xf32> to vector<2x16x16xf32>
    %349 = vector.broadcast %347 : f32 to vector<2x16x16xf32>
    %350 = arith.mulf %349, %348 : vector<2x16x16xf32>
    %351 = arith.addf %344, %350 : vector<2x16x16xf32>
    %c12_177 = arith.constant 12 : index
    %352 = memref.load %arg4[%c12_177] : memref<98xf32, #tpu.memory_space<smem>>
    %353 = vector.extract_strided_slice %346 {offsets = [0, 1, 0], sizes = [2, 16, 16], strides = [1, 1, 1]} : vector<2x22x16xf32> to vector<2x16x16xf32>
    %354 = vector.broadcast %352 : f32 to vector<2x16x16xf32>
    %355 = arith.mulf %354, %353 : vector<2x16x16xf32>
    %356 = arith.addf %351, %355 : vector<2x16x16xf32>
    %c19 = arith.constant 19 : index
    %357 = memref.load %arg4[%c19] : memref<98xf32, #tpu.memory_space<smem>>
    %358 = vector.extract_strided_slice %346 {offsets = [0, 2, 0], sizes = [2, 16, 16], strides = [1, 1, 1]} : vector<2x22x16xf32> to vector<2x16x16xf32>
    %359 = vector.broadcast %357 : f32 to vector<2x16x16xf32>
    %360 = arith.mulf %359, %358 : vector<2x16x16xf32>
    %361 = arith.addf %356, %360 : vector<2x16x16xf32>
    %c26 = arith.constant 26 : index
    %362 = memref.load %arg4[%c26] : memref<98xf32, #tpu.memory_space<smem>>
    %363 = vector.extract_strided_slice %346 {offsets = [0, 3, 0], sizes = [2, 16, 16], strides = [1, 1, 1]} : vector<2x22x16xf32> to vector<2x16x16xf32>
    %364 = vector.broadcast %362 : f32 to vector<2x16x16xf32>
    %365 = arith.mulf %364, %363 : vector<2x16x16xf32>
    %366 = arith.addf %361, %365 : vector<2x16x16xf32>
    %c33 = arith.constant 33 : index
    %367 = memref.load %arg4[%c33] : memref<98xf32, #tpu.memory_space<smem>>
    %368 = vector.extract_strided_slice %346 {offsets = [0, 4, 0], sizes = [2, 16, 16], strides = [1, 1, 1]} : vector<2x22x16xf32> to vector<2x16x16xf32>
    %369 = vector.broadcast %367 : f32 to vector<2x16x16xf32>
    %370 = arith.mulf %369, %368 : vector<2x16x16xf32>
    %371 = arith.addf %366, %370 : vector<2x16x16xf32>
    %c40 = arith.constant 40 : index
    %372 = memref.load %arg4[%c40] : memref<98xf32, #tpu.memory_space<smem>>
    %373 = vector.extract_strided_slice %346 {offsets = [0, 5, 0], sizes = [2, 16, 16], strides = [1, 1, 1]} : vector<2x22x16xf32> to vector<2x16x16xf32>
    %374 = vector.broadcast %372 : f32 to vector<2x16x16xf32>
    %375 = arith.mulf %374, %373 : vector<2x16x16xf32>
    %376 = arith.addf %371, %375 : vector<2x16x16xf32>
    %c47 = arith.constant 47 : index
    %377 = memref.load %arg4[%c47] : memref<98xf32, #tpu.memory_space<smem>>
    %378 = vector.extract_strided_slice %346 {offsets = [0, 6, 0], sizes = [2, 16, 16], strides = [1, 1, 1]} : vector<2x22x16xf32> to vector<2x16x16xf32>
    %379 = vector.broadcast %377 : f32 to vector<2x16x16xf32>
    %380 = arith.mulf %379, %378 : vector<2x16x16xf32>
    %381 = arith.addf %376, %380 : vector<2x16x16xf32>
    %c0_178 = arith.constant 0 : index
    %c0_179 = arith.constant 0 : index
    %c0_180 = arith.constant 0 : index
    %c6_181 = arith.constant 6 : index
    %382 = vector.load %arg7[%c0_178, %c0_179, %c0_180, %c6_181] : memref<2x2x22x22xf32, #tpu.memory_space<vmem>>, vector<1x2x22x16xf32>
    %383 = vector.shape_cast %382 : vector<1x2x22x16xf32> to vector<2x22x16xf32>
    %c6_182 = arith.constant 6 : index
    %384 = memref.load %arg4[%c6_182] : memref<98xf32, #tpu.memory_space<smem>>
    %385 = vector.extract_strided_slice %383 {offsets = [0, 0, 0], sizes = [2, 16, 16], strides = [1, 1, 1]} : vector<2x22x16xf32> to vector<2x16x16xf32>
    %386 = vector.broadcast %384 : f32 to vector<2x16x16xf32>
    %387 = arith.mulf %386, %385 : vector<2x16x16xf32>
    %388 = arith.addf %381, %387 : vector<2x16x16xf32>
    %c13_183 = arith.constant 13 : index
    %389 = memref.load %arg4[%c13_183] : memref<98xf32, #tpu.memory_space<smem>>
    %390 = vector.extract_strided_slice %383 {offsets = [0, 1, 0], sizes = [2, 16, 16], strides = [1, 1, 1]} : vector<2x22x16xf32> to vector<2x16x16xf32>
    %391 = vector.broadcast %389 : f32 to vector<2x16x16xf32>
    %392 = arith.mulf %391, %390 : vector<2x16x16xf32>
    %393 = arith.addf %388, %392 : vector<2x16x16xf32>
    %c20 = arith.constant 20 : index
    %394 = memref.load %arg4[%c20] : memref<98xf32, #tpu.memory_space<smem>>
    %395 = vector.extract_strided_slice %383 {offsets = [0, 2, 0], sizes = [2, 16, 16], strides = [1, 1, 1]} : vector<2x22x16xf32> to vector<2x16x16xf32>
    %396 = vector.broadcast %394 : f32 to vector<2x16x16xf32>
    %397 = arith.mulf %396, %395 : vector<2x16x16xf32>
    %398 = arith.addf %393, %397 : vector<2x16x16xf32>
    %c27 = arith.constant 27 : index
    %399 = memref.load %arg4[%c27] : memref<98xf32, #tpu.memory_space<smem>>
    %400 = vector.extract_strided_slice %383 {offsets = [0, 3, 0], sizes = [2, 16, 16], strides = [1, 1, 1]} : vector<2x22x16xf32> to vector<2x16x16xf32>
    %401 = vector.broadcast %399 : f32 to vector<2x16x16xf32>
    %402 = arith.mulf %401, %400 : vector<2x16x16xf32>
    %403 = arith.addf %398, %402 : vector<2x16x16xf32>
    %c34 = arith.constant 34 : index
    %404 = memref.load %arg4[%c34] : memref<98xf32, #tpu.memory_space<smem>>
    %405 = vector.extract_strided_slice %383 {offsets = [0, 4, 0], sizes = [2, 16, 16], strides = [1, 1, 1]} : vector<2x22x16xf32> to vector<2x16x16xf32>
    %406 = vector.broadcast %404 : f32 to vector<2x16x16xf32>
    %407 = arith.mulf %406, %405 : vector<2x16x16xf32>
    %408 = arith.addf %403, %407 : vector<2x16x16xf32>
    %c41 = arith.constant 41 : index
    %409 = memref.load %arg4[%c41] : memref<98xf32, #tpu.memory_space<smem>>
    %410 = vector.extract_strided_slice %383 {offsets = [0, 5, 0], sizes = [2, 16, 16], strides = [1, 1, 1]} : vector<2x22x16xf32> to vector<2x16x16xf32>
    %411 = vector.broadcast %409 : f32 to vector<2x16x16xf32>
    %412 = arith.mulf %411, %410 : vector<2x16x16xf32>
    %413 = arith.addf %408, %412 : vector<2x16x16xf32>
    %c48 = arith.constant 48 : index
    %414 = memref.load %arg4[%c48] : memref<98xf32, #tpu.memory_space<smem>>
    %415 = vector.extract_strided_slice %383 {offsets = [0, 6, 0], sizes = [2, 16, 16], strides = [1, 1, 1]} : vector<2x22x16xf32> to vector<2x16x16xf32>
    %416 = vector.broadcast %414 : f32 to vector<2x16x16xf32>
    %417 = arith.mulf %416, %415 : vector<2x16x16xf32>
    %418 = arith.addf %413, %417 : vector<2x16x16xf32>
    %c1_184 = arith.constant 1 : index
    %c0_185 = arith.constant 0 : index
    %c0_186 = arith.constant 0 : index
    %c0_187 = arith.constant 0 : index
    %419 = vector.load %arg7[%c1_184, %c0_185, %c0_186, %c0_187] : memref<2x2x22x22xf32, #tpu.memory_space<vmem>>, vector<1x2x22x16xf32>
    %420 = vector.shape_cast %419 : vector<1x2x22x16xf32> to vector<2x22x16xf32>
    %c49 = arith.constant 49 : index
    %421 = memref.load %arg4[%c49] : memref<98xf32, #tpu.memory_space<smem>>
    %422 = vector.extract_strided_slice %420 {offsets = [0, 0, 0], sizes = [2, 16, 16], strides = [1, 1, 1]} : vector<2x22x16xf32> to vector<2x16x16xf32>
    %423 = vector.broadcast %421 : f32 to vector<2x16x16xf32>
    %424 = arith.mulf %423, %422 : vector<2x16x16xf32>
    %425 = arith.addf %418, %424 : vector<2x16x16xf32>
    %c56 = arith.constant 56 : index
    %426 = memref.load %arg4[%c56] : memref<98xf32, #tpu.memory_space<smem>>
    %427 = vector.extract_strided_slice %420 {offsets = [0, 1, 0], sizes = [2, 16, 16], strides = [1, 1, 1]} : vector<2x22x16xf32> to vector<2x16x16xf32>
    %428 = vector.broadcast %426 : f32 to vector<2x16x16xf32>
    %429 = arith.mulf %428, %427 : vector<2x16x16xf32>
    %430 = arith.addf %425, %429 : vector<2x16x16xf32>
    %c63 = arith.constant 63 : index
    %431 = memref.load %arg4[%c63] : memref<98xf32, #tpu.memory_space<smem>>
    %432 = vector.extract_strided_slice %420 {offsets = [0, 2, 0], sizes = [2, 16, 16], strides = [1, 1, 1]} : vector<2x22x16xf32> to vector<2x16x16xf32>
    %433 = vector.broadcast %431 : f32 to vector<2x16x16xf32>
    %434 = arith.mulf %433, %432 : vector<2x16x16xf32>
    %435 = arith.addf %430, %434 : vector<2x16x16xf32>
    %c70 = arith.constant 70 : index
    %436 = memref.load %arg4[%c70] : memref<98xf32, #tpu.memory_space<smem>>
    %437 = vector.extract_strided_slice %420 {offsets = [0, 3, 0], sizes = [2, 16, 16], strides = [1, 1, 1]} : vector<2x22x16xf32> to vector<2x16x16xf32>
    %438 = vector.broadcast %436 : f32 to vector<2x16x16xf32>
    %439 = arith.mulf %438, %437 : vector<2x16x16xf32>
    %440 = arith.addf %435, %439 : vector<2x16x16xf32>
    %c77 = arith.constant 77 : index
    %441 = memref.load %arg4[%c77] : memref<98xf32, #tpu.memory_space<smem>>
    %442 = vector.extract_strided_slice %420 {offsets = [0, 4, 0], sizes = [2, 16, 16], strides = [1, 1, 1]} : vector<2x22x16xf32> to vector<2x16x16xf32>
    %443 = vector.broadcast %441 : f32 to vector<2x16x16xf32>
    %444 = arith.mulf %443, %442 : vector<2x16x16xf32>
    %445 = arith.addf %440, %444 : vector<2x16x16xf32>
    %c84 = arith.constant 84 : index
    %446 = memref.load %arg4[%c84] : memref<98xf32, #tpu.memory_space<smem>>
    %447 = vector.extract_strided_slice %420 {offsets = [0, 5, 0], sizes = [2, 16, 16], strides = [1, 1, 1]} : vector<2x22x16xf32> to vector<2x16x16xf32>
    %448 = vector.broadcast %446 : f32 to vector<2x16x16xf32>
    %449 = arith.mulf %448, %447 : vector<2x16x16xf32>
    %450 = arith.addf %445, %449 : vector<2x16x16xf32>
    %c91 = arith.constant 91 : index
    %451 = memref.load %arg4[%c91] : memref<98xf32, #tpu.memory_space<smem>>
    %452 = vector.extract_strided_slice %420 {offsets = [0, 6, 0], sizes = [2, 16, 16], strides = [1, 1, 1]} : vector<2x22x16xf32> to vector<2x16x16xf32>
    %453 = vector.broadcast %451 : f32 to vector<2x16x16xf32>
    %454 = arith.mulf %453, %452 : vector<2x16x16xf32>
    %455 = arith.addf %450, %454 : vector<2x16x16xf32>
    %c1_188 = arith.constant 1 : index
    %c0_189 = arith.constant 0 : index
    %c0_190 = arith.constant 0 : index
    %c1_191 = arith.constant 1 : index
    %456 = vector.load %arg7[%c1_188, %c0_189, %c0_190, %c1_191] : memref<2x2x22x22xf32, #tpu.memory_space<vmem>>, vector<1x2x22x16xf32>
    %457 = vector.shape_cast %456 : vector<1x2x22x16xf32> to vector<2x22x16xf32>
    %c50 = arith.constant 50 : index
    %458 = memref.load %arg4[%c50] : memref<98xf32, #tpu.memory_space<smem>>
    %459 = vector.extract_strided_slice %457 {offsets = [0, 0, 0], sizes = [2, 16, 16], strides = [1, 1, 1]} : vector<2x22x16xf32> to vector<2x16x16xf32>
    %460 = vector.broadcast %458 : f32 to vector<2x16x16xf32>
    %461 = arith.mulf %460, %459 : vector<2x16x16xf32>
    %462 = arith.addf %455, %461 : vector<2x16x16xf32>
    %c57 = arith.constant 57 : index
    %463 = memref.load %arg4[%c57] : memref<98xf32, #tpu.memory_space<smem>>
    %464 = vector.extract_strided_slice %457 {offsets = [0, 1, 0], sizes = [2, 16, 16], strides = [1, 1, 1]} : vector<2x22x16xf32> to vector<2x16x16xf32>
    %465 = vector.broadcast %463 : f32 to vector<2x16x16xf32>
    %466 = arith.mulf %465, %464 : vector<2x16x16xf32>
    %467 = arith.addf %462, %466 : vector<2x16x16xf32>
    %c64 = arith.constant 64 : index
    %468 = memref.load %arg4[%c64] : memref<98xf32, #tpu.memory_space<smem>>
    %469 = vector.extract_strided_slice %457 {offsets = [0, 2, 0], sizes = [2, 16, 16], strides = [1, 1, 1]} : vector<2x22x16xf32> to vector<2x16x16xf32>
    %470 = vector.broadcast %468 : f32 to vector<2x16x16xf32>
    %471 = arith.mulf %470, %469 : vector<2x16x16xf32>
    %472 = arith.addf %467, %471 : vector<2x16x16xf32>
    %c71 = arith.constant 71 : index
    %473 = memref.load %arg4[%c71] : memref<98xf32, #tpu.memory_space<smem>>
    %474 = vector.extract_strided_slice %457 {offsets = [0, 3, 0], sizes = [2, 16, 16], strides = [1, 1, 1]} : vector<2x22x16xf32> to vector<2x16x16xf32>
    %475 = vector.broadcast %473 : f32 to vector<2x16x16xf32>
    %476 = arith.mulf %475, %474 : vector<2x16x16xf32>
    %477 = arith.addf %472, %476 : vector<2x16x16xf32>
    %c78 = arith.constant 78 : index
    %478 = memref.load %arg4[%c78] : memref<98xf32, #tpu.memory_space<smem>>
    %479 = vector.extract_strided_slice %457 {offsets = [0, 4, 0], sizes = [2, 16, 16], strides = [1, 1, 1]} : vector<2x22x16xf32> to vector<2x16x16xf32>
    %480 = vector.broadcast %478 : f32 to vector<2x16x16xf32>
    %481 = arith.mulf %480, %479 : vector<2x16x16xf32>
    %482 = arith.addf %477, %481 : vector<2x16x16xf32>
    %c85 = arith.constant 85 : index
    %483 = memref.load %arg4[%c85] : memref<98xf32, #tpu.memory_space<smem>>
    %484 = vector.extract_strided_slice %457 {offsets = [0, 5, 0], sizes = [2, 16, 16], strides = [1, 1, 1]} : vector<2x22x16xf32> to vector<2x16x16xf32>
    %485 = vector.broadcast %483 : f32 to vector<2x16x16xf32>
    %486 = arith.mulf %485, %484 : vector<2x16x16xf32>
    %487 = arith.addf %482, %486 : vector<2x16x16xf32>
    %c92 = arith.constant 92 : index
    %488 = memref.load %arg4[%c92] : memref<98xf32, #tpu.memory_space<smem>>
    %489 = vector.extract_strided_slice %457 {offsets = [0, 6, 0], sizes = [2, 16, 16], strides = [1, 1, 1]} : vector<2x22x16xf32> to vector<2x16x16xf32>
    %490 = vector.broadcast %488 : f32 to vector<2x16x16xf32>
    %491 = arith.mulf %490, %489 : vector<2x16x16xf32>
    %492 = arith.addf %487, %491 : vector<2x16x16xf32>
    %c1_192 = arith.constant 1 : index
    %c0_193 = arith.constant 0 : index
    %c0_194 = arith.constant 0 : index
    %c2_195 = arith.constant 2 : index
    %493 = vector.load %arg7[%c1_192, %c0_193, %c0_194, %c2_195] : memref<2x2x22x22xf32, #tpu.memory_space<vmem>>, vector<1x2x22x16xf32>
    %494 = vector.shape_cast %493 : vector<1x2x22x16xf32> to vector<2x22x16xf32>
    %c51 = arith.constant 51 : index
    %495 = memref.load %arg4[%c51] : memref<98xf32, #tpu.memory_space<smem>>
    %496 = vector.extract_strided_slice %494 {offsets = [0, 0, 0], sizes = [2, 16, 16], strides = [1, 1, 1]} : vector<2x22x16xf32> to vector<2x16x16xf32>
    %497 = vector.broadcast %495 : f32 to vector<2x16x16xf32>
    %498 = arith.mulf %497, %496 : vector<2x16x16xf32>
    %499 = arith.addf %492, %498 : vector<2x16x16xf32>
    %c58 = arith.constant 58 : index
    %500 = memref.load %arg4[%c58] : memref<98xf32, #tpu.memory_space<smem>>
    %501 = vector.extract_strided_slice %494 {offsets = [0, 1, 0], sizes = [2, 16, 16], strides = [1, 1, 1]} : vector<2x22x16xf32> to vector<2x16x16xf32>
    %502 = vector.broadcast %500 : f32 to vector<2x16x16xf32>
    %503 = arith.mulf %502, %501 : vector<2x16x16xf32>
    %504 = arith.addf %499, %503 : vector<2x16x16xf32>
    %c65 = arith.constant 65 : index
    %505 = memref.load %arg4[%c65] : memref<98xf32, #tpu.memory_space<smem>>
    %506 = vector.extract_strided_slice %494 {offsets = [0, 2, 0], sizes = [2, 16, 16], strides = [1, 1, 1]} : vector<2x22x16xf32> to vector<2x16x16xf32>
    %507 = vector.broadcast %505 : f32 to vector<2x16x16xf32>
    %508 = arith.mulf %507, %506 : vector<2x16x16xf32>
    %509 = arith.addf %504, %508 : vector<2x16x16xf32>
    %c72 = arith.constant 72 : index
    %510 = memref.load %arg4[%c72] : memref<98xf32, #tpu.memory_space<smem>>
    %511 = vector.extract_strided_slice %494 {offsets = [0, 3, 0], sizes = [2, 16, 16], strides = [1, 1, 1]} : vector<2x22x16xf32> to vector<2x16x16xf32>
    %512 = vector.broadcast %510 : f32 to vector<2x16x16xf32>
    %513 = arith.mulf %512, %511 : vector<2x16x16xf32>
    %514 = arith.addf %509, %513 : vector<2x16x16xf32>
    %c79 = arith.constant 79 : index
    %515 = memref.load %arg4[%c79] : memref<98xf32, #tpu.memory_space<smem>>
    %516 = vector.extract_strided_slice %494 {offsets = [0, 4, 0], sizes = [2, 16, 16], strides = [1, 1, 1]} : vector<2x22x16xf32> to vector<2x16x16xf32>
    %517 = vector.broadcast %515 : f32 to vector<2x16x16xf32>
    %518 = arith.mulf %517, %516 : vector<2x16x16xf32>
    %519 = arith.addf %514, %518 : vector<2x16x16xf32>
    %c86 = arith.constant 86 : index
    %520 = memref.load %arg4[%c86] : memref<98xf32, #tpu.memory_space<smem>>
    %521 = vector.extract_strided_slice %494 {offsets = [0, 5, 0], sizes = [2, 16, 16], strides = [1, 1, 1]} : vector<2x22x16xf32> to vector<2x16x16xf32>
    %522 = vector.broadcast %520 : f32 to vector<2x16x16xf32>
    %523 = arith.mulf %522, %521 : vector<2x16x16xf32>
    %524 = arith.addf %519, %523 : vector<2x16x16xf32>
    %c93 = arith.constant 93 : index
    %525 = memref.load %arg4[%c93] : memref<98xf32, #tpu.memory_space<smem>>
    %526 = vector.extract_strided_slice %494 {offsets = [0, 6, 0], sizes = [2, 16, 16], strides = [1, 1, 1]} : vector<2x22x16xf32> to vector<2x16x16xf32>
    %527 = vector.broadcast %525 : f32 to vector<2x16x16xf32>
    %528 = arith.mulf %527, %526 : vector<2x16x16xf32>
    %529 = arith.addf %524, %528 : vector<2x16x16xf32>
    %c1_196 = arith.constant 1 : index
    %c0_197 = arith.constant 0 : index
    %c0_198 = arith.constant 0 : index
    %c3_199 = arith.constant 3 : index
    %530 = vector.load %arg7[%c1_196, %c0_197, %c0_198, %c3_199] : memref<2x2x22x22xf32, #tpu.memory_space<vmem>>, vector<1x2x22x16xf32>
    %531 = vector.shape_cast %530 : vector<1x2x22x16xf32> to vector<2x22x16xf32>
    %c52 = arith.constant 52 : index
    %532 = memref.load %arg4[%c52] : memref<98xf32, #tpu.memory_space<smem>>
    %533 = vector.extract_strided_slice %531 {offsets = [0, 0, 0], sizes = [2, 16, 16], strides = [1, 1, 1]} : vector<2x22x16xf32> to vector<2x16x16xf32>
    %534 = vector.broadcast %532 : f32 to vector<2x16x16xf32>
    %535 = arith.mulf %534, %533 : vector<2x16x16xf32>
    %536 = arith.addf %529, %535 : vector<2x16x16xf32>
    %c59 = arith.constant 59 : index
    %537 = memref.load %arg4[%c59] : memref<98xf32, #tpu.memory_space<smem>>
    %538 = vector.extract_strided_slice %531 {offsets = [0, 1, 0], sizes = [2, 16, 16], strides = [1, 1, 1]} : vector<2x22x16xf32> to vector<2x16x16xf32>
    %539 = vector.broadcast %537 : f32 to vector<2x16x16xf32>
    %540 = arith.mulf %539, %538 : vector<2x16x16xf32>
    %541 = arith.addf %536, %540 : vector<2x16x16xf32>
    %c66 = arith.constant 66 : index
    %542 = memref.load %arg4[%c66] : memref<98xf32, #tpu.memory_space<smem>>
    %543 = vector.extract_strided_slice %531 {offsets = [0, 2, 0], sizes = [2, 16, 16], strides = [1, 1, 1]} : vector<2x22x16xf32> to vector<2x16x16xf32>
    %544 = vector.broadcast %542 : f32 to vector<2x16x16xf32>
    %545 = arith.mulf %544, %543 : vector<2x16x16xf32>
    %546 = arith.addf %541, %545 : vector<2x16x16xf32>
    %c73 = arith.constant 73 : index
    %547 = memref.load %arg4[%c73] : memref<98xf32, #tpu.memory_space<smem>>
    %548 = vector.extract_strided_slice %531 {offsets = [0, 3, 0], sizes = [2, 16, 16], strides = [1, 1, 1]} : vector<2x22x16xf32> to vector<2x16x16xf32>
    %549 = vector.broadcast %547 : f32 to vector<2x16x16xf32>
    %550 = arith.mulf %549, %548 : vector<2x16x16xf32>
    %551 = arith.addf %546, %550 : vector<2x16x16xf32>
    %c80 = arith.constant 80 : index
    %552 = memref.load %arg4[%c80] : memref<98xf32, #tpu.memory_space<smem>>
    %553 = vector.extract_strided_slice %531 {offsets = [0, 4, 0], sizes = [2, 16, 16], strides = [1, 1, 1]} : vector<2x22x16xf32> to vector<2x16x16xf32>
    %554 = vector.broadcast %552 : f32 to vector<2x16x16xf32>
    %555 = arith.mulf %554, %553 : vector<2x16x16xf32>
    %556 = arith.addf %551, %555 : vector<2x16x16xf32>
    %c87 = arith.constant 87 : index
    %557 = memref.load %arg4[%c87] : memref<98xf32, #tpu.memory_space<smem>>
    %558 = vector.extract_strided_slice %531 {offsets = [0, 5, 0], sizes = [2, 16, 16], strides = [1, 1, 1]} : vector<2x22x16xf32> to vector<2x16x16xf32>
    %559 = vector.broadcast %557 : f32 to vector<2x16x16xf32>
    %560 = arith.mulf %559, %558 : vector<2x16x16xf32>
    %561 = arith.addf %556, %560 : vector<2x16x16xf32>
    %c94 = arith.constant 94 : index
    %562 = memref.load %arg4[%c94] : memref<98xf32, #tpu.memory_space<smem>>
    %563 = vector.extract_strided_slice %531 {offsets = [0, 6, 0], sizes = [2, 16, 16], strides = [1, 1, 1]} : vector<2x22x16xf32> to vector<2x16x16xf32>
    %564 = vector.broadcast %562 : f32 to vector<2x16x16xf32>
    %565 = arith.mulf %564, %563 : vector<2x16x16xf32>
    %566 = arith.addf %561, %565 : vector<2x16x16xf32>
    %c1_200 = arith.constant 1 : index
    %c0_201 = arith.constant 0 : index
    %c0_202 = arith.constant 0 : index
    %c4_203 = arith.constant 4 : index
    %567 = vector.load %arg7[%c1_200, %c0_201, %c0_202, %c4_203] : memref<2x2x22x22xf32, #tpu.memory_space<vmem>>, vector<1x2x22x16xf32>
    %568 = vector.shape_cast %567 : vector<1x2x22x16xf32> to vector<2x22x16xf32>
    %c53 = arith.constant 53 : index
    %569 = memref.load %arg4[%c53] : memref<98xf32, #tpu.memory_space<smem>>
    %570 = vector.extract_strided_slice %568 {offsets = [0, 0, 0], sizes = [2, 16, 16], strides = [1, 1, 1]} : vector<2x22x16xf32> to vector<2x16x16xf32>
    %571 = vector.broadcast %569 : f32 to vector<2x16x16xf32>
    %572 = arith.mulf %571, %570 : vector<2x16x16xf32>
    %573 = arith.addf %566, %572 : vector<2x16x16xf32>
    %c60 = arith.constant 60 : index
    %574 = memref.load %arg4[%c60] : memref<98xf32, #tpu.memory_space<smem>>
    %575 = vector.extract_strided_slice %568 {offsets = [0, 1, 0], sizes = [2, 16, 16], strides = [1, 1, 1]} : vector<2x22x16xf32> to vector<2x16x16xf32>
    %576 = vector.broadcast %574 : f32 to vector<2x16x16xf32>
    %577 = arith.mulf %576, %575 : vector<2x16x16xf32>
    %578 = arith.addf %573, %577 : vector<2x16x16xf32>
    %c67 = arith.constant 67 : index
    %579 = memref.load %arg4[%c67] : memref<98xf32, #tpu.memory_space<smem>>
    %580 = vector.extract_strided_slice %568 {offsets = [0, 2, 0], sizes = [2, 16, 16], strides = [1, 1, 1]} : vector<2x22x16xf32> to vector<2x16x16xf32>
    %581 = vector.broadcast %579 : f32 to vector<2x16x16xf32>
    %582 = arith.mulf %581, %580 : vector<2x16x16xf32>
    %583 = arith.addf %578, %582 : vector<2x16x16xf32>
    %c74 = arith.constant 74 : index
    %584 = memref.load %arg4[%c74] : memref<98xf32, #tpu.memory_space<smem>>
    %585 = vector.extract_strided_slice %568 {offsets = [0, 3, 0], sizes = [2, 16, 16], strides = [1, 1, 1]} : vector<2x22x16xf32> to vector<2x16x16xf32>
    %586 = vector.broadcast %584 : f32 to vector<2x16x16xf32>
    %587 = arith.mulf %586, %585 : vector<2x16x16xf32>
    %588 = arith.addf %583, %587 : vector<2x16x16xf32>
    %c81 = arith.constant 81 : index
    %589 = memref.load %arg4[%c81] : memref<98xf32, #tpu.memory_space<smem>>
    %590 = vector.extract_strided_slice %568 {offsets = [0, 4, 0], sizes = [2, 16, 16], strides = [1, 1, 1]} : vector<2x22x16xf32> to vector<2x16x16xf32>
    %591 = vector.broadcast %589 : f32 to vector<2x16x16xf32>
    %592 = arith.mulf %591, %590 : vector<2x16x16xf32>
    %593 = arith.addf %588, %592 : vector<2x16x16xf32>
    %c88 = arith.constant 88 : index
    %594 = memref.load %arg4[%c88] : memref<98xf32, #tpu.memory_space<smem>>
    %595 = vector.extract_strided_slice %568 {offsets = [0, 5, 0], sizes = [2, 16, 16], strides = [1, 1, 1]} : vector<2x22x16xf32> to vector<2x16x16xf32>
    %596 = vector.broadcast %594 : f32 to vector<2x16x16xf32>
    %597 = arith.mulf %596, %595 : vector<2x16x16xf32>
    %598 = arith.addf %593, %597 : vector<2x16x16xf32>
    %c95 = arith.constant 95 : index
    %599 = memref.load %arg4[%c95] : memref<98xf32, #tpu.memory_space<smem>>
    %600 = vector.extract_strided_slice %568 {offsets = [0, 6, 0], sizes = [2, 16, 16], strides = [1, 1, 1]} : vector<2x22x16xf32> to vector<2x16x16xf32>
    %601 = vector.broadcast %599 : f32 to vector<2x16x16xf32>
    %602 = arith.mulf %601, %600 : vector<2x16x16xf32>
    %603 = arith.addf %598, %602 : vector<2x16x16xf32>
    %c1_204 = arith.constant 1 : index
    %c0_205 = arith.constant 0 : index
    %c0_206 = arith.constant 0 : index
    %c5_207 = arith.constant 5 : index
    %604 = vector.load %arg7[%c1_204, %c0_205, %c0_206, %c5_207] : memref<2x2x22x22xf32, #tpu.memory_space<vmem>>, vector<1x2x22x16xf32>
    %605 = vector.shape_cast %604 : vector<1x2x22x16xf32> to vector<2x22x16xf32>
    %c54 = arith.constant 54 : index
    %606 = memref.load %arg4[%c54] : memref<98xf32, #tpu.memory_space<smem>>
    %607 = vector.extract_strided_slice %605 {offsets = [0, 0, 0], sizes = [2, 16, 16], strides = [1, 1, 1]} : vector<2x22x16xf32> to vector<2x16x16xf32>
    %608 = vector.broadcast %606 : f32 to vector<2x16x16xf32>
    %609 = arith.mulf %608, %607 : vector<2x16x16xf32>
    %610 = arith.addf %603, %609 : vector<2x16x16xf32>
    %c61 = arith.constant 61 : index
    %611 = memref.load %arg4[%c61] : memref<98xf32, #tpu.memory_space<smem>>
    %612 = vector.extract_strided_slice %605 {offsets = [0, 1, 0], sizes = [2, 16, 16], strides = [1, 1, 1]} : vector<2x22x16xf32> to vector<2x16x16xf32>
    %613 = vector.broadcast %611 : f32 to vector<2x16x16xf32>
    %614 = arith.mulf %613, %612 : vector<2x16x16xf32>
    %615 = arith.addf %610, %614 : vector<2x16x16xf32>
    %c68 = arith.constant 68 : index
    %616 = memref.load %arg4[%c68] : memref<98xf32, #tpu.memory_space<smem>>
    %617 = vector.extract_strided_slice %605 {offsets = [0, 2, 0], sizes = [2, 16, 16], strides = [1, 1, 1]} : vector<2x22x16xf32> to vector<2x16x16xf32>
    %618 = vector.broadcast %616 : f32 to vector<2x16x16xf32>
    %619 = arith.mulf %618, %617 : vector<2x16x16xf32>
    %620 = arith.addf %615, %619 : vector<2x16x16xf32>
    %c75 = arith.constant 75 : index
    %621 = memref.load %arg4[%c75] : memref<98xf32, #tpu.memory_space<smem>>
    %622 = vector.extract_strided_slice %605 {offsets = [0, 3, 0], sizes = [2, 16, 16], strides = [1, 1, 1]} : vector<2x22x16xf32> to vector<2x16x16xf32>
    %623 = vector.broadcast %621 : f32 to vector<2x16x16xf32>
    %624 = arith.mulf %623, %622 : vector<2x16x16xf32>
    %625 = arith.addf %620, %624 : vector<2x16x16xf32>
    %c82 = arith.constant 82 : index
    %626 = memref.load %arg4[%c82] : memref<98xf32, #tpu.memory_space<smem>>
    %627 = vector.extract_strided_slice %605 {offsets = [0, 4, 0], sizes = [2, 16, 16], strides = [1, 1, 1]} : vector<2x22x16xf32> to vector<2x16x16xf32>
    %628 = vector.broadcast %626 : f32 to vector<2x16x16xf32>
    %629 = arith.mulf %628, %627 : vector<2x16x16xf32>
    %630 = arith.addf %625, %629 : vector<2x16x16xf32>
    %c89 = arith.constant 89 : index
    %631 = memref.load %arg4[%c89] : memref<98xf32, #tpu.memory_space<smem>>
    %632 = vector.extract_strided_slice %605 {offsets = [0, 5, 0], sizes = [2, 16, 16], strides = [1, 1, 1]} : vector<2x22x16xf32> to vector<2x16x16xf32>
    %633 = vector.broadcast %631 : f32 to vector<2x16x16xf32>
    %634 = arith.mulf %633, %632 : vector<2x16x16xf32>
    %635 = arith.addf %630, %634 : vector<2x16x16xf32>
    %c96 = arith.constant 96 : index
    %636 = memref.load %arg4[%c96] : memref<98xf32, #tpu.memory_space<smem>>
    %637 = vector.extract_strided_slice %605 {offsets = [0, 6, 0], sizes = [2, 16, 16], strides = [1, 1, 1]} : vector<2x22x16xf32> to vector<2x16x16xf32>
    %638 = vector.broadcast %636 : f32 to vector<2x16x16xf32>
    %639 = arith.mulf %638, %637 : vector<2x16x16xf32>
    %640 = arith.addf %635, %639 : vector<2x16x16xf32>
    %c1_208 = arith.constant 1 : index
    %c0_209 = arith.constant 0 : index
    %c0_210 = arith.constant 0 : index
    %c6_211 = arith.constant 6 : index
    %641 = vector.load %arg7[%c1_208, %c0_209, %c0_210, %c6_211] : memref<2x2x22x22xf32, #tpu.memory_space<vmem>>, vector<1x2x22x16xf32>
    %642 = vector.shape_cast %641 : vector<1x2x22x16xf32> to vector<2x22x16xf32>
    %c55 = arith.constant 55 : index
    %643 = memref.load %arg4[%c55] : memref<98xf32, #tpu.memory_space<smem>>
    %644 = vector.extract_strided_slice %642 {offsets = [0, 0, 0], sizes = [2, 16, 16], strides = [1, 1, 1]} : vector<2x22x16xf32> to vector<2x16x16xf32>
    %645 = vector.broadcast %643 : f32 to vector<2x16x16xf32>
    %646 = arith.mulf %645, %644 : vector<2x16x16xf32>
    %647 = arith.addf %640, %646 : vector<2x16x16xf32>
    %c62 = arith.constant 62 : index
    %648 = memref.load %arg4[%c62] : memref<98xf32, #tpu.memory_space<smem>>
    %649 = vector.extract_strided_slice %642 {offsets = [0, 1, 0], sizes = [2, 16, 16], strides = [1, 1, 1]} : vector<2x22x16xf32> to vector<2x16x16xf32>
    %650 = vector.broadcast %648 : f32 to vector<2x16x16xf32>
    %651 = arith.mulf %650, %649 : vector<2x16x16xf32>
    %652 = arith.addf %647, %651 : vector<2x16x16xf32>
    %c69 = arith.constant 69 : index
    %653 = memref.load %arg4[%c69] : memref<98xf32, #tpu.memory_space<smem>>
    %654 = vector.extract_strided_slice %642 {offsets = [0, 2, 0], sizes = [2, 16, 16], strides = [1, 1, 1]} : vector<2x22x16xf32> to vector<2x16x16xf32>
    %655 = vector.broadcast %653 : f32 to vector<2x16x16xf32>
    %656 = arith.mulf %655, %654 : vector<2x16x16xf32>
    %657 = arith.addf %652, %656 : vector<2x16x16xf32>
    %c76 = arith.constant 76 : index
    %658 = memref.load %arg4[%c76] : memref<98xf32, #tpu.memory_space<smem>>
    %659 = vector.extract_strided_slice %642 {offsets = [0, 3, 0], sizes = [2, 16, 16], strides = [1, 1, 1]} : vector<2x22x16xf32> to vector<2x16x16xf32>
    %660 = vector.broadcast %658 : f32 to vector<2x16x16xf32>
    %661 = arith.mulf %660, %659 : vector<2x16x16xf32>
    %662 = arith.addf %657, %661 : vector<2x16x16xf32>
    %c83 = arith.constant 83 : index
    %663 = memref.load %arg4[%c83] : memref<98xf32, #tpu.memory_space<smem>>
    %664 = vector.extract_strided_slice %642 {offsets = [0, 4, 0], sizes = [2, 16, 16], strides = [1, 1, 1]} : vector<2x22x16xf32> to vector<2x16x16xf32>
    %665 = vector.broadcast %663 : f32 to vector<2x16x16xf32>
    %666 = arith.mulf %665, %664 : vector<2x16x16xf32>
    %667 = arith.addf %662, %666 : vector<2x16x16xf32>
    %c90 = arith.constant 90 : index
    %668 = memref.load %arg4[%c90] : memref<98xf32, #tpu.memory_space<smem>>
    %669 = vector.extract_strided_slice %642 {offsets = [0, 5, 0], sizes = [2, 16, 16], strides = [1, 1, 1]} : vector<2x22x16xf32> to vector<2x16x16xf32>
    %670 = vector.broadcast %668 : f32 to vector<2x16x16xf32>
    %671 = arith.mulf %670, %669 : vector<2x16x16xf32>
    %672 = arith.addf %667, %671 : vector<2x16x16xf32>
    %c97 = arith.constant 97 : index
    %673 = memref.load %arg4[%c97] : memref<98xf32, #tpu.memory_space<smem>>
    %674 = vector.extract_strided_slice %642 {offsets = [0, 6, 0], sizes = [2, 16, 16], strides = [1, 1, 1]} : vector<2x22x16xf32> to vector<2x16x16xf32>
    %675 = vector.broadcast %673 : f32 to vector<2x16x16xf32>
    %676 = arith.mulf %675, %674 : vector<2x16x16xf32>
    %677 = arith.addf %672, %676 : vector<2x16x16xf32>
    %678 = arith.negf %677 : vector<2x16x16xf32>
    %679 = math.exp %678 : vector<2x16x16xf32>
    %cst_212 = arith.constant 1.000000e+00 : f32
    %680 = vector.broadcast %cst_212 : f32 to vector<2x16x16xf32>
    %681 = arith.addf %680, %679 : vector<2x16x16xf32>
    %682 = arith.divf %680, %681 : vector<2x16x16xf32>
    %683 = vector.extract_strided_slice %682 {offsets = [0, 0, 0], sizes = [2, 1, 16], strides = [1, 1, 1]} : vector<2x16x16xf32> to vector<2x1x16xf32>
    %684 = vector.shape_cast %683 : vector<2x1x16xf32> to vector<2x16xf32>
    %c0_213 = arith.constant 0 : index
    %c0_214 = arith.constant 0 : index
    %685 = vector.load %arg8[%c0_213, %c0_214] : memref<2x256xf32, #tpu.memory_space<vmem>>, vector<2x16xf32>
    tpu.vector_store %arg8[%c0_213, %c0_214], %684 {strides = array<i32>} : memref<2x256xf32, #tpu.memory_space<vmem>>, vector<2x16xf32>,
    %686 = vector.extract_strided_slice %682 {offsets = [0, 1, 0], sizes = [2, 1, 16], strides = [1, 1, 1]} : vector<2x16x16xf32> to vector<2x1x16xf32>
    %687 = vector.shape_cast %686 : vector<2x1x16xf32> to vector<2x16xf32>
    %c0_215 = arith.constant 0 : index
    %c16_216 = arith.constant 16 : index
    %688 = vector.load %arg8[%c0_215, %c16_216] : memref<2x256xf32, #tpu.memory_space<vmem>>, vector<2x16xf32>
    tpu.vector_store %arg8[%c0_215, %c16_216], %687 {strides = array<i32>} : memref<2x256xf32, #tpu.memory_space<vmem>>, vector<2x16xf32>,
    %689 = vector.extract_strided_slice %682 {offsets = [0, 2, 0], sizes = [2, 1, 16], strides = [1, 1, 1]} : vector<2x16x16xf32> to vector<2x1x16xf32>
    %690 = vector.shape_cast %689 : vector<2x1x16xf32> to vector<2x16xf32>
    %c0_217 = arith.constant 0 : index
    %c32_218 = arith.constant 32 : index
    %691 = vector.load %arg8[%c0_217, %c32_218] : memref<2x256xf32, #tpu.memory_space<vmem>>, vector<2x16xf32>
    tpu.vector_store %arg8[%c0_217, %c32_218], %690 {strides = array<i32>} : memref<2x256xf32, #tpu.memory_space<vmem>>, vector<2x16xf32>,
    %692 = vector.extract_strided_slice %682 {offsets = [0, 3, 0], sizes = [2, 1, 16], strides = [1, 1, 1]} : vector<2x16x16xf32> to vector<2x1x16xf32>
    %693 = vector.shape_cast %692 : vector<2x1x16xf32> to vector<2x16xf32>
    %c0_219 = arith.constant 0 : index
    %c48_220 = arith.constant 48 : index
    %694 = vector.load %arg8[%c0_219, %c48_220] : memref<2x256xf32, #tpu.memory_space<vmem>>, vector<2x16xf32>
    tpu.vector_store %arg8[%c0_219, %c48_220], %693 {strides = array<i32>} : memref<2x256xf32, #tpu.memory_space<vmem>>, vector<2x16xf32>,
    %695 = vector.extract_strided_slice %682 {offsets = [0, 4, 0], sizes = [2, 1, 16], strides = [1, 1, 1]} : vector<2x16x16xf32> to vector<2x1x16xf32>
    %696 = vector.shape_cast %695 : vector<2x1x16xf32> to vector<2x16xf32>
    %c0_221 = arith.constant 0 : index
    %c64_222 = arith.constant 64 : index
    %697 = vector.load %arg8[%c0_221, %c64_222] : memref<2x256xf32, #tpu.memory_space<vmem>>, vector<2x16xf32>
    tpu.vector_store %arg8[%c0_221, %c64_222], %696 {strides = array<i32>} : memref<2x256xf32, #tpu.memory_space<vmem>>, vector<2x16xf32>,
    %698 = vector.extract_strided_slice %682 {offsets = [0, 5, 0], sizes = [2, 1, 16], strides = [1, 1, 1]} : vector<2x16x16xf32> to vector<2x1x16xf32>
    %699 = vector.shape_cast %698 : vector<2x1x16xf32> to vector<2x16xf32>
    %c0_223 = arith.constant 0 : index
    %c80_224 = arith.constant 80 : index
    %700 = vector.load %arg8[%c0_223, %c80_224] : memref<2x256xf32, #tpu.memory_space<vmem>>, vector<2x16xf32>
    tpu.vector_store %arg8[%c0_223, %c80_224], %699 {strides = array<i32>} : memref<2x256xf32, #tpu.memory_space<vmem>>, vector<2x16xf32>,
    %701 = vector.extract_strided_slice %682 {offsets = [0, 6, 0], sizes = [2, 1, 16], strides = [1, 1, 1]} : vector<2x16x16xf32> to vector<2x1x16xf32>
    %702 = vector.shape_cast %701 : vector<2x1x16xf32> to vector<2x16xf32>
    %c0_225 = arith.constant 0 : index
    %c96_226 = arith.constant 96 : index
    %703 = vector.load %arg8[%c0_225, %c96_226] : memref<2x256xf32, #tpu.memory_space<vmem>>, vector<2x16xf32>
    tpu.vector_store %arg8[%c0_225, %c96_226], %702 {strides = array<i32>} : memref<2x256xf32, #tpu.memory_space<vmem>>, vector<2x16xf32>,
    %704 = vector.extract_strided_slice %682 {offsets = [0, 7, 0], sizes = [2, 1, 16], strides = [1, 1, 1]} : vector<2x16x16xf32> to vector<2x1x16xf32>
    %705 = vector.shape_cast %704 : vector<2x1x16xf32> to vector<2x16xf32>
    %c0_227 = arith.constant 0 : index
    %c112 = arith.constant 112 : index
    %706 = vector.load %arg8[%c0_227, %c112] : memref<2x256xf32, #tpu.memory_space<vmem>>, vector<2x16xf32>
    tpu.vector_store %arg8[%c0_227, %c112], %705 {strides = array<i32>} : memref<2x256xf32, #tpu.memory_space<vmem>>, vector<2x16xf32>,
    %707 = vector.extract_strided_slice %682 {offsets = [0, 8, 0], sizes = [2, 1, 16], strides = [1, 1, 1]} : vector<2x16x16xf32> to vector<2x1x16xf32>
    %708 = vector.shape_cast %707 : vector<2x1x16xf32> to vector<2x16xf32>
    %c0_228 = arith.constant 0 : index
    %c128 = arith.constant 128 : index
    %709 = vector.load %arg8[%c0_228, %c128] : memref<2x256xf32, #tpu.memory_space<vmem>>, vector<2x16xf32>
    tpu.vector_store %arg8[%c0_228, %c128], %708 {strides = array<i32>} : memref<2x256xf32, #tpu.memory_space<vmem>>, vector<2x16xf32>,
    %710 = vector.extract_strided_slice %682 {offsets = [0, 9, 0], sizes = [2, 1, 16], strides = [1, 1, 1]} : vector<2x16x16xf32> to vector<2x1x16xf32>
    %711 = vector.shape_cast %710 : vector<2x1x16xf32> to vector<2x16xf32>
    %c0_229 = arith.constant 0 : index
    %c144 = arith.constant 144 : index
    %712 = vector.load %arg8[%c0_229, %c144] : memref<2x256xf32, #tpu.memory_space<vmem>>, vector<2x16xf32>
    tpu.vector_store %arg8[%c0_229, %c144], %711 {strides = array<i32>} : memref<2x256xf32, #tpu.memory_space<vmem>>, vector<2x16xf32>,
    %713 = vector.extract_strided_slice %682 {offsets = [0, 10, 0], sizes = [2, 1, 16], strides = [1, 1, 1]} : vector<2x16x16xf32> to vector<2x1x16xf32>
    %714 = vector.shape_cast %713 : vector<2x1x16xf32> to vector<2x16xf32>
    %c0_230 = arith.constant 0 : index
    %c160 = arith.constant 160 : index
    %715 = vector.load %arg8[%c0_230, %c160] : memref<2x256xf32, #tpu.memory_space<vmem>>, vector<2x16xf32>
    tpu.vector_store %arg8[%c0_230, %c160], %714 {strides = array<i32>} : memref<2x256xf32, #tpu.memory_space<vmem>>, vector<2x16xf32>,
    %716 = vector.extract_strided_slice %682 {offsets = [0, 11, 0], sizes = [2, 1, 16], strides = [1, 1, 1]} : vector<2x16x16xf32> to vector<2x1x16xf32>
    %717 = vector.shape_cast %716 : vector<2x1x16xf32> to vector<2x16xf32>
    %c0_231 = arith.constant 0 : index
    %c176 = arith.constant 176 : index
    %718 = vector.load %arg8[%c0_231, %c176] : memref<2x256xf32, #tpu.memory_space<vmem>>, vector<2x16xf32>
    tpu.vector_store %arg8[%c0_231, %c176], %717 {strides = array<i32>} : memref<2x256xf32, #tpu.memory_space<vmem>>, vector<2x16xf32>,
    %719 = vector.extract_strided_slice %682 {offsets = [0, 12, 0], sizes = [2, 1, 16], strides = [1, 1, 1]} : vector<2x16x16xf32> to vector<2x1x16xf32>
    %720 = vector.shape_cast %719 : vector<2x1x16xf32> to vector<2x16xf32>
    %c0_232 = arith.constant 0 : index
    %c192 = arith.constant 192 : index
    %721 = vector.load %arg8[%c0_232, %c192] : memref<2x256xf32, #tpu.memory_space<vmem>>, vector<2x16xf32>
    tpu.vector_store %arg8[%c0_232, %c192], %720 {strides = array<i32>} : memref<2x256xf32, #tpu.memory_space<vmem>>, vector<2x16xf32>,
    %722 = vector.extract_strided_slice %682 {offsets = [0, 13, 0], sizes = [2, 1, 16], strides = [1, 1, 1]} : vector<2x16x16xf32> to vector<2x1x16xf32>
    %723 = vector.shape_cast %722 : vector<2x1x16xf32> to vector<2x16xf32>
    %c0_233 = arith.constant 0 : index
    %c208 = arith.constant 208 : index
    %724 = vector.load %arg8[%c0_233, %c208] : memref<2x256xf32, #tpu.memory_space<vmem>>, vector<2x16xf32>
    tpu.vector_store %arg8[%c0_233, %c208], %723 {strides = array<i32>} : memref<2x256xf32, #tpu.memory_space<vmem>>, vector<2x16xf32>,
    %725 = vector.extract_strided_slice %682 {offsets = [0, 14, 0], sizes = [2, 1, 16], strides = [1, 1, 1]} : vector<2x16x16xf32> to vector<2x1x16xf32>
    %726 = vector.shape_cast %725 : vector<2x1x16xf32> to vector<2x16xf32>
    %c0_234 = arith.constant 0 : index
    %c224 = arith.constant 224 : index
    %727 = vector.load %arg8[%c0_234, %c224] : memref<2x256xf32, #tpu.memory_space<vmem>>, vector<2x16xf32>
    tpu.vector_store %arg8[%c0_234, %c224], %726 {strides = array<i32>} : memref<2x256xf32, #tpu.memory_space<vmem>>, vector<2x16xf32>,
    %728 = vector.extract_strided_slice %682 {offsets = [0, 15, 0], sizes = [2, 1, 16], strides = [1, 1, 1]} : vector<2x16x16xf32> to vector<2x1x16xf32>
    %729 = vector.shape_cast %728 : vector<2x1x16xf32> to vector<2x16xf32>
    %c0_235 = arith.constant 0 : index
    %c240 = arith.constant 240 : index
    %730 = vector.load %arg8[%c0_235, %c240] : memref<2x256xf32, #tpu.memory_space<vmem>>, vector<2x16xf32>
    tpu.vector_store %arg8[%c0_235, %c240], %729 {strides = array<i32>} : memref<2x256xf32, #tpu.memory_space<vmem>>, vector<2x16xf32>,
    %c0_236 = arith.constant 0 : index
    %c0_237 = arith.constant 0 : index
    %731 = vector.load %arg8[%c0_236, %c0_237] : memref<2x256xf32, #tpu.memory_space<vmem>>, vector<2x256xf32>
    %732 = vector.shape_cast %731 : vector<2x256xf32> to vector<2x1x256xf32>
    %733 = vector.broadcast %732 : vector<2x1x256xf32> to vector<2x8x256xf32>
    %734 = arith.mulf %733, %24 : vector<2x8x256xf32>
    %c0_238 = arith.constant 0 : index
    %c0_239 = arith.constant 0 : index
    %c0_240 = arith.constant 0 : index
    %735 = vector.load %arg5[%c0_238, %c0_239, %c0_240] : memref<2x8x256xf32, #tpu.memory_space<vmem>>, vector<2x8x256xf32>
    tpu.vector_store %arg5[%c0_238, %c0_239, %c0_240], %734 {strides = array<i32>} : memref<2x8x256xf32, #tpu.memory_space<vmem>>, vector<2x8x256xf32>,
    return
  }
  func.func @transform_0(%arg0: i32) -> (i32, i32, i32) {
    %c0_i32 = arith.constant 0 : i32
    %c0_i32_0 = arith.constant 0 : i32
    %c0_i32_1 = arith.constant 0 : i32
    return %arg0, %c0_i32, %c0_i32_0 : i32, i32, i32
  }
  func.func @transform_1(%arg0: i32) -> (i32, i32) {
    %c0_i32 = arith.constant 0 : i32
    %c0_i32_0 = arith.constant 0 : i32
    %c0_i32_1 = arith.constant 0 : i32
    return %c0_i32, %c0_i32_0 : i32, i32
  }
  func.func @transform_2(%arg0: i32) -> (i32, i32) {
    %c0_i32 = arith.constant 0 : i32
    %c0_i32_0 = arith.constant 0 : i32
    %c0_i32_1 = arith.constant 0 : i32
    return %c0_i32, %c0_i32_0 : i32, i32
  }
  func.func @transform_3(%arg0: i32) -> i32 {
    %c0_i32 = arith.constant 0 : i32
    %c0_i32_0 = arith.constant 0 : i32
    return %c0_i32 : i32
  }
  func.func @transform_4(%arg0: i32) -> (i32, i32, i32) {
    %c0_i32 = arith.constant 0 : i32
    %c0_i32_0 = arith.constant 0 : i32
    %c0_i32_1 = arith.constant 0 : i32
    return %arg0, %c0_i32, %c0_i32_0 : i32, i32, i32
  }
}

</mosaic_0001>

<bundles_post_ra>
// kernel: tpu_custom_call.1
= control target key start
LH: loop header
LB: loop body
LE: loop exit
PB: predicated region body
PF: predicated region fallthrough
CT: control target
= control target key end

     0   :  { %9 = vsyncpa [#allocation6], 0  ;;  %s9613_s0 = inlined_call_operand.hbm [shape: f32[2,8,256], index: 0, kind: input, shape index: {}]   ;;  %s9614_s1 = inlined_call_operand.vmem [shape: f32[8,2], index: 1, kind: input, shape index: {}]   ;;  %s9615_s2 = inlined_call_operand.vmem [shape: f32[2,8], index: 2, kind: input, shape index: {}]   ;;  %s9616_s3 = inlined_call_operand.vmem [shape: f32[98], index: 3, kind: input, shape index: {}]   ;;  %s9617_s4 = inlined_call_operand.hbm [shape: f32[2,8,256], index: 4, kind: output, shape index: {}]  }
   0x1   :  { %10 = vsyncpa [#allocation8], 0 }
   0x2   :  { %11 = vsyncpa [#allocation7], 0  ;;  %s4817_s15 = smov [#allocation5]   ;;  %s34_s19 = sshll.u32 %s9616_s3, 4  ;;  %s35_s19 = int_to_ptr.vmem [resolvable:$true] %s34_s19 }
   0x3   :  { %s17_s16 = sshll.u32 %s4817_s15, 4  ;;  %s4755_s22 = scalar_lea.hbm %s9613_s0, 512  ;;  %s18_s16 = int_to_ptr.vmem [resolvable:$true] %s17_s16 }
   0x4   :  { %p4756_p0 = scmp.ne.s32.totalorder %s9613_s0, %s4755_s22  ;;  %p4759_p1 = scmp.lt.u32.totalorder %s4755_s22, %s9613_s0 }
   0x6   :  { %p4761_p2 = pnand %p4759_p1, %p4756_p0 }
   0x8   :  { %4764 = shalt.err (!%p4761_p2)
}
   0x9   :  { %s4765_s27 = scalar_lea.vmem %s18_s16, 512  ;;  %p4770_p4 = scmp.lt.s32.totalorder %s18_s16, %s18_s16 }
   0xa   :  { %p4766_p3 = scmp.ne.s32.totalorder %s18_s16, %s4765_s27  ;;  %p4771_p5 = scmp.lt.s32.totalorder %s4765_s27, %s4765_s27 }
   0xc   :  { %p4772_p6 = por %p4771_p5, %p4770_p4 }
   0xe   :  { %p4773_p7 = pnand %p4772_p6, %p4766_p3 }
  0x10   :  { %4776 = shalt.err (!%p4773_p7)
}
  0x11   :  { %s4818_s3 = smov 256   ;;  %s4819_s28 = smov 16  }
  0x12   :  { %23 = dma.hbm_to_vmem [thread:$0]  %s9613_s0, 512, %s18_s16, [#allocation6], %s4818_s3, %s4818_s3, %s4819_s28  }
  0x13   :  { %s4777_s5 = scalar_lea.vmem %s35_s19, 16  ;;  %p4782_p9 = scmp.lt.s32.totalorder %s35_s19, %s35_s19 }
  0x14   :  { %p4778_p8 = scmp.ne.s32.totalorder %s35_s19, %s4777_s5  ;;  %p4783_p10 = scmp.lt.s32.totalorder %s4777_s5, %s4777_s5 }
  0x16   :  { %p4784_p11 = por %p4783_p10, %p4782_p9 }
  0x18   :  { %p4785_p12 = pnand %p4784_p11, %p4778_p8 }
  0x1a   :  { %4788 = shalt.err (!%p4785_p12)
}
  0x1b   :  { %s4820_s6 = smov [#allocation9]  }
  0x1c   :  { %37 = dma.vmem_to_smem %s35_s19, 16, %s4820_s6, [#allocation8]  }
  0x1d   :  { %4811 = dma.done.wait [#allocation6], 512  }
  0x1e   :  { %4812 = vsyncadd [#allocation6], 4294966784 }
  0x1f   :  { %4813 = dma.done.wait [#allocation8], 16  }
  0x20   :  { %4814 = vsyncadd [#allocation8], 4294967280 }
  0x21   :  { %44 = sfence }
  0x22   :  { %v4888_v0 = vld [vmem:[#allocation5] sm:$0xff]  ;;  %v4890_v1 = vld [vmem:[#allocation5 + $0x8] sm:$0xff]  ;;  %v4892_v2 = vld [vmem:[#allocation5 + $0x10] sm:$0xff]  ;;  %v4821_v9 = vmov 0.0   ;;  %vm4822_vm0 = vmmov 0   ;;  %v57_v10 = vlaneseq  ;;  %vm67_vm1 = vcmask 1041409  }
  0x23   :  { %v72_v3 = vadd.f32 %v4890_v1, %v4888_v0  ;;  %v49_v4 = vmax.f32 %v4888_v0, %v4890_v1  ;;  %v4898_v5 = vld [vmem:[#allocation5 + $0x18] sm:$0xff]  ;;  %4669 = vmatprep.subr.mxu0 %v4821_v9  ;;  %4671 = vmatprep.mubr.msk.f32.mxu0 %vm4822_vm0, %v4821_v9  ;;  %vm70_vm2 = vcmask 58368   ;;  %vm95_vm3 = vcmask 64512   ;;  %s4824_s9 = smov 3   ;;  %s4825_s10 = smov 99  }
  0x24   :  { %v75_v6 = vadd.f32 %v4898_v5, %v4892_v2  ;;  %v52_v7 = vmax.f32 %v4892_v2, %v4898_v5  ;;  %v94_v8 = vld [vmem:[%s9614_s1] sm:$0xff]  ;;  %4674 = vmatprep.subr.mxu1 %v4821_v9  ;;  %4676 = vmatprep.mubr.msk.f32.mxu1 %vm4822_vm0, %v4821_v9  ;;  %v58_v11 = vand.u32 127, %v57_v10  ;;  %v4911_v12 = vshrl.u32 %v57_v10, 7  ;;  %s4826_s11 = smov 83   ;;  %s4827_s12 = smov 67  }
  0x25   :  { %73 = vadd.xlane.f32.xlu0 %v72_v3  ;;  %50 = vmax.xlane.f32.xlu1 %v49_v4  ;;  %v170_v27 = vld [vmem:[%s9615_s2] sm:$0x3]  ;;  %vm175_vm4 = vcmask 1041408   ;;  %vm171_vm5 = vcmask 15360   ;;  %vm329_vm6 = vcmask 179200   ;;  %s4823_s2 = smov 115  }
  0x26   :  { %4670 = vmatpush3.msra.mxu0 %v94_v8  ;;  %9717 = vst [vmem:[#allocation14_spill] sm:$0xff] %v4911_v12  ;;  %v61_v15 = vsub.s32 %v58_v11, %v4911_v12  ;;  %4675 = vmatpush3.msk.msra.mxu1 %vm175_vm4, %v170_v27  ;;  %v4921_v38 = vsub.s32 1, %v4911_v12  ;;  %v4924_v39 = vsub.s32 0, %v4911_v12  ;;  %330 = vst.msk [vmem:[#allocation3] sm:$0xff] %vm329_vm6, %v4821_v9  ;;  %s4828_s13 = smov 51   ;;  %s4829_s14 = smov 35  }
  0x27   :  { %331 = vst.msk [vmem:[#allocation3 + $0x8] sm:$0xff] %vm329_vm6, %v4821_v9  ;;  %334 = vst.msk [vmem:[#allocation3 + $0x18] sm:$0xff] %vm329_vm6, %v4821_v9  ;;  %s4830_s15 = smov 19   ;;  %vm332_vm7 = vcmask 177152   ;;  %vm351_vm8 = vcmask 147480   ;;  %s4569_s16 = sld [smem:[#allocation9 + $0x1]] }
  0x28   :  { %9718 = vst [vmem:[#allocation15_spill] sm:$0xff] %v4921_v38  ;;  %9719 = vst [vmem:[#allocation16_spill] sm:$0xff] %v4924_v39  ;;  %s4576_s17 = sld [smem:[#allocation9 + $0x2]]  ;;  %s4831_s18 = smov 127   ;;  %vm639_vm9 = vcmask 1046528   ;;  %vm672_vm10 = vcmask 1045504  }
  0x29   :  { %76 = vadd.xlane.f32.xlu0 %v75_v6  ;;  %53 = vmax.xlane.f32.xlu1 %v52_v7  ;;  %335 = vst.msk [vmem:[#allocation3 + $0x20] sm:$0xff] %vm329_vm6, %v4821_v9  ;;  %337 = vst.msk [vmem:[#allocation3 + $0x30] sm:$0xff] %vm329_vm6, %v4821_v9  ;;  %s4583_s19 = sld [smem:[#allocation9 + $0x3]]  ;;  %s4832_s20 = smov 126   ;;  %vm705_vm11 = vcmask 1044480   ;;  %vm738_vm12 = vcmask 1043456  }
  0x2a   :  { %338 = vst.msk [vmem:[#allocation3 + $0x38] sm:$0xff] %vm329_vm6, %v4821_v9  ;;  %340 = vst.msk [vmem:[#allocation3 + $0x48] sm:$0xff] %vm329_vm6, %v4821_v9  ;;  %s4590_s21 = sld [smem:[#allocation9 + $0x4]]  ;;  %s4833_s22 = smov 125   ;;  %vm771_vm13 = vcmask 1042432   ;;  %vm4268_vm14 = vcmask 1043459  }
  0x2b   :  { %341 = vst.msk [vmem:[#allocation3 + $0x50] sm:$0xff] %vm329_vm6, %v4821_v9  ;;  %s4597_s23 = sld [smem:[#allocation9 + $0x5]]  ;;  %s4834_s24 = smov 124   ;;  %vm4270_vm15 = vcmask 1045509   ;;  %vm4272_vm0 = vcmask 1047559   ;;  %vm4353_vm6 = vcmask 779904  }
  0x2c   :  { %333 = vst.msk [vmem:[#allocation3 + $0x10] sm:$0x3f] %vm332_vm7, %v4821_v9  ;;  %336 = vst.msk [vmem:[#allocation3 + $0x28] sm:$0x3f] %vm332_vm7, %v4821_v9  ;;  %s4604_s25 = sld [smem:[#allocation9 + $0x6]]  ;;  %s4835_s26 = smov 123  }
  0x2d   :  { %339 = vst.msk [vmem:[#allocation3 + $0x40] sm:$0x3f] %vm332_vm7, %v4821_v9  ;;  %342 = vst.msk [vmem:[#allocation3 + $0x58] sm:$0x3f] %vm332_vm7, %v4821_v9  ;;  %s4836_s27 = smov 122   ;;  %s4618_s29 = sld [smem:[#allocation9 + $0x32]] }
  0x2e   :  { %s4625_s30 = sld [smem:[#allocation9 + $0x33]]  ;;  %s4632_s5 = sld [smem:[#allocation9 + $0x34]]  ;;  %vm4367_vm7 = vcmask 911104  }
  0x2f   :  { %s4639_s6 = sld [smem:[#allocation9 + $0x35]]  ;;  %s4646_s0 = sld [smem:[#allocation9 + $0x36]] }
  0x30   :  { %s4653_s7 = sld [smem:[#allocation9 + $0x37]]  ;;  %s4570_s1 = sld [smem:[#allocation9 + $0x8]] }
  0x31   :  { %s4571_s8 = sld [smem:[#allocation9 + $0xf]] }
  0xb2   :  { %v74_v13 = vpop.xlane.xlu0 %73  ;;  %v51_v14 = vpop.xlane.xlu1 %50 }
  0xb3   :  { %v78_v16 = vmul.f32 0.00390625, %v74_v13  ;;  %v62_v19 = vrot.slane %v51_v14, %v61_v15 }
  0xb5   :  { %v85_v22 = vrot.slane %v78_v16, %v61_v15 }
  0xb6   :  { %v77_v17 = vpop.xlane.xlu0 %76  ;;  %v54_v18 = vpop.xlane.xlu1 %53 }
  0xb7   :  { %v79_v20 = vmul.f32 0.00390625, %v77_v17  ;;  %v66_v21 = vrot.slane %v54_v18, %v61_v15 }
  0xb9   :  { %v89_v23 = vrot.slane %v79_v20, %v61_v15  ;;  %v68_v24 = vsel %vm67_vm1, %v66_v21, %v62_v19 }
  0xba   :  { %71 = vst.msk [vmem:[#allocation2] sm:$0x3] %vm70_vm2, %v68_v24 }
  0xbb   :  { %v90_v25 = vsel %vm67_vm1, %v89_v23, %v85_v22 }
  0xbc   :  { %92 = vst.msk [vmem:[#allocation2 + $0x2] sm:$0x3] %vm70_vm2, %v90_v25  ;;  %vm4275_vm2 = vcmask 123904  }
  0xc3   :  { %v93_v26 = vld [vmem:[#allocation2] sm:$0xf] }
  0xc4   :  { %4672 = vmatmul.mubr.msk.f32.vlgmr.msra.gmra.mrb[0].mxu0 %vm95_vm3, %v93_v26  ;;  %vm4287_vm3 = vcmask 255104  }
 0x197   :  { %v165_v28 = vpop.f32.mrb[0].mxu0 }
 0x198   :  { %v169_v29 = vmax.f32 %v165_v28, 0.0  ;;  %v4673_v30 = vpop.f32.mrb[1].mxu0 }
 0x19a   :  { %4677 = vmatmul.mubr.msk.f32.vlgmr.msra.gmra.mrb[0].mxu1 %vm171_vm5, %v169_v29  ;;  %vm4341_vm5 = vcmask 648704  }
 0x26d   :  { %v245_v31 = vpop.f32.mrb[0].mxu1 }
 0x26e   :  { %v250_v32 = vrot.slane %v245_v31, 2  ;;  %v4678_v33 = vpop.f32.mrb[1].mxu1 }
 0x270   :  { %v252_v34 = vadd.f32 %v250_v32, %v245_v31 }
 0x272   :  { %v4562_v35 = vmul.f32 -1.442695, %v252_v34 }
 0x274   :  { %4707 = vpow2.f32 %v4562_v35 }
 0x27e   :  { %v4708_v36 = vpop.eup %4707 }
 0x27f   :  { %v256_v37 = vadd.f32 1.0, %v4708_v36 }
 0x281   :  { %4709 = vrcp.f32 %v256_v37 }
 0x28b   :  { %v4710_v40 = vpop.eup %4709 }
 0x28c   :  { %v269_v41 = vrot.slane %v4710_v40, %v4921_v38  ;;  %v262_v42 = vrot.slane %v4710_v40, %v4924_v39 }
 0x28e   :  { %271 = vbcast.lane.b32.xlu1 %v269_v41, 256  ;;  %264 = vbcast.lane.b32.xlu0 %v262_v42, 256 }
 0x300   :  { %v272_v43 = vpop.permute.xlu1 %271  ;;  %v265_v44 = vpop.permute.xlu0 %264 }
 0x301   :  { %v4929_v45 = vmul.f32 %v272_v43, %v4892_v2  ;;  %v4932_v46 = vmul.f32 %v265_v44, %v4888_v0  ;;  %v4951_v59 = vmul.f32 %v265_v44, %v4890_v1  ;;  %v4959_v61 = vmul.f32 %v272_v43, %v4898_v5 }
 0x303   :  { %9720 = vst [vmem:[#allocation17_spill] sm:$0xff] %v4929_v45  ;;  %9721 = vst [vmem:[#allocation18_spill] sm:$0xff] %v4932_v46  ;;  %v289_v47 = vrot.slane %v4929_v45, 4  ;;  %v277_v48 = vrot.slane %v4932_v46, 4  ;;  %v283_v60 = vrot.slane %v4951_v59, 4  ;;  %v295_v63 = vrot.slane %v4959_v61, 4 }
 0x304   :  { %9722 = vst [vmem:[#allocation19_spill] sm:$0xff] %v4951_v59  ;;  %9723 = vst [vmem:[#allocation20_spill] sm:$0xff] %v4959_v61 }
 0x305   :  { %v290_v49 = vmax.f32 %v4929_v45, %v289_v47  ;;  %v278_v50 = vmax.f32 %v4932_v46, %v277_v48  ;;  %v284_v62 = vmax.f32 %v4951_v59, %v283_v60  ;;  %v296_v1 = vmax.f32 %v4959_v61, %v295_v63 }
 0x306   :  { %v302_v10 = vadd.f32 %v277_v48, %v4932_v46  ;;  %v314_v13 = vadd.f32 %v289_v47, %v4929_v45  ;;  %v308_v22 = vadd.f32 %v283_v60, %v4951_v59  ;;  %v320_v24 = vadd.f32 %v295_v63, %v4959_v61 }
 0x307   :  { %v291_v51 = vrot.slane %v290_v49, 2  ;;  %v279_v52 = vrot.slane %v278_v50, 2  ;;  %v285_v0 = vrot.slane %v284_v62, 2  ;;  %v297_v3 = vrot.slane %v296_v1, 2 }
 0x308   :  { %v303_v11 = vrot.slane %v302_v10, 2  ;;  %v315_v14 = vrot.slane %v314_v13, 2  ;;  %v309_v23 = vrot.slane %v308_v22, 2  ;;  %v321_v26 = vrot.slane %v320_v24, 2 }
 0x309   :  { %v292_v53 = vmax.f32 %v290_v49, %v291_v51  ;;  %v280_v54 = vmax.f32 %v278_v50, %v279_v52  ;;  %v286_v2 = vmax.f32 %v284_v62, %v285_v0  ;;  %v298_v5 = vmax.f32 %v296_v1, %v297_v3 }
 0x30a   :  { %v304_v9 = vadd.f32 %v303_v11, %v302_v10  ;;  %v316_v16 = vadd.f32 %v315_v14, %v314_v13  ;;  %v310_v25 = vadd.f32 %v309_v23, %v308_v22  ;;  %v322_v28 = vadd.f32 %v321_v26, %v320_v24 }
 0x30b   :  { %v281_v55 = vrot.slane %v280_v54, 1  ;;  %v293_v56 = vrot.slane %v292_v53, 1  ;;  %v287_v4 = vrot.slane %v286_v2, 1  ;;  %v299_v7 = vrot.slane %v298_v5, 1 }
 0x30c   :  { %v305_v15 = vrot.slane %v304_v9, 1  ;;  %v317_v18 = vrot.slane %v316_v16, 1  ;;  %v311_v27 = vrot.slane %v310_v25, 1  ;;  %v323_v30 = vrot.slane %v322_v28, 1 }
 0x30d   :  { %v282_v57 = vmax.f32 %v280_v54, %v281_v55  ;;  %v294_v58 = vmax.f32 %v292_v53, %v293_v56  ;;  %v288_v6 = vmax.f32 %v286_v2, %v287_v4  ;;  %v300_v8 = vmax.f32 %v298_v5, %v299_v7 }
 0x30e   :  { %v306_v17 = vadd.f32 %v305_v15, %v304_v9  ;;  %v318_v20 = vadd.f32 %v317_v18, %v316_v16  ;;  %v312_v29 = vadd.f32 %v311_v27, %v310_v25  ;;  %v324_v32 = vadd.f32 %v323_v30, %v322_v28 }
 0x30f   :  { %354 = vrot.lane.b32.xlu0 %v282_v57, %s4823_s2  ;;  %345 = vrot.lane.b32.xlu1 %v282_v57, %s4824_s9  ;;  %v5050_v48 = vstv %s4569_s16  ;;  %v5067_v60 = vstv %s4576_s17  ;;  %s4581_s16 = sld [smem:[#allocation9 + $0x25]]  ;;  %s4582_s17 = sld [smem:[#allocation9 + $0x2c]] }
 0x310   :  { %v325_v19 = vmul.f32 0.125, %v306_v17  ;;  %v327_v21 = vmul.f32 0.125, %v318_v20  ;;  %v326_v31 = vmul.f32 0.125, %v312_v29  ;;  %v328_v33 = vmul.f32 0.125, %v324_v32 }
 0x311   :  { %v5079_v4 = vstv %s4583_s19  ;;  %v5091_v13 = vstv %s4590_s21  ;;  %v5124_v30 = vstv %s4604_s25  ;;  %s4584_s19 = sld [smem:[#allocation9 + $0xa]]  ;;  %s4585_s21 = sld [smem:[#allocation9 + $0x11]] }
 0x312   :  { %s4587_s25 = sld [smem:[#allocation9 + $0x1f]] }
 0x313   :  { %362 = vrot.lane.b32.xlu0 %v282_v57, %s4825_s10  ;;  %347 = vrot.lane.b32.xlu1 %v294_v58, %s4824_s9 }
 0x317   :  { %370 = vrot.lane.b32.xlu0 %v282_v57, %s4826_s11  ;;  %356 = vrot.lane.b32.xlu1 %v294_v58, %s4823_s2  ;;  %v5713_v38 = vstv %s4584_s19  ;;  %v5755_v12 = vstv %s4585_s21  ;;  %s6647_s19 = sld [smem:[#allocation9 + $0x29]]  ;;  %s6691_s21 = sld [smem:[#allocation9]] }
 0x31b   :  { %378 = vrot.lane.b32.xlu0 %v282_v57, %s4827_s12  ;;  %364 = vrot.lane.b32.xlu1 %v294_v58, %s4825_s10 }
 0x31f   :  { %386 = vrot.lane.b32.xlu0 %v282_v57, %s4828_s13  ;;  %372 = vrot.lane.b32.xlu1 %v294_v58, %s4826_s11 }
 0x323   :  { %394 = vrot.lane.b32.xlu0 %v282_v57, %s4829_s14  ;;  %380 = vrot.lane.b32.xlu1 %v294_v58, %s4827_s12 }
 0x327   :  { %402 = vrot.lane.b32.xlu0 %v282_v57, %s4830_s15  ;;  %388 = vrot.lane.b32.xlu1 %v294_v58, %s4828_s13 }
 0x32b   :  { %412 = vrot.lane.b32.xlu0 %v288_v6, %s4824_s9  ;;  %396 = vrot.lane.b32.xlu1 %v294_v58, %s4829_s14 }
 0x32f   :  { %420 = vrot.lane.b32.xlu0 %v288_v6, %s4823_s2  ;;  %404 = vrot.lane.b32.xlu1 %v294_v58, %s4830_s15 }
 0x333   :  { %428 = vrot.lane.b32.xlu0 %v288_v6, %s4825_s10  ;;  %414 = vrot.lane.b32.xlu1 %v300_v8, %s4824_s9 }
 0x337   :  { %436 = vrot.lane.b32.xlu0 %v288_v6, %s4826_s11  ;;  %422 = vrot.lane.b32.xlu1 %v300_v8, %s4823_s2 }
 0x33b   :  { %444 = vrot.lane.b32.xlu0 %v288_v6, %s4827_s12  ;;  %430 = vrot.lane.b32.xlu1 %v300_v8, %s4825_s10 }
 0x33f   :  { %452 = vrot.lane.b32.xlu0 %v288_v6, %s4828_s13  ;;  %438 = vrot.lane.b32.xlu1 %v300_v8, %s4826_s11 }
 0x343   :  { %460 = vrot.lane.b32.xlu0 %v288_v6, %s4829_s14  ;;  %446 = vrot.lane.b32.xlu1 %v300_v8, %s4827_s12 }
 0x347   :  { %468 = vrot.lane.b32.xlu0 %v288_v6, %s4830_s15  ;;  %454 = vrot.lane.b32.xlu1 %v300_v8, %s4828_s13 }
 0x34b   :  { %478 = vrot.lane.b32.xlu0 %v325_v19, %s4824_s9  ;;  %462 = vrot.lane.b32.xlu1 %v300_v8, %s4829_s14 }
 0x34f   :  { %487 = vrot.lane.b32.xlu0 %v325_v19, %s4823_s2  ;;  %470 = vrot.lane.b32.xlu1 %v300_v8, %s4830_s15 }
 0x353   :  { %495 = vrot.lane.b32.xlu0 %v325_v19, %s4825_s10  ;;  %480 = vrot.lane.b32.xlu1 %v327_v21, %s4824_s9 }
 0x357   :  { %503 = vrot.lane.b32.xlu0 %v325_v19, %s4826_s11  ;;  %489 = vrot.lane.b32.xlu1 %v327_v21, %s4823_s2 }
 0x35b   :  { %511 = vrot.lane.b32.xlu0 %v325_v19, %s4827_s12  ;;  %497 = vrot.lane.b32.xlu1 %v327_v21, %s4825_s10 }
 0x35f   :  { %519 = vrot.lane.b32.xlu0 %v325_v19, %s4828_s13  ;;  %505 = vrot.lane.b32.xlu1 %v327_v21, %s4826_s11 }
 0x363   :  { %527 = vrot.lane.b32.xlu0 %v325_v19, %s4829_s14  ;;  %513 = vrot.lane.b32.xlu1 %v327_v21, %s4827_s12 }
 0x367   :  { %535 = vrot.lane.b32.xlu0 %v325_v19, %s4830_s15  ;;  %521 = vrot.lane.b32.xlu1 %v327_v21, %s4828_s13 }
 0x36b   :  { %545 = vrot.lane.b32.xlu0 %v326_v31, %s4824_s9  ;;  %529 = vrot.lane.b32.xlu1 %v327_v21, %s4829_s14 }
 0x36f   :  { %553 = vrot.lane.b32.xlu0 %v326_v31, %s4823_s2  ;;  %537 = vrot.lane.b32.xlu1 %v327_v21, %s4830_s15  ;;  %v5107_v21 = vstv %s4597_s23  ;;  %s4586_s23 = sld [smem:[#allocation9 + $0x18]] }
 0x373   :  { %561 = vrot.lane.b32.xlu0 %v326_v31, %s4825_s10  ;;  %547 = vrot.lane.b32.xlu1 %v328_v33, %s4824_s9  ;;  %s4573_s9 = sld [smem:[#allocation9 + $0x1d]] }
 0x377   :  { %569 = vrot.lane.b32.xlu0 %v326_v31, %s4826_s11  ;;  %555 = vrot.lane.b32.xlu1 %v328_v33, %s4823_s2  ;;  %s4572_s2 = sld [smem:[#allocation9 + $0x16]] }
 0x37b   :  { %577 = vrot.lane.b32.xlu0 %v326_v31, %s4827_s12  ;;  %563 = vrot.lane.b32.xlu1 %v328_v33, %s4825_s10  ;;  %s4574_s10 = sld [smem:[#allocation9 + $0x24]] }
 0x37f   :  { %585 = vrot.lane.b32.xlu0 %v326_v31, %s4828_s13  ;;  %571 = vrot.lane.b32.xlu1 %v328_v33, %s4826_s11  ;;  %s4575_s11 = sld [smem:[#allocation9 + $0x2b]] }
 0x381   :  { %v355_v34 = vpop.permute.xlu0 %354  ;;  %v346_v35 = vpop.permute.xlu1 %345 }
 0x382   :  { %360 = vst.msk [vmem:[#allocation3 + $0x4] sm:$0x1] %vm351_vm8, %v355_v34  ;;  %352 = vst.msk [vmem:[#allocation3 + $0x3] sm:$0x1] %vm351_vm8, %v346_v35 }
 0x383   :  { %593 = vrot.lane.b32.xlu0 %v326_v31, %s4829_s14  ;;  %579 = vrot.lane.b32.xlu1 %v328_v33, %s4827_s12  ;;  %s4577_s12 = sld [smem:[#allocation9 + $0x9]] }
 0x385   :  { %v363_v36 = vpop.permute.xlu0 %362  ;;  %v348_v37 = vpop.permute.xlu1 %347 }
 0x386   :  { %368 = vst.msk [vmem:[#allocation3 + $0x5] sm:$0x1] %vm351_vm8, %v363_v36  ;;  %353 = vst.msk [vmem:[#allocation3 + $0x1b] sm:$0x1] %vm351_vm8, %v348_v37 }
 0x387   :  { %601 = vrot.lane.b32.xlu0 %v326_v31, %s4830_s15  ;;  %587 = vrot.lane.b32.xlu1 %v328_v33, %s4828_s13  ;;  %s4578_s13 = sld [smem:[#allocation9 + $0x10]] }
 0x389   :  { %v371_v40 = vpop.permute.xlu0 %370  ;;  %v357_v41 = vpop.permute.xlu1 %356 }
 0x38a   :  { %376 = vst.msk [vmem:[#allocation3 + $0x6] sm:$0x1] %vm351_vm8, %v371_v40  ;;  %361 = vst.msk [vmem:[#allocation3 + $0x1c] sm:$0x1] %vm351_vm8, %v357_v41 }
 0x38b   :  { %595 = vrot.lane.b32.xlu1 %v328_v33, %s4829_s14  ;;  %s4579_s14 = sld [smem:[#allocation9 + $0x17]] }
 0x38d   :  { %v379_v42 = vpop.permute.xlu0 %378  ;;  %v365_v43 = vpop.permute.xlu1 %364 }
 0x38e   :  { %384 = vst.msk [vmem:[#allocation3 + $0x7] sm:$0x1] %vm351_vm8, %v379_v42  ;;  %369 = vst.msk [vmem:[#allocation3 + $0x1d] sm:$0x1] %vm351_vm8, %v365_v43 }
 0x38f   :  { %603 = vrot.lane.b32.xlu1 %v328_v33, %s4830_s15  ;;  %s4580_s15 = sld [smem:[#allocation9 + $0x1e]] }
 0x391   :  { %v387_v44 = vpop.permute.xlu0 %386  ;;  %v373_v47 = vpop.permute.xlu1 %372 }
 0x392   :  { %392 = vst.msk [vmem:[#allocation3 + $0x8] sm:$0x1] %vm351_vm8, %v387_v44  ;;  %377 = vst.msk [vmem:[#allocation3 + $0x1e] sm:$0x1] %vm351_vm8, %v373_v47 }
 0x395   :  { %v5052_v49 = vld [vmem:[#allocation3] sm:$0xff]  ;;  %v395_v50 = vpop.permute.xlu0 %394  ;;  %v381_v51 = vpop.permute.xlu1 %380 }
 0x396   :  { %400 = vst.msk [vmem:[#allocation3 + $0x9] sm:$0x1] %vm351_vm8, %v395_v50  ;;  %385 = vst.msk [vmem:[#allocation3 + $0x1f] sm:$0x1] %vm351_vm8, %v381_v51  ;;  %v824_v52 = vmul.f32 %v5050_v48, %v5052_v49  ;;  %v1090_v0 = vmul.f32 %v5067_v60, %v5052_v49  ;;  %v1356_v7 = vmul.f32 %v5079_v4, %v5052_v49 }
 0x397   :  { %v1622_v15 = vmul.f32 %v5091_v13, %v5052_v49  ;;  %v1888_v24 = vmul.f32 %v5107_v21, %v5052_v49  ;;  %v2154_v33 = vmul.f32 %v5124_v30, %v5052_v49 }
 0x398   :  { %832 = vrot.lane.b32.xlu0 %v824_v52, %s4831_s18 }
 0x399   :  { %v403_v53 = vpop.permute.xlu0 %402  ;;  %v389_v54 = vpop.permute.xlu1 %388 }
 0x39a   :  { %408 = vst.msk [vmem:[#allocation3 + $0xa] sm:$0x1] %vm351_vm8, %v403_v53  ;;  %393 = vst.msk [vmem:[#allocation3 + $0x20] sm:$0x1] %vm351_vm8, %v389_v54  ;;  %v5158_v53 = vstv %s4618_s29  ;;  %s4588_s29 = sld [smem:[#allocation9 + $0x26]] }
 0x39d   :  { %v5061_v55 = vld [vmem:[#allocation3 + $0x18] sm:$0xff]  ;;  %v413_v56 = vpop.permute.xlu0 %412  ;;  %v397_v57 = vpop.permute.xlu1 %396 }
 0x39e   :  { %418 = vst.msk [vmem:[#allocation3 + $0xb] sm:$0x1] %vm351_vm8, %v413_v56  ;;  %401 = vst.msk [vmem:[#allocation3 + $0x21] sm:$0x1] %vm351_vm8, %v397_v57  ;;  %v826_v58 = vmul.f32 %v5050_v48, %v5061_v55  ;;  %v1092_v3 = vmul.f32 %v5067_v60, %v5061_v55  ;;  %v1358_v11 = vmul.f32 %v5079_v4, %v5061_v55 }
 0x39f   :  { %v1624_v20 = vmul.f32 %v5091_v13, %v5061_v55  ;;  %v1890_v28 = vmul.f32 %v5107_v21, %v5061_v55  ;;  %v2156_v37 = vmul.f32 %v5124_v30, %v5061_v55 }
 0x3a0   :  { %836 = vrot.lane.b32.xlu0 %v826_v58, %s4831_s18 }
 0x3a1   :  { %v421_v62 = vpop.permute.xlu0 %420  ;;  %v405_v63 = vpop.permute.xlu1 %404 }
 0x3a2   :  { %426 = vst.msk [vmem:[#allocation3 + $0xc] sm:$0x1] %vm351_vm8, %v421_v62  ;;  %409 = vst.msk [vmem:[#allocation3 + $0x22] sm:$0x1] %vm351_vm8, %v405_v63 }
 0x3a4   :  { %1098 = vrot.lane.b32.xlu0 %v1090_v0, %s4832_s20 }
 0x3a5   :  { %v429_v1 = vpop.permute.xlu0 %428  ;;  %v415_v2 = vpop.permute.xlu1 %414 }
 0x3a6   :  { %434 = vst.msk [vmem:[#allocation3 + $0xd] sm:$0x1] %vm351_vm8, %v429_v1  ;;  %419 = vst.msk [vmem:[#allocation3 + $0x23] sm:$0x1] %vm351_vm8, %v415_v2 }
 0x3a8   :  { %1102 = vrot.lane.b32.xlu0 %v1092_v3, %s4832_s20 }
 0x3a9   :  { %v437_v5 = vpop.permute.xlu0 %436  ;;  %v423_v6 = vpop.permute.xlu1 %422 }
 0x3aa   :  { %442 = vst.msk [vmem:[#allocation3 + $0xe] sm:$0x1] %vm351_vm8, %v437_v5  ;;  %427 = vst.msk [vmem:[#allocation3 + $0x24] sm:$0x1] %vm351_vm8, %v423_v6  ;;  %v5184_v6 = vstv %s4625_s30  ;;  %s4589_s30 = sld [smem:[#allocation9 + $0x2d]] }
 0x3ac   :  { %1364 = vrot.lane.b32.xlu0 %v1356_v7, %s4833_s22 }
 0x3ad   :  { %v445_v8 = vpop.permute.xlu0 %444  ;;  %v431_v10 = vpop.permute.xlu1 %430 }
 0x3ae   :  { %450 = vst.msk [vmem:[#allocation3 + $0xf] sm:$0x1] %vm351_vm8, %v445_v8  ;;  %435 = vst.msk [vmem:[#allocation3 + $0x25] sm:$0x1] %vm351_vm8, %v431_v10 }
 0x3b0   :  { %1368 = vrot.lane.b32.xlu0 %v1358_v11, %s4833_s22 }
 0x3b1   :  { %v453_v9 = vpop.permute.xlu0 %452  ;;  %v439_v14 = vpop.permute.xlu1 %438 }
 0x3b2   :  { %458 = vst.msk [vmem:[#allocation3 + $0x10] sm:$0x1] %vm351_vm8, %v453_v9  ;;  %443 = vst.msk [vmem:[#allocation3 + $0x26] sm:$0x1] %vm351_vm8, %v439_v14 }
 0x3b4   :  { %1630 = vrot.lane.b32.xlu0 %v1622_v15, %s4834_s24 }
 0x3b5   :  { %v5099_v16 = vld [vmem:[#allocation3 + $0x8] sm:$0xff]  ;;  %v461_v17 = vpop.permute.xlu0 %460  ;;  %v447_v18 = vpop.permute.xlu1 %446 }
 0x3b6   :  { %466 = vst.msk [vmem:[#allocation3 + $0x11] sm:$0x1] %vm351_vm8, %v461_v17  ;;  %451 = vst.msk [vmem:[#allocation3 + $0x27] sm:$0x1] %vm351_vm8, %v447_v18  ;;  %v825_v19 = vmul.f32 %v5050_v48, %v5099_v16  ;;  %v1091_v34 = vmul.f32 %v5067_v60, %v5099_v16  ;;  %v1357_v43 = vmul.f32 %v5079_v4, %v5099_v16  ;;  %v5202_v17 = vstv %s4632_s5  ;;  %s4591_s5 = sld [smem:[#allocation9 + $0xb]] }
 0x3b7   :  { %v1623_v52 = vmul.f32 %v5091_v13, %v5099_v16  ;;  %v1889_v0 = vmul.f32 %v5107_v21, %v5099_v16  ;;  %v2155_v10 = vmul.f32 %v5124_v30, %v5099_v16 }
 0x3b8   :  { %834 = vrot.lane.b32.xlu1 %v825_v19, %s4831_s18  ;;  %1634 = vrot.lane.b32.xlu0 %v1624_v20, %s4834_s24 }
 0x3b9   :  { %v469_v22 = vpop.permute.xlu0 %468  ;;  %v455_v23 = vpop.permute.xlu1 %454 }
 0x3ba   :  { %474 = vst.msk [vmem:[#allocation3 + $0x12] sm:$0x1] %vm351_vm8, %v469_v22  ;;  %459 = vst.msk [vmem:[#allocation3 + $0x28] sm:$0x1] %vm351_vm8, %v455_v23 }
 0x3bc   :  { %1896 = vrot.lane.b32.xlu0 %v1888_v24, %s4835_s26 }
 0x3bd   :  { %v5116_v25 = vld [vmem:[#allocation3 + $0x20] sm:$0xff]  ;;  %v479_v26 = vpop.permute.xlu0 %478  ;;  %v463_v27 = vpop.permute.xlu1 %462 }
 0x3be   :  { %485 = vst.msk [vmem:[#allocation3 + $0x33] sm:$0x1] %vm351_vm8, %v479_v26  ;;  %467 = vst.msk [vmem:[#allocation3 + $0x29] sm:$0x1] %vm351_vm8, %v463_v27  ;;  %v827_v29 = vmul.f32 %v5050_v48, %v5116_v25  ;;  %v1093_v40 = vmul.f32 %v5067_v60, %v5116_v25  ;;  %v1359_v48 = vmul.f32 %v5079_v4, %v5116_v25  ;;  %v5216_v27 = vstv %s4639_s6  ;;  %s4592_s6 = sld [smem:[#allocation9 + $0x12]] }
 0x3bf   :  { %v1625_v60 = vmul.f32 %v5091_v13, %v5116_v25  ;;  %v1891_v4 = vmul.f32 %v5107_v21, %v5116_v25  ;;  %v2157_v14 = vmul.f32 %v5124_v30, %v5116_v25 }
 0x3c0   :  { %1900 = vrot.lane.b32.xlu0 %v1890_v28, %s4835_s26  ;;  %838 = vrot.lane.b32.xlu1 %v827_v29, %s4831_s18 }
 0x3c1   :  { %v488_v31 = vpop.permute.xlu0 %487  ;;  %v471_v32 = vpop.permute.xlu1 %470 }
 0x3c2   :  { %493 = vst.msk [vmem:[#allocation3 + $0x34] sm:$0x1] %vm351_vm8, %v488_v31  ;;  %475 = vst.msk [vmem:[#allocation3 + $0x2a] sm:$0x1] %vm351_vm8, %v471_v32 }
 0x3c4   :  { %2162 = vrot.lane.b32.xlu0 %v2154_v33, %s4836_s27  ;;  %1100 = vrot.lane.b32.xlu1 %v1091_v34, %s4832_s20 }
 0x3c5   :  { %v496_v35 = vpop.permute.xlu0 %495  ;;  %v481_v36 = vpop.permute.xlu1 %480 }
 0x3c6   :  { %501 = vst.msk [vmem:[#allocation3 + $0x35] sm:$0x1] %vm351_vm8, %v496_v35  ;;  %486 = vst.msk [vmem:[#allocation3 + $0x4b] sm:$0x1] %vm351_vm8, %v481_v36  ;;  %v5233_v36 = vstv %s4646_s0  ;;  %s4593_s0 = sld [smem:[#allocation9 + $0x19]] }
 0x3c8   :  { %2166 = vrot.lane.b32.xlu0 %v2156_v37, %s4836_s27  ;;  %1104 = vrot.lane.b32.xlu1 %v1093_v40, %s4832_s20 }
 0x3c9   :  { %v504_v41 = vpop.permute.xlu0 %503  ;;  %v490_v42 = vpop.permute.xlu1 %489 }
 0x3ca   :  { %509 = vst.msk [vmem:[#allocation3 + $0x36] sm:$0x1] %vm351_vm8, %v504_v41  ;;  %494 = vst.msk [vmem:[#allocation3 + $0x4c] sm:$0x1] %vm351_vm8, %v490_v42 }
 0x3cc   :  { %1366 = vrot.lane.b32.xlu1 %v1357_v43, %s4833_s22 }
 0x3cd   :  { %v512_v44 = vpop.permute.xlu0 %511  ;;  %v498_v47 = vpop.permute.xlu1 %497 }
 0x3ce   :  { %517 = vst.msk [vmem:[#allocation3 + $0x37] sm:$0x1] %vm351_vm8, %v512_v44  ;;  %502 = vst.msk [vmem:[#allocation3 + $0x4d] sm:$0x1] %vm351_vm8, %v498_v47  ;;  %v5249_v47 = vstv %s4653_s7  ;;  %s4594_s7 = sld [smem:[#allocation9 + $0x20]] }
 0x3d0   :  { %1370 = vrot.lane.b32.xlu1 %v1359_v48, %s4833_s22 }
 0x3d1   :  { %v520_v50 = vpop.permute.xlu0 %519  ;;  %v506_v51 = vpop.permute.xlu1 %505 }
 0x3d2   :  { %525 = vst.msk [vmem:[#allocation3 + $0x38] sm:$0x1] %vm351_vm8, %v520_v50  ;;  %510 = vst.msk [vmem:[#allocation3 + $0x4e] sm:$0x1] %vm351_vm8, %v506_v51  ;;  %v5256_v51 = vstv %s4570_s1  ;;  %s4595_s1 = sld [smem:[#allocation9 + $0x27]] }
 0x3d4   :  { %1632 = vrot.lane.b32.xlu1 %v1623_v52, %s4834_s24  ;;  %v5260_v52 = vmul.f32 %v5256_v51, %v5099_v16 }
 0x3d5   :  { %v5161_v54 = vld [vmem:[#allocation3 + $0x30] sm:$0xff]  ;;  %v528_v56 = vpop.permute.xlu0 %527  ;;  %v514_v57 = vpop.permute.xlu1 %513 }
 0x3d6   :  { %533 = vst.msk [vmem:[#allocation3 + $0x39] sm:$0x1] %vm351_vm8, %v528_v56  ;;  %518 = vst.msk [vmem:[#allocation3 + $0x4f] sm:$0x1] %vm351_vm8, %v514_v57  ;;  %v2628_v58 = vmul.f32 %v5158_v53, %v5161_v54  ;;  %v2894_v11 = vmul.f32 %v5184_v6, %v5161_v54  ;;  %v3160_v20 = vmul.f32 %v5202_v17, %v5161_v54 }
 0x3d7   :  { %v3426_v33 = vmul.f32 %v5216_v27, %v5161_v54  ;;  %v3692_v42 = vmul.f32 %v5233_v36, %v5161_v54  ;;  %v3958_v56 = vmul.f32 %v5249_v47, %v5161_v54 }
 0x3d8   :  { %2636 = vrot.lane.b32.xlu0 %v2628_v58, %s4831_s18  ;;  %1636 = vrot.lane.b32.xlu1 %v1625_v60, %s4834_s24  ;;  %v863_v58 = vrot.slane %v5260_v52, 1  ;;  %v5273_v60 = vmul.f32 %v5256_v51, %v5116_v25 }
 0x3d9   :  { %v536_v62 = vpop.permute.xlu0 %535  ;;  %v522_v63 = vpop.permute.xlu1 %521 }
 0x3da   :  { %541 = vst.msk [vmem:[#allocation3 + $0x3a] sm:$0x1] %vm351_vm8, %v536_v62  ;;  %526 = vst.msk [vmem:[#allocation3 + $0x50] sm:$0x1] %vm351_vm8, %v522_v63  ;;  %v853_v63 = vmul.f32 %v5256_v51, %v5061_v55 }
 0x3dc   :  { %1898 = vrot.lane.b32.xlu1 %v1889_v0, %s4835_s26  ;;  %v5281_v0 = vstv %s4571_s8  ;;  %s4596_s8 = sld [smem:[#allocation9 + $0x2e]] }
 0x3dd   :  { %v5176_v1 = vld [vmem:[#allocation3 + $0x48] sm:$0xff]  ;;  %v546_v2 = vpop.permute.xlu0 %545  ;;  %v530_v3 = vpop.permute.xlu1 %529 }
 0x3de   :  { %551 = vst.msk [vmem:[#allocation3 + $0x3b] sm:$0x1] %vm351_vm8, %v546_v2  ;;  %534 = vst.msk [vmem:[#allocation3 + $0x51] sm:$0x1] %vm351_vm8, %v530_v3  ;;  %v2630_v5 = vmul.f32 %v5158_v53, %v5176_v1  ;;  %v2896_v15 = vmul.f32 %v5184_v6, %v5176_v1  ;;  %v3162_v23 = vmul.f32 %v5202_v17, %v5176_v1  ;;  %v868_v2 = vrot.slane %v5273_v60, 1 }
 0x3df   :  { %v3428_v28 = vmul.f32 %v5216_v27, %v5176_v1  ;;  %v3694_v37 = vmul.f32 %v5233_v36, %v5176_v1  ;;  %v3960_v48 = vmul.f32 %v5249_v47, %v5176_v1  ;;  %v5289_v3 = vmul.f32 %v5281_v0, %v5099_v16 }
 0x3e0   :  { %1902 = vrot.lane.b32.xlu1 %v1891_v4, %s4835_s26  ;;  %2640 = vrot.lane.b32.xlu0 %v2630_v5, %s4831_s18  ;;  %v867_v4 = vrot.slane %v853_v63, 1  ;;  %v890_v5 = vmul.f32 %v5281_v0, %v5052_v49  ;;  %v5381_v63 = vstv %s4574_s10  ;;  %s4600_s10 = sld [smem:[#allocation9 + $0x1a]] }
 0x3e1   :  { %v554_v7 = vpop.permute.xlu0 %553  ;;  %v538_v8 = vpop.permute.xlu1 %537 }
 0x3e2   :  { %559 = vst.msk [vmem:[#allocation3 + $0x3c] sm:$0x1] %vm351_vm8, %v554_v7  ;;  %542 = vst.msk [vmem:[#allocation3 + $0x52] sm:$0x1] %vm351_vm8, %v538_v8  ;;  %v869_v8 = vsel %vm639_vm9, %v867_v4, %v868_v2 }
 0x3e4   :  { %2164 = vrot.lane.b32.xlu1 %v2155_v10, %s4836_s27  ;;  %2902 = vrot.lane.b32.xlu0 %v2894_v11, %s4832_s20  ;;  %v903_v10 = vrot.slane %v5289_v3, 2  ;;  %v5305_v11 = vmul.f32 %v5281_v0, %v5116_v25 }
 0x3e5   :  { %v562_v13 = vpop.permute.xlu0 %561  ;;  %v548_v9 = vpop.permute.xlu1 %547 }
 0x3e6   :  { %567 = vst.msk [vmem:[#allocation3 + $0x3d] sm:$0x1] %vm351_vm8, %v562_v13  ;;  %552 = vst.msk [vmem:[#allocation3 + $0x53] sm:$0x1] %vm351_vm8, %v548_v9  ;;  %v902_v13 = vrot.slane %v890_v5, 2  ;;  %v893_v9 = vmul.f32 %v5281_v0, %v5061_v55 }
 0x3e8   :  { %2168 = vrot.lane.b32.xlu1 %v2157_v14, %s4836_s27  ;;  %2906 = vrot.lane.b32.xlu0 %v2896_v15, %s4832_s20 }
 0x3e9   :  { %v570_v18 = vpop.permute.xlu0 %569  ;;  %v556_v19 = vpop.permute.xlu1 %555 }
 0x3ea   :  { %575 = vst.msk [vmem:[#allocation3 + $0x3e] sm:$0x1] %vm351_vm8, %v570_v18  ;;  %560 = vst.msk [vmem:[#allocation3 + $0x54] sm:$0x1] %vm351_vm8, %v556_v19  ;;  %v904_v18 = vsel %vm672_vm10, %v902_v13, %v903_v10  ;;  %v908_v19 = vrot.slane %v5305_v11, 2 }
 0x3ec   :  { %3168 = vrot.lane.b32.xlu0 %v3160_v20, %s4833_s22 }
 0x3ed   :  { %v578_v21 = vpop.permute.xlu0 %577  ;;  %v564_v22 = vpop.permute.xlu1 %563 }
 0x3ee   :  { %583 = vst.msk [vmem:[#allocation3 + $0x3f] sm:$0x1] %vm351_vm8, %v578_v21  ;;  %568 = vst.msk [vmem:[#allocation3 + $0x55] sm:$0x1] %vm351_vm8, %v564_v22  ;;  %v907_v21 = vrot.slane %v893_v9, 2 }
 0x3f0   :  { %3172 = vrot.lane.b32.xlu0 %v3162_v23, %s4833_s22 }
 0x3f1   :  { %v586_v24 = vpop.permute.xlu0 %585  ;;  %v572_v26 = vpop.permute.xlu1 %571 }
 0x3f2   :  { %591 = vst.msk [vmem:[#allocation3 + $0x40] sm:$0x1] %vm351_vm8, %v586_v24  ;;  %576 = vst.msk [vmem:[#allocation3 + $0x56] sm:$0x1] %vm351_vm8, %v572_v26  ;;  %v909_v26 = vsel %vm672_vm10, %v907_v21, %v908_v19  ;;  %v5408_v21 = vmul.f32 %v5381_v63, %v5116_v25 }
 0x3f4   :  { %3438 = vrot.lane.b32.xlu0 %v3428_v28, %s4834_s24 }
 0x3f5   :  { %v5223_v29 = vld [vmem:[#allocation3 + $0x38] sm:$0xff]  ;;  %v594_v30 = vpop.permute.xlu0 %593  ;;  %v580_v31 = vpop.permute.xlu1 %579 }
 0x3f6   :  { %599 = vst.msk [vmem:[#allocation3 + $0x41] sm:$0x1] %vm351_vm8, %v594_v30  ;;  %584 = vst.msk [vmem:[#allocation3 + $0x57] sm:$0x1] %vm351_vm8, %v580_v31  ;;  %v2629_v32 = vmul.f32 %v5158_v53, %v5223_v29  ;;  %v2895_v50 = vmul.f32 %v5184_v6, %v5223_v29  ;;  %v3161_v54 = vmul.f32 %v5202_v17, %v5223_v29 }
 0x3f7   :  { %v3427_v24 = vmul.f32 %v5216_v27, %v5223_v29 }
 0x3f8   :  { %2638 = vrot.lane.b32.xlu1 %v2629_v32, %s4831_s18  ;;  %3434 = vrot.lane.b32.xlu0 %v3426_v33, %s4834_s24 }
 0x3f9   :  { %v602_v34 = vpop.permute.xlu0 %601  ;;  %v588_v35 = vpop.permute.xlu1 %587 }
 0x3fa   :  { %607 = vst.msk [vmem:[#allocation3 + $0x42] sm:$0x1] %vm351_vm8, %v602_v34  ;;  %592 = vst.msk [vmem:[#allocation3 + $0x58] sm:$0x1] %vm351_vm8, %v588_v35  ;;  %v5349_v34 = vstv %s4573_s9  ;;  %s4599_s9 = sld [smem:[#allocation9 + $0x13]] }
 0x3fc   :  { %3704 = vrot.lane.b32.xlu0 %v3694_v37, %s4835_s26 }
 0x3fd   :  { %v5240_v40 = vld [vmem:[#allocation3 + $0x50] sm:$0xff]  ;;  %v596_v41 = vpop.permute.xlu1 %595 }
 0x3fe   :  { %600 = vst.msk [vmem:[#allocation3 + $0x59] sm:$0x1] %vm351_vm8, %v596_v41  ;;  %v2631_v43 = vmul.f32 %v5158_v53, %v5240_v40  ;;  %v850_v53 = vmul.f32 %v5256_v51, %v5052_v49  ;;  %v2897_v57 = vmul.f32 %v5184_v6, %v5240_v40  ;;  %v3163_v7 = vmul.f32 %v5202_v17, %v5240_v40 }
 0x3ff   :  { %v3429_v15 = vmul.f32 %v5216_v27, %v5240_v40  ;;  %v5315_v17 = vstv %s4572_s2  ;;  %v3695_v33 = vmul.f32 %v5233_v36, %v5240_v40  ;;  %v5357_v41 = vmul.f32 %v5349_v34, %v5099_v16  ;;  %s4598_s2 = sld [smem:[#allocation9 + $0xc]] }
 0x400   :  { %3700 = vrot.lane.b32.xlu0 %v3692_v42, %s4835_s26  ;;  %2642 = vrot.lane.b32.xlu1 %v2631_v43, %s4831_s18  ;;  %v862_v62 = vrot.slane %v850_v53, 1  ;;  %v5323_v20 = vmul.f32 %v5315_v17, %v5099_v16  ;;  %v930_v22 = vmul.f32 %v5315_v17, %v5052_v49  ;;  %v5339_v30 = vmul.f32 %v5315_v17, %v5116_v25 }
 0x401   :  { %v604_v44 = vpop.permute.xlu1 %603  ;;  %v933_v32 = vmul.f32 %v5315_v17, %v5061_v55  ;;  %v970_v43 = vmul.f32 %v5349_v34, %v5052_v49  ;;  %v5371_v53 = vmul.f32 %v5349_v34, %v5116_v25 }
 0x402   :  { %608 = vst.msk [vmem:[#allocation3 + $0x5a] sm:$0x1] %vm351_vm8, %v604_v44  ;;  %v864_v1 = vsel %vm639_vm9, %v862_v62, %v863_v58  ;;  %v943_v28 = vrot.slane %v5323_v20, 3  ;;  %v942_v31 = vrot.slane %v930_v22, 3  ;;  %v948_v37 = vrot.slane %v5339_v30, 3 }
 0x403   :  { %v947_v42 = vrot.slane %v933_v32, 3  ;;  %v3693_v44 = vmul.f32 %v5233_v36, %v5223_v29  ;;  %v982_v36 = vrot.slane %v970_v43, 4  ;;  %v973_v62 = vmul.f32 %v5349_v34, %v5061_v55 }
 0x404   :  { %3970 = vrot.lane.b32.xlu0 %v3960_v48, %s4836_s27  ;;  %2904 = vrot.lane.b32.xlu1 %v2895_v50, %s4832_s20  ;;  %v944_v35 = vsel %vm705_vm11, %v942_v31, %v943_v28  ;;  %v983_v50 = vrot.slane %v5357_v41, 4  ;;  %v988_v5 = vrot.slane %v5371_v53, 4  ;;  %v1028_v32 = vrot.slane %v5408_v21, 5 }
 0x405   :  { %v949_v48 = vsel %vm705_vm11, %v947_v42, %v948_v37  ;;  %v987_v13 = vrot.slane %v973_v62, 4  ;;  %v5545_v30 = vstv %s4579_s14  ;;  %s4605_s14 = sld [smem:[#allocation9 + $0xd]]  ;;  %vm4379_vm8 = vcmask 1042304  }
 0x406   :  { %v984_v4 = vsel %vm738_vm12, %v982_v36, %v983_v50 }
 0x407   :  { %v989_v22 = vsel %vm738_vm12, %v987_v13, %v988_v5 }
 0x408   :  { %3966 = vrot.lane.b32.xlu0 %v3958_v56, %s4836_s27  ;;  %2908 = vrot.lane.b32.xlu1 %v2897_v57, %s4832_s20  ;;  %v5373_v56 = vld [vmem:[#allocation3 + $0x10] sm:$0x3f] }
 0x409   :  { %v892_v43 = vmul.f32 %v5281_v0, %v5373_v56 }
 0x40a   :  { %v5295_v6 = vpop.permute.xlu0 %832 }
 0x40b   :  { %9724 = vst [vmem:[#allocation21_spill] sm:$0xff] %v5295_v6 }
 0x40c   :  { %872 = vrot.lane.b32.xlu0 %v864_v1, %s4831_s18  ;;  %3170 = vrot.lane.b32.xlu1 %v3161_v54, %s4833_s22  ;;  %v3961_v54 = vmul.f32 %v5249_v47, %v5240_v40  ;;  %v5387_v1 = vmul.f32 %v5381_v63, %v5099_v16  ;;  %v1010_v40 = vmul.f32 %v5381_v63, %v5052_v49 }
 0x410   :  { %876 = vrot.lane.b32.xlu0 %v869_v8, %s4831_s18  ;;  %3174 = vrot.lane.b32.xlu1 %v3163_v7, %s4833_s22  ;;  %v852_v7 = vmul.f32 %v5256_v51, %v5373_v56  ;;  %v5395_v8 = vld [vmem:[#allocation3 + $0x28] sm:$0x3f] }
 0x412   :  { %v5311_v14 = vpop.permute.xlu0 %836 }
 0x413   :  { %9725 = vst [vmem:[#allocation22_spill] sm:$0xff] %v5311_v14 }
 0x414   :  { %912 = vrot.lane.b32.xlu0 %v904_v18, %s4831_s18  ;;  %3440 = vrot.lane.b32.xlu1 %v3429_v15, %s4834_s24  ;;  %v3959_v15 = vmul.f32 %v5249_v47, %v5223_v29  ;;  %v1023_v18 = vrot.slane %v5387_v1, 5  ;;  %v1022_v29 = vrot.slane %v1010_v40, 5  ;;  %v1013_v47 = vmul.f32 %v5381_v63, %v5061_v55 }
 0x415   :  { %v895_v40 = vmul.f32 %v5281_v0, %v5395_v8 }
 0x416   :  { %v5329_v23 = vpop.permute.xlu0 %1098  ;;  %v1024_v31 = vsel %vm771_vm13, %v1022_v29, %v1023_v18 }
 0x417   :  { %9726 = vst [vmem:[#allocation23_spill] sm:$0xff] %v5329_v23 }
 0x418   :  { %916 = vrot.lane.b32.xlu0 %v909_v26, %s4831_s18  ;;  %3436 = vrot.lane.b32.xlu1 %v3427_v24, %s4834_s24  ;;  %v865_v24 = vrot.slane %v852_v7, 1  ;;  %v855_v26 = vmul.f32 %v5256_v51, %v5395_v8  ;;  %v905_v7 = vrot.slane %v892_v43, 2 }
 0x41a   :  { %v5345_v27 = vpop.permute.xlu0 %1102  ;;  %v866_v51 = vsel %vm639_vm9, %v863_v58, %v865_v24  ;;  %v906_v29 = vsel %vm672_vm10, %v903_v10, %v905_v7 }
 0x41b   :  { %9727 = vst [vmem:[#allocation24_spill] sm:$0xff] %v5345_v27  ;;  %v6878_v27 = vld [vmem:[#allocation3 + $0x38] sm:$0xff] }
 0x41c   :  { %952 = vrot.lane.b32.xlu0 %v944_v35, %s4831_s18  ;;  %3706 = vrot.lane.b32.xlu1 %v3695_v33, %s4835_s26  ;;  %v5423_v33 = vstv %s4575_s11  ;;  %v870_v35 = vrot.slane %v855_v26, 1  ;;  %s4601_s11 = sld [smem:[#allocation9 + $0x21]] }
 0x41d   :  { %v5430_v42 = vmul.f32 %v5423_v33, %v5099_v16  ;;  %v1050_v52 = vmul.f32 %v5423_v33, %v5052_v49  ;;  %v5447_v62 = vmul.f32 %v5423_v33, %v5116_v25  ;;  %v1053_v13 = vmul.f32 %v5423_v33, %v5061_v55 }
 0x41e   :  { %v5375_v57 = vpop.permute.xlu0 %1364 }
 0x41f   :  { %9728 = vst [vmem:[#allocation25_spill] sm:$0xff] %v5375_v57  ;;  %v9623_v24 = vrot.slane %v5447_v62, 6 }
 0x420   :  { %956 = vrot.lane.b32.xlu0 %v949_v48, %s4831_s18  ;;  %3702 = vrot.lane.b32.xlu1 %v3693_v44, %s4835_s26  ;;  %v1027_v48 = vrot.slane %v1013_v47, 5  ;;  %v910_v47 = vrot.slane %v895_v40, 2 }
 0x422   :  { %v5401_v9 = vpop.permute.xlu0 %1368  ;;  %v1029_v58 = vsel %vm771_vm13, %v1027_v48, %v1028_v32  ;;  %v911_v48 = vsel %vm672_vm10, %v908_v19, %v910_v47 }
 0x423   :  { %9729 = vst [vmem:[#allocation26_spill] sm:$0xff] %v5401_v9 }
 0x424   :  { %992 = vrot.lane.b32.xlu0 %v984_v4, %s4831_s18  ;;  %3972 = vrot.lane.b32.xlu1 %v3961_v54, %s4836_s27  ;;  %v871_v54 = vsel %vm639_vm9, %v868_v2, %v870_v35  ;;  %v1063_v4 = vrot.slane %v5430_v42, 6 }
 0x426   :  { %v5434_v44 = vpop.permute.xlu0 %1630 }
 0x427   :  { %9730 = vst [vmem:[#allocation27_spill] sm:$0xff] %v5434_v44 }
 0x428   :  { %996 = vrot.lane.b32.xlu0 %v989_v22, %s4831_s18  ;;  %3968 = vrot.lane.b32.xlu1 %v3959_v15, %s4836_s27  ;;  %v1062_v15 = vrot.slane %v1050_v52, 6  ;;  %v5459_v22 = vstv %s4577_s12  ;;  %s4602_s12 = sld [smem:[#allocation9 + $0x28]] }
 0x429   :  { %v5468_v0 = vmul.f32 %v5459_v22, %v5099_v16  ;;  %v1116_v35 = vmul.f32 %v5459_v22, %v5052_v49  ;;  %v1119_v11 = vmul.f32 %v5459_v22, %v5061_v55 }
 0x42a   :  { %v5440_v36 = vpop.permute.xlu1 %834  ;;  %v5461_v60 = vpop.permute.xlu0 %1634  ;;  %v1064_v26 = vsel %vm175_vm4, %v1062_v15, %v1063_v4 }
 0x42b   :  { %9731 = vst [vmem:[#allocation28_spill] sm:$0xff] %v5440_v36  ;;  %9732 = vst [vmem:[#allocation29_spill] sm:$0xff] %v5461_v60  ;;  %v9619_v10 = vrot.slane %v5468_v0, 1  ;;  %v1128_v40 = vrot.slane %v1116_v35, 1 }
 0x42c   :  { %1032 = vrot.lane.b32.xlu0 %v1024_v31, %s4831_s18  ;;  %874 = vrot.lane.b32.xlu1 %v866_v51, %s4831_s18  ;;  %v932_v31 = vmul.f32 %v5315_v17, %v5373_v56  ;;  %v1067_v51 = vrot.slane %v1053_v13, 6  ;;  %v5503_v13 = vstv %s4578_s13  ;;  %s4603_s13 = sld [smem:[#allocation9 + $0x2f]] }
 0x42d   :  { %v5509_v15 = vmul.f32 %v5503_v13, %v5099_v16  ;;  %v1156_v35 = vmul.f32 %v5503_v13, %v5052_v49 }
 0x42e   :  { %v1069_v3 = vsel %vm175_vm4, %v1067_v51, %v9623_v24  ;;  %v945_v52 = vrot.slane %v932_v31, 3  ;;  %v5497_v7 = vpop.permute.xlu0 %1896  ;;  %v1133_v51 = vrot.slane %v1119_v11, 1  ;;  %v5627_v24 = vstv %s4581_s16  ;;  %s4607_s16 = sld [smem:[#allocation9 + $0x1b]] }
 0x42f   :  { %9735 = vst [vmem:[#allocation32_spill] sm:$0xff] %v5497_v7 }
 0x430   :  { %1036 = vrot.lane.b32.xlu0 %v1029_v58, %s4831_s18  ;;  %878 = vrot.lane.b32.xlu1 %v871_v54, %s4831_s18  ;;  %v5493_v58 = vmul.f32 %v5459_v22, %v5116_v25  ;;  %v935_v54 = vmul.f32 %v5315_v17, %v5395_v8  ;;  %v972_v17 = vmul.f32 %v5349_v34, %v5373_v56 }
 0x432   :  { %v5463_v2 = vpop.permute.xlu1 %838  ;;  %v9618_v47 = vrot.slane %v5493_v58, 1  ;;  %v950_v31 = vrot.slane %v935_v54, 3  ;;  %v975_v54 = vmul.f32 %v5349_v34, %v5395_v8  ;;  %v1012_v34 = vmul.f32 %v5381_v63, %v5373_v56 }
 0x433   :  { %9733 = vst [vmem:[#allocation30_spill] sm:$0xff] %v5463_v2 }
 0x434   :  { %1072 = vrot.lane.b32.xlu0 %v1064_v26, %s4831_s18  ;;  %914 = vrot.lane.b32.xlu1 %v906_v29, %s4831_s18  ;;  %v1130_v26 = vsel %vm639_vm9, %v1128_v40, %v9619_v10  ;;  %v946_v29 = vsel %vm705_vm11, %v943_v28, %v945_v52  ;;  %v985_v40 = vrot.slane %v972_v17, 4  ;;  %v1135_v20 = vsel %vm639_vm9, %v1133_v51, %v9618_v47 }
 0x435   :  { %v951_v28 = vsel %vm705_vm11, %v948_v37, %v950_v31  ;;  %v5535_v52 = vmul.f32 %v5503_v13, %v5116_v25  ;;  %v1168_v17 = vrot.slane %v1156_v35, 2  ;;  %v5549_v37 = vmul.f32 %v5545_v30, %v5099_v16 }
 0x436   :  { %v5482_v43 = vpop.permute.xlu1 %1100  ;;  %v986_v31 = vsel %vm738_vm12, %v983_v50, %v985_v40  ;;  %v990_v35 = vrot.slane %v975_v54, 4  ;;  %v1025_v41 = vrot.slane %v1012_v34, 5  ;;  %v5577_v54 = vmul.f32 %v5545_v30, %v5116_v25 }
 0x437   :  { %9734 = vst [vmem:[#allocation31_spill] sm:$0xff] %v5482_v43  ;;  %v9621_v51 = vrot.slane %v5535_v52, 2 }
 0x438   :  { %1076 = vrot.lane.b32.xlu0 %v1069_v3, %s4831_s18  ;;  %918 = vrot.lane.b32.xlu1 %v911_v48, %s4831_s18  ;;  %v5524_v3 = vpop.permute.xlu0 %1900  ;;  %v9622_v48 = vrot.slane %v5509_v15, 2  ;;  %v991_v40 = vsel %vm738_vm12, %v988_v5, %v990_v35  ;;  %v9624_v35 = vrot.slane %v5577_v54, 3 }
 0x439   :  { %9737 = vst [vmem:[#allocation34_spill] sm:$0xff] %v5524_v3 }
 0x43a   :  { %v5505_v19 = vpop.permute.xlu1 %1104 }
 0x43b   :  { %9736 = vst [vmem:[#allocation33_spill] sm:$0xff] %v5505_v19 }
 0x43c   :  { %1138 = vrot.lane.b32.xlu0 %v1130_v26, %s4832_s20  ;;  %954 = vrot.lane.b32.xlu1 %v946_v29, %s4831_s18  ;;  %v1159_v26 = vmul.f32 %v5503_v13, %v5061_v55  ;;  %v1170_v29 = vsel %vm672_vm10, %v1168_v17, %v9622_v48  ;;  %v9620_v17 = vrot.slane %v5549_v37, 3 }
 0x43e   :  { %v5539_v11 = vpop.permute.xlu1 %1366  ;;  %v1173_v47 = vrot.slane %v1159_v26, 2  ;;  %v1015_v26 = vmul.f32 %v5381_v63, %v5395_v8 }
 0x43f   :  { %9738 = vst [vmem:[#allocation35_spill] sm:$0xff] %v5539_v11 }
 0x440   :  { %1142 = vrot.lane.b32.xlu0 %v1135_v20, %s4832_s20  ;;  %958 = vrot.lane.b32.xlu1 %v951_v28, %s4831_s18  ;;  %v5560_v20 = vpop.permute.xlu0 %2162  ;;  %v1196_v28 = vmul.f32 %v5545_v30, %v5052_v49  ;;  %v1175_v50 = vsel %vm672_vm10, %v1173_v47, %v9621_v51  ;;  %v5585_v47 = vstv %s4580_s15  ;;  %s4606_s15 = sld [smem:[#allocation9 + $0x14]] }
 0x441   :  { %9739 = vst [vmem:[#allocation36_spill] sm:$0xff] %v5560_v20  ;;  %v5594_v63 = vmul.f32 %v5585_v47, %v5099_v16  ;;  %v1239_v48 = vmul.f32 %v5585_v47, %v5061_v55 }
 0x442   :  { %v5566_v10 = vpop.permute.xlu1 %1370  ;;  %v1208_v34 = vrot.slane %v1196_v28, 3  ;;  %v1030_v28 = vrot.slane %v1015_v26, 5 }
 0x443   :  { %9740 = vst [vmem:[#allocation37_spill] sm:$0xff] %v5566_v10  ;;  %v9629_v1 = vrot.slane %v5594_v63, 4 }
 0x444   :  { %1178 = vrot.lane.b32.xlu0 %v1170_v29, %s4832_s20  ;;  %994 = vrot.lane.b32.xlu1 %v986_v31, %s4831_s18  ;;  %v1199_v29 = vmul.f32 %v5545_v30, %v5061_v55  ;;  %v5587_v53 = vpop.permute.xlu0 %2166  ;;  %v1210_v5 = vsel %vm705_vm11, %v1208_v34, %v9620_v17  ;;  %v1026_v31 = vsel %vm771_vm13, %v1023_v18, %v1025_v41 }
 0x445   :  { %9741 = vst [vmem:[#allocation38_spill] sm:$0xff] %v5587_v53  ;;  %v1236_v17 = vmul.f32 %v5585_v47, %v5052_v49  ;;  %v5613_v18 = vmul.f32 %v5585_v47, %v5116_v25  ;;  %v1031_v26 = vsel %vm771_vm13, %v1028_v32, %v1030_v28  ;;  %v5635_v32 = vmul.f32 %v5627_v24, %v5099_v16 }
 0x446   :  { %v1213_v34 = vrot.slane %v1199_v29, 3 }
 0x447   :  { %v9628_v45 = vrot.slane %v5635_v32, 5 }
 0x448   :  { %1182 = vrot.lane.b32.xlu0 %v1175_v50, %s4832_s20  ;;  %998 = vrot.lane.b32.xlu1 %v991_v40, %s4831_s18  ;;  %v1052_v50 = vmul.f32 %v5423_v33, %v5373_v56  ;;  %v5602_v40 = vpop.permute.xlu1 %1632  ;;  %v1215_v41 = vsel %vm705_vm11, %v1213_v34, %v9624_v35  ;;  %v1253_v35 = vrot.slane %v1239_v48, 4  ;;  %v1121_v48 = vmul.f32 %v5459_v22, %v5395_v8 }
 0x449   :  { %9742 = vst [vmem:[#allocation39_spill] sm:$0xff] %v5602_v40 }
 0x44a   :  { %v5608_v51 = vpop.permute.xlu0 %2636  ;;  %v1065_v29 = vrot.slane %v1052_v50, 6  ;;  %v9627_v50 = vrot.slane %v5613_v18, 4 }
 0x44b   :  { %9743 = vst [vmem:[#allocation40_spill] sm:$0xff] %v5608_v51 }
 0x44c   :  { %1218 = vrot.lane.b32.xlu0 %v1210_v5, %s4832_s20  ;;  %1034 = vrot.lane.b32.xlu1 %v1026_v31, %s4831_s18  ;;  %v1055_v5 = vmul.f32 %v5423_v33, %v5395_v8  ;;  %v1248_v31 = vrot.slane %v1236_v17, 4  ;;  %v5629_v34 = vpop.permute.xlu1 %1636  ;;  %v1118_v33 = vmul.f32 %v5459_v22, %v5373_v56  ;;  %v1066_v28 = vsel %vm175_vm4, %v1063_v4, %v1065_v29 }
 0x44d   :  { %9744 = vst [vmem:[#allocation41_spill] sm:$0xff] %v5629_v34  ;;  %v1255_v42 = vsel %vm738_vm12, %v1253_v35, %v9627_v50  ;;  %v9747_v4 = vrot.slane %v5447_v62, 6  ;;  %v1279_v35 = vmul.f32 %v5627_v24, %v5061_v55  ;;  %v5671_v62 = vstv %s4582_s17  ;;  %s4608_s17 = sld [smem:[#allocation9 + $0x22]] }
 0x44e   :  { %v1250_v17 = vsel %vm738_vm12, %v1248_v31, %v9629_v1  ;;  %v1131_v31 = vrot.slane %v1118_v33, 1  ;;  %v5680_v22 = vmul.f32 %v5671_v62, %v5099_v16  ;;  %v1158_v50 = vmul.f32 %v5503_v13, %v5373_v56 }
 0x44f   :  { %v1319_v46 = vmul.f32 %v5671_v62, %v5061_v55 }
 0x450   :  { %1222 = vrot.lane.b32.xlu0 %v1215_v41, %s4832_s20  ;;  %1038 = vrot.lane.b32.xlu1 %v1031_v26, %s4831_s18  ;;  %v1070_v41 = vrot.slane %v1055_v5, 6  ;;  %v1276_v26 = vmul.f32 %v5627_v24, %v5052_v49  ;;  %v5661_v5 = vmul.f32 %v5627_v24, %v5116_v25 }
 0x452   :  { %v5631_v21 = vpop.permute.xlu0 %2640  ;;  %v1071_v29 = vsel %vm175_vm4, %v9747_v4, %v1070_v41  ;;  %v1288_v33 = vrot.slane %v1276_v26, 5  ;;  %v9634_v4 = vrot.slane %v5661_v5, 5 }
 0x453   :  { %9745 = vst [vmem:[#allocation42_spill] sm:$0xff] %v5631_v21 }
 0x454   :  { %1258 = vrot.lane.b32.xlu0 %v1250_v17, %s4832_s20  ;;  %1074 = vrot.lane.b32.xlu1 %v1066_v28, %s4831_s18  ;;  %v5665_v17 = vpop.permute.xlu1 %1898  ;;  %v1290_v41 = vsel %vm771_vm13, %v1288_v33, %v9628_v45  ;;  %v1316_v33 = vmul.f32 %v5671_v62, %v5052_v49  ;;  %v1293_v45 = vrot.slane %v1279_v35, 5  ;;  %v1161_v35 = vmul.f32 %v5503_v13, %v5395_v8 }
 0x455   :  { %9748 = vst [vmem:[#allocation44_spill] sm:$0xff] %v5665_v17  ;;  %v5722_v13 = vmul.f32 %v5713_v38, %v5099_v16 }
 0x456   :  { %v5650_v61 = vpop.permute.xlu0 %2902 }
 0x457   :  { %9746 = vst [vmem:[#allocation43_spill] sm:$0xff] %v5650_v61 }
 0x458   :  { %1262 = vrot.lane.b32.xlu0 %v1255_v42, %s4832_s20  ;;  %1078 = vrot.lane.b32.xlu1 %v1071_v29, %s4831_s18  ;;  %v9750_v42 = vrot.slane %v5468_v0, 1  ;;  %v1136_v29 = vrot.slane %v1121_v48, 1  ;;  %v5692_v1 = vpop.permute.xlu1 %1902  ;;  %v1295_v48 = vsel %vm771_vm13, %v1293_v45, %v9634_v4  ;;  %v1328_v0 = vrot.slane %v1316_v33, 6 }
 0x459   :  { %9751 = vst [vmem:[#allocation46_spill] sm:$0xff] %v5692_v1 }
 0x45a   :  { %v5673_v28 = vpop.permute.xlu0 %2906  ;;  %v1132_v26 = vsel %vm639_vm9, %v9750_v42, %v1131_v31  ;;  %v5699_v31 = vmul.f32 %v5671_v62, %v5116_v25 }
 0x45b   :  { %9749 = vst [vmem:[#allocation45_spill] sm:$0xff] %v5673_v28 }
 0x45c   :  { %1298 = vrot.lane.b32.xlu0 %v1290_v41, %s4832_s20  ;;  %1140 = vrot.lane.b32.xlu1 %v1132_v26, %s4832_s20  ;;  %v9753_v41 = vrot.slane %v5493_v58, 1  ;;  %v1171_v26 = vrot.slane %v1158_v50, 2  ;;  %v9755_v58 = vrot.slane %v5680_v22, 6  ;;  %v5730_v4 = vpop.permute.xlu1 %2164 }
 0x45d   :  { %9757 = vst [vmem:[#allocation49_spill] sm:$0xff] %v5730_v4 }
 0x45e   :  { %v5694_v59 = vpop.permute.xlu0 %3168  ;;  %v1137_v42 = vsel %vm639_vm9, %v9753_v41, %v1136_v29  ;;  %v1330_v50 = vsel %vm175_vm4, %v1328_v0, %v9755_v58  ;;  %v9756_v29 = vrot.slane %v5509_v15, 2  ;;  %v1176_v41 = vrot.slane %v1161_v35, 2 }
 0x45f   :  { %9752 = vst [vmem:[#allocation47_spill] sm:$0xff] %v5694_v59  ;;  %v1333_v0 = vrot.slane %v1319_v46, 6  ;;  %v1382_v58 = vmul.f32 %v5713_v38, %v5052_v49  ;;  %v1201_v49 = vmul.f32 %v5545_v30, %v5395_v8 }
 0x460   :  { %1302 = vrot.lane.b32.xlu0 %v1295_v48, %s4832_s20  ;;  %1144 = vrot.lane.b32.xlu1 %v1137_v42, %s4832_s20  ;;  %v1172_v33 = vsel %vm672_vm10, %v9756_v29, %v1171_v26  ;;  %v9638_v48 = vrot.slane %v5699_v31, 6  ;;  %v1198_v42 = vmul.f32 %v5545_v30, %v5373_v56  ;;  %v5741_v26 = vmul.f32 %v5713_v38, %v5116_v25 }
 0x461   :  { %v1394_v15 = vrot.slane %v1382_v58, 1  ;;  %v5764_v30 = vmul.f32 %v5755_v12, %v5099_v16 }
 0x462   :  { %v5715_v45 = vpop.permute.xlu0 %3172  ;;  %v1335_v35 = vsel %vm175_vm4, %v1333_v0, %v9638_v48  ;;  %v1211_v46 = vrot.slane %v1198_v42, 3  ;;  %v5757_v0 = vpop.permute.xlu1 %2168  ;;  %v9762_v42 = vrot.slane %v5722_v13, 1 }
 0x463   :  { %9754 = vst [vmem:[#allocation48_spill] sm:$0xff] %v5715_v45  ;;  %9760 = vst [vmem:[#allocation51_spill] sm:$0xff] %v5757_v0 }
 0x464   :  { %1338 = vrot.lane.b32.xlu0 %v1330_v50, %s4832_s20  ;;  %1180 = vrot.lane.b32.xlu1 %v1172_v33, %s4832_s20  ;;  %v9759_v50 = vrot.slane %v5535_v52, 2  ;;  %v1385_v33 = vmul.f32 %v5713_v38, %v5061_v55  ;;  %v9763_v55 = vrot.slane %v5549_v37, 3  ;;  %v9766_v37 = vrot.slane %v5741_v26, 1 }
 0x466   :  { %v5736_v39 = vpop.permute.xlu0 %3438  ;;  %v1177_v29 = vsel %vm672_vm10, %v9759_v50, %v1176_v41  ;;  %v1212_v58 = vsel %vm705_vm11, %v9763_v55, %v1211_v46  ;;  %v1216_v50 = vrot.slane %v1201_v49, 3  ;;  %v1399_v48 = vrot.slane %v1385_v33, 1  ;;  %v5776_v41 = vld [vmem:[#allocation3] sm:$0xff] }
 0x467   :  { %9758 = vst [vmem:[#allocation50_spill] sm:$0xff] %v5736_v39  ;;  %v9639_v49 = vrot.slane %v5764_v30, 2  ;;  %v5793_v55 = vmul.f32 %v5755_v12, %v5116_v25 }
 0x468   :  { %1342 = vrot.lane.b32.xlu0 %v1335_v35, %s4832_s20  ;;  %1184 = vrot.lane.b32.xlu1 %v1177_v29, %s4832_s20  ;;  %v1396_v35 = vsel %vm639_vm9, %v1394_v15, %v9762_v42  ;;  %v1238_v29 = vmul.f32 %v5585_v47, %v5373_v56  ;;  %v1401_v46 = vsel %vm639_vm9, %v1399_v48, %v9766_v37  ;;  %v9767_v42 = vrot.slane %v5577_v54, 3  ;;  %v5799_v48 = vld [vmem:[#allocation3 + $0x18] sm:$0xff] }
 0x469   :  { %v1425_v54 = vmul.f32 %v5799_v48, %v5755_v12  ;;  %v5803_v37 = vstv %s4586_s23  ;;  %s6693_s23 = sld [smem:[#allocation9 + $0x7]] }
 0x46a   :  { %v5759_v52 = vpop.permute.xlu0 %3434  ;;  %v5780_v39 = vpop.permute.xlu1 %2638  ;;  %v1251_v33 = vrot.slane %v1238_v29, 4 }
 0x46b   :  { %9761 = vst [vmem:[#allocation52_spill] sm:$0xff] %v5759_v52  ;;  %v1422_v52 = vmul.f32 %v5776_v41, %v5755_v12  ;;  %9764 = vst [vmem:[#allocation53_spill] sm:$0xff] %v5780_v39  ;;  %v1439_v45 = vrot.slane %v1425_v54, 2  ;;  %v9773_v54 = vrot.slane %v5613_v18, 4  ;;  %v5854_v18 = vld [vmem:[#allocation3 + $0x8] sm:$0xff] }
 0x46c   :  { %1404 = vrot.lane.b32.xlu0 %v1396_v35, %s4833_s22  ;;  %1220 = vrot.lane.b32.xlu1 %v1212_v58, %s4832_s20  ;;  %v1217_v35 = vsel %vm705_vm11, %v9767_v42, %v1216_v50  ;;  %v1241_v58 = vmul.f32 %v5585_v47, %v5395_v8 }
 0x46e   :  { %v5782_v15 = vpop.permute.xlu0 %3704  ;;  %v1256_v59 = vrot.slane %v1241_v58, 4 }
 0x46f   :  { %9765 = vst [vmem:[#allocation54_spill] sm:$0xff] %v5782_v15  ;;  %v1434_v15 = vrot.slane %v1422_v52, 2  ;;  %v9770_v52 = vrot.slane %v5594_v63, 4  ;;  %v5832_v63 = vmul.f32 %v5803_v37, %v5116_v25  ;;  %v1465_v25 = vmul.f32 %v5799_v48, %v5803_v37 }
 0x470   :  { %1408 = vrot.lane.b32.xlu0 %v1401_v46, %s4833_s22  ;;  %1224 = vrot.lane.b32.xlu1 %v1217_v35, %s4832_s20  ;;  %v5814_v46 = vmul.f32 %v5803_v37, %v5099_v16  ;;  %v9640_v35 = vrot.slane %v5793_v55, 2 }
 0x471   :  { %v1436_v47 = vsel %vm672_vm10, %v1434_v15, %v9639_v49  ;;  %v1252_v42 = vsel %vm738_vm12, %v9770_v52, %v1251_v33  ;;  %v1462_v15 = vmul.f32 %v5776_v41, %v5803_v37  ;;  %v1281_v33 = vmul.f32 %v5627_v24, %v5395_v8 }
 0x472   :  { %v5805_v50 = vpop.permute.xlu0 %3700  ;;  %v5807_v29 = vpop.permute.xlu1 %2642  ;;  %v1441_v58 = vsel %vm672_vm10, %v1439_v45, %v9640_v35  ;;  %v9641_v52 = vrot.slane %v5814_v46, 3  ;;  %v1318_v35 = vmul.f32 %v5671_v62, %v5373_v56 }
 0x473   :  { %9768 = vst [vmem:[#allocation55_spill] sm:$0xff] %v5805_v50  ;;  %9769 = vst [vmem:[#allocation56_spill] sm:$0xff] %v5807_v29  ;;  %v1278_v50 = vmul.f32 %v5627_v24, %v5373_v56  ;;  %v5847_v24 = vstv %s4587_s25  ;;  %v1384_v29 = vmul.f32 %v5713_v38, %v5373_v56  ;;  %s6701_s25 = sld [smem:[#allocation9 + $0xe]] }
 0x474   :  { %1444 = vrot.lane.b32.xlu0 %v1436_v47, %s4833_s22  ;;  %1260 = vrot.lane.b32.xlu1 %v1252_v42, %s4832_s20  ;;  %v1257_v47 = vsel %vm738_vm12, %v9773_v54, %v1256_v59  ;;  %v1479_v59 = vrot.slane %v1465_v25, 3 }
 0x475   :  { %v1291_v42 = vrot.slane %v1278_v50, 5  ;;  %v5858_v50 = vmul.f32 %v5854_v18, %v5847_v24 }
 0x476   :  { %v5826_v16 = vpop.permute.xlu0 %3970  ;;  %v5828_v49 = vpop.permute.xlu1 %2904 }
 0x477   :  { %9771 = vst [vmem:[#allocation57_spill] sm:$0xff] %v5826_v16  ;;  %9772 = vst [vmem:[#allocation58_spill] sm:$0xff] %v5828_v49  ;;  %v1474_v16 = vrot.slane %v1462_v15, 3  ;;  %v9776_v15 = vrot.slane %v5635_v32, 5  ;;  %v9779_v32 = vrot.slane %v5832_v63, 3 }
 0x478   :  { %1448 = vrot.lane.b32.xlu0 %v1441_v58, %s4833_s22  ;;  %1264 = vrot.lane.b32.xlu1 %v1257_v47, %s4832_s20  ;;  %v1296_v47 = vrot.slane %v1281_v33, 5  ;;  %v9642_v33 = vrot.slane %v5858_v50, 4 }
 0x479   :  { %v1476_v58 = vsel %vm705_vm11, %v1474_v16, %v9641_v52  ;;  %v1292_v54 = vsel %vm771_vm13, %v9776_v15, %v1291_v42  ;;  %v1481_v16 = vsel %vm705_vm11, %v1479_v59, %v9779_v32  ;;  %v9780_v42 = vrot.slane %v5661_v5, 5 }
 0x47a   :  { %v5849_v49 = vpop.permute.xlu0 %3966  ;;  %v5851_v45 = vpop.permute.xlu1 %2908  ;;  %v1331_v15 = vrot.slane %v1318_v35, 6  ;;  %v1321_v52 = vmul.f32 %v5671_v62, %v5395_v8  ;;  %v1505_v5 = vmul.f32 %v5799_v48, %v5847_v24  ;;  %v5895_v32 = vstv %s4588_s29  ;;  %s6703_s29 = sld [smem:[#allocation9 + $0x15]] }
 0x47b   :  { %9774 = vst [vmem:[#allocation59_spill] sm:$0xff] %v5849_v49  ;;  %9775 = vst [vmem:[#allocation60_spill] sm:$0xff] %v5851_v45  ;;  %v1502_v49 = vmul.f32 %v5776_v41, %v5847_v24  ;;  %v5906_v62 = vmul.f32 %v5854_v18, %v5895_v32  ;;  %v1544_v20 = vmul.f32 %v5895_v32, %v5373_v56 }
 0x47c   :  { %1484 = vrot.lane.b32.xlu0 %v1476_v58, %s4833_s22  ;;  %1300 = vrot.lane.b32.xlu1 %v1292_v54, %s4832_s20  ;;  %v1297_v58 = vsel %vm771_vm13, %v9780_v42, %v1296_v47  ;;  %v5883_v54 = vld [vmem:[#allocation3 + $0x20] sm:$0xff] }
 0x47d   :  { %v5887_v25 = vmul.f32 %v5883_v54, %v5847_v24  ;;  %v1514_v59 = vrot.slane %v1502_v49, 4  ;;  %v9783_v49 = vrot.slane %v5680_v22, 6  ;;  %v5924_v22 = vmul.f32 %v5883_v54, %v5895_v32 }
 0x47e   :  { %v5872_v45 = vpop.permute.xlu0 %872  ;;  %v5874_v39 = vpop.permute.xlu1 %3170 }
 0x47f   :  { %9777 = vst [vmem:[#allocation61_spill] sm:$0xff] %v5872_v45  ;;  %9778 = vst [vmem:[#allocation62_spill] sm:$0xff] %v5874_v39  ;;  %v1516_v42 = vsel %vm738_vm12, %v1514_v59, %v9642_v33  ;;  %v1336_v39 = vrot.slane %v1321_v52, 6  ;;  %v1542_v59 = vmul.f32 %v5776_v41, %v5895_v32  ;;  %v1387_v52 = vmul.f32 %v5713_v38, %v5395_v8 }
 0x480   :  { %1488 = vrot.lane.b32.xlu0 %v1481_v16, %s4833_s22  ;;  %1304 = vrot.lane.b32.xlu1 %v1297_v58, %s4832_s20  ;;  %v1332_v16 = vsel %vm175_vm4, %v9783_v49, %v1331_v15  ;;  %v9643_v58 = vrot.slane %v5887_v25, 4  ;;  %v9644_v49 = vrot.slane %v5906_v62, 5  ;;  %v5939_v38 = vstv %s4589_s30  ;;  %s6708_s30 = sld [smem:[#allocation9 + $0x1c]] }
 0x481   :  { %v1554_v28 = vrot.slane %v1542_v59, 5 }
 0x482   :  { %v5897_v35 = vpop.permute.xlu0 %876  ;;  %v5899_v47 = vpop.permute.xlu1 %3174 }
 0x483   :  { %9781 = vst [vmem:[#allocation63_spill] sm:$0xff] %v5897_v35  ;;  %9782 = vst [vmem:[#allocation64_spill] sm:$0xff] %v5899_v47  ;;  %v1519_v47 = vrot.slane %v1505_v5, 4  ;;  %v9786_v5 = vrot.slane %v5699_v31, 6  ;;  %v5948_v31 = vmul.f32 %v5854_v18, %v5939_v38 }
 0x484   :  { %1524 = vrot.lane.b32.xlu0 %v1516_v42, %s4833_s22  ;;  %1340 = vrot.lane.b32.xlu1 %v1332_v16, %s4832_s20  ;;  %v1397_v16 = vrot.slane %v1384_v29, 1  ;;  %v1556_v29 = vsel %vm771_vm13, %v1554_v28, %v9644_v49  ;;  %v9792_v28 = vrot.slane %v5924_v22, 5 }
 0x485   :  { %v1521_v15 = vsel %vm738_vm12, %v1519_v47, %v9643_v58  ;;  %v1337_v42 = vsel %vm175_vm4, %v9786_v5, %v1336_v39  ;;  %v1402_v5 = vrot.slane %v1387_v52, 1  ;;  %v1582_v39 = vmul.f32 %v5776_v41, %v5939_v38 }
 0x486   :  { %v5918_v33 = vpop.permute.xlu0 %912  ;;  %v5920_v61 = vpop.permute.xlu1 %3440  ;;  %v9645_v52 = vrot.slane %v5948_v31, 6 }
 0x487   :  { %9784 = vst [vmem:[#allocation65_spill] sm:$0xff] %v5918_v33  ;;  %9785 = vst [vmem:[#allocation66_spill] sm:$0xff] %v5920_v61  ;;  %v1545_v61 = vmul.f32 %v5799_v48, %v5895_v32  ;;  %v1594_v49 = vrot.slane %v1582_v39, 6  ;;  %v9796_v39 = vrot.slane %v5764_v30, 2 }
 0x488   :  { %1528 = vrot.lane.b32.xlu0 %v1521_v15, %s4833_s22  ;;  %1344 = vrot.lane.b32.xlu1 %v1337_v42, %s4832_s20  ;;  %v9789_v15 = vrot.slane %v5722_v13, 1  ;;  %v1424_v42 = vmul.f32 %v5755_v12, %v5373_v56 }
 0x489   :  { %v1559_v58 = vrot.slane %v1545_v61, 5  ;;  %v5975_v61 = vmul.f32 %v5883_v54, %v5939_v38 }
 0x48a   :  { %v5941_v51 = vpop.permute.xlu0 %916  ;;  %v5943_v47 = vpop.permute.xlu1 %3436  ;;  %v1398_v59 = vsel %vm639_vm9, %v9789_v15, %v1397_v16  ;;  %v9793_v16 = vrot.slane %v5741_v26, 1  ;;  %v1437_v15 = vrot.slane %v1424_v42, 2  ;;  %v1596_v42 = vsel %vm175_vm4, %v1594_v49, %v9645_v52 }
 0x48b   :  { %9787 = vst [vmem:[#allocation67_spill] sm:$0xff] %v5941_v51  ;;  %9788 = vst [vmem:[#allocation68_spill] sm:$0xff] %v5943_v47  ;;  %v1561_v13 = vsel %vm771_vm13, %v1559_v58, %v9792_v28  ;;  %v1585_v58 = vmul.f32 %v5799_v48, %v5939_v38  ;;  %v5983_v28 = vstv %s4591_s5  ;;  %s6719_s5 = sld [smem:[#allocation9 + $0x30]] }
 0x48c   :  { %1564 = vrot.lane.b32.xlu0 %v1556_v29, %s4833_s22  ;;  %1406 = vrot.lane.b32.xlu1 %v1398_v59, %s4833_s22  ;;  %v1403_v29 = vsel %vm639_vm9, %v9793_v16, %v1402_v5  ;;  %v1427_v59 = vmul.f32 %v5755_v12, %v5395_v8  ;;  %v5994_v12 = vmul.f32 %v5854_v18, %v5983_v28  ;;  %v9646_v16 = vrot.slane %v5975_v61, 6 }
 0x48d   :  { %v1648_v49 = vmul.f32 %v5776_v41, %v5983_v28  ;;  %v6012_v30 = vmul.f32 %v5883_v54, %v5983_v28  ;;  %v1650_v44 = vmul.f32 %v5983_v28, %v5373_v56 }
 0x48e   :  { %v5962_v47 = vpop.permute.xlu0 %952  ;;  %v5964_v21 = vpop.permute.xlu1 %3706 }
 0x48f   :  { %9790 = vst [vmem:[#allocation69_spill] sm:$0xff] %v5962_v47  ;;  %9791 = vst [vmem:[#allocation70_spill] sm:$0xff] %v5964_v21  ;;  %v1464_v21 = vmul.f32 %v5803_v37, %v5373_v56  ;;  %v1660_v0 = vrot.slane %v1648_v49, 1 }
 0x490   :  { %1568 = vrot.lane.b32.xlu0 %v1561_v13, %s4833_s22  ;;  %1410 = vrot.lane.b32.xlu1 %v1403_v29, %s4833_s22  ;;  %v1438_v13 = vsel %vm672_vm10, %v9796_v39, %v1437_v15  ;;  %v1442_v29 = vrot.slane %v1427_v59, 2  ;;  %v1467_v15 = vmul.f32 %v5803_v37, %v5395_v8  ;;  %v9647_v39 = vrot.slane %v5994_v12, 1 }
 0x491   :  { %v6027_v37 = vstv %s4592_s6  ;;  %s6729_s6 = sld [smem:[#allocation9 + $0x23]] }
 0x492   :  { %v5985_v26 = vpop.permute.xlu0 %956  ;;  %v5987_v5 = vpop.permute.xlu1 %3702 }
 0x493   :  { %9794 = vst [vmem:[#allocation71_spill] sm:$0xff] %v5985_v26  ;;  %9795 = vst [vmem:[#allocation72_spill] sm:$0xff] %v5987_v5  ;;  %v1599_v5 = vrot.slane %v1585_v58, 6  ;;  %v9799_v58 = vrot.slane %v5793_v55, 2  ;;  %v1688_v55 = vmul.f32 %v5776_v41, %v6027_v37 }
 0x494   :  { %1604 = vrot.lane.b32.xlu0 %v1596_v42, %s4833_s22  ;;  %1446 = vrot.lane.b32.xlu1 %v1438_v13, %s4833_s22  ;;  %v1477_v13 = vrot.slane %v1464_v21, 3  ;;  %v6036_v21 = vmul.f32 %v5854_v18, %v6027_v37 }
 0x495   :  { %v1601_v59 = vsel %vm175_vm4, %v1599_v5, %v9646_v16  ;;  %v1443_v42 = vsel %vm672_vm10, %v9799_v58, %v1442_v29  ;;  %v1662_v29 = vsel %vm639_vm9, %v1660_v0, %v9647_v39  ;;  %v1482_v58 = vrot.slane %v1467_v15, 3 }
 0x496   :  { %v6006_v52 = vpop.permute.xlu0 %992  ;;  %v6008_v4 = vpop.permute.xlu1 %3972  ;;  %v9805_v0 = vrot.slane %v6012_v30, 1  ;;  %v9648_v15 = vrot.slane %v6036_v21, 2  ;;  %v1700_v39 = vrot.slane %v1688_v55, 2  ;;  %v9809_v55 = vrot.slane %v5858_v50, 4 }
 0x497   :  { %9797 = vst [vmem:[#allocation73_spill] sm:$0xff] %v6006_v52  ;;  %9798 = vst [vmem:[#allocation74_spill] sm:$0xff] %v6008_v4  ;;  %v1651_v4 = vmul.f32 %v5799_v48, %v5983_v28 }
 0x498   :  { %1608 = vrot.lane.b32.xlu0 %v1601_v59, %s4833_s22  ;;  %1450 = vrot.lane.b32.xlu1 %v1443_v42, %s4833_s22  ;;  %v9802_v59 = vrot.slane %v5814_v46, 3  ;;  %v1504_v42 = vmul.f32 %v5847_v24, %v5373_v56 }
 0x499   :  { %v1665_v16 = vrot.slane %v1651_v4, 1  ;;  %v6063_v4 = vmul.f32 %v5883_v54, %v6027_v37 }
 0x49a   :  { %v6029_v17 = vpop.permute.xlu0 %996  ;;  %v6031_v5 = vpop.permute.xlu1 %3968  ;;  %v1478_v49 = vsel %vm705_vm11, %v9802_v59, %v1477_v13  ;;  %v9806_v13 = vrot.slane %v5832_v63, 3  ;;  %v1517_v59 = vrot.slane %v1504_v42, 4  ;;  %v1702_v42 = vsel %vm672_vm10, %v1700_v39, %v9648_v15 }
 0x49b   :  { %9800 = vst [vmem:[#allocation75_spill] sm:$0xff] %v6029_v17  ;;  %9801 = vst [vmem:[#allocation76_spill] sm:$0xff] %v6031_v5  ;;  %v1667_v46 = vsel %vm639_vm9, %v1665_v16, %v9805_v0  ;;  %v1691_v16 = vmul.f32 %v5799_v48, %v6027_v37  ;;  %v6071_v0 = vstv %s4593_s0  ;;  %s6731_s0 = sld [smem:[#allocation9 + $0x2a]] }
 0x49c   :  { %1670 = vrot.lane.b32.xlu0 %v1662_v29, %s4834_s24  ;;  %1486 = vrot.lane.b32.xlu1 %v1478_v49, %s4833_s22  ;;  %v1483_v29 = vsel %vm705_vm11, %v9806_v13, %v1482_v58  ;;  %v1507_v49 = vmul.f32 %v5847_v24, %v5395_v8  ;;  %v6082_v24 = vmul.f32 %v5854_v18, %v6071_v0  ;;  %v9649_v13 = vrot.slane %v6063_v4, 2 }
 0x49d   :  { %v1705_v40 = vrot.slane %v1691_v16, 2  ;;  %v1728_v39 = vmul.f32 %v5776_v41, %v6071_v0  ;;  %v6100_v50 = vmul.f32 %v5883_v54, %v6071_v0  ;;  %v9812_v16 = vrot.slane %v5887_v25, 4 }
 0x49e   :  { %v6050_v5 = vpop.permute.xlu0 %1032  ;;  %v6052_v1 = vpop.permute.xlu1 %874  ;;  %v1731_v34 = vmul.f32 %v5799_v48, %v6071_v0 }
 0x49f   :  { %9803 = vst [vmem:[#allocation77_spill] sm:$0xff] %v6050_v5  ;;  %9804 = vst [vmem:[#allocation78_spill] sm:$0xff] %v6052_v1  ;;  %v1740_v7 = vrot.slane %v1728_v39, 3 }
 0x4a0   :  { %1674 = vrot.lane.b32.xlu0 %v1667_v46, %s4834_s24  ;;  %1490 = vrot.lane.b32.xlu1 %v1483_v29, %s4833_s22  ;;  %v1518_v46 = vsel %vm738_vm12, %v9809_v55, %v1517_v59  ;;  %v1522_v29 = vrot.slane %v1507_v49, 4  ;;  %v1547_v59 = vmul.f32 %v5895_v32, %v5395_v8  ;;  %v1707_v49 = vsel %vm672_vm10, %v1705_v40, %v9649_v13 }
 0x4a1   :  { %v9650_v55 = vrot.slane %v6082_v24, 3  ;;  %v6115_v32 = vstv %s4594_s7  ;;  %v1745_v13 = vrot.slane %v1731_v34, 3  ;;  %s6785_s7 = sld [smem:[#allocation9 + $0x39]] }
 0x4a2   :  { %v6073_v63 = vpop.permute.xlu0 %1036  ;;  %v6075_v58 = vpop.permute.xlu1 %878  ;;  %v1768_v25 = vmul.f32 %v5776_v41, %v6115_v32  ;;  %v6151_v34 = vmul.f32 %v5883_v54, %v6115_v32 }
 0x4a3   :  { %9807 = vst [vmem:[#allocation79_spill] sm:$0xff] %v6073_v63  ;;  %9808 = vst [vmem:[#allocation80_spill] sm:$0xff] %v6075_v58 }
 0x4a4   :  { %1710 = vrot.lane.b32.xlu0 %v1702_v42, %s4834_s24  ;;  %1526 = vrot.lane.b32.xlu1 %v1518_v46, %s4833_s22  ;;  %v1523_v42 = vsel %vm738_vm12, %v9812_v16, %v1522_v29  ;;  %v1557_v46 = vrot.slane %v1544_v20, 5  ;;  %v6124_v20 = vmul.f32 %v5854_v18, %v6115_v32  ;;  %v1742_v29 = vsel %vm705_vm11, %v1740_v7, %v9650_v55 }
 0x4a5   :  { %v1562_v16 = vrot.slane %v1547_v59, 5  ;;  %v9818_v7 = vrot.slane %v6100_v50, 3  ;;  %v1780_v55 = vrot.slane %v1768_v25, 4  ;;  %v9822_v25 = vrot.slane %v5948_v31, 6 }
 0x4a6   :  { %v6094_v15 = vpop.permute.xlu0 %1072  ;;  %v6096_v53 = vpop.permute.xlu1 %914  ;;  %v9651_v59 = vrot.slane %v6124_v20, 4 }
 0x4a7   :  { %9810 = vst [vmem:[#allocation81_spill] sm:$0xff] %v6094_v15  ;;  %9811 = vst [vmem:[#allocation82_spill] sm:$0xff] %v6096_v53 }
 0x4a8   :  { %1714 = vrot.lane.b32.xlu0 %v1707_v49, %s4834_s24  ;;  %1530 = vrot.lane.b32.xlu1 %v1523_v42, %s4833_s22  ;;  %v9815_v49 = vrot.slane %v5906_v62, 5  ;;  %v1584_v42 = vmul.f32 %v5939_v38, %v5373_v56  ;;  %v1747_v62 = vsel %vm705_vm11, %v1745_v13, %v9818_v7  ;;  %v1771_v13 = vmul.f32 %v5799_v48, %v6115_v32 }
 0x4a9   :  { %v6159_v7 = vstv %s4595_s1  ;;  %s6861_s1 = sld [smem:[#allocation9 + $0x40]] }
 0x4aa   :  { %v6117_v11 = vpop.permute.xlu0 %1076  ;;  %v6119_v40 = vpop.permute.xlu1 %918  ;;  %v1558_v39 = vsel %vm771_vm13, %v9815_v49, %v1557_v46  ;;  %v9819_v46 = vrot.slane %v5924_v22, 5  ;;  %v1597_v49 = vrot.slane %v1584_v42, 6  ;;  %v1782_v42 = vsel %vm738_vm12, %v1780_v55, %v9651_v59 }
 0x4ab   :  { %9813 = vst [vmem:[#allocation83_spill] sm:$0xff] %v6117_v11  ;;  %9814 = vst [vmem:[#allocation84_spill] sm:$0xff] %v6119_v40  ;;  %v1785_v43 = vrot.slane %v1771_v13, 4  ;;  %v1808_v55 = vmul.f32 %v5776_v41, %v6159_v7  ;;  %v6188_v31 = vmul.f32 %v5883_v54, %v6159_v7  ;;  %v9825_v13 = vrot.slane %v5975_v61, 6  ;;  %v6925_v11 = vld [vmem:[#allocation3 + $0x50] sm:$0xff] }
 0x4ac   :  { %1750 = vrot.lane.b32.xlu0 %v1742_v29, %s4834_s24  ;;  %1566 = vrot.lane.b32.xlu1 %v1558_v39, %s4833_s22  ;;  %v1563_v29 = vsel %vm771_vm13, %v9819_v46, %v1562_v16  ;;  %v1587_v39 = vmul.f32 %v5939_v38, %v5395_v8  ;;  %v6170_v38 = vmul.f32 %v5854_v18, %v6159_v7  ;;  %v9652_v46 = vrot.slane %v6151_v34, 4 }
 0x4ad   :  { %v1811_v19 = vmul.f32 %v5799_v48, %v6159_v7 }
 0x4ae   :  { %v6138_v3 = vpop.permute.xlu0 %1138  ;;  %v6140_v10 = vpop.permute.xlu1 %954 }
 0x4af   :  { %9816 = vst [vmem:[#allocation85_spill] sm:$0xff] %v6138_v3  ;;  %9817 = vst [vmem:[#allocation86_spill] sm:$0xff] %v6140_v10  ;;  %v6955_v26 = vstv %s6861_s1  ;;  %s8150_s1 = sld [smem:[#allocation9 + $0x5e]] }
 0x4b0   :  { %1754 = vrot.lane.b32.xlu0 %v1747_v62, %s4834_s24  ;;  %1570 = vrot.lane.b32.xlu1 %v1563_v29, %s4833_s22  ;;  %v1598_v62 = vsel %vm175_vm4, %v9822_v25, %v1597_v49  ;;  %v1602_v29 = vrot.slane %v1587_v39, 6  ;;  %v1653_v49 = vmul.f32 %v5983_v28, %v5395_v8  ;;  %v1787_v39 = vsel %vm738_vm12, %v1785_v43, %v9652_v46 }
 0x4b1   :  { %v9653_v25 = vrot.slane %v6170_v38, 5  ;;  %v6203_v28 = vstv %s4596_s8  ;;  %v1825_v46 = vrot.slane %v1811_v19, 5  ;;  %s6957_s8 = sld [smem:[#allocation9 + $0x47]] }
 0x4b2   :  { %v6161_v22 = vpop.permute.xlu0 %1142  ;;  %v6163_v16 = vpop.permute.xlu1 %958  ;;  %v1848_v61 = vmul.f32 %v5776_v41, %v6203_v28  ;;  %v6239_v19 = vmul.f32 %v5883_v54, %v6203_v28 }
 0x4b3   :  { %9820 = vst [vmem:[#allocation87_spill] sm:$0xff] %v6161_v22  ;;  %9821 = vst [vmem:[#allocation88_spill] sm:$0xff] %v6163_v16 }
 0x4b4   :  { %1790 = vrot.lane.b32.xlu0 %v1782_v42, %s4834_s24  ;;  %1606 = vrot.lane.b32.xlu1 %v1598_v62, %s4833_s22  ;;  %v1603_v42 = vsel %vm175_vm4, %v9825_v13, %v1602_v29  ;;  %v1663_v62 = vrot.slane %v1650_v44, 1  ;;  %v6212_v44 = vmul.f32 %v5854_v18, %v6203_v28  ;;  %v1668_v13 = vrot.slane %v1653_v49, 1 }
 0x4b6   :  { %v6182_v59 = vpop.permute.xlu0 %1178  ;;  %v6184_v60 = vpop.permute.xlu1 %994  ;;  %v9655_v49 = vrot.slane %v6212_v44, 6 }
 0x4b7   :  { %9823 = vst [vmem:[#allocation89_spill] sm:$0xff] %v6182_v59  ;;  %9824 = vst [vmem:[#allocation90_spill] sm:$0xff] %v6184_v60  ;;  %v1820_v60 = vrot.slane %v1808_v55, 5 }
 0x4b8   :  { %1794 = vrot.lane.b32.xlu0 %v1787_v39, %s4834_s24  ;;  %1610 = vrot.lane.b32.xlu1 %v1603_v42, %s4833_s22  ;;  %v9828_v39 = vrot.slane %v5994_v12, 1  ;;  %v1690_v42 = vmul.f32 %v6027_v37, %v5373_v56  ;;  %v9832_v56 = vrot.slane %v6012_v30, 1 }
 0x4b9   :  { %v1822_v29 = vsel %vm771_vm13, %v1820_v60, %v9653_v25  ;;  %v9831_v60 = vrot.slane %v6188_v31, 5 }
 0x4ba   :  { %v6205_v10 = vpop.permute.xlu0 %1182  ;;  %v6207_v43 = vpop.permute.xlu1 %998  ;;  %v1664_v55 = vsel %vm639_vm9, %v9828_v39, %v1663_v62  ;;  %v1669_v62 = vsel %vm639_vm9, %v9832_v56, %v1668_v13  ;;  %v1693_v39 = vmul.f32 %v6027_v37, %v5395_v8  ;;  %v6257_v56 = vld [vmem:[#allocation3 + $0x10] sm:$0x3f] }
 0x4bb   :  { %9826 = vst [vmem:[#allocation91_spill] sm:$0xff] %v6205_v10  ;;  %9827 = vst [vmem:[#allocation92_spill] sm:$0xff] %v6207_v43  ;;  %v1827_v12 = vsel %vm771_vm13, %v1825_v46, %v9831_v60  ;;  %v1851_v46 = vmul.f32 %v5799_v48, %v6203_v28  ;;  %v6247_v60 = vstv %s4598_s2  ;;  %v1730_v8 = vmul.f32 %v6257_v56, %v6071_v0  ;;  %s7058_s2 = sld [smem:[#allocation9 + $0x4e]] }
 0x4bc   :  { %1830 = vrot.lane.b32.xlu0 %v1822_v29, %s4834_s24  ;;  %1672 = vrot.lane.b32.xlu1 %v1664_v55, %s4834_s24  ;;  %v1703_v29 = vrot.slane %v1690_v42, 2  ;;  %v1860_v55 = vrot.slane %v1848_v61, 6  ;;  %v6255_v42 = vmul.f32 %v5854_v18, %v6247_v60  ;;  %v9835_v61 = vrot.slane %v6036_v21, 2 }
 0x4bd   :  { %v1708_v25 = vrot.slane %v1693_v39, 2  ;;  %v1743_v21 = vrot.slane %v1730_v8, 3  ;;  %v9838_v39 = vrot.slane %v6063_v4, 2 }
 0x4be   :  { %v6226_v43 = vpop.permute.xlu0 %1218  ;;  %v6228_v53 = vpop.permute.xlu1 %1034  ;;  %v1862_v37 = vsel %vm175_vm4, %v1860_v55, %v9655_v49  ;;  %v9656_v55 = vrot.slane %v6255_v42, 1  ;;  %v6305_v49 = vstv %s4599_s9  ;;  %s7149_s9 = sld [smem:[#allocation9 + $0x55]] }
 0x4bf   :  { %9829 = vst [vmem:[#allocation93_spill] sm:$0xff] %v6226_v43  ;;  %9830 = vst [vmem:[#allocation94_spill] sm:$0xff] %v6228_v53  ;;  %v1914_v53 = vmul.f32 %v5776_v41, %v6247_v60 }
 0x4c0   :  { %1834 = vrot.lane.b32.xlu0 %v1827_v12, %s4834_s24  ;;  %1676 = vrot.lane.b32.xlu1 %v1669_v62, %s4834_s24  ;;  %v1704_v12 = vsel %vm672_vm10, %v9835_v61, %v1703_v29  ;;  %v9654_v62 = vrot.slane %v6239_v19, 6  ;;  %v6285_v61 = vmul.f32 %v5883_v54, %v6247_v60 }
 0x4c1   :  { %v1926_v8 = vrot.slane %v1914_v53, 1 }
 0x4c2   :  { %v6249_v30 = vpop.permute.xlu0 %1222  ;;  %v6251_v13 = vpop.permute.xlu1 %1038  ;;  %v9657_v53 = vrot.slane %v6285_v61, 1 }
 0x4c3   :  { %9833 = vst [vmem:[#allocation95_spill] sm:$0xff] %v6249_v30  ;;  %9834 = vst [vmem:[#allocation96_spill] sm:$0xff] %v6251_v13  ;;  %v1865_v13 = vrot.slane %v1851_v46, 6  ;;  %v6287_v46 = vld [vmem:[#allocation3 + $0x28] sm:$0x3f] }
 0x4c4   :  { %1870 = vrot.lane.b32.xlu0 %v1862_v37, %s4834_s24  ;;  %1712 = vrot.lane.b32.xlu1 %v1704_v12, %s4834_s24  ;;  %v1709_v37 = vsel %vm672_vm10, %v9838_v39, %v1708_v25  ;;  %v1733_v12 = vmul.f32 %v6287_v46, %v6071_v0  ;;  %v1928_v39 = vsel %vm639_vm9, %v1926_v8, %v9656_v55 }
 0x4c5   :  { %v1867_v29 = vsel %vm175_vm4, %v1865_v13, %v9654_v62  ;;  %v1917_v13 = vmul.f32 %v5799_v48, %v6247_v60  ;;  %v9841_v62 = vrot.slane %v6082_v24, 3  ;;  %v1773_v55 = vmul.f32 %v6287_v46, %v6115_v32 }
 0x4c6   :  { %v6272_v16 = vpop.permute.xlu0 %1258  ;;  %v6274_v57 = vpop.permute.xlu1 %1074 }
 0x4c7   :  { %9836 = vst [vmem:[#allocation97_spill] sm:$0xff] %v6272_v16  ;;  %9837 = vst [vmem:[#allocation98_spill] sm:$0xff] %v6274_v57  ;;  %v1744_v0 = vsel %vm705_vm11, %v9841_v62, %v1743_v21  ;;  %v1770_v57 = vmul.f32 %v6257_v56, %v6115_v32  ;;  %v1931_v24 = vrot.slane %v1917_v13, 1  ;;  %v1954_v62 = vmul.f32 %v5776_v41, %v6305_v49 }
 0x4c8   :  { %1874 = vrot.lane.b32.xlu0 %v1867_v29, %s4834_s24  ;;  %1716 = vrot.lane.b32.xlu1 %v1709_v37, %s4834_s24  ;;  %v1748_v29 = vrot.slane %v1733_v12, 3  ;;  %v6310_v37 = vmul.f32 %v5854_v18, %v6305_v49  ;;  %v6324_v12 = vmul.f32 %v5883_v54, %v6305_v49  ;;  %v9844_v13 = vrot.slane %v6100_v50, 3 }
 0x4c9   :  { %v1783_v40 = vrot.slane %v1770_v57, 4  ;;  %v1966_v1 = vrot.slane %v1954_v62, 2 }
 0x4ca   :  { %v6295_v4 = vpop.permute.xlu0 %1262  ;;  %v6297_v25 = vpop.permute.xlu1 %1078  ;;  %v9659_v50 = vrot.slane %v6324_v12, 2 }
 0x4cb   :  { %9839 = vst [vmem:[#allocation99_spill] sm:$0xff] %v6295_v4  ;;  %9840 = vst [vmem:[#allocation100_spill] sm:$0xff] %v6297_v25  ;;  %v9658_v25 = vrot.slane %v6310_v37, 2  ;;  %v6831_v4 = vld [vmem:[#allocation3 + $0x20] sm:$0xff] }
 0x4cc   :  { %1936 = vrot.lane.b32.xlu0 %v1928_v39, %s4835_s26  ;;  %1752 = vrot.lane.b32.xlu1 %v1744_v0, %s4834_s24  ;;  %v1933_v39 = vsel %vm639_vm9, %v1931_v24, %v9657_v53  ;;  %v1749_v0 = vsel %vm705_vm11, %v9844_v13, %v1748_v29  ;;  %v1788_v24 = vrot.slane %v1773_v55, 4  ;;  %v6344_v29 = vstv %s4600_s10  ;;  %s7219_s10 = sld [smem:[#allocation9 + $0x5c]] }
 0x4cd   :  { %v1968_v57 = vsel %vm672_vm10, %v1966_v1, %v9658_v25  ;;  %v6354_v62 = vmul.f32 %v5854_v18, %v6344_v29  ;;  %v1994_v53 = vmul.f32 %v5776_v41, %v6344_v29 }
 0x4ce   :  { %v6318_v21 = vpop.permute.xlu0 %1298  ;;  %v6320_v8 = vpop.permute.xlu1 %1140 }
 0x4cf   :  { %9842 = vst [vmem:[#allocation101_spill] sm:$0xff] %v6318_v21  ;;  %9843 = vst [vmem:[#allocation102_spill] sm:$0xff] %v6320_v8  ;;  %v1957_v8 = vmul.f32 %v5799_v48, %v6305_v49 }
 0x4d0   :  { %1940 = vrot.lane.b32.xlu0 %v1933_v39, %s4835_s26  ;;  %1756 = vrot.lane.b32.xlu1 %v1749_v0, %s4834_s24  ;;  %v9847_v39 = vrot.slane %v6124_v20, 4  ;;  %v1810_v0 = vmul.f32 %v6257_v56, %v6159_v7 }
 0x4d1   :  { %v1971_v55 = vrot.slane %v1957_v8, 2  ;;  %v6375_v8 = vmul.f32 %v5883_v54, %v6344_v29 }
 0x4d2   :  { %v6339_v32 = vpop.permute.xlu0 %1302  ;;  %v6341_v58 = vpop.permute.xlu1 %1144  ;;  %v1784_v13 = vsel %vm738_vm12, %v9847_v39, %v1783_v40  ;;  %v9850_v39 = vrot.slane %v6151_v34, 4  ;;  %v1997_v34 = vmul.f32 %v5799_v48, %v6344_v29 }
 0x4d3   :  { %9845 = vst [vmem:[#allocation103_spill] sm:$0xff] %v6339_v32  ;;  %9846 = vst [vmem:[#allocation104_spill] sm:$0xff] %v6341_v58  ;;  %v1973_v40 = vsel %vm672_vm10, %v1971_v55, %v9659_v50  ;;  %v1823_v58 = vrot.slane %v1810_v0, 5  ;;  %v6383_v55 = vstv %s4601_s11  ;;  %v9660_v50 = vrot.slane %v6375_v8, 3  ;;  %s7313_s11 = sld [smem:[#allocation9 + $0x3a]] }
 0x4d4   :  { %1976 = vrot.lane.b32.xlu0 %v1968_v57, %s4835_s26  ;;  %1792 = vrot.lane.b32.xlu1 %v1784_v13, %s4834_s24  ;;  %v1789_v25 = vsel %vm738_vm12, %v9850_v39, %v1788_v24  ;;  %v9661_v57 = vrot.slane %v6354_v62, 3  ;;  %v1813_v13 = vmul.f32 %v6287_v46, %v6159_v7  ;;  %v6391_v39 = vmul.f32 %v5854_v18, %v6383_v55 }
 0x4d5   :  { %v1850_v7 = vmul.f32 %v6257_v56, %v6203_v28 }
 0x4d6   :  { %v6362_v1 = vpop.permute.xlu0 %1338  ;;  %v6364_v20 = vpop.permute.xlu1 %1180  ;;  %v1828_v9 = vrot.slane %v1813_v13, 5  ;;  %v9856_v13 = vrot.slane %v6188_v31, 5 }
 0x4d7   :  { %9848 = vst [vmem:[#allocation105_spill] sm:$0xff] %v6362_v1  ;;  %9849 = vst [vmem:[#allocation106_spill] sm:$0xff] %v6364_v20  ;;  %v2006_v20 = vrot.slane %v1994_v53, 3  ;;  %v9853_v53 = vrot.slane %v6170_v38, 5  ;;  %v2011_v1 = vrot.slane %v1997_v34, 3  ;;  %v1863_v38 = vrot.slane %v1850_v7, 6 }
 0x4d8   :  { %1980 = vrot.lane.b32.xlu0 %v1973_v40, %s4835_s26  ;;  %1796 = vrot.lane.b32.xlu1 %v1789_v25, %s4834_s24  ;;  %v1853_v34 = vmul.f32 %v6287_v46, %v6203_v28 }
 0x4d9   :  { %v2008_v25 = vsel %vm705_vm11, %v2006_v20, %v9661_v57  ;;  %v1824_v40 = vsel %vm771_vm13, %v9853_v53, %v1823_v58  ;;  %v9662_v20 = vrot.slane %v6391_v39, 4  ;;  %v2013_v58 = vsel %vm705_vm11, %v2011_v1, %v9660_v50 }
 0x4da   :  { %v6385_v24 = vpop.permute.xlu0 %1342  ;;  %v6387_v0 = vpop.permute.xlu1 %1184  ;;  %v6419_v53 = vmul.f32 %v5883_v54, %v6383_v55  ;;  %v6437_v50 = vstv %s4602_s12  ;;  %v1916_v57 = vmul.f32 %v6257_v56, %v6247_v60  ;;  %s7378_s12 = sld [smem:[#allocation9 + $0x41]] }
 0x4db   :  { %9851 = vst [vmem:[#allocation107_spill] sm:$0xff] %v6385_v24  ;;  %9852 = vst [vmem:[#allocation108_spill] sm:$0xff] %v6387_v0  ;;  %v2034_v0 = vmul.f32 %v5776_v41, %v6383_v55 }
 0x4dc   :  { %2016 = vrot.lane.b32.xlu0 %v2008_v25, %s4835_s26  ;;  %1832 = vrot.lane.b32.xlu1 %v1824_v40, %s4834_s24  ;;  %v1829_v25 = vsel %vm771_vm13, %v9856_v13, %v1828_v9  ;;  %v2037_v40 = vmul.f32 %v5799_v48, %v6383_v55  ;;  %v9859_v13 = vrot.slane %v6212_v44, 6 }
 0x4dd   :  { %v2046_v7 = vrot.slane %v2034_v0, 4  ;;  %v9663_v0 = vrot.slane %v6419_v53, 4 }
 0x4de   :  { %v6406_v21 = vpop.permute.xlu0 %1404  ;;  %v6408_v24 = vpop.permute.xlu1 %1220  ;;  %v1864_v28 = vsel %vm175_vm4, %v9859_v13, %v1863_v38  ;;  %v2051_v44 = vrot.slane %v2037_v40, 4  ;;  %v2074_v38 = vmul.f32 %v5776_v41, %v6437_v50  ;;  %v9862_v40 = vrot.slane %v6239_v19, 6 }
 0x4df   :  { %9854 = vst [vmem:[#allocation109_spill] sm:$0xff] %v6406_v21  ;;  %9855 = vst [vmem:[#allocation110_spill] sm:$0xff] %v6408_v24  ;;  %v2048_v9 = vsel %vm738_vm12, %v2046_v7, %v9662_v20  ;;  %v1919_v20 = vmul.f32 %v6287_v46, %v6247_v60 }
 0x4e0   :  { %2020 = vrot.lane.b32.xlu0 %v2013_v58, %s4835_s26  ;;  %1836 = vrot.lane.b32.xlu1 %v1829_v25, %s4834_s24  ;;  %v1868_v58 = vrot.slane %v1853_v34, 6  ;;  %v6442_v25 = vmul.f32 %v5854_v18, %v6437_v50  ;;  %v6456_v34 = vmul.f32 %v5883_v54, %v6437_v50 }
 0x4e2   :  { %v6427_v1 = vpop.permute.xlu0 %1408  ;;  %v6429_v31 = vpop.permute.xlu1 %1224  ;;  %v9664_v24 = vrot.slane %v6442_v25, 5  ;;  %v9665_v19 = vrot.slane %v6456_v34, 5 }
 0x4e3   :  { %9857 = vst [vmem:[#allocation111_spill] sm:$0xff] %v6427_v1  ;;  %9858 = vst [vmem:[#allocation112_spill] sm:$0xff] %v6429_v31  ;;  %v1929_v31 = vrot.slane %v1916_v57, 1  ;;  %v6791_v1 = vld [vmem:[#allocation3 + $0x8] sm:$0xff] }
 0x4e4   :  { %2056 = vrot.lane.b32.xlu0 %v2048_v9, %s4835_s26  ;;  %1872 = vrot.lane.b32.xlu1 %v1864_v28, %s4834_s24  ;;  %v2053_v9 = vsel %vm738_vm12, %v2051_v44, %v9663_v0  ;;  %v1869_v28 = vsel %vm175_vm4, %v9862_v40, %v1868_v58  ;;  %v1934_v44 = vrot.slane %v1919_v20, 1  ;;  %v6476_v58 = vstv %s4603_s13  ;;  %s7400_s13 = sld [smem:[#allocation9 + $0x48]] }
 0x4e5   :  { %v2114_v0 = vmul.f32 %v5776_v41, %v6476_v58 }
 0x4e6   :  { %v6450_v7 = vpop.permute.xlu0 %1444  ;;  %v6452_v13 = vpop.permute.xlu1 %1260 }
 0x4e7   :  { %9860 = vst [vmem:[#allocation113_spill] sm:$0xff] %v6450_v7  ;;  %9861 = vst [vmem:[#allocation114_spill] sm:$0xff] %v6452_v13  ;;  %v2077_v13 = vmul.f32 %v5799_v48, %v6437_v50  ;;  %v2086_v7 = vrot.slane %v2074_v38, 5  ;;  %v6486_v38 = vmul.f32 %v5854_v18, %v6476_v58 }
 0x4e8   :  { %2060 = vrot.lane.b32.xlu0 %v2053_v9, %s4835_s26  ;;  %1876 = vrot.lane.b32.xlu1 %v1869_v28, %s4834_s24  ;;  %v9865_v9 = vrot.slane %v6255_v42, 1  ;;  %v1956_v28 = vmul.f32 %v6257_v56, %v6305_v49 }
 0x4e9   :  { %v2088_v57 = vsel %vm771_vm13, %v2086_v7, %v9664_v24  ;;  %v2091_v20 = vrot.slane %v2077_v13, 5  ;;  %v9666_v13 = vrot.slane %v6486_v38, 6 }
 0x4ea   :  { %v6471_v60 = vpop.permute.xlu0 %1448  ;;  %v6473_v21 = vpop.permute.xlu1 %1264  ;;  %v1930_v40 = vsel %vm639_vm9, %v9865_v9, %v1929_v31  ;;  %v6503_v9 = vmul.f32 %v5883_v54, %v6476_v58  ;;  %v1969_v24 = vrot.slane %v1956_v28, 2 }
 0x4eb   :  { %9863 = vst [vmem:[#allocation115_spill] sm:$0xff] %v6471_v60  ;;  %9864 = vst [vmem:[#allocation116_spill] sm:$0xff] %v6473_v21  ;;  %v2093_v31 = vsel %vm771_vm13, %v2091_v20, %v9665_v19  ;;  %v1959_v21 = vmul.f32 %v6287_v46, %v6305_v49  ;;  %v2117_v20 = vmul.f32 %v5799_v48, %v6476_v58  ;;  %v2126_v19 = vrot.slane %v2114_v0, 6 }
 0x4ec   :  { %2096 = vrot.lane.b32.xlu0 %v2088_v57, %s4835_s26  ;;  %1938 = vrot.lane.b32.xlu1 %v1930_v40, %s4835_s26  ;;  %v9868_v57 = vrot.slane %v6285_v61, 1 }
 0x4ed   :  { %v2131_v28 = vrot.slane %v2117_v20, 6 }
 0x4ee   :  { %v6494_v7 = vpop.permute.xlu0 %1484  ;;  %v6496_v42 = vpop.permute.xlu1 %1300  ;;  %v1935_v40 = vsel %vm639_vm9, %v9868_v57, %v1934_v44  ;;  %v9871_v57 = vrot.slane %v6310_v37, 2  ;;  %v9874_v37 = vrot.slane %v6503_v9, 6 }
 0x4ef   :  { %9866 = vst [vmem:[#allocation117_spill] sm:$0xff] %v6494_v7  ;;  %9867 = vst [vmem:[#allocation118_spill] sm:$0xff] %v6496_v42  ;;  %v6515_v42 = vstv %s4605_s14  ;;  %v1996_v7 = vmul.f32 %v6257_v56, %v6344_v29  ;;  %s7461_s14 = sld [smem:[#allocation9 + $0x4f]] }
 0x4f0   :  { %2100 = vrot.lane.b32.xlu0 %v2093_v31, %s4835_s26  ;;  %1942 = vrot.lane.b32.xlu1 %v1935_v40, %s4835_s26  ;;  %v6524_v49 = vmul.f32 %v5854_v18, %v6515_v42  ;;  %v2128_v31 = vsel %vm175_vm4, %v2126_v19, %v9666_v13  ;;  %v1970_v0 = vsel %vm672_vm10, %v9871_v57, %v1969_v24  ;;  %v1974_v40 = vrot.slane %v1959_v21, 2 }
 0x4f1   :  { %v2133_v24 = vsel %vm175_vm4, %v2131_v28, %v9874_v37  ;;  %v9875_v19 = vrot.slane %v6324_v12, 2  ;;  %v2009_v57 = vrot.slane %v1996_v7, 3  ;;  %v6551_v20 = vmul.f32 %v5883_v54, %v6515_v42 }
 0x4f2   :  { %v6517_v61 = vpop.permute.xlu0 %1488  ;;  %v6519_v44 = vpop.permute.xlu1 %1304  ;;  %v9667_v21 = vrot.slane %v6524_v49, 1  ;;  %v2183_v28 = vmul.f32 %v5799_v48, %v6515_v42  ;;  %v6559_v37 = vstv %s4606_s15  ;;  %s7488_s15 = sld [smem:[#allocation9 + $0x56]] }
 0x4f3   :  { %9869 = vst [vmem:[#allocation119_spill] sm:$0xff] %v6517_v61  ;;  %9870 = vst [vmem:[#allocation120_spill] sm:$0xff] %v6519_v44  ;;  %v2180_v44 = vmul.f32 %v5776_v41, %v6515_v42  ;;  %v9908_v3 = vrot.slane %v6551_v20, 1 }
 0x4f4   :  { %2136 = vrot.lane.b32.xlu0 %v2128_v31, %s4835_s26  ;;  %1978 = vrot.lane.b32.xlu1 %v1970_v0, %s4835_s26  ;;  %v1975_v31 = vsel %vm672_vm10, %v9875_v19, %v1974_v40  ;;  %v1999_v0 = vmul.f32 %v6287_v46, %v6344_v29  ;;  %v6570_v29 = vmul.f32 %v5854_v18, %v6559_v37  ;;  %v9668_v19 = vrot.slane %v6551_v20, 1 }
 0x4f5   :  { %v2192_v13 = vrot.slane %v2180_v44, 1  ;;  %v9878_v44 = vrot.slane %v6354_v62, 3 }
 0x4f6   :  { %v6538_v61 = vpop.permute.xlu0 %1524  ;;  %v6540_v60 = vpop.permute.xlu1 %1340 }
 0x4f7   :  { %9872 = vst [vmem:[#allocation121_spill] sm:$0xff] %v6538_v61  ;;  %9873 = vst [vmem:[#allocation122_spill] sm:$0xff] %v6540_v60  ;;  %v2194_v40 = vsel %vm639_vm9, %v2192_v13, %v9667_v21  ;;  %v2036_v60 = vmul.f32 %v6257_v56, %v6383_v55  ;;  %v2220_v13 = vmul.f32 %v5776_v41, %v6559_v37  ;;  %v2197_v21 = vrot.slane %v2183_v28, 1 }
 0x4f8   :  { %2140 = vrot.lane.b32.xlu0 %v2133_v24, %s4835_s26  ;;  %1982 = vrot.lane.b32.xlu1 %v1975_v31, %s4835_s26  ;;  %v2010_v24 = vsel %vm705_vm11, %v9878_v44, %v2009_v57  ;;  %v2014_v31 = vrot.slane %v1999_v0, 3  ;;  %v6589_v57 = vmul.f32 %v5883_v54, %v6559_v37  ;;  %v2039_v28 = vmul.f32 %v6287_v46, %v6383_v55 }
 0x4f9   :  { %v2199_v0 = vsel %vm639_vm9, %v2197_v21, %v9668_v19  ;;  %v2232_v62 = vrot.slane %v2220_v13, 2 }
 0x4fa   :  { %v6561_v12 = vpop.permute.xlu0 %1528  ;;  %v6563_v7 = vpop.permute.xlu1 %1344  ;;  %v9916_v63 = vrot.slane %v6589_v57, 2 }
 0x4fb   :  { %9876 = vst [vmem:[#allocation123_spill] sm:$0xff] %v6561_v12  ;;  %9877 = vst [vmem:[#allocation124_spill] sm:$0xff] %v6563_v7 }
 0x4fc   :  { %2202 = vrot.lane.b32.xlu0 %v2194_v40, %s4836_s27  ;;  %2018 = vrot.lane.b32.xlu1 %v2010_v24, %s4835_s26  ;;  %v9881_v40 = vrot.slane %v6375_v8, 3  ;;  %v2049_v24 = vrot.slane %v2036_v60, 4  ;;  %v9884_v8 = vrot.slane %v6570_v29, 2 }
 0x4fe   :  { %v6582_v7 = vpop.permute.xlu0 %1564  ;;  %v6584_v61 = vpop.permute.xlu1 %1406  ;;  %v2015_v44 = vsel %vm705_vm11, %v9881_v40, %v2014_v31  ;;  %v2234_v60 = vsel %vm672_vm10, %v2232_v62, %v9884_v8  ;;  %v9885_v31 = vrot.slane %v6391_v39, 4  ;;  %v2054_v40 = vrot.slane %v2039_v28, 4 }
 0x4ff   :  { %9879 = vst [vmem:[#allocation125_spill] sm:$0xff] %v6582_v7  ;;  %9880 = vst [vmem:[#allocation126_spill] sm:$0xff] %v6584_v61  ;;  %v2223_v61 = vmul.f32 %v5799_v48, %v6559_v37  ;;  %v6603_v7 = vstv %s4607_s16  ;;  %s7537_s16 = sld [smem:[#allocation9 + $0x5d]] }
 0x500   :  { %2206 = vrot.lane.b32.xlu0 %v2199_v0, %s4836_s27  ;;  %2022 = vrot.lane.b32.xlu1 %v2015_v44, %s4835_s26  ;;  %v6614_v55 = vmul.f32 %v5854_v18, %v6603_v7  ;;  %v2050_v13 = vsel %vm738_vm12, %v9885_v31, %v2049_v24  ;;  %v9669_v0 = vrot.slane %v6589_v57, 2  ;;  %v2076_v44 = vmul.f32 %v6257_v56, %v6437_v50 }
 0x501   :  { %v2260_v62 = vmul.f32 %v5776_v41, %v6603_v7  ;;  %v2237_v8 = vrot.slane %v2223_v61, 2  ;;  %v6633_v24 = vmul.f32 %v5883_v54, %v6603_v7  ;;  %v2079_v61 = vmul.f32 %v6287_v46, %v6437_v50 }
 0x502   :  { %v6605_v12 = vpop.permute.xlu0 %1568  ;;  %v6607_v21 = vpop.permute.xlu1 %1410  ;;  %v2089_v41 = vrot.slane %v2076_v44, 5  ;;  %v2263_v39 = vmul.f32 %v5799_v48, %v6603_v7  ;;  %v6657_v44 = vstv %s4608_s17  ;;  %v9921_v51 = vrot.slane %v6614_v55, 3  ;;  %s7587_s17 = sld [smem:[#allocation9 + $0x3b]] }
 0x503   :  { %9882 = vst [vmem:[#allocation127_spill] sm:$0xff] %v6605_v12  ;;  %9883 = vst [vmem:[#allocation128_spill] sm:$0xff] %v6607_v21  ;;  %v2239_v28 = vsel %vm672_vm10, %v2237_v8, %v9669_v0  ;;  %v9670_v50 = vrot.slane %v6633_v24, 3  ;;  %v6664_v48 = vmul.f32 %v5854_v18, %v6657_v44 }
 0x504   :  { %2242 = vrot.lane.b32.xlu0 %v2234_v60, %s4836_s27  ;;  %2058 = vrot.lane.b32.xlu1 %v2050_v13, %s4835_s26  ;;  %v9888_v60 = vrot.slane %v6419_v53, 4  ;;  %v2272_v13 = vrot.slane %v2260_v62, 3  ;;  %v9891_v53 = vrot.slane %v6614_v55, 3 }
 0x506   :  { %v6626_v19 = vpop.permute.xlu0 %1604  ;;  %v6628_v21 = vpop.permute.xlu1 %1446  ;;  %v2055_v31 = vsel %vm738_vm12, %v9888_v60, %v2054_v40  ;;  %v2274_v40 = vsel %vm705_vm11, %v2272_v13, %v9891_v53  ;;  %v2094_v60 = vrot.slane %v2079_v61, 5  ;;  %v2277_v13 = vrot.slane %v2263_v39, 3  ;;  %v6670_v53 = vld [vmem:[#allocation3] sm:$0xff] }
 0x507   :  { %9886 = vst [vmem:[#allocation129_spill] sm:$0xff] %v6626_v19  ;;  %9887 = vst [vmem:[#allocation130_spill] sm:$0xff] %v6628_v21  ;;  %v9895_v39 = vrot.slane %v6456_v34, 5 }
 0x508   :  { %2246 = vrot.lane.b32.xlu0 %v2239_v28, %s4836_s27  ;;  %2062 = vrot.lane.b32.xlu1 %v2055_v31, %s4835_s26  ;;  %v9892_v28 = vrot.slane %v6442_v25, 5  ;;  %v2116_v31 = vmul.f32 %v6257_v56, %v6476_v58  ;;  %v2300_v25 = vmul.f32 %v6670_v53, %v6657_v44  ;;  %v2279_v61 = vsel %vm705_vm11, %v2277_v13, %v9670_v50  ;;  %v6697_v13 = vld [vmem:[#allocation3 + $0x18] sm:$0xff] }
 0x509   :  { %v2303_v34 = vmul.f32 %v6697_v13, %v6657_v44  ;;  %v9898_v50 = vrot.slane %v6486_v38, 6 }
 0x50a   :  { %v6649_v21 = vpop.permute.xlu0 %1608  ;;  %v6651_v8 = vpop.permute.xlu1 %1450  ;;  %v2090_v62 = vsel %vm771_vm13, %v9892_v28, %v2089_v41  ;;  %v2095_v28 = vsel %vm771_vm13, %v9895_v39, %v2094_v60  ;;  %v2312_v60 = vrot.slane %v2300_v25, 4 }
 0x50b   :  { %9889 = vst [vmem:[#allocation131_spill] sm:$0xff] %v6649_v21  ;;  %9890 = vst [vmem:[#allocation132_spill] sm:$0xff] %v6651_v8  ;;  %v2129_v8 = vrot.slane %v2116_v31, 6  ;;  %v6706_v31 = vstv %s6647_s19  ;;  %s7632_s19 = sld [smem:[#allocation9 + $0x42]] }
 0x50c   :  { %2282 = vrot.lane.b32.xlu0 %v2274_v40, %s4836_s27  ;;  %2098 = vrot.lane.b32.xlu1 %v2090_v62, %s4835_s26  ;;  %v6683_v40 = vmul.f32 %v5883_v54, %v6657_v44  ;;  %v9671_v62 = vrot.slane %v6664_v48, 4  ;;  %v2340_v38 = vmul.f32 %v6670_v53, %v6706_v31 }
 0x50e   :  { %v6674_v0 = vpop.permute.xlu0 %1670  ;;  %v6676_v41 = vpop.permute.xlu1 %1486  ;;  %v2314_v25 = vsel %vm738_vm12, %v2312_v60, %v9671_v62  ;;  %v6750_v62 = vmul.f32 %v5883_v54, %v6706_v31  ;;  %v2343_v54 = vmul.f32 %v6697_v13, %v6706_v31 }
 0x50f   :  { %9893 = vst [vmem:[#allocation133_spill] sm:$0xff] %v6674_v0  ;;  %9894 = vst [vmem:[#allocation134_spill] sm:$0xff] %v6676_v41  ;;  %v2119_v0 = vmul.f32 %v6287_v46, %v6476_v58  ;;  %v2130_v41 = vsel %vm175_vm4, %v9898_v50, %v2129_v8 }
 0x510   :  { %2286 = vrot.lane.b32.xlu0 %v2279_v61, %s4836_s27  ;;  %2102 = vrot.lane.b32.xlu1 %v2095_v28, %s4835_s26  ;;  %v9672_v61 = vrot.slane %v6683_v40, 4  ;;  %v6717_v28 = vmul.f32 %v5854_v18, %v6706_v31  ;;  %v2317_v18 = vrot.slane %v2303_v34, 4  ;;  %v9907_v59 = vrot.slane %v6750_v62, 5 }
 0x511   :  { %v2134_v19 = vrot.slane %v2119_v0, 6 }
 0x512   :  { %v6710_v58 = vpop.permute.xlu0 %1674  ;;  %v6712_v39 = vpop.permute.xlu1 %1490  ;;  %v2319_v50 = vsel %vm738_vm12, %v2317_v18, %v9672_v61  ;;  %v9673_v60 = vrot.slane %v6717_v28, 5  ;;  %v2352_v18 = vrot.slane %v2340_v38, 5  ;;  %v6760_v61 = vstv %s6693_s23  ;;  %s7681_s23 = sld [smem:[#allocation9 + $0x3f]] }
 0x513   :  { %9896 = vst [vmem:[#allocation135_spill] sm:$0xff] %v6710_v58  ;;  %9897 = vst [vmem:[#allocation136_spill] sm:$0xff] %v6712_v39  ;;  %v2182_v39 = vmul.f32 %v6257_v56, %v6515_v42  ;;  %v9904_v58 = vrot.slane %v6524_v49, 1  ;;  %v6805_v16 = vmul.f32 %v6670_v53, %v6760_v61  ;;  %v6890_v22 = vmul.f32 %v6697_v13, %v6760_v61 }
 0x514   :  { %2322 = vrot.lane.b32.xlu0 %v2314_v25, %s4836_s27  ;;  %2138 = vrot.lane.b32.xlu1 %v2130_v41, %s4835_s26  ;;  %v9901_v25 = vrot.slane %v6503_v9, 6  ;;  %v6763_v9 = vstv %s6701_s25  ;;  %v2354_v38 = vsel %vm771_vm13, %v2352_v18, %v9673_v60  ;;  %v6798_v18 = vstv %s6729_s6  ;;  %s7688_s25 = sld [smem:[#allocation9 + $0x46]]  ;;  %s7929_s6 = sld [smem:[#allocation9 + $0x49]] }
 0x515   :  { %v2195_v34 = vrot.slane %v2182_v39, 1  ;;  %v6771_v39 = vstv %s6708_s30  ;;  %v6801_v60 = vstv %s6731_s0  ;;  %v6811_v49 = vmul.f32 %v6670_v53, %v6763_v9  ;;  %s7710_s30 = sld [smem:[#allocation9 + $0x4d]]  ;;  %s8017_s0 = sld [smem:[#allocation9 + $0x50]] }
 0x516   :  { %v6737_v0 = vpop.permute.xlu0 %1710  ;;  %v6739_v8 = vpop.permute.xlu1 %1526  ;;  %v2135_v41 = vsel %vm175_vm4, %v9901_v25, %v2134_v19  ;;  %v6766_v19 = vstv %s6703_s29  ;;  %v7026_v14 = vmul.f32 %v6791_v1, %v6801_v60  ;;  %s7698_s29 = sld [smem:[#allocation9 + $0x31]] }
 0x517   :  { %9899 = vst [vmem:[#allocation137_spill] sm:$0xff] %v6737_v0  ;;  %9900 = vst [vmem:[#allocation138_spill] sm:$0xff] %v6739_v8  ;;  %v2185_v0 = vmul.f32 %v6287_v46, %v6515_v42  ;;  %v6755_v8 = vstv %s6691_s21  ;;  %v2196_v21 = vsel %vm639_vm9, %v9904_v58, %v2195_v34  ;;  %v6815_v58 = vmul.f32 %v6670_v53, %v6766_v19  ;;  %s7662_s21 = sld [smem:[#allocation9 + $0x38]] }
 0x518   :  { %2326 = vrot.lane.b32.xlu0 %v2319_v50, %s4836_s27  ;;  %2142 = vrot.lane.b32.xlu1 %v2135_v41, %s4835_s26  ;;  %v6781_v50 = vstv %s6719_s5  ;;  %v2222_v41 = vmul.f32 %v6257_v56, %v6559_v37  ;;  %v6821_v12 = vmul.f32 %v6670_v53, %v6755_v8  ;;  %9929 = vst [vmem:[#allocation153_spill] sm:$0xff] %v7026_v14  ;;  %s7751_s5 = sld [smem:[#allocation9 + $0x5b]] }
 0x519   :  { %v2380_v34 = vmul.f32 %v6670_v53, %v6781_v50 }
 0x51a   :  { %v6773_v42 = vpop.permute.xlu0 %1714  ;;  %v6775_v25 = vpop.permute.xlu1 %1530  ;;  %v2235_v43 = vrot.slane %v2222_v41, 2  ;;  %v6848_v41 = vmul.f32 %v6670_v53, %v6798_v18 }
 0x51b   :  { %9902 = vst [vmem:[#allocation139_spill] sm:$0xff] %v6773_v42  ;;  %9903 = vst [vmem:[#allocation140_spill] sm:$0xff] %v6775_v25  ;;  %v2200_v42 = vrot.slane %v2185_v0, 1  ;;  %v6795_v25 = vmul.f32 %v6791_v1, %v6781_v50  ;;  %v2357_v0 = vrot.slane %v2343_v54, 5  ;;  %v6835_v54 = vmul.f32 %v6831_v4, %v6781_v50 }
 0x51c   :  { %2362 = vrot.lane.b32.xlu0 %v2354_v38, %s4836_s27  ;;  %2204 = vrot.lane.b32.xlu1 %v2196_v21, %s4836_s27  ;;  %v6825_v38 = vmul.f32 %v6670_v53, %v6771_v39 }
 0x51d   :  { %v2359_v30 = vsel %vm771_vm13, %v2357_v0, %v9907_v59  ;;  %v2201_v10 = vsel %vm639_vm9, %v9908_v3, %v2200_v42  ;;  %v2383_v3 = vmul.f32 %v6697_v13, %v6781_v50  ;;  %v2392_v42 = vrot.slane %v2380_v34, 6 }
 0x51e   :  { %v6827_v21 = vpop.permute.xlu0 %1750  ;;  %v6829_v32 = vpop.permute.xlu1 %1566  ;;  %v6873_v59 = vstv %s6785_s7  ;;  %v9912_v20 = vrot.slane %v6795_v25, 6  ;;  %v9915_v15 = vrot.slane %v6835_v54, 6  ;;  %s8093_s7 = sld [smem:[#allocation9 + $0x57]] }
 0x51f   :  { %9905 = vst [vmem:[#allocation141_spill] sm:$0xff] %v6827_v21  ;;  %9906 = vst [vmem:[#allocation142_spill] sm:$0xff] %v6829_v32  ;;  %v2225_v32 = vmul.f32 %v6287_v46, %v6559_v37  ;;  %v6852_v21 = vmul.f32 %v6670_v53, %v6801_v60  ;;  %v6882_v0 = vmul.f32 %v6878_v27, %v6873_v59 }
 0x520   :  { %2366 = vrot.lane.b32.xlu0 %v2359_v30, %s4836_s27  ;;  %2208 = vrot.lane.b32.xlu1 %v2201_v10, %s4836_s27  ;;  %v9911_v10 = vrot.slane %v6570_v29, 2  ;;  %v2394_v34 = vsel %vm175_vm4, %v2392_v42, %v9912_v20  ;;  %v2262_v29 = vmul.f32 %v6257_v56, %v6603_v7  ;;  %v6896_v20 = vmul.f32 %v6791_v1, %v6760_v61 }
 0x521   :  { %v2240_v37 = vrot.slane %v2225_v32, 2  ;;  %v2397_v32 = vrot.slane %v2383_v3, 6  ;;  %v6900_v42 = vmul.f32 %v6697_v13, %v6755_v8  ;;  %v6912_v3 = vmul.f32 %v6697_v13, %v6766_v19 }
 0x522   :  { %v6864_v53 = vpop.permute.xlu0 %1754  ;;  %v6866_v23 = vpop.permute.xlu1 %1570  ;;  %v2236_v30 = vsel %vm672_vm10, %v9911_v10, %v2235_v43  ;;  %v6904_v10 = vmul.f32 %v6697_v13, %v6763_v9  ;;  %v6906_v43 = vld [vmem:[#allocation3 + $0x30] sm:$0xff]  ;;  %v6929_v52 = vmul.f32 %v6925_v11, %v6873_v59 }
 0x523   :  { %9909 = vst [vmem:[#allocation143_spill] sm:$0xff] %v6864_v53  ;;  %9910 = vst [vmem:[#allocation144_spill] sm:$0xff] %v6866_v23  ;;  %v2399_v5 = vsel %vm175_vm4, %v2397_v32, %v9915_v15  ;;  %v2241_v47 = vsel %vm672_vm10, %v9916_v63, %v2240_v37  ;;  %v6940_v15 = vmul.f32 %v6697_v13, %v6798_v18  ;;  %v6948_v63 = vld [vmem:[#allocation3 + $0x48] sm:$0xff] }
 0x524   :  { %2402 = vrot.lane.b32.xlu0 %v2394_v34, %s4836_s27  ;;  %2244 = vrot.lane.b32.xlu1 %v2236_v30, %s4836_s27  ;;  %v2654_v34 = vmul.f32 %v6906_v43, %v6873_v59  ;;  %v6916_v30 = vmul.f32 %v6697_v13, %v6771_v39  ;;  %v6944_v32 = vmul.f32 %v6697_v13, %v6801_v60  ;;  %v9927_v36 = vrot.slane %v6929_v52, 1 }
 0x525   :  { %v2657_v57 = vmul.f32 %v6948_v63, %v6873_v59  ;;  %v6961_v13 = vmul.f32 %v6791_v1, %v6763_v9  ;;  %v6971_v37 = vmul.f32 %v6878_v27, %v6955_v26  ;;  %v2694_v55 = vmul.f32 %v6906_v43, %v6955_v26 }
 0x526   :  { %v6918_v23 = vpop.permute.xlu0 %1790  ;;  %v6920_v53 = vpop.permute.xlu1 %1606 }
 0x527   :  { %9913 = vst [vmem:[#allocation145_spill] sm:$0xff] %v6918_v23  ;;  %9914 = vst [vmem:[#allocation146_spill] sm:$0xff] %v6920_v53  ;;  %v2275_v23 = vrot.slane %v2262_v29, 3  ;;  %v2265_v53 = vmul.f32 %v6287_v46, %v6603_v7  ;;  %v2666_v29 = vrot.slane %v2654_v34, 1  ;;  %v9920_v34 = vrot.slane %v6882_v0, 1 }
 0x528   :  { %2406 = vrot.lane.b32.xlu0 %v2399_v5, %s4836_s27  ;;  %2248 = vrot.lane.b32.xlu1 %v2241_v47, %s4836_s27  ;;  %9919 = vst [vmem:[#allocation149_spill] sm:$0xff] %v6971_v37  ;;  %v2302_v47 = vmul.f32 %v6257_v56, %v6657_v44 }
 0x529   :  { %v2668_v7 = vsel %vm639_vm9, %v2666_v29, %v9920_v34  ;;  %v2276_v35 = vsel %vm705_vm11, %v9921_v51, %v2275_v23  ;;  %v2280_v45 = vrot.slane %v2265_v53, 3  ;;  %v6992_v23 = vmul.f32 %v6791_v1, %v6771_v39 }
 0x52a   :  { %v6964_v5 = vpop.permute.xlu0 %1794  ;;  %v6966_v17 = vpop.permute.xlu1 %1610  ;;  %v9922_v51 = vrot.slane %v6896_v20, 1  ;;  %v9923_v53 = vrot.slane %v6805_v16, 1  ;;  %v2315_v34 = vrot.slane %v2302_v47, 4  ;;  %v7034_v47 = vmul.f32 %v6831_v4, %v6760_v61 }
 0x52b   :  { %9917 = vst [vmem:[#allocation147_spill] sm:$0xff] %v6964_v5  ;;  %9918 = vst [vmem:[#allocation148_spill] sm:$0xff] %v6966_v17  ;;  %v6983_v17 = vmul.f32 %v6791_v1, %v6766_v19  ;;  %v2671_v5 = vrot.slane %v2657_v57, 1  ;;  %v7004_v57 = vmul.f32 %v6791_v1, %v6798_v18 }
 0x52c   :  { %2676 = vrot.lane.b32.xlu0 %v2668_v7, %s4831_s18  ;;  %2284 = vrot.lane.b32.xlu1 %v2276_v35, %s4836_s27  ;;  %v642_v29 = vsel %vm639_vm9, %v9923_v53, %v9922_v51  ;;  %v9674_v51 = vrot.slane %v6971_v37, 2  ;;  %v9928_v53 = vrot.slane %v6633_v24, 3  ;;  %v7019_v35 = vmul.f32 %v6925_v11, %v6955_v26 }
 0x52d   :  { %9924 = vst [vmem:[#allocation150_spill] sm:$0xff] %v7004_v57  ;;  %v2673_v16 = vsel %vm639_vm9, %v2671_v5, %v9927_v36  ;;  %v654_v36 = vadd.f32 %v642_v29, %v6821_v12  ;;  %v7039_v5 = vstv %s6957_s8  ;;  %v9930_v12 = vrot.slane %v6961_v13, 2  ;;  %s8224_s8 = sld [smem:[#allocation9 + $0x3c]] }
 0x52e   :  { %v7006_v33 = vpop.permute.xlu0 %1830  ;;  %v7008_v2 = vpop.permute.xlu1 %1672  ;;  %v2281_v7 = vsel %vm705_vm11, %v9928_v53, %v2280_v45  ;;  %v2706_v45 = vrot.slane %v2694_v55, 2  ;;  %v9931_v29 = vrot.slane %v6811_v49, 2  ;;  %v9935_v53 = vrot.slane %v6664_v48, 4 }
 0x52f   :  { %9925 = vst [vmem:[#allocation151_spill] sm:$0xff] %v7006_v33  ;;  %9926 = vst [vmem:[#allocation152_spill] sm:$0xff] %v7008_v2  ;;  %v2305_v33 = vmul.f32 %v6287_v46, %v6657_v44  ;;  %v2697_v44 = vmul.f32 %v6948_v63, %v6955_v26  ;;  %v7056_v2 = vmul.f32 %v6878_v27, %v7039_v5 }
 0x530   :  { %2680 = vrot.lane.b32.xlu0 %v2673_v16, %s4831_s18  ;;  %2288 = vrot.lane.b32.xlu1 %v2281_v7, %s4836_s27  ;;  %v675_v7 = vsel %vm672_vm10, %v9931_v29, %v9930_v12  ;;  %v2708_v24 = vsel %vm672_vm10, %v2706_v45, %v9674_v51  ;;  %v2316_v49 = vsel %vm738_vm12, %v9935_v53, %v2315_v34  ;;  %v9677_v12 = vrot.slane %v7019_v35, 2 }
 0x531   :  { %9934 = vst [vmem:[#allocation156_spill] sm:$0xff] %v7056_v2  ;;  %v2320_v29 = vrot.slane %v2305_v33, 4  ;;  %v687_v6 = vadd.f32 %v675_v7, %v654_v36  ;;  %v9936_v45 = vrot.slane %v6983_v17, 3  ;;  %v9937_v51 = vrot.slane %v6815_v58, 3 }
 0x532   :  { %v7047_v55 = vpop.permute.xlu0 %1834  ;;  %v7049_v16 = vpop.permute.xlu1 %1676  ;;  %v2734_v48 = vmul.f32 %v6906_v43, %v7039_v5  ;;  %v9938_v33 = vrot.slane %v6992_v23, 4  ;;  %v9939_v34 = vrot.slane %v6825_v38, 4  ;;  %v7084_v58 = vmul.f32 %v6831_v4, %v6763_v9 }
 0x533   :  { %9932 = vst [vmem:[#allocation154_spill] sm:$0xff] %v7047_v55  ;;  %9933 = vst [vmem:[#allocation155_spill] sm:$0xff] %v7049_v16  ;;  %v2342_v16 = vmul.f32 %v6257_v56, %v6706_v31  ;;  %v708_v37 = vsel %vm705_vm11, %v9937_v51, %v9936_v45  ;;  %v2711_v51 = vrot.slane %v2697_v44, 2  ;;  %v9941_v7 = vrot.slane %v6848_v41, 5 }
 0x534   :  { %2716 = vrot.lane.b32.xlu0 %v2708_v24, %s4831_s18  ;;  %2324 = vrot.lane.b32.xlu1 %v2316_v49, %s4836_s27  ;;  %v741_v53 = vsel %vm738_vm12, %v9939_v34, %v9938_v33  ;;  %v9940_v24 = vrot.slane %v7004_v57, 5  ;;  %v7093_v45 = vmul.f32 %v6831_v4, %v6766_v19  ;;  %v7102_v36 = vmul.f32 %v6925_v11, %v7039_v5 }
 0x535   :  { %v2713_v41 = vsel %vm672_vm10, %v2711_v51, %v9677_v12  ;;  %v9944_v44 = vrot.slane %v6683_v40, 4  ;;  %v2345_v55 = vmul.f32 %v6287_v46, %v6706_v31  ;;  %v9945_v34 = vrot.slane %v7026_v14, 6 }
 0x536   :  { %v774_v49 = vsel %vm771_vm13, %v9941_v7, %v9940_v24  ;;  %v7095_v38 = vpop.permute.xlu0 %1870  ;;  %v7097_v33 = vpop.permute.xlu1 %1712  ;;  %v2355_v7 = vrot.slane %v2342_v16, 5  ;;  %v7121_v51 = vmul.f32 %v6831_v4, %v6771_v39  ;;  %v2746_v40 = vrot.slane %v2734_v48, 3 }
 0x537   :  { %9942 = vst [vmem:[#allocation157_spill] sm:$0xff] %v7095_v38  ;;  %9943 = vst [vmem:[#allocation158_spill] sm:$0xff] %v7097_v33  ;;  %v2321_v24 = vsel %vm738_vm12, %v9944_v44, %v2320_v29  ;;  %v720_v33 = vadd.f32 %v708_v37, %v687_v6  ;;  %v9946_v38 = vrot.slane %v6852_v21, 6  ;;  %v9947_v31 = vrot.slane %v7034_v47, 1 }
 0x538   :  { %2720 = vrot.lane.b32.xlu0 %v2713_v41, %s4831_s18  ;;  %2328 = vrot.lane.b32.xlu1 %v2321_v24, %s4836_s27  ;;  %v9948_v6 = vrot.slane %v6890_v22, 1  ;;  %v7133_v16 = vmul.f32 %v6831_v4, %v6798_v18  ;;  %v2737_v29 = vmul.f32 %v6948_v63, %v7039_v5  ;;  %v9951_v41 = vrot.slane %v7056_v2, 3 }
 0x539   :  { %v7117_v57 = vsel %vm175_vm4, %v9946_v38, %v9945_v34  ;;  %v7147_v24 = vstv %s7058_s2  ;;  %v2360_v12 = vrot.slane %v2345_v55, 5  ;;  %v2382_v21 = vmul.f32 %v6257_v56, %v6781_v50  ;;  %s8358_s2 = sld [smem:[#allocation9 + $0x4a]] }
 0x53a   :  { %v647_v37 = vsel %vm639_vm9, %v9948_v6, %v9947_v31  ;;  %v7138_v34 = vpop.permute.xlu0 %1874  ;;  %v7140_v48 = vpop.permute.xlu1 %1716  ;;  %v2748_v22 = vsel %vm705_vm11, %v2746_v40, %v9951_v41  ;;  %v9952_v31 = vrot.slane %v6717_v28, 5  ;;  %v7156_v38 = vmul.f32 %v6878_v27, %v7147_v24 }
 0x53b   :  { %9949 = vst [vmem:[#allocation159_spill] sm:$0xff] %v7138_v34  ;;  %9950 = vst [vmem:[#allocation160_spill] sm:$0xff] %v7140_v48  ;;  %v753_v48 = vadd.f32 %v741_v53, %v720_v33  ;;  %v656_v40 = vadd.f32 %v647_v37, %v6900_v42  ;;  %v7164_v44 = vmul.f32 %v6831_v4, %v6801_v60  ;;  %v9953_v42 = vrot.slane %v7084_v58, 2 }
 0x53c   :  { %v2356_v6 = vsel %vm771_vm13, %v9952_v31, %v2355_v7  ;;  %2756 = vrot.lane.b32.xlu0 %v2748_v22, %s4831_s18  ;;  %v629_v55 = vmul.f32 %v6257_v56, %v6760_v61  ;;  %v2751_v7 = vrot.slane %v2737_v29, 3  ;;  %v2774_v53 = vmul.f32 %v6906_v43, %v7147_v24 }
 0x53d   :  { %2364 = vrot.lane.b32.xlu1 %v2356_v6, %s4836_s27  ;;  %v9954_v33 = vrot.slane %v6904_v10, 2  ;;  %v9955_v31 = vrot.slane %v7093_v45, 3  ;;  %v9956_v22 = vrot.slane %v6912_v3, 3  ;;  %v7189_v29 = vmul.f32 %v6925_v11, %v7147_v24 }
 0x53e   :  { %v7183_v28 = vpop.permute.xlu0 %1936  ;;  %v7185_v41 = vpop.permute.xlu1 %1752  ;;  %v2385_v34 = vmul.f32 %v6287_v46, %v6781_v50  ;;  %v9959_v10 = vrot.slane %v7102_v36, 3  ;;  %v9681_v2 = vrot.slane %v7164_v44, 6  ;;  %v2777_v50 = vmul.f32 %v6948_v63, %v7147_v24 }
 0x53f   :  { %v680_v37 = vsel %vm672_vm10, %v9954_v33, %v9953_v42  ;;  %v713_v6 = vsel %vm705_vm11, %v9956_v22, %v9955_v31  ;;  %9957 = vst [vmem:[#allocation161_spill] sm:$0xff] %v7183_v28  ;;  %9958 = vst [vmem:[#allocation162_spill] sm:$0xff] %v7185_v41  ;;  %v9960_v33 = vrot.slane %v6750_v62, 5  ;;  %v9680_v31 = vrot.slane %v7156_v38, 4  ;;  %v7200_v28 = vld [vmem:[#allocation3 + $0x40] sm:$0x3f] }
 0x540   :  { %v2753_v42 = vsel %vm705_vm11, %v2751_v7, %v9959_v10  ;;  %v2395_v22 = vrot.slane %v2382_v21, 6  ;;  %v786_v41 = vadd.f32 %v774_v49, %v753_v48  ;;  %v689_v14 = vadd.f32 %v680_v37, %v656_v40 }
 0x541   :  { %v2361_v3 = vsel %vm771_vm13, %v9960_v33, %v2360_v12  ;;  %2760 = vrot.lane.b32.xlu0 %v2753_v42, %s4831_s18  ;;  %v9961_v62 = vrot.slane %v7121_v51, 4  ;;  %v9962_v12 = vrot.slane %v6916_v30, 4  ;;  %v9963_v7 = vrot.slane %v7133_v16, 5 }
 0x542   :  { %2368 = vrot.lane.b32.xlu1 %v2361_v3, %s4836_s27  ;;  %v9964_v49 = vrot.slane %v6940_v15, 5  ;;  %v643_v40 = vrot.slane %v629_v55, 1  ;;  %v2786_v37 = vrot.slane %v2774_v53, 4  ;;  %v632_v10 = vmul.f32 %v6287_v46, %v6760_v61  ;;  %v7223_v42 = vpop.permute.xlu0 %1940  ;;  %v7225_v33 = vpop.permute.xlu1 %1756 }
 0x543   :  { %v746_v21 = vsel %vm738_vm12, %v9962_v12, %v9961_v62  ;;  %9965 = vst [vmem:[#allocation163_spill] sm:$0xff] %v7225_v33  ;;  %v9682_v30 = vrot.slane %v7189_v29, 4  ;;  %v2400_v3 = vrot.slane %v2385_v34, 6  ;;  %v7229_v62 = vstv %s7149_s9  ;;  %v7243_v12 = vld [vmem:[#allocation3 + $0x58] sm:$0x3f]  ;;  %s8413_s9 = sld [smem:[#allocation9 + $0x51]] }
 0x544   :  { %v7217_v48 = vsel %vm771_vm13, %v9964_v49, %v9963_v7  ;;  %v2788_v15 = vsel %vm738_vm12, %v2786_v37, %v9680_v31  ;;  %v9966_v55 = vrot.slane %v6795_v25, 6  ;;  %v7239_v46 = vmul.f32 %v6878_v27, %v7229_v62 }
 0x545   :  { %v2656_v61 = vmul.f32 %v6873_v59, %v7200_v28  ;;  %v722_v34 = vadd.f32 %v713_v6, %v689_v14  ;;  %v662_v7 = vmul.f32 %v6257_v56, %v6763_v9  ;;  %v695_v49 = vmul.f32 %v6257_v56, %v6766_v19  ;;  %2796 = vrot.lane.b32.xlu0 %v2788_v15, %s4831_s18 }
 0x546   :  { %v2396_v53 = vsel %vm175_vm4, %v9966_v55, %v2395_v22  ;;  %v2791_v25 = vrot.slane %v2777_v50, 4  ;;  %v7252_v22 = vadd.f32 %v7117_v57, %v786_v41  ;;  %v9967_v37 = vrot.slane %v6944_v32, 6  ;;  %v7268_v57 = vpop.permute.xlu0 %1976  ;;  %v7270_v41 = vpop.permute.xlu1 %1792 }
 0x547   :  { %2404 = vrot.lane.b32.xlu1 %v2396_v53, %s4836_s27  ;;  %v618_v6 = vmul.f32 %v6791_v1, %v6755_v8  ;;  %v2814_v56 = vmul.f32 %v6906_v43, %v7229_v62  ;;  %v9968_v15 = vrot.slane %v6896_v20, 1  ;;  %v648_v55 = vrot.slane %v632_v10, 1  ;;  %9969 = vst [vmem:[#allocation164_spill] sm:$0xff] %v7270_v41 }
 0x548   :  { %v7259_v14 = vsel %vm175_vm4, %v9967_v37, %v9681_v2  ;;  %v2793_v32 = vsel %vm738_vm12, %v2791_v25, %v9682_v30  ;;  %v9970_v53 = vrot.slane %v6835_v54, 6  ;;  %v9683_v37 = vrot.slane %v7239_v46, 5  ;;  %v7287_v25 = vld [vmem:[#allocation3 + $0x28] sm:$0x3f] }
 0x549   :  { %v644_v50 = vsel %vm639_vm9, %v9968_v15, %v643_v40  ;;  %v2669_v31 = vrot.slane %v2656_v61, 1  ;;  %v7281_v20 = vmul.f32 %v6925_v11, %v7229_v62  ;;  %v2659_v40 = vmul.f32 %v6873_v59, %v7243_v12  ;;  %2800 = vrot.lane.b32.xlu0 %v2793_v32, %s4831_s18 }
 0x54a   :  { %v2401_v1 = vsel %vm175_vm4, %v9970_v53, %v2400_v3  ;;  %v7285_v10 = vadd.f32 %v746_v21, %v722_v34  ;;  %v676_v15 = vrot.slane %v662_v7, 2  ;;  %v709_v2 = vrot.slane %v695_v49, 3  ;;  %v7303_v7 = vpop.permute.xlu0 %1980 }
 0x54b   :  { %v665_v54 = vmul.f32 %v7287_v25, %v6763_v9  ;;  %2408 = vrot.lane.b32.xlu1 %v2401_v1, %s4836_s27  ;;  %v655_v3 = vadd.f32 %v644_v50, %v618_v6  ;;  %v2826_v61 = vrot.slane %v2814_v56, 5  ;;  %v2817_v53 = vmul.f32 %v6948_v63, %v7229_v62  ;;  %v7305_v9 = vpop.permute.xlu1 %1796 }
 0x54c   :  { %v7296_v30 = vstv %s7219_s10  ;;  %v620_v59 = vmul.f32 %v6831_v4, %v6755_v8  ;;  %v9971_v21 = vrot.slane %v7034_v47, 1  ;;  %9972 = vst [vmem:[#allocation165_spill] sm:$0xff] %v7305_v9  ;;  %v2696_v6 = vmul.f32 %v6955_v26, %v7200_v28  ;;  %s8485_s10 = sld [smem:[#allocation9 + $0x58]] }
 0x54d   :  { %v7309_v49 = vmul.f32 %v6878_v27, %v7296_v30  ;;  %v2828_v4 = vsel %vm771_vm13, %v2826_v61, %v9683_v37  ;;  %v9973_v8 = vrot.slane %v6882_v0, 1  ;;  %v2674_v50 = vrot.slane %v2659_v40, 1 }
 0x54e   :  { %v649_v34 = vsel %vm639_vm9, %v9971_v21, %v648_v55  ;;  %v4742_v55 = vld [vmem:[#allocation3 + $0x10] sm:$0x3f]  ;;  %v681_v1 = vrot.slane %v665_v54, 2  ;;  %v698_v21 = vmul.f32 %v7287_v25, %v6766_v19  ;;  %2836 = vrot.lane.b32.xlu0 %v2828_v4, %s4831_s18  ;;  %v2854_v61 = vmul.f32 %v6906_v43, %v7296_v30  ;;  %v7338_v4 = vpop.permute.xlu0 %2016 }
 0x54f   :  { %v2670_v47 = vsel %vm639_vm9, %v9973_v8, %v2669_v31  ;;  %v728_v32 = vmul.f32 %v4742_v55, %v6771_v39  ;;  %v9974_v0 = vrot.slane %v6961_v13, 2  ;;  %v7333_v40 = vmul.f32 %v4742_v55, %v6798_v18  ;;  %9976 = vst [vmem:[#allocation166_spill] sm:$0xff] %v7338_v4  ;;  %v10064_v4 = vld [vmem:[#allocation24_spill] sm:$0xff] }
 0x550   :  { %2678 = vrot.lane.b32.xlu1 %v2670_v47, %s4831_s18  ;;  %v657_v8 = vadd.f32 %v649_v34, %v620_v59  ;;  %v2831_v37 = vrot.slane %v2817_v53, 5  ;;  %v9975_v56 = vrot.slane %v6983_v17, 3  ;;  %v7340_v47 = vpop.permute.xlu1 %1832  ;;  %v9690_v41 = vrot.slane %v7309_v49, 6 }
 0x551   :  { %v677_v31 = vsel %vm672_vm10, %v9974_v0, %v676_v15  ;;  %9977 = vst [vmem:[#allocation167_spill] sm:$0xff] %v7340_v47  ;;  %v2709_v9 = vrot.slane %v2696_v6, 2  ;;  %v9978_v13 = vrot.slane %v7281_v20, 5  ;;  %v9979_v0 = vrot.slane %v6929_v52, 1 }
 0x552   :  { %v688_v54 = vadd.f32 %v677_v31, %v655_v3  ;;  %v710_v19 = vsel %vm705_vm11, %v9975_v56, %v709_v2  ;;  %v7351_v17 = vmul.f32 %v6925_v11, %v7296_v30  ;;  %v2699_v2 = vmul.f32 %v6955_v26, %v7243_v12  ;;  %v7365_v31 = vpop.permute.xlu0 %2020 }
 0x553   :  { %v2833_v15 = vsel %vm771_vm13, %v2831_v37, %v9978_v13  ;;  %v2675_v53 = vsel %vm639_vm9, %v9979_v0, %v2674_v50  ;;  %v9980_v3 = vrot.slane %v7084_v58, 2  ;;  %v714_v34 = vrot.slane %v698_v21, 3  ;;  %v9982_v21 = vld [vmem:[#allocation149_spill] sm:$0xff] }
 0x554   :  { %v731_v37 = vmul.f32 %v7287_v25, %v6771_v39  ;;  %2840 = vrot.lane.b32.xlu0 %v2833_v15, %s4831_s18  ;;  %2682 = vrot.lane.b32.xlu1 %v2675_v53, %s4831_s18  ;;  %v2866_v52 = vrot.slane %v2854_v61, 6  ;;  %v742_v6 = vrot.slane %v728_v32, 4  ;;  %v794_v56 = vmul.f32 %v4742_v55, %v6801_v60 }
 0x555   :  { %v682_v59 = vsel %vm672_vm10, %v9980_v3, %v681_v1  ;;  %v2857_v26 = vmul.f32 %v6948_v63, %v7296_v30  ;;  %v721_v58 = vadd.f32 %v710_v19, %v688_v54  ;;  %v7367_v1 = vpop.permute.xlu1 %1836  ;;  %v9983_v13 = vrot.slane %v9982_v21, 2 }
 0x556   :  { %v690_v50 = vadd.f32 %v682_v59, %v657_v8  ;;  %9981 = vst [vmem:[#allocation168_spill] sm:$0xff] %v7367_v1  ;;  %v2868_v39 = vsel %vm175_vm4, %v2866_v52, %v9690_v41  ;;  %v7376_v32 = vstv %s7313_s11  ;;  %v9688_v55 = vrot.slane %v7351_v17, 6  ;;  %s8551_s11 = sld [smem:[#allocation9 + $0x5f]] }
 0x557   :  { %v2710_v61 = vsel %vm672_vm10, %v9983_v13, %v2709_v9  ;;  %v2714_v8 = vrot.slane %v2699_v2, 2  ;;  %v7383_v54 = vmul.f32 %v6878_v27, %v7376_v32  ;;  %v2736_v19 = vmul.f32 %v7039_v5, %v7200_v28 }
 0x558   :  { %v775_v15 = vrot.slane %v7333_v40, 5  ;;  %v9984_v0 = vrot.slane %v7093_v45, 3  ;;  %v747_v53 = vrot.slane %v731_v37, 4  ;;  %v764_v3 = vmul.f32 %v7287_v25, %v6798_v18  ;;  %2876 = vrot.lane.b32.xlu0 %v2868_v39, %s4831_s18  ;;  %2718 = vrot.lane.b32.xlu1 %v2710_v61, %s4831_s18  ;;  %v7402_v37 = vpop.permute.xlu0 %2056 }
 0x559   :  { %v9985_v2 = vrot.slane %v6992_v23, 4  ;;  %v2871_v21 = vrot.slane %v2857_v26, 6  ;;  %v2920_v40 = vmul.f32 %v6906_v43, %v7376_v32  ;;  %9986 = vst [vmem:[#allocation149_spill] sm:$0xff] %v7402_v37  ;;  %v7404_v18 = vpop.permute.xlu1 %1872  ;;  %v7408_v39 = vmul.f32 %v6925_v11, %v7376_v32 }
 0x55a   :  { %v715_v9 = vsel %vm705_vm11, %v9984_v0, %v714_v34  ;;  %v807_v34 = vrot.slane %v794_v56, 6  ;;  %9987 = vst [vmem:[#allocation169_spill] sm:$0xff] %v7404_v18  ;;  %v2739_v23 = vmul.f32 %v7039_v5, %v7243_v12  ;;  %v9687_v56 = vrot.slane %v7383_v54, 1 }
 0x55b   :  { %v743_v59 = vsel %vm738_vm12, %v9985_v2, %v742_v6  ;;  %v723_v52 = vadd.f32 %v715_v9, %v690_v50  ;;  %v2873_v6 = vsel %vm175_vm4, %v2871_v21, %v9688_v55  ;;  %v9988_v50 = vrot.slane %v7019_v35, 2 }
 0x55c   :  { %v754_v45 = vadd.f32 %v743_v59, %v721_v58  ;;  %v2749_v58 = vrot.slane %v2736_v19, 3  ;;  %v9989_v13 = vrot.slane %v7121_v51, 4  ;;  %v780_v0 = vrot.slane %v764_v3, 5  ;;  %2880 = vrot.lane.b32.xlu0 %v2873_v6, %s4831_s18  ;;  %v9990_v19 = vld [vmem:[#allocation150_spill] sm:$0xff]  ;;  %v7433_v59 = vpop.permute.xlu0 %2060 }
 0x55d   :  { %v2715_v26 = vsel %vm672_vm10, %v9988_v50, %v2714_v8  ;;  %v797_v5 = vmul.f32 %v7287_v25, %v6801_v60  ;;  %v2923_v35 = vmul.f32 %v6948_v63, %v7376_v32  ;;  %v788_v8 = vadd.f32 %v7217_v48, %v7285_v10  ;;  %9992 = vst [vmem:[#allocation150_spill] sm:$0xff] %v7433_v59  ;;  %v7435_v60 = vpop.permute.xlu1 %1876  ;;  %v9994_v10 = vld [vmem:[#allocation156_spill] sm:$0xff] }
 0x55e   :  { %v748_v61 = vsel %vm738_vm12, %v9989_v13, %v747_v53  ;;  %2722 = vrot.lane.b32.xlu1 %v2715_v26, %s4831_s18  ;;  %v9991_v9 = vrot.slane %v9990_v19, 5  ;;  %v2932_v53 = vrot.slane %v2920_v40, 1  ;;  %9993 = vst [vmem:[#allocation170_spill] sm:$0xff] %v7435_v60  ;;  %v9686_v25 = vrot.slane %v7408_v39, 1 }
 0x55f   :  { %v756_v2 = vadd.f32 %v748_v61, %v723_v52  ;;  %v2754_v21 = vrot.slane %v2739_v23, 3  ;;  %v7439_v6 = vstv %s7378_s12  ;;  %v9995_v50 = vrot.slane %v9994_v10, 3  ;;  %s8692_s12 = sld [smem:[#allocation9 + $0x44]] }
 0x560   :  { %v776_v51 = vsel %vm771_vm13, %v9991_v9, %v775_v15  ;;  %v2934_v48 = vsel %vm639_vm9, %v2932_v53, %v9687_v56  ;;  %v7449_v52 = vmul.f32 %v6878_v27, %v7439_v6  ;;  %v2776_v40 = vmul.f32 %v7147_v24, %v7200_v28 }
 0x561   :  { %v787_v3 = vadd.f32 %v776_v51, %v754_v45  ;;  %v2750_v15 = vsel %vm705_vm11, %v9995_v50, %v2749_v58  ;;  %v9996_v45 = vld [vmem:[#allocation153_spill] sm:$0xff]  ;;  %v9998_v13 = vrot.slane %v7133_v16, 5  ;;  %v812_v19 = vrot.slane %v797_v5, 6  ;;  %2942 = vrot.lane.b32.xlu0 %v2934_v48, %s4832_s20  ;;  %v7473_v5 = vpop.permute.xlu0 %2096  ;;  %v7475_v48 = vpop.permute.xlu1 %1938 }
 0x562   :  { %v9997_v23 = vrot.slane %v9996_v45, 6  ;;  %2758 = vrot.lane.b32.xlu1 %v2750_v15, %s4831_s18  ;;  %v2937_v58 = vrot.slane %v2923_v35, 1  ;;  %v2960_v51 = vmul.f32 %v6906_v43, %v7439_v6  ;;  %v7467_v53 = vmul.f32 %v6925_v11, %v7439_v6  ;;  %9999 = vst [vmem:[#allocation156_spill] sm:$0xff] %v7473_v5  ;;  %10000 = vst [vmem:[#allocation153_spill] sm:$0xff] %v7475_v48 }
 0x563   :  { %v781_v61 = vsel %vm771_vm13, %v9998_v13, %v780_v0  ;;  %v820_v16 = vadd.f32 %v7259_v14, %v788_v8  ;;  %v10001_v10 = vrot.slane %v7102_v36, 3  ;;  %v9685_v15 = vrot.slane %v7449_v52, 2 }
 0x564   :  { %v808_v26 = vsel %vm175_vm4, %v9997_v23, %v807_v34  ;;  %v789_v9 = vadd.f32 %v781_v61, %v756_v2  ;;  %v7470_v34 = vstv %s7400_s13  ;;  %v2939_v35 = vsel %vm639_vm9, %v2937_v58, %v9686_v25  ;;  %v10004_v61 = vld [vmem:[#allocation22_spill] sm:$0xff]  ;;  %s8779_s13 = sld [smem:[#allocation9 + $0x4b]] }
 0x565   :  { %v819_v0 = vadd.f32 %v808_v26, %v787_v3  ;;  %v2779_v2 = vmul.f32 %v7147_v24, %v7243_v12  ;;  %v2755_v50 = vsel %vm705_vm11, %v10001_v10, %v2754_v21  ;;  %v2789_v45 = vrot.slane %v2776_v40, 4  ;;  %2946 = vrot.lane.b32.xlu0 %v2939_v35, %s4832_s20  ;;  %v10003_v26 = vld [vmem:[#allocation21_spill] sm:$0xff]  ;;  %v7511_v58 = vpop.permute.xlu0 %2100  ;;  %v7513_v35 = vpop.permute.xlu1 %1942 }
 0x566   :  { %v2963_v14 = vmul.f32 %v6948_v63, %v7439_v6  ;;  %v10002_v8 = vrot.slane %v7164_v44, 6  ;;  %2762 = vrot.lane.b32.xlu1 %v2755_v50, %s4831_s18  ;;  %v3000_v36 = vmul.f32 %v6906_v43, %v7470_v34  ;;  %v7499_v24 = vmul.f32 %v6878_v27, %v7470_v34  ;;  %10005 = vst [vmem:[#allocation21_spill] sm:$0xff] %v7511_v58 }
 0x567   :  { %v2972_v40 = vrot.slane %v2960_v51, 2  ;;  %v9684_v23 = vrot.slane %v7467_v53, 2  ;;  %v2816_v44 = vmul.f32 %v7229_v62, %v7200_v28  ;;  %v7506_v13 = vadd.f32 %v10003_v26, %v7252_v22  ;;  %10006 = vst [vmem:[#allocation22_spill] sm:$0xff] %v7513_v35  ;;  %v10007_v51 = vld [vmem:[#allocation28_spill] sm:$0xff]  ;;  %v10009_v26 = vld [vmem:[#allocation30_spill] sm:$0xff] }
 0x568   :  { %v813_v3 = vsel %vm175_vm4, %v10002_v8, %v812_v19  ;;  %v7509_v19 = vadd.f32 %v10004_v61, %v820_v16  ;;  %v2794_v10 = vrot.slane %v2779_v2, 4  ;;  %v7520_v50 = vadd.f32 %v10007_v51, %v819_v0 }
 0x569   :  { %v821_v21 = vadd.f32 %v813_v3, %v789_v9  ;;  %v7517_v9 = vmul.f32 %v6925_v11, %v7470_v34  ;;  %v2974_v22 = vsel %vm672_vm10, %v2972_v40, %v9685_v15  ;;  %v10008_v8 = vrot.slane %v7156_v38, 4  ;;  %v7546_v40 = vpop.permute.xlu0 %2136 }
 0x56a   :  { %v2977_v3 = vrot.slane %v2963_v14, 2  ;;  %2982 = vrot.lane.b32.xlu0 %v2974_v22, %s4832_s20  ;;  %v3012_v2 = vrot.slane %v3000_v36, 3  ;;  %v9689_v0 = vrot.slane %v7499_v24, 3  ;;  %v7535_v51 = vstv %s7461_s14  ;;  %10010 = vst [vmem:[#allocation28_spill] sm:$0xff] %v7546_v40  ;;  %v7548_v36 = vpop.permute.xlu1 %1978  ;;  %s8831_s14 = sld [smem:[#allocation9 + $0x52]] }
 0x56b   :  { %v2790_v16 = vsel %vm738_vm12, %v10008_v8, %v2789_v45  ;;  %v7529_v61 = vadd.f32 %v10009_v26, %v821_v21  ;;  %v2829_v45 = vrot.slane %v2816_v44, 5  ;;  %v3003_v14 = vmul.f32 %v6948_v63, %v7470_v34  ;;  %10011 = vst [vmem:[#allocation30_spill] sm:$0xff] %v7548_v36 }
 0x56c   :  { %2798 = vrot.lane.b32.xlu1 %v2790_v16, %s4831_s18  ;;  %v2979_v38 = vsel %vm672_vm10, %v2977_v3, %v9684_v23  ;;  %v2819_v21 = vmul.f32 %v7229_v62, %v7243_v12  ;;  %v10012_v22 = vrot.slane %v7189_v29, 4  ;;  %v9691_v16 = vrot.slane %v7517_v9, 3 }
 0x56d   :  { %v7556_v3 = vmul.f32 %v6878_v27, %v7535_v51  ;;  %v2856_v44 = vmul.f32 %v7296_v30, %v7200_v28  ;;  %v3040_v62 = vmul.f32 %v6906_v43, %v7535_v51  ;;  %v7564_v26 = vmul.f32 %v6925_v11, %v7535_v51 }
 0x56e   :  { %v2795_v8 = vsel %vm738_vm12, %v10012_v22, %v2794_v10  ;;  %v2859_v29 = vmul.f32 %v7296_v30, %v7243_v12  ;;  %v7569_v10 = vstv %s7488_s15  ;;  %2986 = vrot.lane.b32.xlu0 %v2979_v38, %s4832_s20  ;;  %v3014_v22 = vsel %vm705_vm11, %v3012_v2, %v9689_v0  ;;  %v7589_v2 = vpop.permute.xlu0 %2140  ;;  %s8931_s15 = sld [smem:[#allocation9 + $0x59]] }
 0x56f   :  { %v7578_v23 = vmul.f32 %v6878_v27, %v7569_v10  ;;  %v2922_v15 = vmul.f32 %v7376_v32, %v7200_v28  ;;  %v10013_v25 = vrot.slane %v7239_v46, 5  ;;  %v3017_v56 = vrot.slane %v3003_v14, 3  ;;  %10014 = vst [vmem:[#allocation171_spill] sm:$0xff] %v7589_v2  ;;  %v10056_v2 = vld [vmem:[#allocation83_spill] sm:$0xff] }
 0x570   :  { %2802 = vrot.lane.b32.xlu1 %v2795_v8, %s4831_s18  ;;  %v2834_v55 = vrot.slane %v2819_v21, 5  ;;  %v3043_v38 = vmul.f32 %v6948_v63, %v7535_v51  ;;  %v7591_v8 = vpop.permute.xlu1 %1982  ;;  %v2869_v41 = vrot.slane %v2856_v44, 6  ;;  %v3080_v46 = vmul.f32 %v6906_v43, %v7569_v10 }
 0x571   :  { %v2830_v30 = vsel %vm771_vm13, %v10013_v25, %v2829_v45  ;;  %10015 = vst [vmem:[#allocation172_spill] sm:$0xff] %v7591_v8  ;;  %v7598_v25 = vmul.f32 %v6925_v11, %v7569_v10  ;;  %v3019_v45 = vsel %vm705_vm11, %v3017_v56, %v9691_v16  ;;  %v3052_v14 = vrot.slane %v3040_v62, 4 }
 0x572   :  { %v9692_v21 = vrot.slane %v7564_v26, 4  ;;  %v2874_v36 = vrot.slane %v2859_v29, 6  ;;  %3022 = vrot.lane.b32.xlu0 %v3014_v22, %s4832_s20  ;;  %v2935_v0 = vrot.slane %v2922_v15, 1  ;;  %v3083_v48 = vmul.f32 %v6948_v63, %v7569_v10 }
 0x573   :  { %v7610_v8 = vstv %s7537_s16  ;;  %v10016_v35 = vrot.slane %v7281_v20, 5  ;;  %v3057_v62 = vrot.slane %v3043_v38, 4  ;;  %v2925_v29 = vmul.f32 %v7376_v32, %v7243_v12  ;;  %s8978_s16 = sld [smem:[#allocation9 + $0x60]] }
 0x574   :  { %2838 = vrot.lane.b32.xlu1 %v2830_v30, %s4831_s18  ;;  %v7619_v22 = vmul.f32 %v6878_v27, %v7610_v8  ;;  %v7621_v30 = vpop.permute.xlu0 %2202  ;;  %v7623_v15 = vpop.permute.xlu1 %2018  ;;  %v10019_v16 = vrot.slane %v7556_v3, 4  ;;  %v10020_v20 = vrot.slane %v7309_v49, 6  ;;  %v7643_v49 = vmul.f32 %v6925_v11, %v7610_v8 }
 0x575   :  { %v2835_v56 = vsel %vm771_vm13, %v10016_v35, %v2834_v55  ;;  %10017 = vst [vmem:[#allocation173_spill] sm:$0xff] %v7621_v30  ;;  %10018 = vst [vmem:[#allocation174_spill] sm:$0xff] %v7623_v15  ;;  %v3092_v35 = vrot.slane %v3080_v46, 5  ;;  %v3059_v38 = vsel %vm738_vm12, %v3057_v62, %v9692_v21  ;;  %v3120_v15 = vmul.f32 %v6906_v43, %v7610_v8 }
 0x576   :  { %v3054_v44 = vsel %vm738_vm12, %v3052_v14, %v10019_v16  ;;  %v2870_v55 = vsel %vm175_vm4, %v10020_v20, %v2869_v41  ;;  %v2962_v16 = vmul.f32 %v7439_v6, %v7200_v28  ;;  %3026 = vrot.lane.b32.xlu0 %v3019_v45, %s4832_s20  ;;  %v10021_v41 = vrot.slane %v7351_v17, 6 }
 0x577   :  { %v10022_v14 = vrot.slane %v7578_v23, 5  ;;  %v10023_v20 = vrot.slane %v7383_v54, 1  ;;  %v3097_v32 = vrot.slane %v3083_v48, 5  ;;  %v2940_v18 = vrot.slane %v2925_v29, 1 }
 0x578   :  { %2842 = vrot.lane.b32.xlu1 %v2835_v56, %s4831_s18  ;;  %v2875_v46 = vsel %vm175_vm4, %v10021_v41, %v2874_v36  ;;  %v3123_v45 = vmul.f32 %v6948_v63, %v7610_v8  ;;  %v7660_v56 = vstv %s7587_s17  ;;  %v7664_v17 = vpop.permute.xlu0 %2206  ;;  %v7666_v36 = vpop.permute.xlu1 %2022  ;;  %v2965_v48 = vmul.f32 %v7439_v6, %v7243_v12  ;;  %s9044_s17 = sld [smem:[#allocation9 + $0x3e]] }
 0x579   :  { %v3094_v62 = vsel %vm771_vm13, %v3092_v35, %v10022_v14  ;;  %v2936_v21 = vsel %vm639_vm9, %v10023_v20, %v2935_v0  ;;  %10024 = vst [vmem:[#allocation175_spill] sm:$0xff] %v7664_v17  ;;  %10025 = vst [vmem:[#allocation176_spill] sm:$0xff] %v7666_v36  ;;  %v10026_v35 = vrot.slane %v7598_v25, 5  ;;  %v7677_v0 = vmul.f32 %v6878_v27, %v7660_v56 }
 0x57a   :  { %v3002_v29 = vmul.f32 %v7470_v34, %v7200_v28  ;;  %v3132_v41 = vrot.slane %v3120_v15, 6  ;;  %v2975_v14 = vrot.slane %v2962_v16, 2  ;;  %3062 = vrot.lane.b32.xlu0 %v3054_v44, %s4832_s20  ;;  %v3186_v6 = vmul.f32 %v6906_v43, %v7660_v56 }
 0x57b   :  { %v7671_v54 = vsel %vm771_vm13, %v3097_v32, %v10026_v35  ;;  %v7686_v32 = vmul.f32 %v6925_v11, %v7660_v56  ;;  %v3189_v15 = vmul.f32 %v6948_v63, %v7660_v56  ;;  %v3005_v16 = vmul.f32 %v7470_v34, %v7243_v12  ;;  %v10027_v35 = vld [vmem:[#allocation61_spill] sm:$0xff] }
 0x57c   :  { %2878 = vrot.lane.b32.xlu1 %v2870_v55, %s4831_s18  ;;  %v884_v20 = vadd.f32 %v10027_v35, %v7506_v13  ;;  %v10028_v47 = vrot.slane %v7408_v39, 1  ;;  %v10029_v55 = vrot.slane %v7619_v22, 6  ;;  %v3137_v60 = vrot.slane %v3123_v45, 6  ;;  %v7712_v1 = vpop.permute.xlu0 %2242  ;;  %v7714_v34 = vpop.permute.xlu1 %2058 }
 0x57d   :  { %10030 = vst [vmem:[#allocation61_spill] sm:$0xff] %v7712_v1  ;;  %10031 = vst [vmem:[#allocation177_spill] sm:$0xff] %v7714_v34  ;;  %v2980_v30 = vrot.slane %v2965_v48, 2  ;;  %v3015_v13 = vrot.slane %v3002_v29, 3  ;;  %v7718_v39 = vstv %s7632_s19  ;;  %v10034_v35 = vrot.slane %v7643_v49, 6  ;;  %s9185_s19 = sld [smem:[#allocation9 + $0x4c]] }
 0x57e   :  { %v2941_v44 = vsel %vm639_vm9, %v10028_v47, %v2940_v18  ;;  %v7708_v36 = vsel %vm175_vm4, %v3132_v41, %v10029_v55  ;;  %v10032_v47 = vld [vmem:[#allocation63_spill] sm:$0xff]  ;;  %v10033_v41 = vrot.slane %v7449_v52, 2  ;;  %3066 = vrot.lane.b32.xlu0 %v3059_v38, %s4832_s20  ;;  %v3198_v29 = vrot.slane %v3186_v6, 1 }
 0x57f   :  { %v886_v18 = vadd.f32 %v10032_v47, %v7509_v19  ;;  %v7730_v55 = vsel %vm175_vm4, %v3137_v60, %v10034_v35  ;;  %v3203_v33 = vrot.slane %v3189_v15, 1  ;;  %v3020_v34 = vrot.slane %v3005_v16, 3  ;;  %v10035_v19 = vld [vmem:[#allocation67_spill] sm:$0xff] }
 0x580   :  { %v7725_v45 = vsel %vm672_vm10, %v10033_v41, %v2975_v14  ;;  %2882 = vrot.lane.b32.xlu1 %v2875_v46, %s4831_s18  ;;  %v3042_v52 = vmul.f32 %v7535_v51, %v7200_v28  ;;  %v7740_v60 = vmul.f32 %v6906_v43, %v7718_v39  ;;  %v7744_v47 = vmul.f32 %v6878_v27, %v7718_v39  ;;  %s7749_s18 = sld [smem:[#allocation9 + $0x54]]  ;;  %v10036_v46 = vld [vmem:[#allocation65_spill] sm:$0xff]  ;;  %v7754_v15 = vpop.permute.xlu0 %2246  ;;  %v7756_v16 = vpop.permute.xlu1 %2062 }
 0x581   :  { %v926_v14 = vadd.f32 %v10035_v19, %v886_v18  ;;  %v7747_v38 = vstv %s7662_s21  ;;  %v924_v6 = vadd.f32 %v10036_v46, %v884_v20  ;;  %10037 = vst [vmem:[#allocation63_spill] sm:$0xff] %v7754_v15  ;;  %10038 = vst [vmem:[#allocation67_spill] sm:$0xff] %v7756_v16  ;;  %v10039_v18 = vrot.slane %v7467_v53, 2  ;;  %v10042_v20 = vld [vmem:[#allocation71_spill] sm:$0xff]  ;;  %s9226_s21 = sld [smem:[#allocation9 + $0x53]] }
 0x582   :  { %v10040_v35 = vrot.slane %v7677_v0, 1  ;;  %v10041_v48 = vrot.slane %v7499_v24, 3  ;;  %v10043_v16 = vrot.slane %v7686_v32, 1  ;;  %3102 = vrot.lane.b32.xlu0 %v3094_v62, %s4832_s20  ;;  %v10044_v24 = vrot.slane %v7517_v9, 3 }
 0x583   :  { %v7761_v41 = vsel %vm672_vm10, %v10039_v18, %v2980_v30  ;;  %v966_v46 = vadd.f32 %v10042_v20, %v926_v14  ;;  %v7780_v30 = vstv %s7681_s23  ;;  %v7783_v18 = vstv %s7688_s25  ;;  %v10045_v14 = vld [vmem:[#allocation75_spill] sm:$0xff]  ;;  %s9275_s23 = sld [smem:[#allocation9 + $0x5a]]  ;;  %s9330_s25 = sld [smem:[#allocation9 + $0x61]] }
 0x584   :  { %v7766_v19 = vsel %vm639_vm9, %v3198_v29, %v10040_v35  ;;  %v7771_v1 = vsel %vm705_vm11, %v10041_v48, %v3015_v13  ;;  %v7777_v53 = vsel %vm639_vm9, %v3203_v33, %v10043_v16  ;;  %2944 = vrot.lane.b32.xlu1 %v2936_v21, %s4832_s20  ;;  %v7790_v13 = vsel %vm705_vm11, %v10044_v24, %v3020_v34  ;;  %v7803_v21 = vpop.permute.xlu0 %2282  ;;  %v7805_v9 = vpop.permute.xlu1 %2098  ;;  %v10049_v24 = vld [vmem:[#allocation69_spill] sm:$0xff]  ;;  %v10050_v20 = vld [vmem:[#allocation79_spill] sm:$0xff] }
 0x585   :  { %v3055_v48 = vrot.slane %v3042_v52, 4  ;;  %v7793_v29 = vstv %s7698_s29  ;;  %v2436_v33 = vmul.f32 %v6906_v43, %v7747_v38  ;;  %v1006_v16 = vadd.f32 %v10045_v14, %v966_v46  ;;  %10046 = vst [vmem:[#allocation65_spill] sm:$0xff] %v7803_v21  ;;  %10047 = vst [vmem:[#allocation71_spill] sm:$0xff] %v7805_v9  ;;  %s4840_s29 = smov 64  }
 0x586   :  { %v3238_v35 = vrot.slane %v7740_v60, 2  ;;  %v7801_v62 = vstv %s7710_s30  ;;  %v7809_v34 = vmul.f32 %v6878_v27, %v7747_v38  ;;  %v2468_v52 = vmul.f32 %v6906_v43, %v7780_v30  ;;  %3106 = vrot.lane.b32.xlu0 %v7671_v54, %s4832_s20  ;;  %s4841_s30 = smov 80  }
 0x587   :  { %v7815_v60 = vmul.f32 %v6878_v27, %v7780_v30  ;;  %v2500_v46 = vmul.f32 %v6906_v43, %v7783_v18  ;;  %v964_v14 = vadd.f32 %v10049_v24, %v924_v6  ;;  %v1046_v9 = vadd.f32 %v10050_v20, %v1006_v16  ;;  %v10055_v24 = vld [vmem:[#allocation73_spill] sm:$0xff] }
 0x588   :  { %v7823_v21 = vmul.f32 %v6878_v27, %v7783_v18  ;;  %v7827_v15 = vmul.f32 %v6878_v27, %v7801_v62  ;;  %2948 = vrot.lane.b32.xlu1 %v2941_v44, %s4832_s20  ;;  %v10053_v17 = vrot.slane %v7556_v3, 4  ;;  %v7839_v6 = vmul.f32 %v6906_v43, %v7793_v29  ;;  %v7851_v3 = vpop.permute.xlu0 %2286 }
 0x589   :  { %10048 = vst [vmem:[#allocation75_spill] sm:$0xff] %v7815_v60  ;;  %v2448_v16 = vrot.slane %v2436_v33, 1  ;;  %v2532_v20 = vmul.f32 %v6906_v43, %v7801_v62  ;;  %v1004_v5 = vadd.f32 %v10055_v24, %v964_v14  ;;  %v1086_v37 = vadd.f32 %v10056_v2, %v1046_v9  ;;  %10058 = vst [vmem:[#allocation83_spill] sm:$0xff] %v7851_v3  ;;  %v10061_v14 = vld [vmem:[#allocation77_spill] sm:$0xff]  ;;  %v10070_v3 = vld [vmem:[#allocation87_spill] sm:$0xff] }
 0x58a   :  { %10051 = vst [vmem:[#allocation69_spill] sm:$0xff] %v7823_v21  ;;  %10052 = vst [vmem:[#allocation79_spill] sm:$0xff] %v7827_v15  ;;  %v7835_v40 = vsel %vm738_vm12, %v10053_v17, %v3055_v48  ;;  %v7846_v54 = vstv %s7749_s18  ;;  %v7849_v44 = vstv %s7751_s5  ;;  %v7853_v17 = vpop.permute.xlu1 %2102  ;;  %v2480_v58 = vrot.slane %v2468_v52, 2  ;;  %3142 = vrot.lane.b32.xlu0 %v7708_v36, %s4832_s20  ;;  %s4842_s18 = smov 96   ;;  %s4843_s5 = smov 112  }
 0x58b   :  { %10054 = vst [vmem:[#allocation178_spill] sm:$0xff] %v7839_v6  ;;  %10057 = vst [vmem:[#allocation73_spill] sm:$0xff] %v7849_v44  ;;  %v7859_v6 = vmul.f32 %v6878_v27, %v7846_v54  ;;  %v1044_v24 = vadd.f32 %v10061_v14, %v1004_v5  ;;  %v2512_v2 = vrot.slane %v2500_v46, 3  ;;  %v2544_v52 = vrot.slane %v2532_v20, 4  ;;  %v10063_v46 = vld [vmem:[#allocation81_spill] sm:$0xff] }
 0x58c   :  { %10059 = vst [vmem:[#allocation179_spill] sm:$0xff] %v7853_v17  ;;  %2984 = vrot.lane.b32.xlu1 %v7725_v45, %s4832_s20  ;;  %v2564_v33 = vmul.f32 %v6906_v43, %v7846_v54  ;;  %v2596_v48 = vmul.f32 %v6906_v43, %v7849_v44  ;;  %v7874_v5 = vmul.f32 %v6878_v27, %v7849_v44  ;;  %v7884_v20 = vpop.permute.xlu0 %2322  ;;  %v10067_v43 = vrot.slane %v7744_v47, 2 }
 0x58d   :  { %10060 = vst [vmem:[#allocation180_spill] sm:$0xff] %v7859_v6  ;;  %v1084_v14 = vadd.f32 %v10063_v46, %v1044_v24  ;;  %v1112_v9 = vadd.f32 %v10064_v4, %v1086_v37  ;;  %v3229_v36 = vmul.f32 %v6948_v63, %v7718_v39  ;;  %v7882_v45 = vmul.f32 %v6925_v11, %v7718_v39 }
 0x58e   :  { %10062 = vst [vmem:[#allocation77_spill] sm:$0xff] %v7874_v5  ;;  %10065 = vst [vmem:[#allocation81_spill] sm:$0xff] %v7884_v20  ;;  %v7886_v17 = vpop.permute.xlu1 %2138  ;;  %v7891_v27 = vsel %vm672_vm10, %v3238_v35, %v10067_v43  ;;  %v10068_v24 = vrot.slane %v7809_v34, 1  ;;  %v3045_v46 = vmul.f32 %v7535_v51, %v7243_v12  ;;  %v10071_v20 = vrot.slane %v7815_v60, 2  ;;  %3146 = vrot.lane.b32.xlu0 %v7730_v55, %s4832_s20 }
 0x58f   :  { %10066 = vst [vmem:[#allocation24_spill] sm:$0xff] %v7886_v17  ;;  %v1152_v59 = vadd.f32 %v10070_v3, %v1112_v9  ;;  %v10073_v35 = vrot.slane %v7823_v21, 3  ;;  %v2576_v51 = vrot.slane %v2564_v33, 5  ;;  %v2608_v3 = vrot.slane %v2596_v48, 6 }
 0x590   :  { %v7896_v4 = vsel %vm639_vm9, %v2448_v16, %v10068_v24  ;;  %v7905_v17 = vsel %vm672_vm10, %v2480_v58, %v10071_v20  ;;  %v10075_v16 = vrot.slane %v7827_v15, 4  ;;  %2988 = vrot.lane.b32.xlu1 %v7761_v41, %s4832_s20  ;;  %v7924_v9 = vmul.f32 %v6925_v11, %v7747_v38  ;;  %v7931_v55 = vpop.permute.xlu0 %2326 }
 0x591   :  { %10069 = vst [vmem:[#allocation181_spill] sm:$0xff] %v7896_v4  ;;  %10072 = vst [vmem:[#allocation87_spill] sm:$0xff] %v7905_v17  ;;  %v7910_v43 = vsel %vm705_vm11, %v2512_v2, %v10073_v35  ;;  %v10078_v2 = vld [vmem:[#allocation23_spill] sm:$0xff]  ;;  %v10081_v48 = vrot.slane %v7859_v6, 5  ;;  %v3060_v11 = vrot.slane %v3045_v46, 4  ;;  %v10091_v15 = vrot.slane %v7882_v45, 2 }
 0x592   :  { %10074 = vst [vmem:[#allocation182_spill] sm:$0xff] %v7910_v43  ;;  %v7915_v24 = vsel %vm738_vm12, %v2544_v52, %v10075_v16  ;;  %10077 = vst [vmem:[#allocation184_spill] sm:$0xff] %v7924_v9  ;;  %v1110_v20 = vadd.f32 %v10078_v2, %v1084_v14  ;;  %v10079_v35 = vld [vmem:[#allocation91_spill] sm:$0xff]  ;;  %v3243_v52 = vrot.slane %v3229_v36, 2  ;;  %v7933_v41 = vpop.permute.xlu1 %2142  ;;  %v2439_v14 = vmul.f32 %v6948_v63, %v7747_v38  ;;  %v10084_v36 = vld [vmem:[#allocation85_spill] sm:$0xff] }
 0x593   :  { %10076 = vst [vmem:[#allocation183_spill] sm:$0xff] %v7915_v24  ;;  %v1192_v37 = vadd.f32 %v10079_v35, %v1152_v59  ;;  %10080 = vst [vmem:[#allocation23_spill] sm:$0xff] %v7933_v41  ;;  %v7938_v33 = vsel %vm771_vm13, %v2576_v51, %v10081_v48  ;;  %v7942_v2 = vld [vmem:[#allocation3 + $0x50] sm:$0xff]  ;;  %v7950_v24 = vld [vmem:[#allocation3 + $0x48] sm:$0xff]  ;;  %3208 = vrot.lane.b32.xlu0 %v7766_v19, %s4833_s22  ;;  %v10087_v63 = vrot.slane %v7874_v5, 6  ;;  %v10094_v5 = vrot.slane %v7564_v26, 4 }
 0x594   :  { %10082 = vst [vmem:[#allocation91_spill] sm:$0xff] %v7938_v33  ;;  %v7946_v59 = vmul.f32 %v7942_v2, %v7780_v30  ;;  %v1150_v35 = vadd.f32 %v10084_v36, %v1110_v20  ;;  %v10085_v16 = vld [vmem:[#allocation95_spill] sm:$0xff]  ;;  %v7954_v51 = vmul.f32 %v7950_v24, %v7793_v29  ;;  %v7958_v46 = vmul.f32 %v7942_v2, %v7783_v18  ;;  %v10089_v36 = vld [vmem:[#allocation89_spill] sm:$0xff] }
 0x595   :  { %v1232_v58 = vadd.f32 %v10085_v16, %v1192_v37  ;;  %3024 = vrot.lane.b32.xlu1 %v7771_v1, %s4832_s20  ;;  %v7967_v37 = vsel %vm175_vm4, %v2608_v3, %v10087_v63  ;;  %v2471_v16 = vmul.f32 %v7950_v24, %v7780_v30  ;;  %v2503_v48 = vmul.f32 %v7950_v24, %v7783_v18  ;;  %v10090_v33 = vld [vmem:[#allocation99_spill] sm:$0xff]  ;;  %v7983_v63 = vpop.permute.xlu0 %2362 }
 0x596   :  { %10083 = vst [vmem:[#allocation185_spill] sm:$0xff] %v7946_v59  ;;  %10086 = vst [vmem:[#allocation85_spill] sm:$0xff] %v7958_v46  ;;  %v1190_v6 = vadd.f32 %v10089_v36, %v1150_v35  ;;  %v3245_v1 = vsel %vm672_vm10, %v3243_v52, %v10091_v15  ;;  %v7981_v3 = vmul.f32 %v7942_v2, %v7801_v62  ;;  %v7985_v20 = vpop.permute.xlu1 %2204  ;;  %v2453_v43 = vrot.slane %v2439_v14, 1  ;;  %v10095_v15 = vld [vmem:[#allocation93_spill] sm:$0xff]  ;;  %v10096_v35 = vld [vmem:[#allocation103_spill] sm:$0xff] }
 0x597   :  { %10088 = vst [vmem:[#allocation95_spill] sm:$0xff] %v7967_v37  ;;  %v1272_v19 = vadd.f32 %v10090_v33, %v1232_v58  ;;  %10093 = vst [vmem:[#allocation99_spill] sm:$0xff] %v7985_v20  ;;  %v3061_v37 = vsel %vm738_vm12, %v10094_v5, %v3060_v11  ;;  %v2535_v33 = vmul.f32 %v7950_v24, %v7801_v62  ;;  %3212 = vrot.lane.b32.xlu0 %v7777_v53, %s4833_s22 }
 0x598   :  { %10092 = vst [vmem:[#allocation89_spill] sm:$0xff] %v7981_v3  ;;  %v1230_v52 = vadd.f32 %v10095_v15, %v1190_v6  ;;  %v7998_v20 = vmul.f32 %v7942_v2, %v7846_v54  ;;  %v10098_v26 = vrot.slane %v7924_v9, 1  ;;  %v2485_v6 = vrot.slane %v2471_v16, 2 }
 0x599   :  { %v1312_v36 = vadd.f32 %v10096_v35, %v1272_v19  ;;  %3028 = vrot.lane.b32.xlu1 %v7790_v13, %s4832_s20  ;;  %v2517_v11 = vrot.slane %v2503_v48, 3  ;;  %v2567_v14 = vmul.f32 %v7950_v24, %v7846_v54  ;;  %v10099_v19 = vld [vmem:[#allocation97_spill] sm:$0xff]  ;;  %v10100_v35 = vld [vmem:[#allocation107_spill] sm:$0xff]  ;;  %v8015_v53 = vstv %s7929_s6  ;;  %v8019_v13 = vpop.permute.xlu0 %2366  ;;  %s4844_s6 = smov [#allocation10]  }
 0x59a   :  { %10097 = vst [vmem:[#allocation93_spill] sm:$0xff] %v7998_v20  ;;  %v8007_v5 = vsel %vm639_vm9, %v2453_v43, %v10098_v26  ;;  %v1270_v15 = vadd.f32 %v10099_v19, %v1230_v52  ;;  %v8021_v9 = vpop.permute.xlu1 %2208  ;;  %v10102_v43 = vrot.slane %v7946_v59, 2  ;;  %v2549_v48 = vrot.slane %v2535_v33, 4  ;;  %v10104_v19 = vld [vmem:[#allocation101_spill] sm:$0xff] }
 0x59b   :  { %v1352_v21 = vadd.f32 %v10100_v35, %v1312_v36  ;;  %10101 = vst [vmem:[#allocation103_spill] sm:$0xff] %v8021_v9  ;;  %v8030_v52 = vmul.f32 %v7950_v24, %v7849_v44  ;;  %v8032_v36 = vld [vmem:[#allocation3 + $0x38] sm:$0xff]  ;;  %v10105_v58 = vrot.slane %v7958_v46, 3  ;;  %v3082_v33 = vmul.f32 %v7569_v10, %v7200_v28  ;;  %3248 = vrot.lane.b32.xlu0 %v7891_v27, %s4833_s22  ;;  %v10108_v46 = vld [vmem:[#allocation26_spill] sm:$0xff] }
 0x59c   :  { %v8026_v16 = vsel %vm672_vm10, %v2485_v6, %v10102_v43  ;;  %v8036_v26 = vmul.f32 %v8032_v36, %v8015_v53  ;;  %v1310_v35 = vadd.f32 %v10104_v19, %v1270_v15  ;;  %v8051_v43 = vld [vmem:[#allocation3 + $0x30] sm:$0xff]  ;;  %v10107_v19 = vld [vmem:[#allocation105_spill] sm:$0xff]  ;;  %v10109_v27 = vrot.slane %v7981_v3, 4 }
 0x59d   :  { %10103 = vst [vmem:[#allocation97_spill] sm:$0xff] %v8026_v16  ;;  %v8042_v59 = vsel %vm705_vm11, %v2517_v11, %v10105_v58  ;;  %3064 = vrot.lane.b32.xlu1 %v7835_v40, %s4832_s20  ;;  %v3266_v15 = vmul.f32 %v8051_v43, %v8015_v53  ;;  %v8057_v58 = vmul.f32 %v7942_v2, %v8015_v53  ;;  %v8068_v17 = vpop.permute.xlu0 %2402  ;;  %v10126_v16 = vrot.slane %v7578_v23, 5  ;;  %v10129_v23 = vld [vmem:[#allocation82_spill] sm:$0xff] }
 0x59e   :  { %10106 = vst [vmem:[#allocation107_spill] sm:$0xff] %v8042_v59  ;;  %v3085_v11 = vmul.f32 %v7569_v10, %v7243_v12  ;;  %v1350_v6 = vadd.f32 %v10107_v19, %v1310_v35  ;;  %v1378_v9 = vadd.f32 %v10108_v46, %v1352_v21  ;;  %v8066_v40 = vsel %vm738_vm12, %v2549_v48, %v10109_v27  ;;  %v8070_v41 = vpop.permute.xlu1 %2244  ;;  %v10113_v46 = vld [vmem:[#allocation80_spill] sm:$0xff] }
 0x59f   :  { %10110 = vst [vmem:[#allocation101_spill] sm:$0xff] %v8066_v40  ;;  %v2581_v59 = vrot.slane %v2567_v14, 5  ;;  %10111 = vst [vmem:[#allocation105_spill] sm:$0xff] %v8070_v41  ;;  %v8074_v60 = vmul.f32 %v7942_v2, %v7849_v44  ;;  %v3269_v21 = vmul.f32 %v7950_v24, %v8015_v53  ;;  %v887_v48 = vadd.f32 %v10113_v46, %v7529_v61  ;;  %v10114_v14 = vld [vmem:[#allocation111_spill] sm:$0xff]  ;;  %v10117_v40 = vld [vmem:[#allocation78_spill] sm:$0xff] }
 0x5a0   :  { %v1418_v19 = vadd.f32 %v10114_v14, %v1378_v9  ;;  %v10115_v27 = vrot.slane %v7998_v20, 5  ;;  %v3095_v41 = vrot.slane %v3082_v33, 5  ;;  %v885_v10 = vadd.f32 %v10117_v40, %v7520_v50  ;;  %3252 = vrot.lane.b32.xlu0 %v3245_v1, %s4833_s22  ;;  %v10118_v61 = vld [vmem:[#allocation84_spill] sm:$0xff]  ;;  %v10119_v46 = vld [vmem:[#allocation25_spill] sm:$0xff] }
 0x5a1   :  { %10112 = vst [vmem:[#allocation26_spill] sm:$0xff] %v8074_v60  ;;  %3068 = vrot.lane.b32.xlu1 %v3061_v37, %s4832_s20  ;;  %v3278_v35 = vrot.slane %v3266_v15, 3  ;;  %v3100_v4 = vrot.slane %v3085_v11, 5  ;;  %v927_v9 = vadd.f32 %v10118_v61, %v887_v48  ;;  %v1376_v14 = vadd.f32 %v10119_v46, %v1350_v6  ;;  %v8101_v20 = vpop.permute.xlu0 %2406  ;;  %v10123_v40 = vld [vmem:[#allocation88_spill] sm:$0xff]  ;;  %v10125_v46 = vld [vmem:[#allocation119_spill] sm:$0xff] }
 0x5a2   :  { %v8086_v3 = vsel %vm771_vm13, %v2581_v59, %v10115_v27  ;;  %v10120_v59 = vld [vmem:[#allocation115_spill] sm:$0xff]  ;;  %v8099_v33 = vstv %s8017_s0  ;;  %v8103_v50 = vpop.permute.xlu1 %2248  ;;  %v10122_v37 = vrot.slane %v8036_v26, 3  ;;  %v3283_v15 = vrot.slane %v3269_v21, 3  ;;  %s4546_s0 = sshll.u32 %s4844_s6, 4  ;;  %s4547_s0 = int_to_ptr.vmem [resolvable:$true] %s4546_s0 }
 0x5a3   :  { %10116 = vst [vmem:[#allocation80_spill] sm:$0xff] %v8086_v3  ;;  %v1458_v27 = vadd.f32 %v10120_v59, %v1418_v19  ;;  %10121 = vst [vmem:[#allocation111_spill] sm:$0xff] %v8103_v50  ;;  %v8110_v11 = vmul.f32 %v7942_v2, %v8099_v33  ;;  %v3122_v6 = vmul.f32 %v7610_v8, %v7200_v28  ;;  %v10124_v19 = vld [vmem:[#allocation109_spill] sm:$0xff]  ;;  %v10127_v21 = vrot.slane %v8057_v58, 3  ;;  %p4794_p0 = scmp.lt.s32.totalorder %s4547_s0, %s4547_s0 }
 0x5a4   :  { %v3280_v1 = vsel %vm705_vm11, %v3278_v35, %v10122_v37  ;;  %v967_v48 = vadd.f32 %v10123_v40, %v927_v9  ;;  %v1416_v61 = vadd.f32 %v10124_v19, %v1376_v14  ;;  %v3096_v50 = vsel %vm771_vm13, %v10126_v16, %v3095_v41  ;;  %v10130_v41 = vld [vmem:[#allocation92_spill] sm:$0xff]  ;;  %v10131_v19 = vld [vmem:[#allocation113_spill] sm:$0xff] }
 0x5a5   :  { %v1498_v59 = vadd.f32 %v10125_v46, %v1458_v27  ;;  %3288 = vrot.lane.b32.xlu0 %v3280_v1, %s4833_s22  ;;  %3104 = vrot.lane.b32.xlu1 %v3096_v50, %s4832_s20  ;;  %v3285_v37 = vsel %vm705_vm11, %v3283_v15, %v10127_v21  ;;  %v10128_v9 = vrot.slane %v7598_v25, 5  ;;  %v3309_v27 = vmul.f32 %v7950_v24, %v8099_v33  ;;  %v10132_v1 = vld [vmem:[#allocation123_spill] sm:$0xff]  ;;  %v8135_v50 = vpop.permute.xlu0 %2676 }
 0x5a6   :  { %v925_v40 = vadd.f32 %v10129_v23, %v885_v10  ;;  %v1007_v16 = vadd.f32 %v10130_v41, %v967_v48  ;;  %v1456_v46 = vadd.f32 %v10131_v19, %v1416_v61  ;;  %10133 = vst [vmem:[#allocation78_spill] sm:$0xff] %v8135_v50  ;;  %v8137_v3 = vpop.permute.xlu1 %2284  ;;  %v3135_v15 = vrot.slane %v3122_v6, 6  ;;  %v10135_v48 = vld [vmem:[#allocation86_spill] sm:$0xff]  ;;  %v10136_v61 = vld [vmem:[#allocation96_spill] sm:$0xff]  ;;  %v10138_v41 = vld [vmem:[#allocation127_spill] sm:$0xff] }
 0x5a7   :  { %v3101_v14 = vsel %vm771_vm13, %v10128_v9, %v3100_v4  ;;  %v1538_v35 = vadd.f32 %v10132_v1, %v1498_v59  ;;  %10134 = vst [vmem:[#allocation84_spill] sm:$0xff] %v8137_v3  ;;  %v8142_v4 = vmul.f32 %v8032_v36, %v8099_v33  ;;  %v3125_v10 = vmul.f32 %v7610_v8, %v7243_v12  ;;  %v10137_v59 = vld [vmem:[#allocation117_spill] sm:$0xff] }
 0x5a8   :  { %v965_v21 = vadd.f32 %v10135_v48, %v925_v40  ;;  %v1047_v9 = vadd.f32 %v10136_v61, %v1007_v16  ;;  %v1496_v23 = vadd.f32 %v10137_v59, %v1456_v46  ;;  %v3323_v6 = vrot.slane %v3309_v27, 4  ;;  %v10139_v40 = vld [vmem:[#allocation90_spill] sm:$0xff]  ;;  %v10140_v46 = vld [vmem:[#allocation100_spill] sm:$0xff]  ;;  %v10142_v59 = vld [vmem:[#allocation131_spill] sm:$0xff] }
 0x5a9   :  { %v1578_v19 = vadd.f32 %v10138_v41, %v1538_v35  ;;  %3292 = vrot.lane.b32.xlu0 %v3285_v37, %s4833_s22  ;;  %3108 = vrot.lane.b32.xlu1 %v3101_v14, %s4832_s20  ;;  %v3306_v1 = vmul.f32 %v8051_v43, %v8099_v33  ;;  %v8157_v25 = vstv %s8093_s7  ;;  %v3188_v8 = vmul.f32 %v7660_v56, %v7200_v28  ;;  %v10141_v35 = vld [vmem:[#allocation121_spill] sm:$0xff]  ;;  %v8165_v37 = vpop.permute.xlu0 %2680  ;;  %s4789_s7 = scalar_lea.vmem %s4547_s0, 512 }
 0x5aa   :  { %v1005_v16 = vadd.f32 %v10139_v40, %v965_v21  ;;  %v1087_v48 = vadd.f32 %v10140_v46, %v1047_v9  ;;  %v1536_v61 = vadd.f32 %v10141_v35, %v1496_v23  ;;  %10143 = vst [vmem:[#allocation25_spill] sm:$0xff] %v8165_v37  ;;  %v8167_v14 = vpop.permute.xlu1 %2288  ;;  %v10145_v27 = vrot.slane %v7619_v22, 6  ;;  %v10146_v9 = vld [vmem:[#allocation94_spill] sm:$0xff]  ;;  %p4790_p13 = scmp.ne.s32.totalorder %s4547_s0, %s4789_s7  ;;  %p4795_p1 = scmp.lt.s32.totalorder %s4789_s7, %s4789_s7 }
 0x5ab   :  { %v1618_v41 = vadd.f32 %v10142_v59, %v1578_v19  ;;  %10144 = vst [vmem:[#allocation115_spill] sm:$0xff] %v8167_v14  ;;  %v3349_v28 = vmul.f32 %v7950_v24, %v8157_v25  ;;  %v8177_v21 = vmul.f32 %v7942_v2, %v8157_v25  ;;  %v10147_v19 = vld [vmem:[#allocation125_spill] sm:$0xff]  ;;  %v10148_v46 = vrot.slane %v8110_v11, 4 }
 0x5ac   :  { %v3136_v50 = vsel %vm175_vm4, %v10145_v27, %v3135_v15  ;;  %v1045_v23 = vadd.f32 %v10146_v9, %v1005_v16  ;;  %v1576_v40 = vadd.f32 %v10147_v19, %v1536_v61  ;;  %v3140_v22 = vrot.slane %v3125_v10, 6  ;;  %v10149_v61 = vld [vmem:[#allocation98_spill] sm:$0xff]  ;;  %v10150_v19 = vld [vmem:[#allocation33_spill] sm:$0xff]  ;;  %p4796_p2 = por %p4795_p1, %p4794_p0 }
 0x5ad   :  { %v3325_v35 = vsel %vm738_vm12, %v3323_v6, %v10148_v46  ;;  %3144 = vrot.lane.b32.xlu1 %v3136_v50, %s4832_s20  ;;  %v3318_v15 = vrot.slane %v3306_v1, 4  ;;  %v3201_v59 = vrot.slane %v3188_v8, 1  ;;  %v8188_v27 = vmul.f32 %v8032_v36, %v8157_v25  ;;  %v10151_v6 = vld [vmem:[#allocation129_spill] sm:$0xff]  ;;  %v8196_v37 = vpop.permute.xlu0 %2716 }
 0x5ae   :  { %3332 = vrot.lane.b32.xlu0 %v3325_v35, %s4833_s22  ;;  %v3191_v16 = vmul.f32 %v7660_v56, %v7243_v12  ;;  %v1085_v9 = vadd.f32 %v10149_v61, %v1045_v23  ;;  %v1113_v3 = vadd.f32 %v10150_v19, %v1087_v48  ;;  %v1616_v10 = vadd.f32 %v10151_v6, %v1576_v40  ;;  %v10152_v46 = vld [vmem:[#allocation29_spill] sm:$0xff]  ;;  %v8198_v50 = vpop.permute.xlu1 %2324  ;;  %v10156_v56 = vld [vmem:[#allocation104_spill] sm:$0xff]  ;;  %v10157_v23 = vld [vmem:[#allocation135_spill] sm:$0xff]  ;;  %p4797_p3 = pnand %p4796_p2, %p4790_p13 }
 0x5af   :  { %v1644_v35 = vadd.f32 %v10152_v46, %v1618_v41  ;;  %10153 = vst [vmem:[#allocation88_spill] sm:$0xff] %v8196_v37  ;;  %10154 = vst [vmem:[#allocation109_spill] sm:$0xff] %v8198_v50  ;;  %v10155_v1 = vrot.slane %v8142_v4, 4  ;;  %v3363_v14 = vrot.slane %v3349_v28, 5  ;;  %v9705_v44 = vrot.slane %v8177_v21, 5 }
 0x5b0   :  { %v3346_v12 = vmul.f32 %v8051_v43, %v8157_v25  ;;  %v1153_v48 = vadd.f32 %v10156_v56, %v1113_v3  ;;  %v10158_v41 = vrot.slane %v7643_v49, 6  ;;  %v8212_v19 = vstv %s8150_s1  ;;  %v10160_v49 = vld [vmem:[#allocation31_spill] sm:$0xff]  ;;  %v8239_v6 = vld [vmem:[#allocation3 + $0x40] sm:$0x3f] }
 0x5b1   :  { %v3320_v8 = vsel %vm738_vm12, %v3318_v15, %v10155_v1  ;;  %v1684_v40 = vadd.f32 %v10157_v23, %v1644_v35  ;;  %v10159_v28 = vrot.slane %v7677_v0, 1  ;;  %v3206_v46 = vrot.slane %v3191_v16, 1  ;;  %v10161_v35 = vld [vmem:[#allocation108_spill] sm:$0xff]  ;;  %v10163_v23 = vld [vmem:[#allocation139_spill] sm:$0xff]  ;;  %v8230_v0 = vpop.permute.xlu0 %2720 }
 0x5b2   :  { %v3141_v61 = vsel %vm175_vm4, %v10158_v41, %v3140_v22  ;;  %3328 = vrot.lane.b32.xlu0 %v3320_v8, %s4833_s22  ;;  %v8222_v3 = vmul.f32 %v7942_v2, %v8212_v19  ;;  %v1111_v22 = vadd.f32 %v10160_v49, %v1085_v9  ;;  %v1193_v1 = vadd.f32 %v10161_v35, %v1153_v48  ;;  %v10162_v8 = vld [vmem:[#allocation27_spill] sm:$0xff]  ;;  %v10167_v35 = vld [vmem:[#allocation133_spill] sm:$0xff] }
 0x5b3   :  { %3148 = vrot.lane.b32.xlu1 %v3141_v61, %s4832_s20  ;;  %v3202_v15 = vsel %vm639_vm9, %v10159_v28, %v3201_v59  ;;  %v1642_v56 = vadd.f32 %v10162_v8, %v1616_v10  ;;  %v1724_v41 = vadd.f32 %v10163_v23, %v1684_v40  ;;  %10164 = vst [vmem:[#allocation119_spill] sm:$0xff] %v8230_v0  ;;  %v8232_v59 = vpop.permute.xlu1 %2328  ;;  %v3358_v61 = vrot.slane %v3346_v12, 5  ;;  %v10165_v10 = vld [vmem:[#allocation102_spill] sm:$0xff]  ;;  %v10166_v40 = vld [vmem:[#allocation112_spill] sm:$0xff]  ;;  %v10168_v23 = vld [vmem:[#allocation143_spill] sm:$0xff]  ;;  %s8297_s20 = sld [smem:[#allocation9 + $0x43]] }
 0x5b4   :  { %v3365_v16 = vsel %vm771_vm13, %v3363_v14, %v9705_v44  ;;  %v3389_v28 = vmul.f32 %v7950_v24, %v8212_v19  ;;  %v3228_v9 = vmul.f32 %v8239_v6, %v7718_v39  ;;  %v1151_v48 = vadd.f32 %v10165_v10, %v1111_v22  ;;  %v10173_v10 = vld [vmem:[#allocation106_spill] sm:$0xff] }
 0x5b5   :  { %v1233_v49 = vadd.f32 %v10166_v40, %v1193_v1  ;;  %v1682_v8 = vadd.f32 %v10167_v35, %v1642_v56  ;;  %v1764_v37 = vadd.f32 %v10168_v23, %v1724_v41  ;;  %v10169_v0 = vrot.slane %v8074_v60, 6  ;;  %v8267_v60 = vpop.permute.xlu0 %2756 }
 0x5b6   :  { %v10170_v14 = vrot.slane %v8030_v52, 6  ;;  %3372 = vrot.lane.b32.xlu0 %v3365_v16, %s4833_s22  ;;  %v10171_v44 = vrot.slane %v8188_v27, 5  ;;  %v10172_v1 = vrot.slane %v7686_v32, 1  ;;  %v9707_v41 = vrot.slane %v8222_v3, 6  ;;  %v10174_v52 = vld [vmem:[#allocation116_spill] sm:$0xff]  ;;  %10177 = vst [vmem:[#allocation82_spill] sm:$0xff] %v8267_v60 }
 0x5b7   :  { %3210 = vrot.lane.b32.xlu1 %v3202_v15, %s4833_s22  ;;  %v1191_v40 = vadd.f32 %v10173_v10, %v1151_v48  ;;  %v1273_v35 = vadd.f32 %v10174_v52, %v1233_v49  ;;  %v8269_v15 = vpop.permute.xlu1 %2364  ;;  %v8273_v32 = vmul.f32 %v8032_v36, %v8212_v19  ;;  %v10179_v49 = vld [vmem:[#allocation110_spill] sm:$0xff]  ;;  %v10181_v10 = vld [vmem:[#allocation141_spill] sm:$0xff] }
 0x5b8   :  { %v8252_v12 = vsel %vm175_vm4, %v10170_v14, %v10169_v0  ;;  %v3360_v22 = vsel %vm771_vm13, %v3358_v61, %v10171_v44  ;;  %v3207_v56 = vsel %vm639_vm9, %v10172_v1, %v3206_v46  ;;  %v10175_v0 = vld [vmem:[#allocation137_spill] sm:$0xff]  ;;  %v10176_v14 = vld [vmem:[#allocation147_spill] sm:$0xff]  ;;  %10178 = vst [vmem:[#allocation92_spill] sm:$0xff] %v8269_v15  ;;  %v3403_v44 = vrot.slane %v3389_v28, 6  ;;  %v10180_v1 = vld [vmem:[#allocation120_spill] sm:$0xff] }
 0x5b9   :  { %v1722_v23 = vadd.f32 %v10175_v0, %v1682_v8  ;;  %v1804_v16 = vadd.f32 %v10176_v14, %v1764_v37  ;;  %v3241_v61 = vrot.slane %v3228_v9, 2  ;;  %v8275_v46 = vld [vmem:[#allocation3 + $0x58] sm:$0x3f]  ;;  %v1231_v8 = vadd.f32 %v10179_v49, %v1191_v40  ;;  %v10182_v0 = vld [vmem:[#allocation154_spill] sm:$0xff] }
 0x5ba   :  { %v3231_v48 = vmul.f32 %v8275_v46, %v7718_v39  ;;  %v1313_v37 = vadd.f32 %v10180_v1, %v1273_v35  ;;  %3368 = vrot.lane.b32.xlu0 %v3360_v22, %s4833_s22  ;;  %v3405_v28 = vsel %vm175_vm4, %v3403_v44, %v9707_v41  ;;  %v8290_v9 = vmul.f32 %v8032_v36, %v7793_v29  ;;  %v10184_v35 = vld [vmem:[#allocation114_spill] sm:$0xff]  ;;  %v10185_v22 = vld [vmem:[#allocation124_spill] sm:$0xff]  ;;  %v10187_v1 = vld [vmem:[#allocation159_spill] sm:$0xff]  ;;  %v8303_v44 = vpop.permute.xlu0 %2760 }
 0x5bb   :  { %v1762_v52 = vadd.f32 %v10181_v10, %v1722_v23  ;;  %v1844_v14 = vadd.f32 %v10182_v0, %v1804_v16  ;;  %3214 = vrot.lane.b32.xlu1 %v3207_v56, %s4833_s22  ;;  %v3386_v39 = vmul.f32 %v8051_v43, %v8212_v19  ;;  %v8295_v40 = vstv %s8224_s8  ;;  %v10186_v56 = vld [vmem:[#allocation145_spill] sm:$0xff]  ;;  %10188 = vst [vmem:[#allocation123_spill] sm:$0xff] %v8303_v44  ;;  %v8305_v0 = vpop.permute.xlu1 %2368 }
 0x5bc   :  { %10183 = vst [vmem:[#allocation113_spill] sm:$0xff] %v8290_v9  ;;  %v1271_v23 = vadd.f32 %v10184_v35, %v1231_v8  ;;  %v1353_v16 = vadd.f32 %v10185_v22, %v1313_v37  ;;  %10189 = vst [vmem:[#allocation86_spill] sm:$0xff] %v8305_v0  ;;  %v10190_v41 = vrot.slane %v7744_v47, 2  ;;  %v8313_v15 = vmul.f32 %v7942_v2, %v8295_v40  ;;  %v10191_v37 = vld [vmem:[#allocation118_spill] sm:$0xff] }
 0x5bd   :  { %v1802_v49 = vadd.f32 %v10186_v56, %v1762_v52  ;;  %v1884_v10 = vadd.f32 %v10187_v1, %v1844_v14  ;;  %v3268_v8 = vmul.f32 %v8239_v6, %v8015_v53  ;;  %v10192_v14 = vld [vmem:[#allocation151_spill] sm:$0xff]  ;;  %v3246_v22 = vrot.slane %v3231_v48, 2  ;;  %v10194_v1 = vld [vmem:[#allocation37_spill] sm:$0xff] }
 0x5be   :  { %v3242_v60 = vsel %vm672_vm10, %v10190_v41, %v3241_v61  ;;  %v1311_v52 = vadd.f32 %v10191_v37, %v1271_v23  ;;  %v3455_v56 = vmul.f32 %v7950_v24, %v8295_v40  ;;  %3412 = vrot.lane.b32.xlu0 %v3405_v28, %s4833_s22  ;;  %v3398_v47 = vrot.slane %v3386_v39, 6  ;;  %v10196_v28 = vld [vmem:[#allocation34_spill] sm:$0xff] }
 0x5bf   :  { %v1842_v35 = vadd.f32 %v10192_v14, %v1802_v49  ;;  %3250 = vrot.lane.b32.xlu1 %v3242_v60, %s4833_s22  ;;  %v3452_v41 = vmul.f32 %v8051_v43, %v8295_v40  ;;  %v8327_v61 = vmul.f32 %v8032_v36, %v8295_v40  ;;  %v3271_v23 = vmul.f32 %v8275_v46, %v8015_v53  ;;  %v10193_v49 = vld [vmem:[#allocation122_spill] sm:$0xff]  ;;  %v10195_v14 = vld [vmem:[#allocation157_spill] sm:$0xff]  ;;  %v8335_v60 = vpop.permute.xlu0 %2796  ;;  %v8341_v50 = vpop.permute.xlu1 %2404 }
 0x5c0   :  { %v1351_v48 = vadd.f32 %v10193_v49, %v1311_v52  ;;  %v1379_v37 = vadd.f32 %v10194_v1, %v1353_v16  ;;  %v1910_v44 = vadd.f32 %v10196_v28, %v1884_v10  ;;  %10197 = vst [vmem:[#allocation96_spill] sm:$0xff] %v8335_v60  ;;  %v8339_v39 = vmul.f32 %v8239_v6, %v7747_v38  ;;  %v10200_v49 = vld [vmem:[#allocation128_spill] sm:$0xff] }
 0x5c1   :  { %v1882_v9 = vadd.f32 %v10195_v14, %v1842_v35  ;;  %10198 = vst [vmem:[#allocation117_spill] sm:$0xff] %v8341_v50  ;;  %v10199_v0 = vrot.slane %v8273_v32, 6  ;;  %v9709_v52 = vrot.slane %v8313_v15, 1  ;;  %v3281_v16 = vrot.slane %v3268_v8, 3  ;;  %v10202_v8 = vld [vmem:[#allocation35_spill] sm:$0xff] }
 0x5c2   :  { %v1419_v35 = vadd.f32 %v10200_v49, %v1379_v37  ;;  %v1950_v10 = vadd.f32 %v7223_v42, %v1910_v44  ;;  %v10201_v1 = vrot.slane %v7882_v45, 2  ;;  %v3469_v28 = vrot.slane %v3455_v56, 1  ;;  %v10203_v42 = vld [vmem:[#allocation132_spill] sm:$0xff] }
 0x5c3   :  { %v3400_v53 = vsel %vm175_vm4, %v3398_v47, %v10199_v0  ;;  %v3464_v60 = vrot.slane %v3452_v41, 1  ;;  %v9708_v50 = vrot.slane %v8327_v61, 1  ;;  %v3286_v0 = vrot.slane %v3271_v23, 3  ;;  %v10204_v45 = vld [vmem:[#allocation32_spill] sm:$0xff]  ;;  %v8364_v56 = vpop.permute.xlu0 %2800 }
 0x5c4   :  { %v3247_v14 = vsel %vm672_vm10, %v10201_v1, %v3246_v22  ;;  %3408 = vrot.lane.b32.xlu0 %v3400_v53, %s4833_s22  ;;  %v8356_v47 = vstv %s8297_s20  ;;  %v1377_v37 = vadd.f32 %v10202_v8, %v1351_v48  ;;  %v1459_v44 = vadd.f32 %v10203_v42, %v1419_v35  ;;  %v8366_v53 = vpop.permute.xlu1 %2408  ;;  %v10208_v8 = vld [vmem:[#allocation161_spill] sm:$0xff] }
 0x5c5   :  { %3254 = vrot.lane.b32.xlu1 %v3247_v14, %s4833_s22  ;;  %v1908_v49 = vadd.f32 %v10204_v45, %v1882_v9  ;;  %v1990_v22 = vadd.f32 %v7303_v7, %v1950_v10  ;;  %v3471_v41 = vsel %vm639_vm9, %v3469_v28, %v9709_v52  ;;  %v10205_v23 = vrot.slane %v8036_v26, 3  ;;  %v10206_v7 = vld [vmem:[#allocation126_spill] sm:$0xff]  ;;  %v10207_v10 = vld [vmem:[#allocation136_spill] sm:$0xff] }
 0x5c6   :  { %v8376_v48 = vmul.f32 %v7942_v2, %v8356_v47  ;;  %v3311_v9 = vmul.f32 %v8275_v46, %v8099_v33  ;;  %v1417_v35 = vadd.f32 %v10206_v7, %v1377_v37  ;;  %v1499_v14 = vadd.f32 %v10207_v10, %v1459_v44  ;;  %v10210_v44 = vld [vmem:[#allocation130_spill] sm:$0xff] }
 0x5c7   :  { %v3282_v1 = vsel %vm705_vm11, %v10205_v23, %v3281_v16  ;;  %v1948_v42 = vadd.f32 %v10208_v8, %v1908_v49  ;;  %v2030_v45 = vadd.f32 %v7365_v31, %v1990_v22  ;;  %v3466_v26 = vsel %vm639_vm9, %v3464_v60, %v9708_v50  ;;  %v10211_v49 = vld [vmem:[#allocation140_spill] sm:$0xff]  ;;  %v10212_v22 = vld [vmem:[#allocation150_spill] sm:$0xff] }
 0x5c8   :  { %3478 = vrot.lane.b32.xlu0 %v3471_v41, %s4834_s24  ;;  %v10209_v16 = vrot.slane %v8057_v58, 3  ;;  %v3495_v37 = vmul.f32 %v7950_v24, %v8356_v47  ;;  %v1457_v23 = vadd.f32 %v10210_v44, %v1417_v35  ;;  %v1539_v7 = vadd.f32 %v10211_v49, %v1499_v14  ;;  %v8400_v10 = vpop.permute.xlu1 %2678  ;;  %v10215_v14 = vld [vmem:[#allocation134_spill] sm:$0xff]  ;;  %v10218_v44 = vld [vmem:[#allocation21_spill] sm:$0xff] }
 0x5c9   :  { %3290 = vrot.lane.b32.xlu1 %v3282_v1, %s4833_s22  ;;  %v1988_v31 = vadd.f32 %v7268_v57, %v1948_v42  ;;  %v2070_v41 = vadd.f32 %v10212_v22, %v2030_v45  ;;  %v8398_v1 = vpop.permute.xlu0 %2836  ;;  %10214 = vst [vmem:[#allocation90_spill] sm:$0xff] %v8400_v10  ;;  %v9710_v58 = vrot.slane %v8376_v48, 2  ;;  %v3326_v60 = vrot.slane %v3311_v9, 4  ;;  %v10216_v57 = vld [vmem:[#allocation144_spill] sm:$0xff]  ;;  %v10217_v45 = vld [vmem:[#allocation166_spill] sm:$0xff] }
 0x5ca   :  { %v3287_v28 = vsel %vm705_vm11, %v10209_v16, %v3286_v0  ;;  %10213 = vst [vmem:[#allocation127_spill] sm:$0xff] %v8398_v1  ;;  %v8405_v0 = vmul.f32 %v8032_v36, %v8356_v47  ;;  %v3308_v35 = vmul.f32 %v8239_v6, %v8099_v33  ;;  %v1497_v8 = vadd.f32 %v10215_v14, %v1457_v23  ;;  %v10219_v23 = vld [vmem:[#allocation138_spill] sm:$0xff]  ;;  %v10220_v14 = vld [vmem:[#allocation148_spill] sm:$0xff] }
 0x5cb   :  { %v1579_v42 = vadd.f32 %v10216_v57, %v1539_v7  ;;  %v2028_v16 = vadd.f32 %v10217_v45, %v1988_v31  ;;  %v2110_v49 = vadd.f32 %v10218_v44, %v2070_v41  ;;  %v3509_v9 = vrot.slane %v3495_v37, 2  ;;  %v10221_v57 = vld [vmem:[#allocation149_spill] sm:$0xff]  ;;  %v10222_v45 = vld [vmem:[#allocation171_spill] sm:$0xff] }
 0x5cc   :  { %3474 = vrot.lane.b32.xlu0 %v3466_v26, %s4834_s24  ;;  %v3492_v33 = vmul.f32 %v8051_v43, %v8356_v47  ;;  %v8421_v50 = vstv %s8358_s2  ;;  %v1537_v7 = vadd.f32 %v10219_v23, %v1497_v8  ;;  %v8429_v22 = vpop.permute.xlu1 %2682  ;;  %v3351_v8 = vmul.f32 %v8275_v46, %v8157_v25 }
 0x5cd   :  { %3294 = vrot.lane.b32.xlu1 %v3287_v28, %s4833_s22  ;;  %v1619_v31 = vadd.f32 %v10220_v14, %v1579_v42  ;;  %v2068_v41 = vadd.f32 %v10221_v57, %v2028_v16  ;;  %v2150_v44 = vadd.f32 %v10222_v45, %v2110_v49  ;;  %v8427_v52 = vpop.permute.xlu0 %2840  ;;  %10224 = vst [vmem:[#allocation121_spill] sm:$0xff] %v8429_v22  ;;  %v10225_v42 = vld [vmem:[#allocation142_spill] sm:$0xff]  ;;  %v10226_v49 = vld [vmem:[#allocation156_spill] sm:$0xff]  ;;  %v10227_v14 = vrot.slane %v8110_v11, 4 }
 0x5ce   :  { %10223 = vst [vmem:[#allocation100_spill] sm:$0xff] %v8427_v52  ;;  %v3511_v26 = vsel %vm672_vm10, %v3509_v9, %v9710_v58  ;;  %v8437_v37 = vmul.f32 %v7942_v2, %v8421_v50  ;;  %v1577_v16 = vadd.f32 %v10225_v42, %v1537_v7  ;;  %v3321_v45 = vrot.slane %v3308_v35, 4  ;;  %v10228_v11 = vld [vmem:[#allocation146_spill] sm:$0xff]  ;;  %v10230_v42 = vld [vmem:[#allocation28_spill] sm:$0xff] }
 0x5cf   :  { %v2108_v23 = vadd.f32 %v10226_v49, %v2068_v41  ;;  %v3327_v57 = vsel %vm738_vm12, %v10227_v14, %v3326_v60  ;;  %v3504_v9 = vrot.slane %v3492_v33, 2  ;;  %v3535_v58 = vmul.f32 %v7950_v24, %v8421_v50  ;;  %v10229_v60 = vld [vmem:[#allocation41_spill] sm:$0xff]  ;;  %v10231_v49 = vld [vmem:[#allocation38_spill] sm:$0xff] }
 0x5d0   :  { %3518 = vrot.lane.b32.xlu0 %v3511_v26, %s4834_s24  ;;  %v3532_v28 = vmul.f32 %v8051_v43, %v8421_v50  ;;  %v8454_v7 = vmul.f32 %v8032_v36, %v8421_v50  ;;  %v1617_v41 = vadd.f32 %v10228_v11, %v1577_v16  ;;  %v1645_v35 = vadd.f32 %v10229_v60, %v1619_v31  ;;  %v10235_v11 = vld [vmem:[#allocation155_spill] sm:$0xff] }
 0x5d1   :  { %3334 = vrot.lane.b32.xlu1 %v3327_v57, %s4833_s22  ;;  %v2148_v26 = vadd.f32 %v10230_v42, %v2108_v23  ;;  %v2176_v14 = vadd.f32 %v10231_v49, %v2150_v44  ;;  %v8460_v33 = vpop.permute.xlu0 %2876  ;;  %v8462_v57 = vpop.permute.xlu1 %2718  ;;  %v10234_v10 = vrot.slane %v8405_v0, 2  ;;  %v3366_v52 = vrot.slane %v3351_v8, 5  ;;  %v10236_v60 = vld [vmem:[#allocation175_spill] sm:$0xff] }
 0x5d2   :  { %10232 = vst [vmem:[#allocation131_spill] sm:$0xff] %v8460_v33  ;;  %10233 = vst [vmem:[#allocation94_spill] sm:$0xff] %v8462_v57  ;;  %v3348_v16 = vmul.f32 %v8239_v6, %v8157_v25  ;;  %v1685_v31 = vadd.f32 %v10235_v11, %v1645_v35  ;;  %v10237_v44 = vrot.slane %v8142_v4, 4  ;;  %v8476_v49 = vstv %s8413_s9  ;;  %v10238_v35 = vld [vmem:[#allocation39_spill] sm:$0xff]  ;;  %v10240_v11 = vld [vmem:[#allocation36_spill] sm:$0xff] }
 0x5d3   :  { %v3506_v22 = vsel %vm672_vm10, %v3504_v9, %v10234_v10  ;;  %v2216_v23 = vadd.f32 %v10236_v60, %v2176_v14  ;;  %v3549_v10 = vrot.slane %v3535_v58, 3  ;;  %v3544_v9 = vrot.slane %v3532_v28, 3  ;;  %v10239_v14 = vld [vmem:[#allocation160_spill] sm:$0xff] }
 0x5d4   :  { %v3322_v42 = vsel %vm738_vm12, %v10237_v44, %v3321_v45  ;;  %3514 = vrot.lane.b32.xlu0 %v3506_v22, %s4834_s24  ;;  %v8483_v25 = vmul.f32 %v7942_v2, %v8476_v49  ;;  %v1643_v4 = vadd.f32 %v10238_v35, %v1617_v41  ;;  %v1725_v45 = vadd.f32 %v10239_v14, %v1685_v31  ;;  %v10241_v44 = vld [vmem:[#allocation63_spill] sm:$0xff]  ;;  %v10246_v31 = vld [vmem:[#allocation152_spill] sm:$0xff]  ;;  %v10248_v14 = vld [vmem:[#allocation173_spill] sm:$0xff] }
 0x5d5   :  { %3330 = vrot.lane.b32.xlu1 %v3322_v42, %s4833_s22  ;;  %v2174_v60 = vadd.f32 %v10240_v11, %v2148_v26  ;;  %v2256_v22 = vadd.f32 %v10241_v44, %v2216_v23  ;;  %v8491_v1 = vpop.permute.xlu0 %2880  ;;  %v8493_v58 = vpop.permute.xlu1 %2722  ;;  %v10244_v28 = vrot.slane %v8437_v37, 3  ;;  %v10245_v8 = vrot.slane %v8177_v21, 5  ;;  %v10247_v35 = vld [vmem:[#allocation163_spill] sm:$0xff] }
 0x5d6   :  { %10242 = vst [vmem:[#allocation125_spill] sm:$0xff] %v8491_v1  ;;  %10243 = vst [vmem:[#allocation98_spill] sm:$0xff] %v8493_v58  ;;  %v3361_v33 = vrot.slane %v3348_v16, 5  ;;  %v3391_v41 = vmul.f32 %v8275_v46, %v8212_v19  ;;  %v1683_v26 = vadd.f32 %v10246_v31, %v1643_v4  ;;  %v1765_v23 = vadd.f32 %v10247_v35, %v1725_v45  ;;  %v10249_v44 = vld [vmem:[#allocation83_spill] sm:$0xff]  ;;  %v10252_v45 = vld [vmem:[#allocation165_spill] sm:$0xff] }
 0x5d7   :  { %v3551_v42 = vsel %vm705_vm11, %v3549_v10, %v10244_v28  ;;  %v3367_v57 = vsel %vm771_vm13, %v10245_v8, %v3366_v52  ;;  %v2214_v11 = vadd.f32 %v10248_v14, %v2174_v60  ;;  %v2296_v58 = vadd.f32 %v10249_v44, %v2256_v22  ;;  %v10251_v8 = vld [vmem:[#allocation158_spill] sm:$0xff]  ;;  %v10253_v22 = vld [vmem:[#allocation61_spill] sm:$0xff] }
 0x5d8   :  { %v8509_v1 = vmul.f32 %v8239_v6, %v7780_v30  ;;  %3558 = vrot.lane.b32.xlu0 %v3551_v42, %s4834_s24  ;;  %v10250_v21 = vrot.slane %v8454_v7, 3  ;;  %v3575_v16 = vmul.f32 %v7950_v24, %v8476_v49  ;;  %v9712_v10 = vrot.slane %v8483_v25, 4 }
 0x5d9   :  { %3374 = vrot.lane.b32.xlu1 %v3367_v57, %s4833_s22  ;;  %v1723_v4 = vadd.f32 %v10251_v8, %v1683_v26  ;;  %v1805_v60 = vadd.f32 %v10252_v45, %v1765_v23  ;;  %v2254_v28 = vadd.f32 %v10253_v22, %v2214_v11  ;;  %v2336_v31 = vadd.f32 %v7931_v55, %v2296_v58  ;;  %v8523_v42 = vpop.permute.xlu0 %2942  ;;  %v8525_v57 = vpop.permute.xlu1 %2758  ;;  %v10256_v23 = vld [vmem:[#allocation162_spill] sm:$0xff]  ;;  %v10257_v55 = vld [vmem:[#allocation168_spill] sm:$0xff] }
 0x5da   :  { %v3546_v52 = vsel %vm705_vm11, %v3544_v9, %v10250_v21  ;;  %10254 = vst [vmem:[#allocation33_spill] sm:$0xff] %v8525_v57  ;;  %v10255_v9 = vrot.slane %v8188_v27, 5  ;;  %v3406_v14 = vrot.slane %v3391_v41, 6  ;;  %v8532_v44 = vmul.f32 %v8032_v36, %v8476_v49  ;;  %v10258_v21 = vld [vmem:[#allocation65_spill] sm:$0xff]  ;;  %v10260_v22 = vld [vmem:[#allocation170_spill] sm:$0xff] }
 0x5db   :  { %v3388_v26 = vmul.f32 %v8239_v6, %v8212_v19  ;;  %v1763_v11 = vadd.f32 %v10256_v23, %v1723_v4  ;;  %v1845_v58 = vadd.f32 %v10257_v55, %v1805_v60  ;;  %v2294_v8 = vadd.f32 %v10258_v21, %v2254_v28  ;;  %v10259_v4 = vld [vmem:[#allocation164_spill] sm:$0xff]  ;;  %v10261_v28 = vld [vmem:[#allocation81_spill] sm:$0xff] }
 0x5dc   :  { %v3362_v35 = vsel %vm771_vm13, %v10255_v9, %v3361_v33  ;;  %v2376_v45 = vadd.f32 %v8019_v13, %v2336_v31  ;;  %v8542_v27 = vmul.f32 %v8239_v6, %v7783_v18  ;;  %3554 = vrot.lane.b32.xlu0 %v3546_v52, %s4834_s24  ;;  %v3589_v33 = vrot.slane %v3575_v16, 4 }
 0x5dd   :  { %3370 = vrot.lane.b32.xlu1 %v3362_v35, %s4833_s22  ;;  %v3572_v19 = vmul.f32 %v8051_v43, %v8476_v49  ;;  %v8549_v41 = vstv %s8485_s10  ;;  %v1803_v60 = vadd.f32 %v10259_v4, %v1763_v11  ;;  %v1885_v13 = vadd.f32 %v10260_v22, %v1845_v58  ;;  %v8557_v23 = vpop.permute.xlu0 %2946  ;;  %v8559_v52 = vpop.permute.xlu1 %2762 }
 0x5de   :  { %v2334_v31 = vadd.f32 %v10261_v28, %v2294_v8  ;;  %v2416_v9 = vadd.f32 %v8101_v20, %v2376_v45  ;;  %10262 = vst [vmem:[#allocation129_spill] sm:$0xff] %v8559_v52  ;;  %v3591_v16 = vsel %vm738_vm12, %v3589_v33, %v9712_v10  ;;  %v10263_v35 = vrot.slane %v8222_v3, 6  ;;  %v10264_v20 = vld [vmem:[#allocation167_spill] sm:$0xff] }
 0x5df   :  { %v8569_v11 = vmul.f32 %v7942_v2, %v8549_v41  ;;  %v3457_v58 = vmul.f32 %v8275_v46, %v8295_v40  ;;  %v1843_v21 = vadd.f32 %v10264_v20, %v1803_v60  ;;  %v9711_v45 = vrot.slane %v8532_v44, 4  ;;  %v10267_v60 = vld [vmem:[#allocation169_spill] sm:$0xff] }
 0x5e0   :  { %v3407_v55 = vsel %vm175_vm4, %v10263_v35, %v3406_v14  ;;  %v2374_v8 = vadd.f32 %v7983_v63, %v2334_v31  ;;  %v3401_v4 = vrot.slane %v3388_v26, 6  ;;  %v10265_v33 = vrot.slane %v8339_v39, 1  ;;  %3598 = vrot.lane.b32.xlu0 %v3591_v16, %s4834_s24  ;;  %v10268_v26 = vld [vmem:[#allocation46_spill] sm:$0xff] }
 0x5e1   :  { %v10266_v3 = vrot.slane %v7809_v34, 1  ;;  %v2483_v22 = vrot.slane %v8509_v1, 2  ;;  %3414 = vrot.lane.b32.xlu1 %v3407_v55, %s4833_s22  ;;  %v3584_v28 = vrot.slane %v3572_v19, 4  ;;  %v3615_v63 = vmul.f32 %v7950_v24, %v8549_v41  ;;  %v8596_v16 = vpop.permute.xlu0 %2982  ;;  %v8598_v55 = vpop.permute.xlu1 %2798 }
 0x5e2   :  { %v1883_v31 = vadd.f32 %v10267_v60, %v1843_v21  ;;  %v1911_v35 = vadd.f32 %v10268_v26, %v1885_v13  ;;  %v2414_v39 = vadd.f32 %v8068_v17, %v2374_v8  ;;  %v2432_v34 = vadd.f32 %v7954_v51, %v2416_v9  ;;  %10269 = vst [vmem:[#allocation29_spill] sm:$0xff] %v8596_v16  ;;  %v10271_v13 = vld [vmem:[#allocation22_spill] sm:$0xff] }
 0x5e3   :  { %v8581_v14 = vsel %vm639_vm9, %v10266_v3, %v10265_v33  ;;  %v8594_v1 = vmul.f32 %v8239_v6, %v7801_v62  ;;  %10270 = vst [vmem:[#allocation104_spill] sm:$0xff] %v8598_v55  ;;  %v9713_v19 = vrot.slane %v8569_v11, 5  ;;  %v3472_v20 = vrot.slane %v3457_v58, 1  ;;  %v10284_v55 = vld [vmem:[#allocation97_spill] sm:$0xff] }
 0x5e4   :  { %v8603_v21 = vmul.f32 %v8032_v36, %v8549_v41  ;;  %v1951_v17 = vadd.f32 %v10271_v13, %v1911_v35  ;;  %v3586_v51 = vsel %vm738_vm12, %v3584_v28, %v9711_v45  ;;  %v10272_v9 = vrot.slane %v8273_v32, 6  ;;  %v10273_v32 = vld [vmem:[#allocation44_spill] sm:$0xff]  ;;  %v10275_v13 = vld [vmem:[#allocation178_spill] sm:$0xff] }
 0x5e5   :  { %v3454_v33 = vmul.f32 %v8239_v6, %v8295_v40  ;;  %v8616_v58 = vmul.f32 %v8239_v6, %v7846_v54  ;;  %3594 = vrot.lane.b32.xlu0 %v3586_v51, %s4834_s24  ;;  %v3629_v3 = vrot.slane %v3615_v63, 5  ;;  %v3612_v60 = vmul.f32 %v8051_v43, %v8549_v41  ;;  %v8629_v45 = vpop.permute.xlu0 %2986  ;;  %v8631_v10 = vpop.permute.xlu1 %2802 }
 0x5e6   :  { %v3402_v8 = vsel %vm175_vm4, %v10272_v9, %v3401_v4  ;;  %v8623_v28 = vstv %s8551_s11  ;;  %v1909_v26 = vadd.f32 %v10273_v32, %v1883_v31  ;;  %v10274_v4 = vld [vmem:[#allocation172_spill] sm:$0xff]  ;;  %v2430_v40 = vadd.f32 %v10275_v13, %v2414_v39  ;;  %10276 = vst [vmem:[#allocation135_spill] sm:$0xff] %v8631_v10  ;;  %v10280_v13 = vld [vmem:[#allocation73_spill] sm:$0xff] }
 0x5e7   :  { %3410 = vrot.lane.b32.xlu1 %v3402_v8, %s4833_s22  ;;  %v1991_v35 = vadd.f32 %v10274_v4, %v1951_v17  ;;  %v2464_v9 = vadd.f32 %v8007_v5, %v2432_v34  ;;  %v3631_v63 = vsel %vm771_vm13, %v3629_v3, %v9713_v19  ;;  %v10277_v51 = vrot.slane %v8313_v15, 1  ;;  %s8644_s22 = sld [smem:[#allocation9 + $0x3d]]  ;;  %v10278_v5 = vld [vmem:[#allocation153_spill] sm:$0xff]  ;;  %v10279_v34 = vld [vmem:[#allocation176_spill] sm:$0xff] }
 0x5e8   :  { %v8642_v17 = vmul.f32 %v7942_v2, %v8623_v28  ;;  %v1949_v39 = vadd.f32 %v10278_v5, %v1909_v26  ;;  %v3467_v4 = vrot.slane %v3454_v33, 1  ;;  %v3497_v3 = vmul.f32 %v8275_v46, %v8356_v47  ;;  %v10281_v5 = vld [vmem:[#allocation30_spill] sm:$0xff]  ;;  %v10282_v33 = vld [vmem:[#allocation67_spill] sm:$0xff]  ;;  %v10283_v19 = vld [vmem:[#allocation181_spill] sm:$0xff] }
 0x5e9   :  { %v3473_v8 = vsel %vm639_vm9, %v10277_v51, %v3472_v20  ;;  %v2031_v32 = vadd.f32 %v10279_v34, %v1991_v35  ;;  %v2515_v15 = vrot.slane %v8542_v27, 3  ;;  %v8653_v20 = vmul.f32 %v8239_v6, %v10280_v13  ;;  %3638 = vrot.lane.b32.xlu0 %v3631_v63, %s4834_s24  ;;  %v8663_v57 = vpop.permute.xlu0 %3022  ;;  %v8665_v10 = vpop.permute.xlu1 %2838 }
 0x5ea   :  { %v3624_v51 = vrot.slane %v3612_v60, 5  ;;  %v3655_v26 = vmul.f32 %v7950_v24, %v8623_v28  ;;  %v1989_v35 = vadd.f32 %v10281_v5, %v1949_v39  ;;  %v2462_v31 = vadd.f32 %v10283_v19, %v2430_v40  ;;  %10285 = vst [vmem:[#allocation31_spill] sm:$0xff] %v8663_v57  ;;  %10286 = vst [vmem:[#allocation108_spill] sm:$0xff] %v8665_v10  ;;  %v10288_v19 = vld [vmem:[#allocation174_spill] sm:$0xff]  ;;  %v10291_v10 = vld [vmem:[#allocation75_spill] sm:$0xff] }
 0x5eb   :  { %3480 = vrot.lane.b32.xlu1 %v3473_v8, %s4834_s24  ;;  %v2071_v34 = vadd.f32 %v10282_v33, %v2031_v32  ;;  %v2496_v27 = vadd.f32 %v10284_v55, %v2464_v9  ;;  %v10287_v63 = vrot.slane %v8603_v21, 5  ;;  %v8673_v52 = vmul.f32 %v8032_v36, %v8623_v28  ;;  %v10289_v55 = vld [vmem:[#allocation179_spill] sm:$0xff] }
 0x5ec   :  { %v3494_v39 = vmul.f32 %v8239_v6, %v8356_v47  ;;  %v2029_v40 = vadd.f32 %v10288_v19, %v1989_v35  ;;  %v10290_v32 = vrot.slane %v8327_v61, 1  ;;  %v3512_v33 = vrot.slane %v3497_v3, 2  ;;  %v10293_v61 = vld [vmem:[#allocation177_spill] sm:$0xff]  ;;  %v10294_v3 = vld [vmem:[#allocation23_spill] sm:$0xff] }
 0x5ed   :  { %v3626_v8 = vsel %vm771_vm13, %v3624_v51, %v10287_v63  ;;  %v2111_v9 = vadd.f32 %v10289_v55, %v2071_v34  ;;  %v10292_v51 = vrot.slane %v10291_v10, 2  ;;  %v2547_v60 = vrot.slane %v8594_v1, 4  ;;  %v10295_v34 = vld [vmem:[#allocation87_spill] sm:$0xff]  ;;  %v8700_v1 = vpop.permute.xlu1 %2842 }
 0x5ee   :  { %v3468_v5 = vsel %vm639_vm9, %v10290_v32, %v3467_v4  ;;  %3634 = vrot.lane.b32.xlu0 %v3626_v8, %s4834_s24  ;;  %v3669_v47 = vrot.slane %v3655_v26, 6  ;;  %v3652_v35 = vmul.f32 %v8051_v43, %v8623_v28  ;;  %v2069_v4 = vadd.f32 %v10293_v61, %v2029_v40  ;;  %v10296_v19 = vld [vmem:[#allocation107_spill] sm:$0xff]  ;;  %v8698_v32 = vpop.permute.xlu0 %3026  ;;  %10297 = vst [vmem:[#allocation27_spill] sm:$0xff] %v8700_v1 }
 0x5ef   :  { %v8685_v63 = vsel %vm672_vm10, %v10292_v51, %v2483_v22  ;;  %3476 = vrot.lane.b32.xlu1 %v3468_v5, %s4834_s24  ;;  %v2151_v10 = vadd.f32 %v10294_v3, %v2111_v9  ;;  %v2494_v22 = vadd.f32 %v10295_v34, %v2462_v31  ;;  %v2528_v55 = vadd.f32 %v10296_v19, %v2496_v27  ;;  %v10299_v40 = vld [vmem:[#allocation71_spill] sm:$0xff]  ;;  %v10301_v34 = vld [vmem:[#allocation69_spill] sm:$0xff]  ;;  %v10305_v5 = vld [vmem:[#allocation182_spill] sm:$0xff] }
 0x5f0   :  { %v10298_v8 = vrot.slane %v8642_v17, 6  ;;  %v3507_v51 = vrot.slane %v3494_v39, 2  ;;  %v8707_v57 = vstv %s8644_s22  ;;  %v2109_v61 = vadd.f32 %v10299_v40, %v2069_v4  ;;  %v10303_v4 = vld [vmem:[#allocation24_spill] sm:$0xff]  ;;  %v10304_v40 = vld [vmem:[#allocation51_spill] sm:$0xff] }
 0x5f1   :  { %v10300_v9 = vrot.slane %v8376_v48, 2  ;;  %v8715_v27 = vmul.f32 %v7942_v2, %v8707_v57  ;;  %v3537_v3 = vmul.f32 %v8275_v46, %v8421_v50  ;;  %v3664_v48 = vrot.slane %v3652_v35, 6 }
 0x5f2   :  { %v3671_v26 = vsel %vm175_vm4, %v3669_v47, %v10298_v8  ;;  %v10302_v47 = vrot.slane %v10301_v34, 3  ;;  %v2149_v8 = vadd.f32 %v10303_v4, %v2109_v61  ;;  %v2526_v1 = vadd.f32 %v10305_v5, %v2494_v22  ;;  %v10306_v34 = vld [vmem:[#allocation101_spill] sm:$0xff]  ;;  %v10309_v22 = vld [vmem:[#allocation103_spill] sm:$0xff] }
 0x5f3   :  { %v3513_v31 = vsel %vm672_vm10, %v10300_v9, %v3512_v33  ;;  %3678 = vrot.lane.b32.xlu0 %v3671_v26, %s4834_s24  ;;  %v3721_v33 = vmul.f32 %v7950_v24, %v8707_v57  ;;  %v2177_v9 = vadd.f32 %v10304_v40, %v2151_v10  ;;  %v2560_v16 = vadd.f32 %v10306_v34, %v2528_v55  ;;  %v8736_v26 = vpop.permute.xlu1 %2878 }
 0x5f4   :  { %v8722_v19 = vsel %vm705_vm11, %v10302_v47, %v2515_v15  ;;  %3520 = vrot.lane.b32.xlu1 %v3513_v31, %s4834_s24  ;;  %v8734_v47 = vpop.permute.xlu0 %3062  ;;  %10307 = vst [vmem:[#allocation139_spill] sm:$0xff] %v8736_v26  ;;  %v10308_v35 = vrot.slane %v8673_v52, 6  ;;  %v8743_v61 = vmul.f32 %v8032_v36, %v8707_v57  ;;  %v3534_v10 = vmul.f32 %v8239_v6, %v8421_v50  ;;  %v10311_v15 = vld [vmem:[#allocation79_spill] sm:$0xff] }
 0x5f5   :  { %v2217_v55 = vadd.f32 %v10309_v22, %v2177_v9  ;;  %v10310_v5 = vrot.slane %v8405_v0, 2  ;;  %v3552_v34 = vrot.slane %v3537_v3, 3  ;;  %v10312_v39 = vrot.slane %v10311_v15, 4  ;;  %v10313_v0 = vld [vmem:[#allocation49_spill] sm:$0xff]  ;;  %v10314_v22 = vld [vmem:[#allocation183_spill] sm:$0xff]  ;;  %v10315_v3 = vld [vmem:[#allocation80_spill] sm:$0xff] }
 0x5f6   :  { %v3666_v31 = vsel %vm175_vm4, %v3664_v48, %v10308_v35  ;;  %v3735_v35 = vrot.slane %v3721_v33, 1  ;;  %v3718_v50 = vmul.f32 %v8051_v43, %v8707_v57  ;;  %v8762_v9 = vstv %s8692_s12  ;;  %v10316_v15 = vld [vmem:[#allocation111_spill] sm:$0xff] }
 0x5f7   :  { %v3508_v4 = vsel %vm672_vm10, %v10310_v5, %v3507_v51  ;;  %v8755_v48 = vsel %vm738_vm12, %v10312_v39, %v2547_v60  ;;  %3674 = vrot.lane.b32.xlu0 %v3666_v31, %s4834_s24  ;;  %v2175_v51 = vadd.f32 %v10313_v0, %v2149_v8  ;;  %v2558_v5 = vadd.f32 %v10314_v22, %v2526_v1  ;;  %v8770_v39 = vpop.permute.xlu1 %2882  ;;  %v10318_v1 = vld [vmem:[#allocation99_spill] sm:$0xff] }
 0x5f8   :  { %3516 = vrot.lane.b32.xlu1 %v3508_v4, %s4834_s24  ;;  %v2592_v40 = vadd.f32 %v10315_v3, %v2560_v16  ;;  %v2257_v26 = vadd.f32 %v10316_v15, %v2217_v55  ;;  %v8768_v60 = vpop.permute.xlu0 %3066  ;;  %10317 = vst [vmem:[#allocation102_spill] sm:$0xff] %v8770_v39  ;;  %v3547_v33 = vrot.slane %v3534_v10, 3  ;;  %v8775_v4 = vmul.f32 %v7942_v2, %v8762_v9  ;;  %v10319_v0 = vld [vmem:[#allocation115_spill] sm:$0xff] }
 0x5f9   :  { %v3577_v8 = vmul.f32 %v8275_v46, %v8476_v49  ;;  %v2215_v16 = vadd.f32 %v10318_v1, %v2175_v51  ;;  %v10320_v22 = vrot.slane %v8715_v27, 1  ;;  %v10321_v15 = vrot.slane %v8437_v37, 3  ;;  %v10323_v37 = vld [vmem:[#allocation105_spill] sm:$0xff] }
 0x5fa   :  { %v2297_v55 = vadd.f32 %v10319_v0, %v2257_v26  ;;  %v2429_v31 = vmul.f32 %v7942_v2, %v7793_v29  ;;  %v8793_v39 = vmul.f32 %v8275_v46, %v7747_v38  ;;  %v3730_v26 = vrot.slane %v3718_v50, 1 }
 0x5fb   :  { %v3737_v3 = vsel %vm639_vm9, %v3735_v35, %v10320_v22  ;;  %v3553_v10 = vsel %vm705_vm11, %v10321_v15, %v3552_v34  ;;  %v3761_v51 = vmul.f32 %v7950_v24, %v8762_v9  ;;  %v10322_v35 = vld [vmem:[#allocation91_spill] sm:$0xff]  ;;  %v2255_v0 = vadd.f32 %v10323_v37, %v2215_v16  ;;  %v8805_v38 = vpop.permute.xlu1 %2944  ;;  %v10327_v16 = vld [vmem:[#allocation84_spill] sm:$0xff] }
 0x5fc   :  { %3744 = vrot.lane.b32.xlu0 %v3737_v3, %s4835_s26  ;;  %3560 = vrot.lane.b32.xlu1 %v3553_v10, %s4834_s24  ;;  %v2590_v1 = vadd.f32 %v10322_v35, %v2558_v5  ;;  %v2624_v34 = vadd.f32 %v8252_v12, %v2592_v40  ;;  %v2337_v29 = vadd.f32 %v8232_v59, %v2297_v55  ;;  %v8803_v2 = vpop.permute.xlu0 %3102  ;;  %v10325_v22 = vrot.slane %v8743_v61, 1  ;;  %v10328_v12 = vld [vmem:[#allocation86_spill] sm:$0xff] }
 0x5fd   :  { %10324 = vst [vmem:[#allocation112_spill] sm:$0xff] %v8805_v38  ;;  %v10326_v50 = vrot.slane %v8454_v7, 3  ;;  %v9714_v5 = vrot.slane %v8775_v4, 2  ;;  %v3592_v15 = vrot.slane %v3577_v8, 4  ;;  %v2295_v10 = vadd.f32 %v10327_v16, %v2255_v0  ;;  %v10331_v0 = vld [vmem:[#allocation109_spill] sm:$0xff] }
 0x5fe   :  { %v3732_v3 = vsel %vm639_vm9, %v3730_v26, %v10325_v22  ;;  %v2377_v40 = vadd.f32 %v10328_v12, %v2337_v29  ;;  %v8818_v59 = vmul.f32 %v8032_v36, %v8762_v9  ;;  %v3574_v55 = vmul.f32 %v8239_v6, %v8476_v49  ;;  %v10329_v36 = vld [vmem:[#allocation95_spill] sm:$0xff]  ;;  %v10330_v49 = vld [vmem:[#allocation42_spill] sm:$0xff] }
 0x5ff   :  { %v3548_v24 = vsel %vm705_vm11, %v10326_v50, %v3547_v33  ;;  %v2456_v26 = vrot.slane %v8793_v39, 1  ;;  %v8825_v7 = vmul.f32 %v8275_v46, %v7780_v30  ;;  %v3775_v33 = vrot.slane %v3761_v51, 2  ;;  %v8839_v22 = vpop.permute.xlu1 %2948 }
 0x600   :  { %3740 = vrot.lane.b32.xlu0 %v3732_v3, %s4835_s26  ;;  %3556 = vrot.lane.b32.xlu1 %v3548_v24, %s4834_s24  ;;  %v3758_v8 = vmul.f32 %v8051_v43, %v8762_v9  ;;  %v2622_v35 = vadd.f32 %v10329_v36, %v2590_v1  ;;  %v2650_v37 = vadd.f32 %v10330_v49, %v2624_v34  ;;  %v8837_v30 = vpop.permute.xlu0 %3106  ;;  %v10333_v43 = vrot.slane %v8483_v25, 4  ;;  %v10334_v34 = vld [vmem:[#allocation92_spill] sm:$0xff] }
 0x601   :  { %v2335_v39 = vadd.f32 %v10331_v0, %v2295_v10  ;;  %v2417_v29 = vadd.f32 %v8366_v53, %v2377_v40  ;;  %10332 = vst [vmem:[#allocation133_spill] sm:$0xff] %v8839_v22  ;;  %v3777_v51 = vsel %vm672_vm10, %v3775_v33, %v9714_v5  ;;  %v8848_v50 = vstv %s8779_s13  ;;  %v8854_v10 = vld [vmem:[#allocation3 + $0x50] sm:$0xff]  ;;  %v8867_v33 = vld [vmem:[#allocation3 + $0x48] sm:$0xff]  ;;  %v10336_v0 = vld [vmem:[#allocation25_spill] sm:$0xff] }
 0x602   :  { %v3593_v3 = vsel %vm738_vm12, %v10333_v43, %v3592_v15  ;;  %v3617_v1 = vmul.f32 %v8275_v46, %v8549_v41  ;;  %v9715_v53 = vrot.slane %v8818_v59, 2  ;;  %v3587_v16 = vrot.slane %v3574_v55, 4  ;;  %v10335_v36 = vld [vmem:[#allocation40_spill] sm:$0xff]  ;;  %v10337_v43 = vld [vmem:[#allocation117_spill] sm:$0xff] }
 0x603   :  { %v2375_v24 = vadd.f32 %v10334_v34, %v2335_v39  ;;  %v8858_v12 = vmul.f32 %v8854_v10, %v8848_v50  ;;  %v2488_v25 = vrot.slane %v8825_v7, 2  ;;  %v8863_v15 = vmul.f32 %v8275_v46, %v7783_v18 }
 0x604   :  { %3784 = vrot.lane.b32.xlu0 %v3777_v51, %s4835_s26  ;;  %3600 = vrot.lane.b32.xlu1 %v3593_v3, %s4834_s24  ;;  %v3770_v40 = vrot.slane %v3758_v8, 2  ;;  %v3801_v55 = vmul.f32 %v8867_v33, %v8848_v50  ;;  %v2648_v49 = vadd.f32 %v10335_v36, %v2622_v35  ;;  %v2690_v39 = vadd.f32 %v10336_v0, %v2650_v37  ;;  %v8882_v8 = vpop.permute.xlu0 %3142  ;;  %v8884_v3 = vpop.permute.xlu1 %2984 }
 0x605   :  { %v2415_v7 = vadd.f32 %v10337_v43, %v2375_v24  ;;  %v2433_v34 = vadd.f32 %v2429_v31, %v2417_v29  ;;  %v8876_v18 = vmul.f32 %v8275_v46, %v7801_v62  ;;  %v8880_v51 = vmul.f32 %v8275_v46, %v7846_v54  ;;  %10338 = vst [vmem:[#allocation143_spill] sm:$0xff] %v8884_v3  ;;  %v8895_v29 = vld [vmem:[#allocation3 + $0x38] sm:$0xff]  ;;  %v10342_v43 = vld [vmem:[#allocation78_spill] sm:$0xff] }
 0x606   :  { %v3632_v5 = vrot.slane %v3617_v1, 5  ;;  %v3614_v35 = vmul.f32 %v8239_v6, %v8549_v41  ;;  %v3772_v31 = vsel %vm672_vm10, %v3770_v40, %v9715_v53  ;;  %v10339_v62 = vrot.slane %v8532_v44, 4  ;;  %v10340_v1 = vld [vmem:[#allocation184_spill] sm:$0xff]  ;;  %v10343_v53 = vld [vmem:[#allocation119_spill] sm:$0xff]  ;;  %v10344_v3 = vld [vmem:[#allocation113_spill] sm:$0xff] }
 0x607   :  { %v8899_v24 = vmul.f32 %v8895_v29, %v8848_v50  ;;  %v10341_v36 = vrot.slane %v10340_v1, 1  ;;  %v3815_v40 = vrot.slane %v3801_v55, 3  ;;  %v8906_v44 = vld [vmem:[#allocation3 + $0x30] sm:$0xff]  ;;  %v8911_v0 = vstv %s8831_s14 }
 0x608   :  { %v3588_v37 = vsel %vm738_vm12, %v10339_v62, %v3587_v16  ;;  %3780 = vrot.lane.b32.xlu0 %v3772_v31, %s4835_s26  ;;  %v3798_v16 = vmul.f32 %v8906_v44, %v8848_v50  ;;  %v2688_v62 = vadd.f32 %v10342_v43, %v2648_v49  ;;  %v2730_v54 = vadd.f32 %v10343_v53, %v2690_v39  ;;  %v8920_v31 = vpop.permute.xlu0 %3146  ;;  %v8922_v55 = vpop.permute.xlu1 %2988  ;;  %v10346_v53 = vld [vmem:[#allocation123_spill] sm:$0xff] }
 0x609   :  { %v2457_v41 = vsel %vm639_vm9, %v10341_v36, %v2456_v26  ;;  %3596 = vrot.lane.b32.xlu1 %v3588_v37, %s4834_s24  ;;  %v2431_v1 = vadd.f32 %v10344_v3, %v2415_v7  ;;  %v8918_v26 = vmul.f32 %v8275_v46, %v10280_v13  ;;  %v10345_v37 = vrot.slane %v8569_v11, 5  ;;  %v10348_v3 = vld [vmem:[#allocation185_spill] sm:$0xff] }
 0x60a   :  { %v2465_v38 = vadd.f32 %v2457_v41, %v2433_v34  ;;  %v3627_v22 = vrot.slane %v3614_v35, 5  ;;  %v8929_v49 = vmul.f32 %v8854_v10, %v8911_v0  ;;  %v2770_v39 = vadd.f32 %v10346_v53, %v2730_v54 }
 0x60b   :  { %v3633_v36 = vsel %vm771_vm13, %v10345_v37, %v3632_v5  ;;  %v10347_v13 = vrot.slane %v8858_v12, 3  ;;  %v3657_v11 = vmul.f32 %v8275_v46, %v8623_v28  ;;  %v10349_v5 = vrot.slane %v10348_v3, 2 }
 0x60c   :  { %v2520_v41 = vrot.slane %v8863_v15, 3  ;;  %v3810_v54 = vrot.slane %v3798_v16, 3  ;;  %v3841_v43 = vmul.f32 %v8867_v33, %v8911_v0  ;;  %v2463_v53 = vadd.f32 %v8581_v14, %v2431_v1  ;;  %v8951_v3 = vpop.permute.xlu0 %3208 }
 0x60d   :  { %v3817_v7 = vsel %vm705_vm11, %v3815_v40, %v10347_v13  ;;  %v2489_v35 = vsel %vm672_vm10, %v10349_v5, %v2488_v25  ;;  %3640 = vrot.lane.b32.xlu1 %v3633_v36, %s4834_s24  ;;  %v10350_v40 = vld [vmem:[#allocation88_spill] sm:$0xff]  ;;  %v2810_v13 = vadd.f32 %v8364_v56, %v2770_v39  ;;  %v8953_v25 = vpop.permute.xlu1 %3024  ;;  %v10351_v15 = vrot.slane %v8603_v21, 5 }
 0x60e   :  { %3824 = vrot.lane.b32.xlu0 %v3817_v7, %s4835_s26  ;;  %v2728_v37 = vadd.f32 %v10350_v40, %v2688_v62  ;;  %v2497_v34 = vadd.f32 %v2489_v35, %v2465_v38  ;;  %v9716_v16 = vrot.slane %v8929_v49, 4  ;;  %v8961_v36 = vmul.f32 %v8895_v29, %v8911_v0  ;;  %v10352_v62 = vld [vmem:[#allocation82_spill] sm:$0xff]  ;;  %v10353_v38 = vld [vmem:[#allocation100_spill] sm:$0xff]  ;;  %v10355_v35 = vld [vmem:[#allocation85_spill] sm:$0xff] }
 0x60f   :  { %v3628_v7 = vsel %vm771_vm13, %v10351_v15, %v3627_v22  ;;  %v3654_v14 = vmul.f32 %v8239_v6, %v8623_v28  ;;  %v2850_v1 = vadd.f32 %v10353_v38, %v2810_v13  ;;  %v10354_v39 = vrot.slane %v8899_v24, 3  ;;  %v10357_v13 = vld [vmem:[#allocation96_spill] sm:$0xff]  ;;  %v10358_v38 = vld [vmem:[#allocation125_spill] sm:$0xff] }
 0x610   :  { %v2768_v56 = vadd.f32 %v10352_v62, %v2728_v37  ;;  %v3672_v21 = vrot.slane %v3657_v11, 6  ;;  %v10356_v22 = vrot.slane %v10355_v35, 3  ;;  %v2552_v15 = vrot.slane %v8876_v18, 4 }
 0x611   :  { %v3812_v5 = vsel %vm705_vm11, %v3810_v54, %v10354_v39  ;;  %3636 = vrot.lane.b32.xlu1 %v3628_v7, %s4834_s24  ;;  %v3855_v28 = vrot.slane %v3841_v43, 4  ;;  %v3838_v37 = vmul.f32 %v8906_v44, %v8911_v0  ;;  %v2495_v11 = vadd.f32 %v8685_v63, %v2463_v53  ;;  %v8983_v39 = vpop.permute.xlu0 %3212  ;;  %v8985_v18 = vpop.permute.xlu1 %3028 }
 0x612   :  { %v2521_v40 = vsel %vm705_vm11, %v10356_v22, %v2520_v41  ;;  %3820 = vrot.lane.b32.xlu0 %v3812_v5, %s4835_s26  ;;  %v2808_v54 = vadd.f32 %v10357_v13, %v2768_v56  ;;  %v2890_v41 = vadd.f32 %v10358_v38, %v2850_v1  ;;  %v3667_v5 = vrot.slane %v3654_v14, 6  ;;  %v10359_v22 = vld [vmem:[#allocation127_spill] sm:$0xff] }
 0x613   :  { %v2529_v62 = vadd.f32 %v2521_v40, %v2497_v34  ;;  %v3857_v43 = vsel %vm738_vm12, %v3855_v28, %v9716_v16  ;;  %v8992_v35 = vstv %s8931_s15  ;;  %v10360_v63 = vrot.slane %v8642_v17, 6  ;;  %v10361_v40 = vld [vmem:[#allocation89_spill] sm:$0xff] }
 0x614   :  { %v2848_v56 = vadd.f32 %v10359_v22, %v2808_v54  ;;  %v9000_v53 = vmul.f32 %v8854_v10, %v8992_v35  ;;  %v3723_v1 = vmul.f32 %v8275_v46, %v8707_v57  ;;  %v10362_v28 = vrot.slane %v10361_v40, 4  ;;  %v10363_v22 = vld [vmem:[#allocation131_spill] sm:$0xff]  ;;  %v10364_v16 = vld [vmem:[#allocation45_spill] sm:$0xff] }
 0x615   :  { %v3673_v34 = vsel %vm175_vm4, %v10360_v63, %v3672_v21  ;;  %v2584_v14 = vrot.slane %v8880_v51, 5  ;;  %v3850_v17 = vrot.slane %v3838_v37, 4  ;;  %v3881_v21 = vmul.f32 %v8867_v33, %v8992_v35  ;;  %v9016_v40 = vpop.permute.xlu0 %3248  ;;  %v9018_v51 = vpop.permute.xlu1 %3064 }
 0x616   :  { %v2553_v13 = vsel %vm738_vm12, %v10362_v28, %v2552_v15  ;;  %3864 = vrot.lane.b32.xlu0 %v3857_v43, %s4835_s26  ;;  %3680 = vrot.lane.b32.xlu1 %v3673_v34, %s4834_s24  ;;  %v2527_v54 = vadd.f32 %v8722_v19, %v2495_v11  ;;  %v2888_v63 = vadd.f32 %v10363_v22, %v2848_v56  ;;  %v2616_v15 = vrot.slane %v8918_v26, 6  ;;  %v10367_v56 = vld [vmem:[#allocation93_spill] sm:$0xff] }
 0x617   :  { %v2561_v38 = vadd.f32 %v2553_v13, %v2529_v62  ;;  %v2916_v7 = vadd.f32 %v10364_v16, %v2890_v41  ;;  %v10365_v43 = vrot.slane %v8961_v36, 4  ;;  %v9025_v34 = vmul.f32 %v8895_v29, %v8992_v35 }
 0x618   :  { %v3720_v19 = vmul.f32 %v8239_v6, %v8707_v57  ;;  %v10366_v11 = vrot.slane %v8673_v52, 6  ;;  %v3896_v62 = vrot.slane %v9000_v53, 5  ;;  %v3738_v41 = vrot.slane %v3723_v1, 1 }
 0x619   :  { %v3852_v37 = vsel %vm738_vm12, %v3850_v17, %v10365_v43  ;;  %v2956_v16 = vadd.f32 %v8557_v23, %v2916_v7  ;;  %v10368_v28 = vrot.slane %v10367_v56, 5  ;;  %v3895_v17 = vrot.slane %v3881_v21, 5  ;;  %v10369_v7 = vld [vmem:[#allocation43_spill] sm:$0xff]  ;;  %v9051_v22 = vpop.permute.xlu1 %3068 }
 0x61a   :  { %v3668_v26 = vsel %vm175_vm4, %v10366_v11, %v3667_v5  ;;  %3860 = vrot.lane.b32.xlu0 %v3852_v37, %s4835_s26  ;;  %v3878_v6 = vmul.f32 %v8906_v44, %v8992_v35  ;;  %v9042_v57 = vstv %s8978_s16  ;;  %v2559_v23 = vadd.f32 %v8755_v48, %v2527_v54 }
 0x61b   :  { %v2585_v13 = vsel %vm771_vm13, %v10368_v28, %v2584_v14  ;;  %3676 = vrot.lane.b32.xlu1 %v3668_v26, %s4834_s24  ;;  %v2914_v5 = vadd.f32 %v10369_v7, %v2888_v63  ;;  %v2996_v1 = vadd.f32 %v8629_v45, %v2956_v16  ;;  %v9049_v14 = vpop.permute.xlu0 %3252  ;;  %v3891_v21 = vrot.slane %v9025_v34, 5  ;;  %v10372_v16 = vld [vmem:[#allocation180_spill] sm:$0xff]  ;;  %v10374_v28 = vld [vmem:[#allocation26_spill] sm:$0xff]  ;;  %s9115_s24 = sld [smem:[#allocation9 + $0x45]] }
 0x61c   :  { %v2593_v52 = vadd.f32 %v2585_v13, %v2561_v38  ;;  %v3733_v43 = vrot.slane %v3720_v19, 1  ;;  %v9056_v37 = vmul.f32 %v8854_v10, %v9042_v57  ;;  %v3763_v11 = vmul.f32 %v8275_v46, %v8762_v9 }
 0x61d   :  { %v2954_v48 = vadd.f32 %v8523_v42, %v2914_v5  ;;  %v3036_v54 = vadd.f32 %v8698_v32, %v2996_v1  ;;  %v3897_v45 = vsel %vm771_vm13, %v3895_v17, %v3896_v62  ;;  %v10370_v38 = vrot.slane %v8715_v27, 1  ;;  %v10376_v17 = vld [vmem:[#allocation29_spill] sm:$0xff]  ;;  %v9084_v1 = vpop.permute.xlu1 %3104 }
 0x61e   :  { %v10371_v19 = vrot.slane %v8616_v58, 5  ;;  %v10373_v26 = vrot.slane %v10372_v16, 5  ;;  %v10375_v46 = vrot.slane %v10374_v28, 6  ;;  %3904 = vrot.lane.b32.xlu0 %v3897_v45, %s4835_s26  ;;  %v3890_v32 = vrot.slane %v3878_v6, 5  ;;  %v10380_v16 = vld [vmem:[#allocation77_spill] sm:$0xff] }
 0x61f   :  { %v3739_v63 = vsel %vm639_vm9, %v10370_v38, %v3738_v41  ;;  %v3921_v27 = vmul.f32 %v8867_v33, %v9042_v57  ;;  %v2994_v58 = vadd.f32 %v10376_v17, %v2954_v48  ;;  %v3076_v7 = vadd.f32 %v8768_v60, %v3036_v54  ;;  %v9082_v5 = vpop.permute.xlu0 %3288  ;;  %v10378_v38 = vld [vmem:[#allocation31_spill] sm:$0xff] }
 0x620   :  { %v2580_v56 = vsel %vm771_vm13, %v10373_v26, %v10371_v19  ;;  %v2617_v42 = vsel %vm175_vm4, %v10375_v46, %v2616_v15  ;;  %3746 = vrot.lane.b32.xlu1 %v3739_v63, %s4835_s26  ;;  %v3892_v15 = vsel %vm771_vm13, %v3890_v32, %v3891_v21  ;;  %v10377_v6 = vrot.slane %v8743_v61, 1  ;;  %v9099_v63 = vld [vmem:[#allocation3 + $0x40] sm:$0x3f] }
 0x621   :  { %v2591_v13 = vadd.f32 %v2580_v56, %v2559_v23  ;;  %v2625_v41 = vadd.f32 %v2617_v42, %v2593_v52  ;;  %v3936_v23 = vrot.slane %v9056_v37, 6  ;;  %v3778_v52 = vrot.slane %v3763_v11, 2  ;;  %v9120_v17 = vpop.permute.xlu1 %3108 }
 0x622   :  { %v3734_v45 = vsel %vm639_vm9, %v10377_v6, %v3733_v43  ;;  %v3034_v48 = vadd.f32 %v10378_v38, %v2994_v58  ;;  %v3116_v60 = vadd.f32 %v8837_v30, %v3076_v7  ;;  %v9097_v54 = vmul.f32 %v8895_v29, %v9042_v57  ;;  %3900 = vrot.lane.b32.xlu0 %v3892_v15, %s4835_s26  ;;  %v9134_v15 = vld [vmem:[#allocation3 + $0x58] sm:$0x3f] }
 0x623   :  { %v3760_v19 = vmul.f32 %v9099_v63, %v8762_v9  ;;  %v10379_v61 = vrot.slane %v8653_v20, 6  ;;  %v10381_v43 = vrot.slane %v10380_v16, 6  ;;  %v3935_v30 = vrot.slane %v3921_v27, 6  ;;  %v10382_v9 = vld [vmem:[#allocation56_spill] sm:$0xff]  ;;  %v3293_v32 = vpop.permute.xlu0 %3292 }
 0x624   :  { %3742 = vrot.lane.b32.xlu1 %v3734_v45, %s4835_s26  ;;  %v3918_v11 = vmul.f32 %v8906_v44, %v9042_v57  ;;  %v9113_v56 = vstv %s9044_s17  ;;  %v2651_v46 = vadd.f32 %v10382_v9, %v2625_v41  ;;  %v3074_v20 = vadd.f32 %v8734_v47, %v3034_v48  ;;  %v10385_v48 = vld [vmem:[#allocation121_spill] sm:$0xff] }
 0x625   :  { %v2612_v26 = vsel %vm175_vm4, %v10381_v43, %v10379_v61  ;;  %v3156_v42 = vadd.f32 %v8920_v31, %v3116_v60  ;;  %v3937_v27 = vsel %vm175_vm4, %v3935_v30, %v3936_v23  ;;  %v10383_v58 = vrot.slane %v8775_v4, 2  ;;  %v10386_v61 = vld [vmem:[#allocation48_spill] sm:$0xff] }
 0x626   :  { %v2623_v28 = vadd.f32 %v2612_v26, %v2591_v13  ;;  %v9130_v13 = vmul.f32 %v8854_v10, %v9113_v56  ;;  %v3114_v41 = vadd.f32 %v8803_v2, %v3074_v20  ;;  %v3931_v47 = vrot.slane %v9097_v54, 6  ;;  %3944 = vrot.lane.b32.xlu0 %v3937_v27, %s4835_s26  ;;  %v10384_v2 = vld [vmem:[#allocation53_spill] sm:$0xff]  ;;  %v9150_v26 = vpop.permute.xlu1 %3144 }
 0x627   :  { %v3779_v7 = vsel %vm672_vm10, %v10383_v58, %v3778_v52  ;;  %v3773_v31 = vrot.slane %v3760_v19, 2  ;;  %v3803_v6 = vmul.f32 %v9134_v15, %v8848_v50  ;;  %v3930_v4 = vrot.slane %v3918_v11, 6  ;;  %v3333_v43 = vpop.permute.xlu0 %3332 }
 0x628   :  { %3786 = vrot.lane.b32.xlu1 %v3779_v7, %s4835_s26  ;;  %v3987_v45 = vmul.f32 %v8867_v33, %v9113_v56  ;;  %v9144_v52 = vmul.f32 %v8895_v29, %v9113_v56  ;;  %v2649_v38 = vadd.f32 %v10384_v2, %v2623_v28  ;;  %v2691_v60 = vadd.f32 %v10385_v48, %v2651_v46 }
 0x629   :  { %v3154_v19 = vadd.f32 %v8882_v8, %v3114_v41  ;;  %v3182_v16 = vadd.f32 %v10386_v61, %v3156_v42  ;;  %v4002_v30 = vrot.slane %v9130_v13, 1  ;;  %v3984_v11 = vmul.f32 %v8906_v44, %v9113_v56 }
 0x62a   :  { %v3800_v9 = vmul.f32 %v9099_v63, %v8848_v50  ;;  %v3932_v46 = vsel %vm175_vm4, %v3930_v4, %v3931_v47  ;;  %v10387_v8 = vrot.slane %v8818_v59, 2  ;;  %v3818_v42 = vrot.slane %v3803_v6, 3  ;;  %v10389_v4 = vld [vmem:[#allocation98_spill] sm:$0xff]  ;;  %v10390_v59 = vld [vmem:[#allocation47_spill] sm:$0xff]  ;;  %v9176_v61 = vpop.permute.xlu1 %3148 }
 0x62b   :  { %v3222_v28 = vadd.f32 %v8983_v39, %v3182_v16  ;;  %3940 = vrot.lane.b32.xlu0 %v3932_v46, %s4835_s26  ;;  %v4001_v27 = vrot.slane %v3987_v45, 1  ;;  %v3997_v58 = vrot.slane %v9144_v52, 1  ;;  %v9168_v7 = vstv %s9115_s24  ;;  %v10388_v39 = vld [vmem:[#allocation90_spill] sm:$0xff]  ;;  %v3329_v6 = vpop.permute.xlu0 %3328 }
 0x62c   :  { %v3774_v20 = vsel %vm672_vm10, %v10387_v8, %v3773_v31  ;;  %v3843_v50 = vmul.f32 %v9134_v15, %v8911_v0  ;;  %v2689_v41 = vadd.f32 %v10388_v39, %v2649_v38  ;;  %v2731_v2 = vadd.f32 %v10389_v4, %v2691_v60  ;;  %v10391_v38 = vld [vmem:[#allocation129_spill] sm:$0xff]  ;;  %v10393_v39 = vld [vmem:[#allocation94_spill] sm:$0xff] }
 0x62d   :  { %3782 = vrot.lane.b32.xlu1 %v3774_v20, %s4835_s26  ;;  %v3180_v48 = vadd.f32 %v10390_v59, %v3154_v19  ;;  %v3262_v31 = vadd.f32 %v9049_v14, %v3222_v28  ;;  %v4003_v45 = vsel %vm639_vm9, %v4001_v27, %v4002_v30  ;;  %v3996_v16 = vrot.slane %v3984_v11, 1 }
 0x62e   :  { %v3813_v46 = vrot.slane %v3800_v9, 3  ;;  %v9183_v8 = vmul.f32 %v8854_v10, %v9168_v7  ;;  %v2771_v60 = vadd.f32 %v10391_v38, %v2731_v2  ;;  %v10392_v28 = vrot.slane %v8858_v12, 3  ;;  %v9202_v59 = vpop.permute.xlu1 %3210 }
 0x62f   :  { %v3220_v19 = vadd.f32 %v8951_v3, %v3180_v48  ;;  %v3302_v14 = vadd.f32 %v3293_v32, %v3262_v31  ;;  %4010 = vrot.lane.b32.xlu0 %v4003_v45, %s4836_s27  ;;  %v3998_v11 = vsel %vm639_vm9, %v3996_v16, %v3997_v58  ;;  %v4027_v9 = vmul.f32 %v8867_v33, %v9168_v7  ;;  %v10394_v3 = vld [vmem:[#allocation135_spill] sm:$0xff] }
 0x630   :  { %v3819_v20 = vsel %vm705_vm11, %v10392_v28, %v3818_v42  ;;  %v3858_v27 = vrot.slane %v3843_v50, 4  ;;  %v2729_v4 = vadd.f32 %v10393_v39, %v2689_v41  ;;  %v2811_v32 = vadd.f32 %v10394_v3, %v2771_v60  ;;  %v3373_v42 = vpop.permute.xlu0 %3372  ;;  %v10396_v41 = vld [vmem:[#allocation33_spill] sm:$0xff] }
 0x631   :  { %3826 = vrot.lane.b32.xlu1 %v3819_v20, %s4835_s26  ;;  %v3260_v12 = vadd.f32 %v9016_v40, %v3220_v19  ;;  %v3342_v2 = vadd.f32 %v3333_v43, %v3302_v14  ;;  %v10395_v48 = vrot.slane %v8899_v24, 3  ;;  %v4042_v45 = vrot.slane %v9183_v8, 2  ;;  %v10397_v40 = vld [vmem:[#allocation27_spill] sm:$0xff]  ;;  %v10398_v14 = vld [vmem:[#allocation104_spill] sm:$0xff]  ;;  %v10399_v20 = vld [vmem:[#allocation102_spill] sm:$0xff] }
 0x632   :  { %v9210_v16 = vmul.f32 %v8895_v29, %v9168_v7  ;;  %v3840_v50 = vmul.f32 %v9099_v63, %v8911_v0  ;;  %v2769_v38 = vadd.f32 %v10396_v41, %v2729_v4  ;;  %v2851_v43 = vadd.f32 %v10397_v40, %v2811_v32  ;;  %v9228_v32 = vpop.permute.xlu1 %3214 }
 0x633   :  { %v3814_v31 = vsel %vm705_vm11, %v10395_v48, %v3813_v46  ;;  %v3300_v60 = vadd.f32 %v9082_v5, %v3260_v12  ;;  %v3382_v19 = vadd.f32 %v3373_v42, %v3342_v2  ;;  %4006 = vrot.lane.b32.xlu0 %v3998_v11, %s4836_s27  ;;  %v4041_v24 = vrot.slane %v4027_v9, 2  ;;  %v10401_v2 = vld [vmem:[#allocation108_spill] sm:$0xff] }
 0x634   :  { %v4024_v46 = vmul.f32 %v8906_v44, %v9168_v7  ;;  %v2809_v28 = vadd.f32 %v10398_v14, %v2769_v38  ;;  %v2891_v0 = vadd.f32 %v10399_v20, %v2851_v43  ;;  %v10400_v4 = vrot.slane %v8929_v49, 4  ;;  %v3369_v5 = vpop.permute.xlu0 %3368  ;;  %v10402_v38 = vld [vmem:[#allocation139_spill] sm:$0xff]  ;;  %v10403_v43 = vld [vmem:[#allocation60_spill] sm:$0xff] }
 0x635   :  { %3822 = vrot.lane.b32.xlu1 %v3814_v31, %s4835_s26  ;;  %v3340_v39 = vadd.f32 %v3329_v6, %v3300_v60  ;;  %v4043_v11 = vsel %vm672_vm10, %v4041_v24, %v4042_v45  ;;  %v4037_v9 = vrot.slane %v9210_v16, 2  ;;  %v9235_v12 = vstv %s9185_s19  ;;  %v10413_v16 = vld [vmem:[#allocation66_spill] sm:$0xff] }
 0x636   :  { %v3859_v3 = vsel %vm738_vm12, %v10400_v4, %v3858_v27  ;;  %v3883_v6 = vmul.f32 %v9134_v15, %v8992_v35  ;;  %v2849_v49 = vadd.f32 %v10401_v2, %v2809_v28  ;;  %v3853_v27 = vrot.slane %v3840_v50, 4  ;;  %v9252_v14 = vpop.permute.xlu1 %3250  ;;  %v10406_v2 = vld [vmem:[#allocation58_spill] sm:$0xff] }
 0x637   :  { %v3380_v42 = vadd.f32 %v3369_v5, %v3340_v39  ;;  %v9242_v48 = vmul.f32 %v8854_v10, %v9235_v12  ;;  %4050 = vrot.lane.b32.xlu0 %v4043_v11, %s4836_s27  ;;  %v4036_v31 = vrot.slane %v4024_v46, 2  ;;  %v4067_v41 = vmul.f32 %v8867_v33, %v9235_v12  ;;  %v10404_v39 = vld [vmem:[#allocation133_spill] sm:$0xff] }
 0x638   :  { %v2889_v40 = vadd.f32 %v10402_v38, %v2849_v49  ;;  %v2917_v60 = vadd.f32 %v10403_v43, %v2891_v0  ;;  %v3880_v24 = vmul.f32 %v9099_v63, %v8992_v35  ;;  %v3413_v50 = vpop.permute.xlu0 %3412  ;;  %v3898_v20 = vrot.slane %v3883_v6, 5 }
 0x639   :  { %3866 = vrot.lane.b32.xlu1 %v3859_v3, %s4835_s26  ;;  %v4038_v28 = vsel %vm672_vm10, %v4036_v31, %v4037_v9  ;;  %v9259_v46 = vmul.f32 %v8895_v29, %v9235_v12  ;;  %v3422_v3 = vadd.f32 %v3413_v50, %v3382_v19  ;;  %v10405_v0 = vrot.slane %v8961_v36, 4 }
 0x63a   :  { %v2957_v4 = vadd.f32 %v10404_v39, %v2917_v60  ;;  %v4082_v5 = vrot.slane %v9242_v48, 3  ;;  %v4081_v11 = vrot.slane %v4067_v41, 3  ;;  %v4064_v6 = vmul.f32 %v8906_v44, %v9235_v12  ;;  %v10408_v39 = vld [vmem:[#allocation143_spill] sm:$0xff]  ;;  %v10414_v48 = vld [vmem:[#allocation68_spill] sm:$0xff] }
 0x63b   :  { %v3854_v35 = vsel %vm738_vm12, %v10405_v0, %v3853_v27  ;;  %4046 = vrot.lane.b32.xlu0 %v4038_v28, %s4836_s27  ;;  %v2915_v49 = vadd.f32 %v10406_v2, %v2889_v40  ;;  %v3893_v38 = vrot.slane %v3880_v24, 5  ;;  %v9273_v19 = vstv %s9226_s21  ;;  %v9277_v27 = vpop.permute.xlu1 %3254  ;;  %v10407_v40 = vld [vmem:[#allocation112_spill] sm:$0xff] }
 0x63c   :  { %v2997_v31 = vadd.f32 %v8922_v55, %v2957_v4  ;;  %v3409_v36 = vpop.permute.xlu0 %3408  ;;  %v3899_v43 = vsel %vm771_vm13, %v3896_v62, %v3898_v20  ;;  %v4077_v41 = vrot.slane %v9259_v46, 3  ;;  %v9285_v60 = vmul.f32 %v8854_v10, %v9273_v19 }
 0x63d   :  { %3862 = vrot.lane.b32.xlu1 %v3854_v35, %s4835_s26  ;;  %v3923_v55 = vmul.f32 %v9134_v15, %v9042_v57  ;;  %v2955_v24 = vadd.f32 %v10407_v40, %v2915_v49  ;;  %v3420_v28 = vadd.f32 %v3409_v36, %v3380_v42  ;;  %v4083_v53 = vsel %vm705_vm11, %v4081_v11, %v4082_v5  ;;  %v10409_v35 = vld [vmem:[#allocation50_spill] sm:$0xff] }
 0x63e   :  { %v3037_v50 = vadd.f32 %v8985_v18, %v2997_v31  ;;  %v4076_v62 = vrot.slane %v4064_v6, 3  ;;  %v4107_v20 = vmul.f32 %v8867_v33, %v9273_v19  ;;  %v3448_v2 = vadd.f32 %v10409_v35, %v3422_v3 }
 0x63f   :  { %4090 = vrot.lane.b32.xlu0 %v4083_v53, %s4836_s27  ;;  %v2995_v4 = vadd.f32 %v10408_v39, %v2955_v24  ;;  %v3894_v18 = vsel %vm771_vm13, %v3891_v21, %v3893_v38  ;;  %v9304_v11 = vpop.permute.xlu1 %3290  ;;  %v4122_v49 = vrot.slane %v9285_v60, 4  ;;  %v3938_v31 = vrot.slane %v3923_v55, 6 }
 0x640   :  { %v3077_v0 = vadd.f32 %v9051_v22, %v3037_v50  ;;  %v3479_v42 = vpop.permute.xlu0 %3478  ;;  %v4078_v6 = vsel %vm705_vm11, %v4076_v62, %v4077_v41  ;;  %v9312_v22 = vmul.f32 %v8895_v29, %v9273_v19  ;;  %v3920_v38 = vmul.f32 %v9099_v63, %v9042_v57 }
 0x641   :  { %3906 = vrot.lane.b32.xlu1 %v3899_v43, %s4835_s26  ;;  %v3035_v3 = vadd.f32 %v8953_v25, %v2995_v4  ;;  %v3488_v21 = vadd.f32 %v3479_v42, %v3448_v2  ;;  %v4121_v36 = vrot.slane %v4107_v20, 4  ;;  %v4104_v43 = vmul.f32 %v8906_v44, %v9273_v19  ;;  %v10411_v42 = vld [vmem:[#allocation64_spill] sm:$0xff] }
 0x642   :  { %v3117_v34 = vadd.f32 %v9120_v17, %v3077_v0  ;;  %v3989_v55 = vmul.f32 %v9134_v15, %v9113_v56  ;;  %v10410_v17 = vld [vmem:[#allocation52_spill] sm:$0xff]  ;;  %v9328_v50 = vstv %s9275_s23  ;;  %v4117_v20 = vrot.slane %v9312_v22, 4  ;;  %v10415_v22 = vld [vmem:[#allocation54_spill] sm:$0xff] }
 0x643   :  { %4086 = vrot.lane.b32.xlu0 %v4078_v6, %s4836_s27  ;;  %v3075_v40 = vadd.f32 %v9018_v51, %v3035_v3  ;;  %v3446_v24 = vadd.f32 %v10410_v17, %v3420_v28  ;;  %v3295_v53 = vpop.permute.xlu1 %3294  ;;  %v4123_v62 = vsel %vm738_vm12, %v4121_v36, %v4122_v49  ;;  %v9338_v39 = vmul.f32 %v8854_v10, %v9328_v50 }
 0x644   :  { %v3157_v25 = vadd.f32 %v9176_v61, %v3117_v34  ;;  %v3475_v57 = vpop.permute.xlu0 %3474  ;;  %v3939_v28 = vsel %vm175_vm4, %v3936_v23, %v3938_v31  ;;  %v3933_v4 = vrot.slane %v3920_v38, 6  ;;  %v4116_v0 = vrot.slane %v4104_v43, 4 }
 0x645   :  { %3902 = vrot.lane.b32.xlu1 %v3894_v18, %s4835_s26  ;;  %v3115_v51 = vadd.f32 %v9084_v1, %v3075_v40  ;;  %v3486_v61 = vadd.f32 %v3475_v57, %v3446_v24  ;;  %v4147_v35 = vmul.f32 %v8867_v33, %v9328_v50  ;;  %v4004_v2 = vrot.slane %v3989_v55, 1 }
 0x646   :  { %v3183_v6 = vadd.f32 %v10411_v42, %v3157_v25  ;;  %v9352_v1 = vmul.f32 %v8895_v29, %v9328_v50  ;;  %v4118_v31 = vsel %vm738_vm12, %v4116_v0, %v4117_v20  ;;  %v4162_v3 = vrot.slane %v9338_v39, 5  ;;  %v10412_v25 = vld [vmem:[#allocation62_spill] sm:$0xff]  ;;  %v10416_v39 = vld [vmem:[#allocation55_spill] sm:$0xff] }
 0x647   :  { %4130 = vrot.lane.b32.xlu0 %v4123_v62, %s4836_s27  ;;  %v3155_v18 = vadd.f32 %v9150_v26, %v3115_v51  ;;  %v3335_v23 = vpop.permute.xlu1 %3334  ;;  %v4144_v34 = vmul.f32 %v8906_v44, %v9328_v50  ;;  %v3934_v36 = vsel %vm175_vm4, %v3931_v47, %v3933_v4  ;;  %v3986_v43 = vmul.f32 %v9099_v63, %v9113_v56 }
 0x648   :  { %v3519_v37 = vpop.permute.xlu0 %3518  ;;  %v3223_v26 = vadd.f32 %v9228_v32, %v3183_v6  ;;  %v4161_v55 = vrot.slane %v4147_v35, 5  ;;  %v4005_v40 = vsel %vm639_vm9, %v4002_v30, %v4004_v2  ;;  %v4157_v54 = vrot.slane %v9352_v1, 5 }
 0x649   :  { %3946 = vrot.lane.b32.xlu1 %v3939_v28, %s4835_s26  ;;  %v3528_v38 = vadd.f32 %v3519_v37, %v3488_v21  ;;  %v3181_v17 = vadd.f32 %v10412_v25, %v3155_v18  ;;  %v9375_v21 = vstv %s9330_s25  ;;  %v4156_v57 = vrot.slane %v4144_v34, 5 }
 0x64a   :  { %v3263_v32 = vadd.f32 %v9277_v27, %v3223_v26  ;;  %v4163_v56 = vsel %vm771_vm13, %v4161_v55, %v4162_v3  ;;  %v9382_v13 = vmul.f32 %v8854_v10, %v9375_v21  ;;  %v4029_v30 = vmul.f32 %v9134_v15, %v9168_v7 }
 0x64b   :  { %4126 = vrot.lane.b32.xlu0 %v4118_v31, %s4836_s27  ;;  %v3331_v24 = vpop.permute.xlu1 %3330  ;;  %v3221_v27 = vadd.f32 %v9202_v59, %v3181_v17  ;;  %v3999_v28 = vrot.slane %v3986_v43, 1  ;;  %v4187_v4 = vmul.f32 %v8867_v33, %v9375_v21  ;;  %v4158_v10 = vsel %vm771_vm13, %v4156_v57, %v4157_v54 }
 0x64c   :  { %v3515_v47 = vpop.permute.xlu0 %3514  ;;  %v3303_v62 = vadd.f32 %v3295_v53, %v3263_v32  ;;  %v4202_v59 = vrot.slane %v9382_v13, 6  ;;  %v4044_v53 = vrot.slane %v4029_v30, 2  ;;  %v4026_v42 = vmul.f32 %v9099_v63, %v9168_v7 }
 0x64d   :  { %3942 = vrot.lane.b32.xlu1 %v3934_v36, %s4835_s26  ;;  %v3526_v51 = vadd.f32 %v3515_v47, %v3486_v61  ;;  %v3261_v0 = vadd.f32 %v9252_v14, %v3221_v27  ;;  %v9398_v61 = vmul.f32 %v8895_v29, %v9375_v21  ;;  %v4000_v37 = vsel %vm639_vm9, %v3997_v58, %v3999_v28  ;;  %s4838_s26 = smov 32  }
 0x64e   :  { %v3343_v35 = vadd.f32 %v3335_v23, %v3303_v62  ;;  %v4201_v23 = vrot.slane %v4187_v4, 6  ;;  %v4184_v29 = vmul.f32 %v8906_v44, %v9375_v21  ;;  %v4045_v52 = vsel %vm672_vm10, %v4042_v45, %v4044_v53 }
 0x64f   :  { %4170 = vrot.lane.b32.xlu0 %v4163_v56, %s4836_s27  ;;  %v3375_v18 = vpop.permute.xlu1 %3374  ;;  %v3301_v33 = vadd.f32 %v9304_v11, %v3261_v0  ;;  %v4197_v58 = vrot.slane %v9398_v61, 6  ;;  %v4039_v36 = vrot.slane %v4026_v42, 2  ;;  %v4069_v43 = vmul.f32 %v9134_v15, %v9235_v12  ;;  %v10417_v61 = vld [vmem:[#allocation70_spill] sm:$0xff] }
 0x650   :  { %v3559_v2 = vpop.permute.xlu0 %3558  ;;  %v3383_v6 = vadd.f32 %v3375_v18, %v3343_v35  ;;  %v4203_v7 = vsel %vm175_vm4, %v4201_v23, %v4202_v59  ;;  %v4196_v44 = vrot.slane %v4184_v29, 6  ;;  %v4066_v45 = vmul.f32 %v9099_v63, %v9235_v12 }
 0x651   :  { %4012 = vrot.lane.b32.xlu1 %v4005_v40, %s4836_s27  ;;  %v3568_v14 = vadd.f32 %v3559_v2, %v3528_v38  ;;  %v3341_v31 = vadd.f32 %v3331_v24, %v3301_v33  ;;  %v4040_v32 = vsel %vm672_vm10, %v4037_v9, %v4039_v36  ;;  %v4084_v47 = vrot.slane %v4069_v43, 3 }
 0x652   :  { %v4198_v8 = vsel %vm175_vm4, %v4196_v44, %v4197_v58  ;;  %v4109_v57 = vmul.f32 %v9134_v15, %v9273_v19  ;;  %v4079_v62 = vrot.slane %v4066_v45, 3  ;;  %v4106_v4 = vmul.f32 %v9099_v63, %v9273_v19 }
 0x653   :  { %4166 = vrot.lane.b32.xlu0 %v4158_v10, %s4836_s27  ;;  %v3371_v26 = vpop.permute.xlu1 %3370  ;;  %v4085_v12 = vsel %vm705_vm11, %v4082_v5, %v4084_v47  ;;  %v4149_v42 = vmul.f32 %v9134_v15, %v9328_v50  ;;  %v4186_v43 = vmul.f32 %v9099_v63, %v9375_v21 }
 0x654   :  { %v3555_v34 = vpop.permute.xlu0 %3554  ;;  %v3381_v38 = vadd.f32 %v3371_v26, %v3341_v31  ;;  %v4080_v10 = vsel %vm705_vm11, %v4077_v41, %v4079_v62  ;;  %v4124_v2 = vrot.slane %v4109_v57, 4 }
 0x655   :  { %4008 = vrot.lane.b32.xlu1 %v4000_v37, %s4836_s27  ;;  %v3566_v11 = vadd.f32 %v3555_v34, %v3526_v51  ;;  %v4164_v37 = vrot.slane %v4149_v42, 5  ;;  %v4146_v34 = vmul.f32 %v9099_v63, %v9328_v50  ;;  %v4199_v63 = vrot.slane %v4186_v43, 6 }
 0x656   :  { %v4125_v19 = vsel %vm738_vm12, %v4122_v49, %v4124_v2  ;;  %v4189_v49 = vmul.f32 %v9134_v15, %v9375_v21 }
 0x657   :  { %4210 = vrot.lane.b32.xlu0 %v4203_v7, %s4836_s27  ;;  %v3415_v40 = vpop.permute.xlu1 %3414 }
 0x658   :  { %v3599_v55 = vpop.permute.xlu0 %3598  ;;  %v3423_v17 = vadd.f32 %v3415_v40, %v3383_v6  ;;  %v4119_v6 = vrot.slane %v4106_v4, 4  ;;  %v4204_v40 = vrot.slane %v4189_v49, 6 }
 0x659   :  { %4052 = vrot.lane.b32.xlu1 %v4045_v52, %s4836_s27  ;;  %v3608_v25 = vadd.f32 %v3599_v55, %v3568_v14 }
 0x65a   :  { %v3449_v9 = vadd.f32 %v10413_v16, %v3423_v17  ;;  %v4120_v31 = vsel %vm738_vm12, %v4117_v20, %v4119_v6 }
 0x65b   :  { %4206 = vrot.lane.b32.xlu0 %v4198_v8, %s4836_s27  ;;  %v3411_v56 = vpop.permute.xlu1 %3410 }
 0x65c   :  { %v3595_v24 = vpop.permute.xlu0 %3594  ;;  %v3421_v27 = vadd.f32 %v3411_v56, %v3381_v38  ;;  %v4159_v38 = vrot.slane %v4146_v34, 5 }
 0x65d   :  { %4048 = vrot.lane.b32.xlu1 %v4040_v32, %s4836_s27  ;;  %v3606_v30 = vadd.f32 %v3595_v24, %v3566_v11  ;;  %v4165_v11 = vsel %vm771_vm13, %v4162_v3, %v4164_v37  ;;  %v4205_v32 = vsel %vm175_vm4, %v4202_v59, %v4204_v40  ;;  %v4200_v24 = vsel %vm175_vm4, %v4197_v58, %v4199_v63 }
 0x65e   :  { %v3447_v5 = vadd.f32 %v10414_v48, %v3421_v27  ;;  %v4160_v15 = vsel %vm771_vm13, %v4157_v54, %v4159_v38  ;;  %vm4313_vm4 = vcmask 517504  }
 0x65f   :  { %v3481_v28 = vpop.permute.xlu1 %3480 }
 0x660   :  { %v3639_v51 = vpop.permute.xlu0 %3638  ;;  %v3489_v35 = vadd.f32 %v3481_v28, %v3449_v9 }
 0x661   :  { %4092 = vrot.lane.b32.xlu1 %v4085_v12, %s4836_s27  ;;  %v3648_v0 = vadd.f32 %v3639_v51, %v3608_v25 }
 0x663   :  { %v3477_v53 = vpop.permute.xlu1 %3476 }
 0x664   :  { %v3635_v18 = vpop.permute.xlu0 %3634  ;;  %v3487_v14 = vadd.f32 %v3477_v53, %v3447_v5  ;;  %v10418_v5 = vld [vmem:[#allocation72_spill] sm:$0xff] }
 0x665   :  { %4088 = vrot.lane.b32.xlu1 %v4080_v10, %s4836_s27  ;;  %v3646_v33 = vadd.f32 %v3635_v18, %v3606_v30 }
 0x667   :  { %v3521_v41 = vpop.permute.xlu1 %3520 }
 0x668   :  { %v3679_v46 = vpop.permute.xlu0 %3678  ;;  %v3529_v29 = vadd.f32 %v3521_v41, %v3489_v35 }
 0x669   :  { %4132 = vrot.lane.b32.xlu1 %v4125_v19, %s4836_s27  ;;  %v3688_v23 = vadd.f32 %v3679_v46, %v3648_v0 }
 0x66b   :  { %v3517_v26 = vpop.permute.xlu1 %3516  ;;  %v3714_v20 = vadd.f32 %v10415_v22, %v3688_v23 }
 0x66c   :  { %v3675_v60 = vpop.permute.xlu0 %3674  ;;  %v3527_v52 = vadd.f32 %v3517_v26, %v3487_v14 }
 0x66d   :  { %4128 = vrot.lane.b32.xlu1 %v4120_v31, %s4836_s27  ;;  %v3686_v7 = vadd.f32 %v3675_v60, %v3646_v33 }
 0x66f   :  { %v3561_v50 = vpop.permute.xlu1 %3560  ;;  %v3712_v3 = vadd.f32 %v10416_v39, %v3686_v7 }
 0x670   :  { %v3745_v36 = vpop.permute.xlu0 %3744  ;;  %v3569_v55 = vadd.f32 %v3561_v50, %v3529_v29 }
 0x671   :  { %4172 = vrot.lane.b32.xlu1 %v4165_v11, %s4836_s27  ;;  %v3754_v44 = vadd.f32 %v3745_v36, %v3714_v20 }
 0x673   :  { %v3557_v45 = vpop.permute.xlu1 %3556 }
 0x674   :  { %v3741_v8 = vpop.permute.xlu0 %3740  ;;  %v3567_v17 = vadd.f32 %v3557_v45, %v3527_v52 }
 0x675   :  { %4168 = vrot.lane.b32.xlu1 %v4160_v15, %s4836_s27  ;;  %v3752_v25 = vadd.f32 %v3741_v8, %v3712_v3 }
 0x677   :  { %v3601_v1 = vpop.permute.xlu1 %3600 }
 0x678   :  { %v3785_v21 = vpop.permute.xlu0 %3784  ;;  %v3609_v54 = vadd.f32 %v3601_v1, %v3569_v55 }
 0x679   :  { %4212 = vrot.lane.b32.xlu1 %v4205_v32, %s4836_s27  ;;  %v3794_v47 = vadd.f32 %v3785_v21, %v3754_v44 }
 0x67b   :  { %v3597_v57 = vpop.permute.xlu1 %3596 }
 0x67c   :  { %v3781_v56 = vpop.permute.xlu0 %3780  ;;  %v3607_v30 = vadd.f32 %v3597_v57, %v3567_v17  ;;  %v10419_v17 = vld [vmem:[#allocation57_spill] sm:$0xff] }
 0x67d   :  { %4208 = vrot.lane.b32.xlu1 %v4200_v24, %s4836_s27  ;;  %v3792_v20 = vadd.f32 %v3781_v56, %v3752_v25  ;;  %s4839_s27 = smov 48  }
 0x67f   :  { %v3641_v13 = vpop.permute.xlu1 %3640 }
 0x680   :  { %v3825_v27 = vpop.permute.xlu0 %3824  ;;  %v3649_v12 = vadd.f32 %v3641_v13, %v3609_v54 }
 0x681   :  { %v3834_v11 = vadd.f32 %v3825_v27, %v3794_v47  ;;  %v10420_v47 = vld [vmem:[#allocation59_spill] sm:$0xff] }
 0x683   :  { %v3637_v62 = vpop.permute.xlu1 %3636 }
 0x684   :  { %v3821_v59 = vpop.permute.xlu0 %3820  ;;  %v3647_v16 = vadd.f32 %v3637_v62, %v3607_v30 }
 0x685   :  { %v3832_v50 = vadd.f32 %v3821_v59, %v3792_v20 }
 0x688   :  { %v3865_v9 = vpop.permute.xlu0 %3864  ;;  %v3681_v51 = vpop.permute.xlu1 %3680 }
 0x689   :  { %v3689_v28 = vadd.f32 %v3681_v51, %v3649_v12  ;;  %v3874_v36 = vadd.f32 %v3865_v9, %v3834_v11 }
 0x68b   :  { %v3715_v10 = vadd.f32 %v10417_v61, %v3689_v28 }
 0x68c   :  { %v3861_v4 = vpop.permute.xlu0 %3860 }
 0x68d   :  { %v3677_v0 = vpop.permute.xlu1 %3676  ;;  %v3872_v15 = vadd.f32 %v3861_v4, %v3832_v50 }
 0x68e   :  { %v3687_v35 = vadd.f32 %v3677_v0, %v3647_v16 }
 0x690   :  { %v3905_v58 = vpop.permute.xlu0 %3904  ;;  %v3713_v18 = vadd.f32 %v10418_v5, %v3687_v35 }
 0x691   :  { %v3914_v43 = vadd.f32 %v3905_v58, %v3874_v36 }
 0x692   :  { %v3747_v2 = vpop.permute.xlu1 %3746 }
 0x693   :  { %v3755_v48 = vadd.f32 %v3747_v2, %v3715_v10 }
 0x694   :  { %v3901_v53 = vpop.permute.xlu0 %3900 }
 0x695   :  { %v3912_v39 = vadd.f32 %v3901_v53, %v3872_v15 }
 0x696   :  { %v3743_v42 = vpop.permute.xlu1 %3742 }
 0x697   :  { %v3753_v33 = vadd.f32 %v3743_v42, %v3713_v18 }
 0x698   :  { %v3945_v14 = vpop.permute.xlu0 %3944 }
 0x699   :  { %v3954_v40 = vadd.f32 %v3945_v14, %v3914_v43 }
 0x69a   :  { %v3787_v19 = vpop.permute.xlu1 %3786 }
 0x69b   :  { %v3795_v6 = vadd.f32 %v3787_v19, %v3755_v48  ;;  %v3980_v32 = vadd.f32 %v10419_v17, %v3954_v40 }
 0x69d   :  { %v3941_v46 = vpop.permute.xlu0 %3940 }
 0x69e   :  { %v3952_v45 = vadd.f32 %v3941_v46, %v3912_v39 }
 0x69f   :  { %v3783_v41 = vpop.permute.xlu1 %3782 }
 0x6a0   :  { %v3978_v54 = vadd.f32 %v10420_v47, %v3952_v45  ;;  %v3793_v48 = vadd.f32 %v3783_v41, %v3753_v33 }
 0x6a1   :  { %v4011_v37 = vpop.permute.xlu0 %4010 }
 0x6a2   :  { %v4020_v63 = vadd.f32 %v4011_v37, %v3980_v32 }
 0x6a3   :  { %v3827_v23 = vpop.permute.xlu1 %3826 }
 0x6a4   :  { %v3835_v2 = vadd.f32 %v3827_v23, %v3795_v6  ;;  %v10421_v6 = vld [vmem:[#allocation74_spill] sm:$0xff]  ;;  %v10422_v23 = vld [vmem:[#allocation76_spill] sm:$0xff] }
 0x6a5   :  { %v4007_v29 = vpop.permute.xlu0 %4006 }
 0x6a6   :  { %v4018_v25 = vadd.f32 %v4007_v29, %v3978_v54  ;;  %v4837_v29 = vmov 1983009808  }
 0x6a7   :  { %v3823_v31 = vpop.permute.xlu1 %3822 }
 0x6a8   :  { %v3833_v53 = vadd.f32 %v3823_v31, %v3793_v48 }
 0x6a9   :  { %v4051_v34 = vpop.permute.xlu0 %4050 }
 0x6aa   :  { %v4060_v24 = vadd.f32 %v4051_v34, %v4020_v63  ;;  %v4249_v34 = vunpack.c.l.s4 %v4837_v29 }
 0x6ab   :  { %v3867_v60 = vpop.permute.xlu1 %3866 }
 0x6ac   :  { %v3875_v18 = vadd.f32 %v3867_v60, %v3835_v2  ;;  %v4250_v50 = vunpack.c.0.s8 %v4249_v34 }
 0x6ad   :  { %v4047_v26 = vpop.permute.xlu0 %4046 }
 0x6ae   :  { %v4058_v27 = vadd.f32 %v4047_v26, %v4018_v25 }
 0x6af   :  { %v3863_v49 = vpop.permute.xlu1 %3862 }
 0x6b0   :  { %v3873_v19 = vadd.f32 %v3863_v49, %v3833_v53  ;;  %v10423_v49 = vld [vmem:[#allocation14_spill] sm:$0xff] }
 0x6b1   :  { %v4091_v7 = vpop.permute.xlu0 %4090 }
 0x6b2   :  { %v4100_v56 = vadd.f32 %v4091_v7, %v4060_v24 }
 0x6b3   :  { %v3907_v52 = vpop.permute.xlu1 %3906 }
 0x6b4   :  { %v3915_v14 = vadd.f32 %v3907_v52, %v3875_v18  ;;  %v9486_v52 = vsub.s32 %v4250_v50, %v10423_v49 }
 0x6b5   :  { %v4087_v38 = vpop.permute.xlu0 %4086 }
 0x6b6   :  { %v4098_v12 = vadd.f32 %v4087_v38, %v4058_v27 }
 0x6b7   :  { %v3903_v22 = vpop.permute.xlu1 %3902 }
 0x6b8   :  { %v3913_v7 = vadd.f32 %v3903_v22, %v3873_v19 }
 0x6b9   :  { %v4131_v44 = vpop.permute.xlu0 %4130 }
 0x6ba   :  { %v4140_v13 = vadd.f32 %v4131_v44, %v4100_v56 }
 0x6bb   :  { %v3947_v55 = vpop.permute.xlu1 %3946 }
 0x6bc   :  { %v3955_v26 = vadd.f32 %v3947_v55, %v3915_v14 }
 0x6bd   :  { %v4127_v3 = vpop.permute.xlu0 %4126 }
 0x6be   :  { %v4138_v9 = vadd.f32 %v4127_v3, %v4098_v12  ;;  %v3981_v33 = vadd.f32 %v10421_v6, %v3955_v26 }
 0x6bf   :  { %v3943_v8 = vpop.permute.xlu1 %3942 }
 0x6c0   :  { %v3953_v38 = vadd.f32 %v3943_v8, %v3913_v7 }
 0x6c1   :  { %v4171_v21 = vpop.permute.xlu0 %4170 }
 0x6c2   :  { %v4180_v59 = vadd.f32 %v4171_v21, %v4140_v13  ;;  %v3979_v31 = vadd.f32 %v10422_v23, %v3953_v38 }
 0x6c3   :  { %v4013_v1 = vpop.permute.xlu1 %4012 }
 0x6c4   :  { %v4021_v41 = vadd.f32 %v4013_v1, %v3981_v33 }
 0x6c5   :  { %v4167_v57 = vpop.permute.xlu0 %4166 }
 0x6c6   :  { %v4178_v28 = vadd.f32 %v4167_v57, %v4138_v9 }
 0x6c7   :  { %v4009_v30 = vpop.permute.xlu1 %4008 }
 0x6c8   :  { %v4019_v44 = vadd.f32 %v4009_v30, %v3979_v31 }
 0x6c9   :  { %v4211_v62 = vpop.permute.xlu0 %4210 }
 0x6ca   :  { %v4220_v51 = vadd.f32 %v4211_v62, %v4180_v59 }
 0x6cb   :  { %v4053_v16 = vpop.permute.xlu1 %4052 }
 0x6cc   :  { %v4662_v4 = vmul.f32 -1.442695, %v4220_v51  ;;  %v4061_v43 = vadd.f32 %v4053_v16, %v4021_v41 }
 0x6cd   :  { %v4207_v0 = vpop.permute.xlu0 %4206 }
 0x6ce   :  { %4711 = vpow2.f32 %v4662_v4  ;;  %v4218_v61 = vadd.f32 %v4207_v0, %v4178_v28 }
 0x6cf   :  { %v4049_v35 = vpop.permute.xlu1 %4048 }
 0x6d0   :  { %v4660_v10 = vmul.f32 -1.442695, %v4218_v61  ;;  %v4059_v15 = vadd.f32 %v4049_v35, %v4019_v44 }
 0x6d2   :  { %4713 = vpow2.f32 %v4660_v10 }
 0x6d3   :  { %v4093_v58 = vpop.permute.xlu1 %4092 }
 0x6d4   :  { %v4101_v55 = vadd.f32 %v4093_v58, %v4061_v43 }
 0x6d7   :  { %v4089_v5 = vpop.permute.xlu1 %4088 }
 0x6d8   :  { %v4712_v42 = vpop.eup %4711  ;;  %v4099_v45 = vadd.f32 %v4089_v5, %v4059_v15 }
 0x6d9   :  { %v4236_v46 = vadd.f32 1.0, %v4712_v42 }
 0x6db   :  { %v4133_v37 = vpop.permute.xlu1 %4132  ;;  %4715 = vrcp.f32 %v4236_v46 }
 0x6dc   :  { %v4714_v11 = vpop.eup %4713  ;;  %v4141_v8 = vadd.f32 %v4133_v37, %v4101_v55 }
 0x6dd   :  { %v4234_v20 = vadd.f32 1.0, %v4714_v11 }
 0x6df   :  { %v4129_v36 = vpop.permute.xlu1 %4128  ;;  %4717 = vrcp.f32 %v4234_v20 }
 0x6e0   :  { %v4139_v1 = vadd.f32 %v4129_v36, %v4099_v45 }
 0x6e3   :  { %v4173_v60 = vpop.permute.xlu1 %4172 }
 0x6e4   :  { %v4181_v17 = vadd.f32 %v4173_v60, %v4141_v8 }
 0x6e5   :  { %v4716_v22 = vpop.eup %4715 }
 0x6e6   :  { %v4261_v39 = vrot.slane %v4716_v22, %v9486_v52  ;;  %v4323_v3 = vcombine.high %v4716_v22, %v4716_v22 }
 0x6e7   :  { %v4169_v40 = vpop.permute.xlu1 %4168 }
 0x6e8   :  { %v4290_v32 = vcombine.high %v4261_v39, %v4261_v39  ;;  %v4330_v21 = vrot.slane %v4323_v3, %v9486_v52  ;;  %v4179_v56 = vadd.f32 %v4169_v40, %v4139_v1  ;;  %v4266_v30 = vrot.slane %v4261_v39, 7 }
 0x6e9   :  { %v4718_v63 = vpop.eup %4717 }
 0x6ea   :  { %v4254_v54 = vrot.slane %v4718_v63, %v9486_v52  ;;  %v4315_v24 = vcombine.high %v4718_v63, %v4718_v63  ;;  %v4293_v57 = vrot.slane %v4290_v32, 7  ;;  %v4333_v16 = vrot.slane %v4330_v21, 7 }
 0x6eb   :  { %v4213_v47 = vpop.permute.xlu1 %4212  ;;  %v4356_v9 = vcombine.high %v4330_v21, %v4330_v21 }
 0x6ec   :  { %v4221_v25 = vadd.f32 %v4213_v47, %v4181_v17  ;;  %v4277_v13 = vrot.slane %v4254_v54, 1  ;;  %v4289_v12 = vcombine.high %v4254_v54, %v4254_v54  ;;  %v4322_v59 = vrot.slane %v4315_v24, %v9486_v52 }
 0x6ed   :  { %v4267_v51 = vsel %vm67_vm1, %v4266_v30, %v4254_v54  ;;  %v4359_v7 = vrot.slane %v4356_v9, 7 }
 0x6ee   :  { %v4663_v27 = vmul.f32 -1.442695, %v4221_v25  ;;  %v4280_v4 = vsel %vm67_vm1, %v4261_v39, %v4277_v13  ;;  %v4294_v0 = vsel %vm67_vm1, %v4293_v57, %v4289_v12  ;;  %v4303_v10 = vrot.slane %v4289_v12, 1 }
 0x6ef   :  { %v4209_v62 = vpop.permute.xlu1 %4208  ;;  %v4281_v35 = vsel %vm4268_vm14, %v4261_v39, %v4280_v4  ;;  %v4295_v61 = vsel %vm4268_vm14, %v4293_v57, %v4294_v0  ;;  %v4334_v58 = vsel %vm67_vm1, %v4333_v16, %v4322_v59  ;;  %v4343_v29 = vrot.slane %v4322_v59, 1 }
 0x6f0   :  { %4719 = vpow2.f32 %v4663_v27  ;;  %v4219_v28 = vadd.f32 %v4209_v62, %v4179_v56  ;;  %v4282_v48 = vsel %vm4270_vm15, %v4261_v39, %v4281_v35  ;;  %v4296_v5 = vsel %vm4270_vm15, %v4293_v57, %v4295_v61 }
 0x6f1   :  { %v4335_v18 = vsel %vm4268_vm14, %v4333_v16, %v4334_v58  ;;  %v4283_v53 = vsel %vm4272_vm0, %v4261_v39, %v4282_v48  ;;  %v4297_v42 = vsel %vm4272_vm0, %v4293_v57, %v4296_v5  ;;  %v4306_v14 = vsel %vm67_vm1, %v4290_v32, %v4303_v10 }
 0x6f2   :  { %v4661_v2 = vmul.f32 -1.442695, %v4219_v28  ;;  %v4336_v19 = vsel %vm4270_vm15, %v4333_v16, %v4335_v18  ;;  %4284 = vrot.lane.b32.xlu0 %v4283_v53, %s4819_s28  ;;  %v4307_v46 = vsel %vm4268_vm14, %v4290_v32, %v4306_v14  ;;  %v4355_v26 = vcombine.high %v4322_v59, %v4322_v59 }
 0x6f3   :  { %v4337_v37 = vsel %vm4272_vm0, %v4333_v16, %v4336_v19  ;;  %v4308_v34 = vsel %vm4270_vm15, %v4290_v32, %v4307_v46  ;;  %v4269_v11 = vsel %vm4268_vm14, %v4266_v30, %v4267_v51  ;;  %v4346_v20 = vsel %vm67_vm1, %v4330_v21, %v4343_v29 }
 0x6f4   :  { %4721 = vpow2.f32 %v4661_v2  ;;  %v4309_v38 = vsel %vm4272_vm0, %v4290_v32, %v4308_v34  ;;  %v4271_v36 = vsel %vm4270_vm15, %v4266_v30, %v4269_v11  ;;  %v4347_v50 = vsel %vm4268_vm14, %v4330_v21, %v4346_v20 }
 0x6f5   :  { %v4360_v6 = vsel %vm67_vm1, %v4359_v7, %v4355_v26  ;;  %v4369_v33 = vrot.slane %v4355_v26, 1  ;;  %v4273_v41 = vsel %vm4272_vm0, %v4266_v30, %v4271_v36  ;;  %v4348_v23 = vsel %vm4270_vm15, %v4330_v21, %v4347_v50 }
 0x6f6   :  { %4298 = vrot.lane.b32.xlu0 %v4297_v42, %s4838_s26  ;;  %v4361_v31 = vsel %vm4268_vm14, %v4359_v7, %v4360_v6  ;;  %4276 = vst.msk [vmem:[#allocation4] sm:$0x3] %vm4275_vm2, %v4273_v41  ;;  %v4349_v60 = vsel %vm4272_vm0, %v4330_v21, %v4348_v23 }
 0x6f7   :  { %v4362_v49 = vsel %vm4270_vm15, %v4359_v7, %v4361_v31  ;;  %v4372_v43 = vsel %vm67_vm1, %v4356_v9, %v4369_v33 }
 0x6f8   :  { %v4363_v55 = vsel %vm4272_vm0, %v4359_v7, %v4362_v49  ;;  %v4373_v22 = vsel %vm4268_vm14, %v4356_v9, %v4372_v43 }
 0x6f9   :  { %v4374_v40 = vsel %vm4270_vm15, %v4356_v9, %v4373_v22 }
 0x6fa   :  { %v4720_v44 = vpop.eup %4719  ;;  %4310 = vrot.lane.b32.xlu0 %v4309_v38, %s4839_s27  ;;  %v4375_v39 = vsel %vm4272_vm0, %v4356_v9, %v4374_v40 }
 0x6fb   :  { %v4237_v15 = vadd.f32 1.0, %v4720_v44 }
 0x6fd   :  { %4723 = vrcp.f32 %v4237_v15 }
 0x6fe   :  { %v4722_v3 = vpop.eup %4721  ;;  %4338 = vrot.lane.b32.xlu0 %v4337_v37, %s4840_s29 }
 0x6ff   :  { %v4235_v8 = vadd.f32 1.0, %v4722_v3 }
 0x701   :  { %4725 = vrcp.f32 %v4235_v8 }
 0x702   :  { %4350 = vrot.lane.b32.xlu0 %v4349_v60, %s4841_s30 }
 0x706   :  { %4364 = vrot.lane.b32.xlu0 %v4363_v55, %s4842_s18 }
 0x707   :  { %v4724_v45 = vpop.eup %4723 }
 0x708   :  { %v4396_v17 = vrot.slane %v4724_v45, %v9486_v52  ;;  %v4449_v32 = vcombine.high %v4724_v45, %v4724_v45 }
 0x70a   :  { %v4456_v63 = vrot.slane %v4449_v32, %v9486_v52  ;;  %v4418_v21 = vcombine.high %v4396_v17, %v4396_v17  ;;  %4376 = vrot.lane.b32.xlu0 %v4375_v39, %s4843_s5  ;;  %v4399_v24 = vrot.slane %v4396_v17, 7 }
 0x70b   :  { %v4726_v1 = vpop.eup %4725 }
 0x70c   :  { %v4389_v47 = vrot.slane %v4726_v1, %v9486_v52  ;;  %v4441_v54 = vcombine.high %v4726_v1, %v4726_v1  ;;  %v4421_v25 = vrot.slane %v4418_v21, 7  ;;  %v4459_v56 = vrot.slane %v4456_v63, 7 }
 0x70d   :  { %v4480_v57 = vcombine.high %v4456_v63, %v4456_v63 }
 0x70e   :  { %v4406_v30 = vrot.slane %v4389_v47, 1  ;;  %v4417_v27 = vcombine.high %v4389_v47, %v4389_v47  ;;  %v4448_v13 = vrot.slane %v4441_v54, %v9486_v52  ;;  %v4400_v12 = vsel %vm67_vm1, %v4399_v24, %v4389_v47  ;;  %v10425_v47 = vld [vmem:[#allocation15_spill] sm:$0xff] }
 0x70f   :  { %v4483_v59 = vrot.slane %v4480_v57, 7  ;;  %v4401_v62 = vsel %vm4268_vm14, %v4399_v24, %v4400_v12 }
 0x710   :  { %v4409_v16 = vsel %vm67_vm1, %v4396_v17, %v4406_v30  ;;  %v4422_v9 = vsel %vm67_vm1, %v4421_v25, %v4417_v27  ;;  %v4430_v51 = vrot.slane %v4417_v27, 1  ;;  %v4460_v28 = vsel %vm67_vm1, %v4459_v56, %v4448_v13  ;;  %v10427_v30 = vld [vmem:[#allocation19_spill] sm:$0xff] }
 0x711   :  { %v4410_v4 = vsel %vm4268_vm14, %v4396_v17, %v4409_v16  ;;  %v4423_v0 = vsel %vm4268_vm14, %v4421_v25, %v4422_v9  ;;  %v4461_v35 = vsel %vm4268_vm14, %v4459_v56, %v4460_v28  ;;  %v4468_v61 = vrot.slane %v4448_v13, 1 }
 0x712   :  { %v4411_v52 = vsel %vm4270_vm15, %v4396_v17, %v4410_v4  ;;  %v4424_v10 = vsel %vm4270_vm15, %v4421_v25, %v4423_v0  ;;  %v4433_v58 = vsel %vm67_vm1, %v4418_v21, %v4430_v51  ;;  %v4462_v2 = vsel %vm4270_vm15, %v4459_v56, %v4461_v35 }
 0x713   :  { %v4412_v48 = vsel %vm4272_vm0, %v4396_v17, %v4411_v52  ;;  %v4425_v5 = vsel %vm4272_vm0, %v4421_v25, %v4424_v10  ;;  %v4434_v18 = vsel %vm4268_vm14, %v4418_v21, %v4433_v58  ;;  %v4463_v53 = vsel %vm4272_vm0, %v4459_v56, %v4462_v2  ;;  %v10426_v56 = vld [vmem:[#allocation18_spill] sm:$0xff] }
 0x714   :  { %4413 = vrot.lane.b32.xlu1 %v4412_v48, %s4819_s28  ;;  %v4435_v42 = vsel %vm4270_vm15, %v4418_v21, %v4434_v18  ;;  %v4471_v14 = vsel %vm67_vm1, %v4456_v63, %v4468_v61  ;;  %v4479_v19 = vcombine.high %v4448_v13, %v4448_v13  ;;  %v4402_v46 = vsel %vm4270_vm15, %v4399_v24, %v4401_v62  ;;  %v10428_v13 = vld [vmem:[#allocation17_spill] sm:$0xff] }
 0x715   :  { %v4436_v37 = vsel %vm4272_vm0, %v4418_v21, %v4435_v42  ;;  %v4472_v29 = vsel %vm4268_vm14, %v4456_v63, %v4471_v14  ;;  %v4403_v34 = vsel %vm4272_vm0, %v4399_v24, %v4402_v46  ;;  %v10424_v21 = vld [vmem:[#allocation16_spill] sm:$0xff] }
 0x716   :  { %v4473_v26 = vsel %vm4270_vm15, %v4456_v63, %v4472_v29  ;;  %v4484_v7 = vsel %vm67_vm1, %v4483_v59, %v4479_v19  ;;  %v4492_v11 = vrot.slane %v4479_v19, 1  ;;  %4405 = vst.msk [vmem:[#allocation4 + $0x2] sm:$0x3] %vm4275_vm2, %v4403_v34 }
 0x717   :  { %v4474_v38 = vsel %vm4272_vm0, %v4456_v63, %v4473_v26  ;;  %v4485_v20 = vsel %vm4268_vm14, %v4483_v59, %v4484_v7 }
 0x718   :  { %4426 = vrot.lane.b32.xlu1 %v4425_v5, %s4838_s26  ;;  %v4486_v36 = vsel %vm4270_vm15, %v4483_v59, %v4485_v20  ;;  %v4495_v50 = vsel %vm67_vm1, %v4480_v57, %v4492_v11  ;;  %vm4301_vm1 = vcmask 386304  }
 0x719   :  { %v4487_v6 = vsel %vm4272_vm0, %v4483_v59, %v4486_v36  ;;  %v4496_v33 = vsel %vm4268_vm14, %v4480_v57, %v4495_v50  ;;  %v10429_v59 = vld [vmem:[#allocation20_spill] sm:$0xff] }
 0x71a   :  { %v4497_v41 = vsel %vm4270_vm15, %v4480_v57, %v4496_v33 }
 0x71b   :  { %v4498_v23 = vsel %vm4272_vm0, %v4480_v57, %v4497_v41 }
 0x71c   :  { %4437 = vrot.lane.b32.xlu1 %v4436_v37, %s4839_s27 }
 0x720   :  { %4464 = vrot.lane.b32.xlu1 %v4463_v53, %s4840_s29 }
 0x724   :  { %4475 = vrot.lane.b32.xlu1 %v4474_v38, %s4841_s30 }
 0x728   :  { %4488 = vrot.lane.b32.xlu1 %v4487_v6, %s4842_s18 }
 0x72c   :  { %4499 = vrot.lane.b32.xlu1 %v4498_v23, %s4843_s5 }
 0x764   :  { %v4285_v31 = vpop.permute.xlu0 %4284 }
 0x765   :  { %4288 = vst.msk [vmem:[#allocation4] sm:$0x3] %vm4287_vm3, %v4285_v31 }
 0x768   :  { %v4299_v60 = vpop.permute.xlu0 %4298 }
 0x769   :  { %4302 = vst.msk [vmem:[#allocation4] sm:$0x3] %vm4301_vm1, %v4299_v60 }
 0x76c   :  { %v4311_v49 = vpop.permute.xlu0 %4310 }
 0x76d   :  { %4314 = vst.msk [vmem:[#allocation4] sm:$0x3] %vm4313_vm4, %v4311_v49 }
 0x770   :  { %v4339_v43 = vpop.permute.xlu0 %4338 }
 0x771   :  { %4342 = vst.msk [vmem:[#allocation4] sm:$0x3] %vm4341_vm5, %v4339_v43 }
 0x774   :  { %v4351_v44 = vpop.permute.xlu0 %4350 }
 0x775   :  { %4354 = vst.msk [vmem:[#allocation4] sm:$0x3] %vm4353_vm6, %v4351_v44 }
 0x778   :  { %v4365_v55 = vpop.permute.xlu0 %4364 }
 0x779   :  { %4368 = vst.msk [vmem:[#allocation4] sm:$0x3] %vm4367_vm7, %v4365_v55 }
 0x77c   :  { %v4377_v22 = vpop.permute.xlu0 %4376 }
 0x77d   :  { %4380 = vst.msk [vmem:[#allocation4] sm:$0x3] %vm4379_vm8, %v4377_v22 }
 0x786   :  { %v4414_v15 = vpop.permute.xlu1 %4413 }
 0x787   :  { %4416 = vst.msk [vmem:[#allocation4 + $0x2] sm:$0x3] %vm4287_vm3, %v4414_v15 }
 0x78a   :  { %v4427_v40 = vpop.permute.xlu1 %4426 }
 0x78b   :  { %4429 = vst.msk [vmem:[#allocation4 + $0x2] sm:$0x3] %vm4301_vm1, %v4427_v40 }
 0x78e   :  { %v4438_v39 = vpop.permute.xlu1 %4437 }
 0x78f   :  { %4440 = vst.msk [vmem:[#allocation4 + $0x2] sm:$0x3] %vm4313_vm4, %v4438_v39 }
 0x792   :  { %v4465_v3 = vpop.permute.xlu1 %4464 }
 0x793   :  { %4467 = vst.msk [vmem:[#allocation4 + $0x2] sm:$0x3] %vm4341_vm5, %v4465_v3 }
 0x796   :  { %v4476_v8 = vpop.permute.xlu1 %4475 }
 0x797   :  { %4478 = vst.msk [vmem:[#allocation4 + $0x2] sm:$0x3] %vm4353_vm6, %v4476_v8 }
 0x79a   :  { %v4489_v45 = vpop.permute.xlu1 %4488 }
 0x79b   :  { %4491 = vst.msk [vmem:[#allocation4 + $0x2] sm:$0x3] %vm4367_vm7, %v4489_v45 }
 0x79e   :  { %v4500_v17 = vpop.permute.xlu1 %4499 }
 0x79f   :  { %4502 = vst.msk [vmem:[#allocation4 + $0x2] sm:$0x3] %vm4379_vm8, %v4500_v17 }
 0x7a6   :  { %v4664_v32 = vld.sshfl [vmem:[#allocation4] sm:$0x33 pattern:$0x75316420] }
 0x7a7   :  { %v4512_v63 = vcombine.high %v4664_v32, %v4664_v32  ;;  %v4516_v1 = vrot.slane %v4664_v32, %v10424_v21  ;;  %v4520_v54 = vrot.slane %v4664_v32, %v10425_v47 }
 0x7a9   :  { %v4524_v24 = vrot.slane %v4512_v63, %v10424_v21  ;;  %v4528_v25 = vrot.slane %v4512_v63, %v10425_v47  ;;  %v4533_v57 = vmul.f32 %v4516_v1, %v10426_v56  ;;  %v4534_v27 = vmul.f32 %v4520_v54, %v10427_v30 }
 0x7ab   :  { %v4535_v12 = vmul.f32 %v4524_v24, %v10428_v13  ;;  %v4536_v62 = vmul.f32 %v4528_v25, %v10429_v59  ;;  %4537 = vst [vmem:[#allocation10] sm:$0xff] %v4533_v57  ;;  %4538 = vst [vmem:[#allocation10 + $0x8] sm:$0xff] %v4534_v27 }
 0x7ad   :  { %4539 = vst [vmem:[#allocation10 + $0x10] sm:$0xff] %v4535_v12  ;;  %4540 = vst [vmem:[#allocation10 + $0x18] sm:$0xff] %v4536_v62 }
 0x7ae   :  { %4800 = shalt.err (!%p4797_p3)
}
 0x7af   :  { %s4801_s20 = scalar_lea.hbm %s9617_s4, 512 }
 0x7b0   :  { %p4802_p4 = scmp.ne.s32.totalorder %s9617_s4, %s4801_s20  ;;  %p4805_p5 = scmp.lt.u32.totalorder %s4801_s20, %s9617_s4 }
 0x7b2   :  { %p4807_p6 = pnand %p4805_p5, %p4802_p4 }
 0x7b4   :  { %4810 = shalt.err (!%p4807_p6)
}
 0x7b5   :  { %4552 = dma.vmem_to_hbm [thread:$0]  %s4547_s0, 512, %s9617_s4, [#allocation7], %s4818_s3, %s4818_s3, %s4819_s28  }
 0x7b6   :  { %4815 = dma.done.wait [#allocation7], 512  }
 0x7b7   :  { %4816 = vsyncadd [#allocation7], 4294966784 }
 0x7b8   :  { %4556 = vsyncpa [#allocation6], 1 }
 0x7b9   :  { %4557 = vsyncpa [#allocation7], 1 }
 0x7ba   :  { %4558 = vsyncpa [#allocation8], 1 }

</bundles_post_ra>
